<compile_context>
chip_gen: v5e
topology: v5e:2x2
jax: 0.10.0
libtpu: 0.0.40
codegen_flags: <defaults>
</compile_context>

<pallas_src>
import math
from functools import partial

import jax
import jax.numpy as jnp
from jax import lax
from jax.experimental import pallas as pl
from jax.experimental.pallas import tpu as pltpu

PAD = 5  # single zero-pad large enough for the largest dilation (d = 5)


def _round_up(v, m):
    return (v + m - 1) // m * m


# ----------------------------------------------------------------------------
# Kernel 1: fused dilated-conv branches + 1x1 branch, per (image, row-tile).
# Outputs: s = x1+x3+x5 (ungated), xn, and per-image channel sums of s.
# ----------------------------------------------------------------------------
def _conv_kernel(xpad_ref, w3_ref, wc_ref, bb_ref,
                 s_ref, xn_ref, pool_ref, patch_sc,
                 *, cin_p, tile_h, W, K9p):
    h = pl.program_id(1)
    r0 = pl.multiple_of(h * tile_h, tile_h)        # first output row of tile

    # ---- in-VMEM im2col: gather the 27 dilated taps of this row tile --------
    # (no HBM blow-up: only the halo-padded image is ever DMA'd from HBM)
    for b, d in enumerate((1, 3, 5)):
        for ky in range(3):
            for r in range(tile_h):
                row = xpad_ref[r0 + r + PAD + (ky - 1) * d]     # (cin_p, Wp)
                for kx in range(3):
                    t = b * 9 + ky * 3 + kx
                    cs = PAD + (kx - 1) * d                      # static
                    patch_sc[t * cin_p:(t + 1) * cin_p,
                             r * W:(r + 1) * W] = row[:, cs:cs + W]

    # ---- one dense MXU matmul per conv branch (no zero-block padding) -------
    def relu_bias(y, bidx):
        return jnp.maximum(y + bb_ref[bidx], 0.0)   # folded BN bias + ReLU

    x1 = relu_bias(jnp.dot(w3_ref[0], patch_sc[0 * K9p:1 * K9p, :],
                           preferred_element_type=jnp.float32), 0)
    x3 = relu_bias(jnp.dot(w3_ref[1], patch_sc[1 * K9p:2 * K9p, :],
                           preferred_element_type=jnp.float32), 1)
    x5 = relu_bias(jnp.dot(w3_ref[2], patch_sc[2 * K9p:3 * K9p, :],
                           preferred_element_type=jnp.float32), 2)
    # 1x1 branch rides on the centre tap (t = 4) of the d=1 patch block.
    xn = relu_bias(jnp.dot(wc_ref[...], patch_sc[4 * cin_p:5 * cin_p, :],
                           preferred_element_type=jnp.float32), 3)

    s = x1 + x3 + x5
    s_ref[...] = s                                   # ungated; gated in pass 2
    xn_ref[...] = xn

    # ---- two-pass SE (pass 1): accumulate per-image channel sums over tiles -
    part = jnp.sum(s, axis=1, keepdims=True)         # (med, 1), lane reduction

    @pl.when(h == 0)
    def _():
        pool_ref[...] = part

    @pl.when(h > 0)
    def _():
        pool_ref[...] = pool_ref[...] + part


# ----------------------------------------------------------------------------
# Kernel 2: SE gate (computed once per image from the pooled sums) applied to s.
# ----------------------------------------------------------------------------
def _gate_kernel(s_ref, pool_ref, fc1wt_ref, fc1b_ref, fc2w_ref, fc2b_ref,
                 xa_ref, g_sc, *, inv_hw):
    h = pl.program_id(1)

    @pl.when(h == 0)
    def _():
        mean = pool_ref[...] * inv_hw                              # (med, 1)
        z = jnp.maximum(
            jnp.sum(fc1wt_ref[...] * mean, axis=0, keepdims=True)
            + fc1b_ref[...], 0.0)                                  # (1, hid)
        g_sc[...] = jax.nn.sigmoid(
            jnp.sum(fc2w_ref[...] * z, axis=1, keepdims=True)
            + fc2b_ref[...])                                       # (med, 1)

    xa_ref[...] = s_ref[...] * g_sc[...]


# ----------------------------------------------------------------------------
# Parameter construction / folding (wrapper-side glue)
# ----------------------------------------------------------------------------
def init_params(key, in_ch, out_ch, ratio=2):
    """Synthetic parameters matching the PyTorch module's __init__ shapes."""
    med = math.ceil(out_ch / 2)
    hid = max(1, med // ratio)
    ks = jax.random.split(key, 10)
    sc = 0.1

    def bn_params(k):
        kg, kb, km, kv = jax.random.split(k, 4)
        return {
            "gamma": 1.0 + 0.1 * jax.random.normal(kg, (med,), jnp.float32),
            "beta": 0.1 * jax.random.normal(kb, (med,), jnp.float32),
            "mean": 0.1 * jax.random.normal(km, (med,), jnp.float32),
            "var": 1.0 + jax.random.uniform(kv, (med,), jnp.float32),
        }

    p = {
        "w1": jax.random.normal(ks[0], (med, in_ch, 3, 3), jnp.float32) * sc,
        "w3": jax.random.normal(ks[1], (med, in_ch, 3, 3), jnp.float32) * sc,
        "w5": jax.random.normal(ks[2], (med, in_ch, 3, 3), jnp.float32) * sc,
        "wc1": jax.random.normal(ks[3], (med, in_ch, 1, 1), jnp.float32) * sc,
        "bn1": bn_params(ks[4]),
        "bn3": bn_params(ks[5]),
        "bn5": bn_params(ks[6]),
        "bnc": bn_params(ks[7]),
        "fc1_w": jax.random.normal(ks[8], (hid, med), jnp.float32) * sc,
        "fc1_b": jnp.zeros((hid,), jnp.float32),
        "fc2_w": jax.random.normal(ks[9], (med, hid), jnp.float32) * sc,
        "fc2_b": jnp.zeros((med,), jnp.float32),
    }
    return p, med, hid


def _fold_bn(w_oihw, bn, eps=1e-5):
    """Fold eval-mode BatchNorm into conv weight scale + per-channel bias."""
    scale = bn["gamma"] / jnp.sqrt(bn["var"] + eps)
    w = w_oihw * scale[:, None, None, None]
    b = bn["beta"] - bn["mean"] * scale
    return w, b


# ----------------------------------------------------------------------------
# Forward pass wrapper (NCHW in, NCHW out — like the PyTorch module)
# ----------------------------------------------------------------------------
def conv_our_feature_output(x_nchw, params, out_ch, med, hid, *, tile_h=8):
    N, C_in, H, W = x_nchw.shape
    assert H % tile_h == 0, "tile_h must divide H"
    n_h = H // tile_h
    THW = tile_h * W
    HW = H * W
    assert THW % 128 == 0 or THW == HW, "row tile must be lane-dense"
    Hp, Wp = H + 2 * PAD, W + 2 * PAD
    cin_p = _round_up(C_in, 16)      # bf16 sublane-packing / MXU-K alignment
    K9p = 9 * cin_p

    # ---- fold eval-mode BN into conv weight scale + per-channel bias --------
    w1, b1 = _fold_bn(params["w1"], params["bn1"])
    w3, b3 = _fold_bn(params["w3"], params["bn3"])
    w5, b5 = _fold_bn(params["w5"], params["bn5"])
    wc, bc = _fold_bn(params["wc1"], params["bnc"])

    def flat3(w):   # (med, C, 3, 3) -> (med, 9*cin_p), tap-major, channel-minor
        w9 = jnp.transpose(w, (0, 2, 3, 1)).reshape(med, 9, C_in)
        w9 = jnp.pad(w9, ((0, 0), (0, 0), (0, cin_p - C_in)))
        return w9.reshape(med, K9p)

    W3 = jnp.stack([flat3(w1), flat3(w3), flat3(w5)], 0).astype(jnp.bfloat16)
    Wc = jnp.pad(wc[:, :, 0, 0],
                 ((0, 0), (0, cin_p - C_in))).astype(jnp.bfloat16)
    BB = jnp.stack([b1, b3, b5, bc], 0)[:, :, None]        # (4, med, 1) f32

    fc1wt = params["fc1_w"].T                              # (med, hid)
    fc1b = params["fc1_b"][None, :]                        # (1, hid)
    fc2w = params["fc2_w"]                                 # (med, hid)
    fc2b = params["fc2_b"][:, None]                        # (med, 1)

    # Halo-padded, channel-padded input with rows leading: (N, Hp, cin_p, Wp).
    # This (plus the tiny weights) is the ONLY HBM input to the conv kernel.
    xpad = jnp.pad(x_nchw,
                   ((0, 0), (0, cin_p - C_in), (PAD, PAD), (PAD, PAD)))
    xpad = jnp.transpose(xpad, (0, 2, 1, 3)).astype(jnp.bfloat16)

    cparams = pltpu.CompilerParams(
        dimension_semantics=("parallel", "arbitrary"),
        vmem_limit_bytes=48 * 1024 * 1024)

    def tiled(c):     # per-image, per-row-tile block over the flattened H*W
        return pl.BlockSpec((None, c, THW), lambda n, h: (n, 0, h))

    def per_image(r, c):   # resident / accumulated across the row-tile axis
        return pl.BlockSpec((None, r, c), lambda n, h: (n, 0, 0))

    def const(shape):      # grid-invariant operand, never re-DMA'd
        nd = len(shape)
        return pl.BlockSpec(shape, lambda n, h: (0,) * nd)

    conv = partial(_conv_kernel, cin_p=cin_p, tile_h=tile_h, W=W, K9p=K9p)

    s, xn, pool = pl.pallas_call(
        conv,
        out_shape=(
            jax.ShapeDtypeStruct((N, med, HW), jnp.float32),   # s = x1+x3+x5
            jax.ShapeDtypeStruct((N, med, HW), jnp.float32),   # xn
            jax.ShapeDtypeStruct((N, med, 1), jnp.float32),    # sum_hw(s)
        ),
        grid_spec=pltpu.PrefetchScalarGridSpec(
            num_scalar_prefetch=0,
            grid=(N, n_h),
            in_specs=[
                # whole padded image, resident across the inner row-tile axis
                pl.BlockSpec((None, Hp, cin_p, Wp), lambda n, h: (n, 0, 0, 0)),
                const((3, med, K9p)),      # per-branch 3x3 weights (bf16)
                const((med, cin_p)),       # 1x1 weight (bf16)
                const((4, med, 1)),        # folded BN biases (f32)
            ],
            out_specs=[tiled(med), tiled(med), per_image(med, 1)],
            scratch_shapes=[pltpu.VMEM((3 * K9p, THW), jnp.bfloat16)],
        ),
        compiler_params=cparams,
    )(xpad, W3, Wc, BB)

    gate = partial(_gate_kernel, inv_hw=1.0 / HW)
    xa = pl.pallas_call(
        gate,
        out_shape=jax.ShapeDtypeStruct((N, med, HW), jnp.float32),
        grid_spec=pltpu.PrefetchScalarGridSpec(
            num_scalar_prefetch=0,
            grid=(N, n_h),
            in_specs=[
                tiled(med),                # s
                per_image(med, 1),         # pooled channel sums
                const((med, hid)),         # SE fc1 weight (transposed)
                const((1, hid)),           # SE fc1 bias
                const((med, hid)),         # SE fc2 weight
                const((med, 1)),           # SE fc2 bias
            ],
            out_specs=tiled(med),
            scratch_shapes=[pltpu.VMEM((med, 1), jnp.float32)],
        ),
        compiler_params=cparams,
    )(s, pool, fc1wt, fc1b, fc2w, fc2b)

    # `out` is a pure re-slice of xa/xn -> built in the wrapper (no duplicated
    # in-kernel slab stores of the same data).
    out = jnp.concatenate([xa, xn], axis=1)[:, :out_ch]
    return (out.reshape(N, out_ch, H, W),
            xa.reshape(N, med, H, W),
            xn.reshape(N, med, H, W))


# ----------------------------------------------------------------------------
# Pure-JAX (XLA) reference for a correctness sanity check
# ----------------------------------------------------------------------------
def _reference(x, params, out_ch):
    eps = 1e-5

    def branch(w, bn, d, pad):
        y = lax.conv_general_dilated(
            x, w, window_strides=(1, 1), padding=[(pad, pad), (pad, pad)],
            rhs_dilation=(d, d),
            dimension_numbers=("NCHW", "OIHW", "NCHW"))
        scale = bn["gamma"] / jnp.sqrt(bn["var"] + eps)
        bias = bn["beta"] - bn["mean"] * scale
        y = y * scale[None, :, None, None] + bias[None, :, None, None]
        return jnp.maximum(y, 0.0)

    x1 = branch(params["w1"], params["bn1"], 1, 1)
    x3 = branch(params["w3"], params["bn3"], 3, 3)
    x5 = branch(params["w5"], params["bn5"], 5, 5)
    s = x1 + x3 + x5
    pooled = s.mean(axis=(2, 3))                                   # (N, med)
    z = jnp.maximum(pooled @ params["fc1_w"].T + params["fc1_b"], 0.0)
    g = jax.nn.sigmoid(z @ params["fc2_w"].T + params["fc2_b"])    # (N, med)
    xa = s * g[:, :, None, None]
    xn = branch(params["wc1"], params["bnc"], 1, 0)
    out = jnp.concatenate([xa, xn], axis=1)[:, :out_ch]
    return out, xa, xn


if __name__ == "__main__":
    key = jax.random.PRNGKey(0)
    k_x, k_p = jax.random.split(key)

    N, in_ch, H, W = 2, 4, 16, 16
    out_ch = 8

    x = jax.random.normal(k_x, (N, in_ch, H, W), jnp.float32)
    params, med, hid = init_params(k_p, in_ch, out_ch)

    out, xa, xn = conv_our_feature_output(x, params, out_ch, med, hid,
                                          tile_h=8)
    jax.block_until_ready((out, xa, xn))

    assert out.shape == (N, out_ch, H, W), out.shape
    assert xa.shape == (N, med, H, W), xa.shape
    assert xn.shape == (N, med, H, W), xn.shape

    # Loose tolerance: kernel matmuls use bf16 operands (f32 accumulation).
    r_out, r_xa, r_xn = _reference(x, params, out_ch)
    for got, ref in ((out, r_out), (xa, r_xa), (xn, r_xn)):
        err = float(jnp.max(jnp.abs(got - ref)))
        assert err < 1e-1, f"max abs error {err}"

    print("KERNEL_OK")
</pallas_src>

<mosaic_0001>
module attributes {stable_mosaic.version = 11 : i64} {
  func.func @_conv_kernel(%arg0: i32, %arg1: i32, %arg2: memref<1x26x16x26xbf16, #tpu.memory_space<vmem>>, %arg3: memref<3x4x144xbf16, #tpu.memory_space<vmem>>, %arg4: memref<4x16xbf16, #tpu.memory_space<vmem>>, %arg5: memref<4x4x1xf32, #tpu.memory_space<vmem>>, %arg6: memref<1x4x128xf32, #tpu.memory_space<vmem>>, %arg7: memref<1x4x128xf32, #tpu.memory_space<vmem>>, %arg8: memref<1x4x1xf32, #tpu.memory_space<vmem>>, %arg9: memref<432x128xbf16, #tpu.memory_space<vmem>>) attributes {dimension_semantics = [#tpu.dimension_semantics<parallel>, #tpu.dimension_semantics<arbitrary>], iteration_bounds = array<i64: 2, 2>, scalar_prefetch = 0 : i64, scratch_operands = 1 : i64, tpu.core_type = #tpu.core_type<tc>, window_params = [{transform_indices = @transform_0, window_bounds = array<i64: 1, 26, 16, 26>}, {pipeline_mode = #tpu.pipeline_mode<synchronous>, transform_indices = @transform_1, window_bounds = array<i64: 3, 4, 144>}, {pipeline_mode = #tpu.pipeline_mode<synchronous>, transform_indices = @transform_2, window_bounds = array<i64: 4, 16>}, {pipeline_mode = #tpu.pipeline_mode<synchronous>, transform_indices = @transform_3, window_bounds = array<i64: 4, 4, 1>}, {transform_indices = @transform_4, window_bounds = array<i64: 1, 4, 128>}, {transform_indices = @transform_5, window_bounds = array<i64: 1, 4, 128>}, {transform_indices = @transform_6, window_bounds = array<i64: 1, 4, 1>}]} {
    %c8_i32 = arith.constant 8 : i32
    %0 = arith.muli %arg1, %c8_i32 : i32
    %1 = tpu.assume_multiple %0, 8 : i32
    %c0_i32 = arith.constant 0 : i32
    %2 = arith.addi %1, %c0_i32 : i32
    %c5_i32 = arith.constant 5 : i32
    %3 = arith.addi %2, %c5_i32 : i32
    %c-1_i32 = arith.constant -1 : i32
    %4 = arith.addi %3, %c-1_i32 : i32
    %c0 = arith.constant 0 : index
    %5 = arith.index_cast %4 : i32 to index
    %c0_0 = arith.constant 0 : index
    %c0_1 = arith.constant 0 : index
    %6 = vector.load %arg2[%c0, %5, %c0_0, %c0_1] : memref<1x26x16x26xbf16, #tpu.memory_space<vmem>>, vector<1x1x16x26xbf16>
    %7 = vector.shape_cast %6 : vector<1x1x16x26xbf16> to vector<16x26xbf16>
    %8 = vector.extract_strided_slice %7 {offsets = [0, 4], sizes = [16, 16], strides = [1, 1]} : vector<16x26xbf16> to vector<16x16xbf16>
    %c0_2 = arith.constant 0 : index
    %c0_3 = arith.constant 0 : index
    %9 = vector.load %arg9[%c0_2, %c0_3] : memref<432x128xbf16, #tpu.memory_space<vmem>>, vector<16x16xbf16>
    tpu.vector_store %arg9[%c0_2, %c0_3], %8 {strides = array<i32>} : memref<432x128xbf16, #tpu.memory_space<vmem>>, vector<16x16xbf16>,
    %10 = vector.extract_strided_slice %7 {offsets = [0, 5], sizes = [16, 16], strides = [1, 1]} : vector<16x26xbf16> to vector<16x16xbf16>
    %c16 = arith.constant 16 : index
    %c0_4 = arith.constant 0 : index
    %11 = vector.load %arg9[%c16, %c0_4] : memref<432x128xbf16, #tpu.memory_space<vmem>>, vector<16x16xbf16>
    tpu.vector_store %arg9[%c16, %c0_4], %10 {strides = array<i32>} : memref<432x128xbf16, #tpu.memory_space<vmem>>, vector<16x16xbf16>,
    %12 = vector.extract_strided_slice %7 {offsets = [0, 6], sizes = [16, 16], strides = [1, 1]} : vector<16x26xbf16> to vector<16x16xbf16>
    %c32 = arith.constant 32 : index
    %c0_5 = arith.constant 0 : index
    %13 = vector.load %arg9[%c32, %c0_5] : memref<432x128xbf16, #tpu.memory_space<vmem>>, vector<16x16xbf16>
    tpu.vector_store %arg9[%c32, %c0_5], %12 {strides = array<i32>} : memref<432x128xbf16, #tpu.memory_space<vmem>>, vector<16x16xbf16>,
    %c1_i32 = arith.constant 1 : i32
    %14 = arith.addi %1, %c1_i32 : i32
    %c5_i32_6 = arith.constant 5 : i32
    %15 = arith.addi %14, %c5_i32_6 : i32
    %c-1_i32_7 = arith.constant -1 : i32
    %16 = arith.addi %15, %c-1_i32_7 : i32
    %c0_8 = arith.constant 0 : index
    %17 = arith.index_cast %16 : i32 to index
    %c0_9 = arith.constant 0 : index
    %c0_10 = arith.constant 0 : index
    %18 = vector.load %arg2[%c0_8, %17, %c0_9, %c0_10] : memref<1x26x16x26xbf16, #tpu.memory_space<vmem>>, vector<1x1x16x26xbf16>
    %19 = vector.shape_cast %18 : vector<1x1x16x26xbf16> to vector<16x26xbf16>
    %20 = vector.extract_strided_slice %19 {offsets = [0, 4], sizes = [16, 16], strides = [1, 1]} : vector<16x26xbf16> to vector<16x16xbf16>
    %c0_11 = arith.constant 0 : index
    %c16_12 = arith.constant 16 : index
    %21 = vector.load %arg9[%c0_11, %c16_12] : memref<432x128xbf16, #tpu.memory_space<vmem>>, vector<16x16xbf16>
    tpu.vector_store %arg9[%c0_11, %c16_12], %20 {strides = array<i32>} : memref<432x128xbf16, #tpu.memory_space<vmem>>, vector<16x16xbf16>,
    %22 = vector.extract_strided_slice %19 {offsets = [0, 5], sizes = [16, 16], strides = [1, 1]} : vector<16x26xbf16> to vector<16x16xbf16>
    %c16_13 = arith.constant 16 : index
    %c16_14 = arith.constant 16 : index
    %23 = vector.load %arg9[%c16_13, %c16_14] : memref<432x128xbf16, #tpu.memory_space<vmem>>, vector<16x16xbf16>
    tpu.vector_store %arg9[%c16_13, %c16_14], %22 {strides = array<i32>} : memref<432x128xbf16, #tpu.memory_space<vmem>>, vector<16x16xbf16>,
    %24 = vector.extract_strided_slice %19 {offsets = [0, 6], sizes = [16, 16], strides = [1, 1]} : vector<16x26xbf16> to vector<16x16xbf16>
    %c32_15 = arith.constant 32 : index
    %c16_16 = arith.constant 16 : index
    %25 = vector.load %arg9[%c32_15, %c16_16] : memref<432x128xbf16, #tpu.memory_space<vmem>>, vector<16x16xbf16>
    tpu.vector_store %arg9[%c32_15, %c16_16], %24 {strides = array<i32>} : memref<432x128xbf16, #tpu.memory_space<vmem>>, vector<16x16xbf16>,
    %c2_i32 = arith.constant 2 : i32
    %26 = arith.addi %1, %c2_i32 : i32
    %c5_i32_17 = arith.constant 5 : i32
    %27 = arith.addi %26, %c5_i32_17 : i32
    %c-1_i32_18 = arith.constant -1 : i32
    %28 = arith.addi %27, %c-1_i32_18 : i32
    %c0_19 = arith.constant 0 : index
    %29 = arith.index_cast %28 : i32 to index
    %c0_20 = arith.constant 0 : index
    %c0_21 = arith.constant 0 : index
    %30 = vector.load %arg2[%c0_19, %29, %c0_20, %c0_21] : memref<1x26x16x26xbf16, #tpu.memory_space<vmem>>, vector<1x1x16x26xbf16>
    %31 = vector.shape_cast %30 : vector<1x1x16x26xbf16> to vector<16x26xbf16>
    %32 = vector.extract_strided_slice %31 {offsets = [0, 4], sizes = [16, 16], strides = [1, 1]} : vector<16x26xbf16> to vector<16x16xbf16>
    %c0_22 = arith.constant 0 : index
    %c32_23 = arith.constant 32 : index
    %33 = vector.load %arg9[%c0_22, %c32_23] : memref<432x128xbf16, #tpu.memory_space<vmem>>, vector<16x16xbf16>
    tpu.vector_store %arg9[%c0_22, %c32_23], %32 {strides = array<i32>} : memref<432x128xbf16, #tpu.memory_space<vmem>>, vector<16x16xbf16>,
    %34 = vector.extract_strided_slice %31 {offsets = [0, 5], sizes = [16, 16], strides = [1, 1]} : vector<16x26xbf16> to vector<16x16xbf16>
    %c16_24 = arith.constant 16 : index
    %c32_25 = arith.constant 32 : index
    %35 = vector.load %arg9[%c16_24, %c32_25] : memref<432x128xbf16, #tpu.memory_space<vmem>>, vector<16x16xbf16>
    tpu.vector_store %arg9[%c16_24, %c32_25], %34 {strides = array<i32>} : memref<432x128xbf16, #tpu.memory_space<vmem>>, vector<16x16xbf16>,
    %36 = vector.extract_strided_slice %31 {offsets = [0, 6], sizes = [16, 16], strides = [1, 1]} : vector<16x26xbf16> to vector<16x16xbf16>
    %c32_26 = arith.constant 32 : index
    %c32_27 = arith.constant 32 : index
    %37 = vector.load %arg9[%c32_26, %c32_27] : memref<432x128xbf16, #tpu.memory_space<vmem>>, vector<16x16xbf16>
    tpu.vector_store %arg9[%c32_26, %c32_27], %36 {strides = array<i32>} : memref<432x128xbf16, #tpu.memory_space<vmem>>, vector<16x16xbf16>,
    %c3_i32 = arith.constant 3 : i32
    %38 = arith.addi %1, %c3_i32 : i32
    %c5_i32_28 = arith.constant 5 : i32
    %39 = arith.addi %38, %c5_i32_28 : i32
    %c-1_i32_29 = arith.constant -1 : i32
    %40 = arith.addi %39, %c-1_i32_29 : i32
    %c0_30 = arith.constant 0 : index
    %41 = arith.index_cast %40 : i32 to index
    %c0_31 = arith.constant 0 : index
    %c0_32 = arith.constant 0 : index
    %42 = vector.load %arg2[%c0_30, %41, %c0_31, %c0_32] : memref<1x26x16x26xbf16, #tpu.memory_space<vmem>>, vector<1x1x16x26xbf16>
    %43 = vector.shape_cast %42 : vector<1x1x16x26xbf16> to vector<16x26xbf16>
    %44 = vector.extract_strided_slice %43 {offsets = [0, 4], sizes = [16, 16], strides = [1, 1]} : vector<16x26xbf16> to vector<16x16xbf16>
    %c0_33 = arith.constant 0 : index
    %c48 = arith.constant 48 : index
    %45 = vector.load %arg9[%c0_33, %c48] : memref<432x128xbf16, #tpu.memory_space<vmem>>, vector<16x16xbf16>
    tpu.vector_store %arg9[%c0_33, %c48], %44 {strides = array<i32>} : memref<432x128xbf16, #tpu.memory_space<vmem>>, vector<16x16xbf16>,
    %46 = vector.extract_strided_slice %43 {offsets = [0, 5], sizes = [16, 16], strides = [1, 1]} : vector<16x26xbf16> to vector<16x16xbf16>
    %c16_34 = arith.constant 16 : index
    %c48_35 = arith.constant 48 : index
    %47 = vector.load %arg9[%c16_34, %c48_35] : memref<432x128xbf16, #tpu.memory_space<vmem>>, vector<16x16xbf16>
    tpu.vector_store %arg9[%c16_34, %c48_35], %46 {strides = array<i32>} : memref<432x128xbf16, #tpu.memory_space<vmem>>, vector<16x16xbf16>,
    %48 = vector.extract_strided_slice %43 {offsets = [0, 6], sizes = [16, 16], strides = [1, 1]} : vector<16x26xbf16> to vector<16x16xbf16>
    %c32_36 = arith.constant 32 : index
    %c48_37 = arith.constant 48 : index
    %49 = vector.load %arg9[%c32_36, %c48_37] : memref<432x128xbf16, #tpu.memory_space<vmem>>, vector<16x16xbf16>
    tpu.vector_store %arg9[%c32_36, %c48_37], %48 {strides = array<i32>} : memref<432x128xbf16, #tpu.memory_space<vmem>>, vector<16x16xbf16>,
    %c4_i32 = arith.constant 4 : i32
    %50 = arith.addi %1, %c4_i32 : i32
    %c5_i32_38 = arith.constant 5 : i32
    %51 = arith.addi %50, %c5_i32_38 : i32
    %c-1_i32_39 = arith.constant -1 : i32
    %52 = arith.addi %51, %c-1_i32_39 : i32
    %c0_40 = arith.constant 0 : index
    %53 = arith.index_cast %52 : i32 to index
    %c0_41 = arith.constant 0 : index
    %c0_42 = arith.constant 0 : index
    %54 = vector.load %arg2[%c0_40, %53, %c0_41, %c0_42] : memref<1x26x16x26xbf16, #tpu.memory_space<vmem>>, vector<1x1x16x26xbf16>
    %55 = vector.shape_cast %54 : vector<1x1x16x26xbf16> to vector<16x26xbf16>
    %56 = vector.extract_strided_slice %55 {offsets = [0, 4], sizes = [16, 16], strides = [1, 1]} : vector<16x26xbf16> to vector<16x16xbf16>
    %c0_43 = arith.constant 0 : index
    %c64 = arith.constant 64 : index
    %57 = vector.load %arg9[%c0_43, %c64] : memref<432x128xbf16, #tpu.memory_space<vmem>>, vector<16x16xbf16>
    tpu.vector_store %arg9[%c0_43, %c64], %56 {strides = array<i32>} : memref<432x128xbf16, #tpu.memory_space<vmem>>, vector<16x16xbf16>,
    %58 = vector.extract_strided_slice %55 {offsets = [0, 5], sizes = [16, 16], strides = [1, 1]} : vector<16x26xbf16> to vector<16x16xbf16>
    %c16_44 = arith.constant 16 : index
    %c64_45 = arith.constant 64 : index
    %59 = vector.load %arg9[%c16_44, %c64_45] : memref<432x128xbf16, #tpu.memory_space<vmem>>, vector<16x16xbf16>
    tpu.vector_store %arg9[%c16_44, %c64_45], %58 {strides = array<i32>} : memref<432x128xbf16, #tpu.memory_space<vmem>>, vector<16x16xbf16>,
    %60 = vector.extract_strided_slice %55 {offsets = [0, 6], sizes = [16, 16], strides = [1, 1]} : vector<16x26xbf16> to vector<16x16xbf16>
    %c32_46 = arith.constant 32 : index
    %c64_47 = arith.constant 64 : index
    %61 = vector.load %arg9[%c32_46, %c64_47] : memref<432x128xbf16, #tpu.memory_space<vmem>>, vector<16x16xbf16>
    tpu.vector_store %arg9[%c32_46, %c64_47], %60 {strides = array<i32>} : memref<432x128xbf16, #tpu.memory_space<vmem>>, vector<16x16xbf16>,
    %c5_i32_48 = arith.constant 5 : i32
    %62 = arith.addi %1, %c5_i32_48 : i32
    %c5_i32_49 = arith.constant 5 : i32
    %63 = arith.addi %62, %c5_i32_49 : i32
    %c-1_i32_50 = arith.constant -1 : i32
    %64 = arith.addi %63, %c-1_i32_50 : i32
    %c0_51 = arith.constant 0 : index
    %65 = arith.index_cast %64 : i32 to index
    %c0_52 = arith.constant 0 : index
    %c0_53 = arith.constant 0 : index
    %66 = vector.load %arg2[%c0_51, %65, %c0_52, %c0_53] : memref<1x26x16x26xbf16, #tpu.memory_space<vmem>>, vector<1x1x16x26xbf16>
    %67 = vector.shape_cast %66 : vector<1x1x16x26xbf16> to vector<16x26xbf16>
    %68 = vector.extract_strided_slice %67 {offsets = [0, 4], sizes = [16, 16], strides = [1, 1]} : vector<16x26xbf16> to vector<16x16xbf16>
    %c0_54 = arith.constant 0 : index
    %c80 = arith.constant 80 : index
    %69 = vector.load %arg9[%c0_54, %c80] : memref<432x128xbf16, #tpu.memory_space<vmem>>, vector<16x16xbf16>
    tpu.vector_store %arg9[%c0_54, %c80], %68 {strides = array<i32>} : memref<432x128xbf16, #tpu.memory_space<vmem>>, vector<16x16xbf16>,
    %70 = vector.extract_strided_slice %67 {offsets = [0, 5], sizes = [16, 16], strides = [1, 1]} : vector<16x26xbf16> to vector<16x16xbf16>
    %c16_55 = arith.constant 16 : index
    %c80_56 = arith.constant 80 : index
    %71 = vector.load %arg9[%c16_55, %c80_56] : memref<432x128xbf16, #tpu.memory_space<vmem>>, vector<16x16xbf16>
    tpu.vector_store %arg9[%c16_55, %c80_56], %70 {strides = array<i32>} : memref<432x128xbf16, #tpu.memory_space<vmem>>, vector<16x16xbf16>,
    %72 = vector.extract_strided_slice %67 {offsets = [0, 6], sizes = [16, 16], strides = [1, 1]} : vector<16x26xbf16> to vector<16x16xbf16>
    %c32_57 = arith.constant 32 : index
    %c80_58 = arith.constant 80 : index
    %73 = vector.load %arg9[%c32_57, %c80_58] : memref<432x128xbf16, #tpu.memory_space<vmem>>, vector<16x16xbf16>
    tpu.vector_store %arg9[%c32_57, %c80_58], %72 {strides = array<i32>} : memref<432x128xbf16, #tpu.memory_space<vmem>>, vector<16x16xbf16>,
    %c6_i32 = arith.constant 6 : i32
    %74 = arith.addi %1, %c6_i32 : i32
    %c5_i32_59 = arith.constant 5 : i32
    %75 = arith.addi %74, %c5_i32_59 : i32
    %c-1_i32_60 = arith.constant -1 : i32
    %76 = arith.addi %75, %c-1_i32_60 : i32
    %c0_61 = arith.constant 0 : index
    %77 = arith.index_cast %76 : i32 to index
    %c0_62 = arith.constant 0 : index
    %c0_63 = arith.constant 0 : index
    %78 = vector.load %arg2[%c0_61, %77, %c0_62, %c0_63] : memref<1x26x16x26xbf16, #tpu.memory_space<vmem>>, vector<1x1x16x26xbf16>
    %79 = vector.shape_cast %78 : vector<1x1x16x26xbf16> to vector<16x26xbf16>
    %80 = vector.extract_strided_slice %79 {offsets = [0, 4], sizes = [16, 16], strides = [1, 1]} : vector<16x26xbf16> to vector<16x16xbf16>
    %c0_64 = arith.constant 0 : index
    %c96 = arith.constant 96 : index
    %81 = vector.load %arg9[%c0_64, %c96] : memref<432x128xbf16, #tpu.memory_space<vmem>>, vector<16x16xbf16>
    tpu.vector_store %arg9[%c0_64, %c96], %80 {strides = array<i32>} : memref<432x128xbf16, #tpu.memory_space<vmem>>, vector<16x16xbf16>,
    %82 = vector.extract_strided_slice %79 {offsets = [0, 5], sizes = [16, 16], strides = [1, 1]} : vector<16x26xbf16> to vector<16x16xbf16>
    %c16_65 = arith.constant 16 : index
    %c96_66 = arith.constant 96 : index
    %83 = vector.load %arg9[%c16_65, %c96_66] : memref<432x128xbf16, #tpu.memory_space<vmem>>, vector<16x16xbf16>
    tpu.vector_store %arg9[%c16_65, %c96_66], %82 {strides = array<i32>} : memref<432x128xbf16, #tpu.memory_space<vmem>>, vector<16x16xbf16>,
    %84 = vector.extract_strided_slice %79 {offsets = [0, 6], sizes = [16, 16], strides = [1, 1]} : vector<16x26xbf16> to vector<16x16xbf16>
    %c32_67 = arith.constant 32 : index
    %c96_68 = arith.constant 96 : index
    %85 = vector.load %arg9[%c32_67, %c96_68] : memref<432x128xbf16, #tpu.memory_space<vmem>>, vector<16x16xbf16>
    tpu.vector_store %arg9[%c32_67, %c96_68], %84 {strides = array<i32>} : memref<432x128xbf16, #tpu.memory_space<vmem>>, vector<16x16xbf16>,
    %c7_i32 = arith.constant 7 : i32
    %86 = arith.addi %1, %c7_i32 : i32
    %c5_i32_69 = arith.constant 5 : i32
    %87 = arith.addi %86, %c5_i32_69 : i32
    %c-1_i32_70 = arith.constant -1 : i32
    %88 = arith.addi %87, %c-1_i32_70 : i32
    %c0_71 = arith.constant 0 : index
    %89 = arith.index_cast %88 : i32 to index
    %c0_72 = arith.constant 0 : index
    %c0_73 = arith.constant 0 : index
    %90 = vector.load %arg2[%c0_71, %89, %c0_72, %c0_73] : memref<1x26x16x26xbf16, #tpu.memory_space<vmem>>, vector<1x1x16x26xbf16>
    %91 = vector.shape_cast %90 : vector<1x1x16x26xbf16> to vector<16x26xbf16>
    %92 = vector.extract_strided_slice %91 {offsets = [0, 4], sizes = [16, 16], strides = [1, 1]} : vector<16x26xbf16> to vector<16x16xbf16>
    %c0_74 = arith.constant 0 : index
    %c112 = arith.constant 112 : index
    %93 = vector.load %arg9[%c0_74, %c112] : memref<432x128xbf16, #tpu.memory_space<vmem>>, vector<16x16xbf16>
    tpu.vector_store %arg9[%c0_74, %c112], %92 {strides = array<i32>} : memref<432x128xbf16, #tpu.memory_space<vmem>>, vector<16x16xbf16>,
    %94 = vector.extract_strided_slice %91 {offsets = [0, 5], sizes = [16, 16], strides = [1, 1]} : vector<16x26xbf16> to vector<16x16xbf16>
    %c16_75 = arith.constant 16 : index
    %c112_76 = arith.constant 112 : index
    %95 = vector.load %arg9[%c16_75, %c112_76] : memref<432x128xbf16, #tpu.memory_space<vmem>>, vector<16x16xbf16>
    tpu.vector_store %arg9[%c16_75, %c112_76], %94 {strides = array<i32>} : memref<432x128xbf16, #tpu.memory_space<vmem>>, vector<16x16xbf16>,
    %96 = vector.extract_strided_slice %91 {offsets = [0, 6], sizes = [16, 16], strides = [1, 1]} : vector<16x26xbf16> to vector<16x16xbf16>
    %c32_77 = arith.constant 32 : index
    %c112_78 = arith.constant 112 : index
    %97 = vector.load %arg9[%c32_77, %c112_78] : memref<432x128xbf16, #tpu.memory_space<vmem>>, vector<16x16xbf16>
    tpu.vector_store %arg9[%c32_77, %c112_78], %96 {strides = array<i32>} : memref<432x128xbf16, #tpu.memory_space<vmem>>, vector<16x16xbf16>,
    %c0_i32_79 = arith.constant 0 : i32
    %98 = arith.addi %1, %c0_i32_79 : i32
    %c5_i32_80 = arith.constant 5 : i32
    %99 = arith.addi %98, %c5_i32_80 : i32
    %c0_i32_81 = arith.constant 0 : i32
    %100 = arith.addi %99, %c0_i32_81 : i32
    %c0_82 = arith.constant 0 : index
    %101 = arith.index_cast %100 : i32 to index
    %c0_83 = arith.constant 0 : index
    %c0_84 = arith.constant 0 : index
    %102 = vector.load %arg2[%c0_82, %101, %c0_83, %c0_84] : memref<1x26x16x26xbf16, #tpu.memory_space<vmem>>, vector<1x1x16x26xbf16>
    %103 = vector.shape_cast %102 : vector<1x1x16x26xbf16> to vector<16x26xbf16>
    %104 = vector.extract_strided_slice %103 {offsets = [0, 4], sizes = [16, 16], strides = [1, 1]} : vector<16x26xbf16> to vector<16x16xbf16>
    %c48_85 = arith.constant 48 : index
    %c0_86 = arith.constant 0 : index
    %105 = vector.load %arg9[%c48_85, %c0_86] : memref<432x128xbf16, #tpu.memory_space<vmem>>, vector<16x16xbf16>
    tpu.vector_store %arg9[%c48_85, %c0_86], %104 {strides = array<i32>} : memref<432x128xbf16, #tpu.memory_space<vmem>>, vector<16x16xbf16>,
    %106 = vector.extract_strided_slice %103 {offsets = [0, 5], sizes = [16, 16], strides = [1, 1]} : vector<16x26xbf16> to vector<16x16xbf16>
    %c64_87 = arith.constant 64 : index
    %c0_88 = arith.constant 0 : index
    %107 = vector.load %arg9[%c64_87, %c0_88] : memref<432x128xbf16, #tpu.memory_space<vmem>>, vector<16x16xbf16>
    tpu.vector_store %arg9[%c64_87, %c0_88], %106 {strides = array<i32>} : memref<432x128xbf16, #tpu.memory_space<vmem>>, vector<16x16xbf16>,
    %108 = vector.extract_strided_slice %103 {offsets = [0, 6], sizes = [16, 16], strides = [1, 1]} : vector<16x26xbf16> to vector<16x16xbf16>
    %c80_89 = arith.constant 80 : index
    %c0_90 = arith.constant 0 : index
    %109 = vector.load %arg9[%c80_89, %c0_90] : memref<432x128xbf16, #tpu.memory_space<vmem>>, vector<16x16xbf16>
    tpu.vector_store %arg9[%c80_89, %c0_90], %108 {strides = array<i32>} : memref<432x128xbf16, #tpu.memory_space<vmem>>, vector<16x16xbf16>,
    %c1_i32_91 = arith.constant 1 : i32
    %110 = arith.addi %1, %c1_i32_91 : i32
    %c5_i32_92 = arith.constant 5 : i32
    %111 = arith.addi %110, %c5_i32_92 : i32
    %c0_i32_93 = arith.constant 0 : i32
    %112 = arith.addi %111, %c0_i32_93 : i32
    %c0_94 = arith.constant 0 : index
    %113 = arith.index_cast %112 : i32 to index
    %c0_95 = arith.constant 0 : index
    %c0_96 = arith.constant 0 : index
    %114 = vector.load %arg2[%c0_94, %113, %c0_95, %c0_96] : memref<1x26x16x26xbf16, #tpu.memory_space<vmem>>, vector<1x1x16x26xbf16>
    %115 = vector.shape_cast %114 : vector<1x1x16x26xbf16> to vector<16x26xbf16>
    %116 = vector.extract_strided_slice %115 {offsets = [0, 4], sizes = [16, 16], strides = [1, 1]} : vector<16x26xbf16> to vector<16x16xbf16>
    %c48_97 = arith.constant 48 : index
    %c16_98 = arith.constant 16 : index
    %117 = vector.load %arg9[%c48_97, %c16_98] : memref<432x128xbf16, #tpu.memory_space<vmem>>, vector<16x16xbf16>
    tpu.vector_store %arg9[%c48_97, %c16_98], %116 {strides = array<i32>} : memref<432x128xbf16, #tpu.memory_space<vmem>>, vector<16x16xbf16>,
    %118 = vector.extract_strided_slice %115 {offsets = [0, 5], sizes = [16, 16], strides = [1, 1]} : vector<16x26xbf16> to vector<16x16xbf16>
    %c64_99 = arith.constant 64 : index
    %c16_100 = arith.constant 16 : index
    %119 = vector.load %arg9[%c64_99, %c16_100] : memref<432x128xbf16, #tpu.memory_space<vmem>>, vector<16x16xbf16>
    tpu.vector_store %arg9[%c64_99, %c16_100], %118 {strides = array<i32>} : memref<432x128xbf16, #tpu.memory_space<vmem>>, vector<16x16xbf16>,
    %120 = vector.extract_strided_slice %115 {offsets = [0, 6], sizes = [16, 16], strides = [1, 1]} : vector<16x26xbf16> to vector<16x16xbf16>
    %c80_101 = arith.constant 80 : index
    %c16_102 = arith.constant 16 : index
    %121 = vector.load %arg9[%c80_101, %c16_102] : memref<432x128xbf16, #tpu.memory_space<vmem>>, vector<16x16xbf16>
    tpu.vector_store %arg9[%c80_101, %c16_102], %120 {strides = array<i32>} : memref<432x128xbf16, #tpu.memory_space<vmem>>, vector<16x16xbf16>,
    %c2_i32_103 = arith.constant 2 : i32
    %122 = arith.addi %1, %c2_i32_103 : i32
    %c5_i32_104 = arith.constant 5 : i32
    %123 = arith.addi %122, %c5_i32_104 : i32
    %c0_i32_105 = arith.constant 0 : i32
    %124 = arith.addi %123, %c0_i32_105 : i32
    %c0_106 = arith.constant 0 : index
    %125 = arith.index_cast %124 : i32 to index
    %c0_107 = arith.constant 0 : index
    %c0_108 = arith.constant 0 : index
    %126 = vector.load %arg2[%c0_106, %125, %c0_107, %c0_108] : memref<1x26x16x26xbf16, #tpu.memory_space<vmem>>, vector<1x1x16x26xbf16>
    %127 = vector.shape_cast %126 : vector<1x1x16x26xbf16> to vector<16x26xbf16>
    %128 = vector.extract_strided_slice %127 {offsets = [0, 4], sizes = [16, 16], strides = [1, 1]} : vector<16x26xbf16> to vector<16x16xbf16>
    %c48_109 = arith.constant 48 : index
    %c32_110 = arith.constant 32 : index
    %129 = vector.load %arg9[%c48_109, %c32_110] : memref<432x128xbf16, #tpu.memory_space<vmem>>, vector<16x16xbf16>
    tpu.vector_store %arg9[%c48_109, %c32_110], %128 {strides = array<i32>} : memref<432x128xbf16, #tpu.memory_space<vmem>>, vector<16x16xbf16>,
    %130 = vector.extract_strided_slice %127 {offsets = [0, 5], sizes = [16, 16], strides = [1, 1]} : vector<16x26xbf16> to vector<16x16xbf16>
    %c64_111 = arith.constant 64 : index
    %c32_112 = arith.constant 32 : index
    %131 = vector.load %arg9[%c64_111, %c32_112] : memref<432x128xbf16, #tpu.memory_space<vmem>>, vector<16x16xbf16>
    tpu.vector_store %arg9[%c64_111, %c32_112], %130 {strides = array<i32>} : memref<432x128xbf16, #tpu.memory_space<vmem>>, vector<16x16xbf16>,
    %132 = vector.extract_strided_slice %127 {offsets = [0, 6], sizes = [16, 16], strides = [1, 1]} : vector<16x26xbf16> to vector<16x16xbf16>
    %c80_113 = arith.constant 80 : index
    %c32_114 = arith.constant 32 : index
    %133 = vector.load %arg9[%c80_113, %c32_114] : memref<432x128xbf16, #tpu.memory_space<vmem>>, vector<16x16xbf16>
    tpu.vector_store %arg9[%c80_113, %c32_114], %132 {strides = array<i32>} : memref<432x128xbf16, #tpu.memory_space<vmem>>, vector<16x16xbf16>,
    %c3_i32_115 = arith.constant 3 : i32
    %134 = arith.addi %1, %c3_i32_115 : i32
    %c5_i32_116 = arith.constant 5 : i32
    %135 = arith.addi %134, %c5_i32_116 : i32
    %c0_i32_117 = arith.constant 0 : i32
    %136 = arith.addi %135, %c0_i32_117 : i32
    %c0_118 = arith.constant 0 : index
    %137 = arith.index_cast %136 : i32 to index
    %c0_119 = arith.constant 0 : index
    %c0_120 = arith.constant 0 : index
    %138 = vector.load %arg2[%c0_118, %137, %c0_119, %c0_120] : memref<1x26x16x26xbf16, #tpu.memory_space<vmem>>, vector<1x1x16x26xbf16>
    %139 = vector.shape_cast %138 : vector<1x1x16x26xbf16> to vector<16x26xbf16>
    %140 = vector.extract_strided_slice %139 {offsets = [0, 4], sizes = [16, 16], strides = [1, 1]} : vector<16x26xbf16> to vector<16x16xbf16>
    %c48_121 = arith.constant 48 : index
    %c48_122 = arith.constant 48 : index
    %141 = vector.load %arg9[%c48_121, %c48_122] : memref<432x128xbf16, #tpu.memory_space<vmem>>, vector<16x16xbf16>
    tpu.vector_store %arg9[%c48_121, %c48_122], %140 {strides = array<i32>} : memref<432x128xbf16, #tpu.memory_space<vmem>>, vector<16x16xbf16>,
    %142 = vector.extract_strided_slice %139 {offsets = [0, 5], sizes = [16, 16], strides = [1, 1]} : vector<16x26xbf16> to vector<16x16xbf16>
    %c64_123 = arith.constant 64 : index
    %c48_124 = arith.constant 48 : index
    %143 = vector.load %arg9[%c64_123, %c48_124] : memref<432x128xbf16, #tpu.memory_space<vmem>>, vector<16x16xbf16>
    tpu.vector_store %arg9[%c64_123, %c48_124], %142 {strides = array<i32>} : memref<432x128xbf16, #tpu.memory_space<vmem>>, vector<16x16xbf16>,
    %144 = vector.extract_strided_slice %139 {offsets = [0, 6], sizes = [16, 16], strides = [1, 1]} : vector<16x26xbf16> to vector<16x16xbf16>
    %c80_125 = arith.constant 80 : index
    %c48_126 = arith.constant 48 : index
    %145 = vector.load %arg9[%c80_125, %c48_126] : memref<432x128xbf16, #tpu.memory_space<vmem>>, vector<16x16xbf16>
    tpu.vector_store %arg9[%c80_125, %c48_126], %144 {strides = array<i32>} : memref<432x128xbf16, #tpu.memory_space<vmem>>, vector<16x16xbf16>,
    %c4_i32_127 = arith.constant 4 : i32
    %146 = arith.addi %1, %c4_i32_127 : i32
    %c5_i32_128 = arith.constant 5 : i32
    %147 = arith.addi %146, %c5_i32_128 : i32
    %c0_i32_129 = arith.constant 0 : i32
    %148 = arith.addi %147, %c0_i32_129 : i32
    %c0_130 = arith.constant 0 : index
    %149 = arith.index_cast %148 : i32 to index
    %c0_131 = arith.constant 0 : index
    %c0_132 = arith.constant 0 : index
    %150 = vector.load %arg2[%c0_130, %149, %c0_131, %c0_132] : memref<1x26x16x26xbf16, #tpu.memory_space<vmem>>, vector<1x1x16x26xbf16>
    %151 = vector.shape_cast %150 : vector<1x1x16x26xbf16> to vector<16x26xbf16>
    %152 = vector.extract_strided_slice %151 {offsets = [0, 4], sizes = [16, 16], strides = [1, 1]} : vector<16x26xbf16> to vector<16x16xbf16>
    %c48_133 = arith.constant 48 : index
    %c64_134 = arith.constant 64 : index
    %153 = vector.load %arg9[%c48_133, %c64_134] : memref<432x128xbf16, #tpu.memory_space<vmem>>, vector<16x16xbf16>
    tpu.vector_store %arg9[%c48_133, %c64_134], %152 {strides = array<i32>} : memref<432x128xbf16, #tpu.memory_space<vmem>>, vector<16x16xbf16>,
    %154 = vector.extract_strided_slice %151 {offsets = [0, 5], sizes = [16, 16], strides = [1, 1]} : vector<16x26xbf16> to vector<16x16xbf16>
    %c64_135 = arith.constant 64 : index
    %c64_136 = arith.constant 64 : index
    %155 = vector.load %arg9[%c64_135, %c64_136] : memref<432x128xbf16, #tpu.memory_space<vmem>>, vector<16x16xbf16>
    tpu.vector_store %arg9[%c64_135, %c64_136], %154 {strides = array<i32>} : memref<432x128xbf16, #tpu.memory_space<vmem>>, vector<16x16xbf16>,
    %156 = vector.extract_strided_slice %151 {offsets = [0, 6], sizes = [16, 16], strides = [1, 1]} : vector<16x26xbf16> to vector<16x16xbf16>
    %c80_137 = arith.constant 80 : index
    %c64_138 = arith.constant 64 : index
    %157 = vector.load %arg9[%c80_137, %c64_138] : memref<432x128xbf16, #tpu.memory_space<vmem>>, vector<16x16xbf16>
    tpu.vector_store %arg9[%c80_137, %c64_138], %156 {strides = array<i32>} : memref<432x128xbf16, #tpu.memory_space<vmem>>, vector<16x16xbf16>,
    %c5_i32_139 = arith.constant 5 : i32
    %158 = arith.addi %1, %c5_i32_139 : i32
    %c5_i32_140 = arith.constant 5 : i32
    %159 = arith.addi %158, %c5_i32_140 : i32
    %c0_i32_141 = arith.constant 0 : i32
    %160 = arith.addi %159, %c0_i32_141 : i32
    %c0_142 = arith.constant 0 : index
    %161 = arith.index_cast %160 : i32 to index
    %c0_143 = arith.constant 0 : index
    %c0_144 = arith.constant 0 : index
    %162 = vector.load %arg2[%c0_142, %161, %c0_143, %c0_144] : memref<1x26x16x26xbf16, #tpu.memory_space<vmem>>, vector<1x1x16x26xbf16>
    %163 = vector.shape_cast %162 : vector<1x1x16x26xbf16> to vector<16x26xbf16>
    %164 = vector.extract_strided_slice %163 {offsets = [0, 4], sizes = [16, 16], strides = [1, 1]} : vector<16x26xbf16> to vector<16x16xbf16>
    %c48_145 = arith.constant 48 : index
    %c80_146 = arith.constant 80 : index
    %165 = vector.load %arg9[%c48_145, %c80_146] : memref<432x128xbf16, #tpu.memory_space<vmem>>, vector<16x16xbf16>
    tpu.vector_store %arg9[%c48_145, %c80_146], %164 {strides = array<i32>} : memref<432x128xbf16, #tpu.memory_space<vmem>>, vector<16x16xbf16>,
    %166 = vector.extract_strided_slice %163 {offsets = [0, 5], sizes = [16, 16], strides = [1, 1]} : vector<16x26xbf16> to vector<16x16xbf16>
    %c64_147 = arith.constant 64 : index
    %c80_148 = arith.constant 80 : index
    %167 = vector.load %arg9[%c64_147, %c80_148] : memref<432x128xbf16, #tpu.memory_space<vmem>>, vector<16x16xbf16>
    tpu.vector_store %arg9[%c64_147, %c80_148], %166 {strides = array<i32>} : memref<432x128xbf16, #tpu.memory_space<vmem>>, vector<16x16xbf16>,
    %168 = vector.extract_strided_slice %163 {offsets = [0, 6], sizes = [16, 16], strides = [1, 1]} : vector<16x26xbf16> to vector<16x16xbf16>
    %c80_149 = arith.constant 80 : index
    %c80_150 = arith.constant 80 : index
    %169 = vector.load %arg9[%c80_149, %c80_150] : memref<432x128xbf16, #tpu.memory_space<vmem>>, vector<16x16xbf16>
    tpu.vector_store %arg9[%c80_149, %c80_150], %168 {strides = array<i32>} : memref<432x128xbf16, #tpu.memory_space<vmem>>, vector<16x16xbf16>,
    %c6_i32_151 = arith.constant 6 : i32
    %170 = arith.addi %1, %c6_i32_151 : i32
    %c5_i32_152 = arith.constant 5 : i32
    %171 = arith.addi %170, %c5_i32_152 : i32
    %c0_i32_153 = arith.constant 0 : i32
    %172 = arith.addi %171, %c0_i32_153 : i32
    %c0_154 = arith.constant 0 : index
    %173 = arith.index_cast %172 : i32 to index
    %c0_155 = arith.constant 0 : index
    %c0_156 = arith.constant 0 : index
    %174 = vector.load %arg2[%c0_154, %173, %c0_155, %c0_156] : memref<1x26x16x26xbf16, #tpu.memory_space<vmem>>, vector<1x1x16x26xbf16>
    %175 = vector.shape_cast %174 : vector<1x1x16x26xbf16> to vector<16x26xbf16>
    %176 = vector.extract_strided_slice %175 {offsets = [0, 4], sizes = [16, 16], strides = [1, 1]} : vector<16x26xbf16> to vector<16x16xbf16>
    %c48_157 = arith.constant 48 : index
    %c96_158 = arith.constant 96 : index
    %177 = vector.load %arg9[%c48_157, %c96_158] : memref<432x128xbf16, #tpu.memory_space<vmem>>, vector<16x16xbf16>
    tpu.vector_store %arg9[%c48_157, %c96_158], %176 {strides = array<i32>} : memref<432x128xbf16, #tpu.memory_space<vmem>>, vector<16x16xbf16>,
    %178 = vector.extract_strided_slice %175 {offsets = [0, 5], sizes = [16, 16], strides = [1, 1]} : vector<16x26xbf16> to vector<16x16xbf16>
    %c64_159 = arith.constant 64 : index
    %c96_160 = arith.constant 96 : index
    %179 = vector.load %arg9[%c64_159, %c96_160] : memref<432x128xbf16, #tpu.memory_space<vmem>>, vector<16x16xbf16>
    tpu.vector_store %arg9[%c64_159, %c96_160], %178 {strides = array<i32>} : memref<432x128xbf16, #tpu.memory_space<vmem>>, vector<16x16xbf16>,
    %180 = vector.extract_strided_slice %175 {offsets = [0, 6], sizes = [16, 16], strides = [1, 1]} : vector<16x26xbf16> to vector<16x16xbf16>
    %c80_161 = arith.constant 80 : index
    %c96_162 = arith.constant 96 : index
    %181 = vector.load %arg9[%c80_161, %c96_162] : memref<432x128xbf16, #tpu.memory_space<vmem>>, vector<16x16xbf16>
    tpu.vector_store %arg9[%c80_161, %c96_162], %180 {strides = array<i32>} : memref<432x128xbf16, #tpu.memory_space<vmem>>, vector<16x16xbf16>,
    %c7_i32_163 = arith.constant 7 : i32
    %182 = arith.addi %1, %c7_i32_163 : i32
    %c5_i32_164 = arith.constant 5 : i32
    %183 = arith.addi %182, %c5_i32_164 : i32
    %c0_i32_165 = arith.constant 0 : i32
    %184 = arith.addi %183, %c0_i32_165 : i32
    %c0_166 = arith.constant 0 : index
    %185 = arith.index_cast %184 : i32 to index
    %c0_167 = arith.constant 0 : index
    %c0_168 = arith.constant 0 : index
    %186 = vector.load %arg2[%c0_166, %185, %c0_167, %c0_168] : memref<1x26x16x26xbf16, #tpu.memory_space<vmem>>, vector<1x1x16x26xbf16>
    %187 = vector.shape_cast %186 : vector<1x1x16x26xbf16> to vector<16x26xbf16>
    %188 = vector.extract_strided_slice %187 {offsets = [0, 4], sizes = [16, 16], strides = [1, 1]} : vector<16x26xbf16> to vector<16x16xbf16>
    %c48_169 = arith.constant 48 : index
    %c112_170 = arith.constant 112 : index
    %189 = vector.load %arg9[%c48_169, %c112_170] : memref<432x128xbf16, #tpu.memory_space<vmem>>, vector<16x16xbf16>
    tpu.vector_store %arg9[%c48_169, %c112_170], %188 {strides = array<i32>} : memref<432x128xbf16, #tpu.memory_space<vmem>>, vector<16x16xbf16>,
    %190 = vector.extract_strided_slice %187 {offsets = [0, 5], sizes = [16, 16], strides = [1, 1]} : vector<16x26xbf16> to vector<16x16xbf16>
    %c64_171 = arith.constant 64 : index
    %c112_172 = arith.constant 112 : index
    %191 = vector.load %arg9[%c64_171, %c112_172] : memref<432x128xbf16, #tpu.memory_space<vmem>>, vector<16x16xbf16>
    tpu.vector_store %arg9[%c64_171, %c112_172], %190 {strides = array<i32>} : memref<432x128xbf16, #tpu.memory_space<vmem>>, vector<16x16xbf16>,
    %192 = vector.extract_strided_slice %187 {offsets = [0, 6], sizes = [16, 16], strides = [1, 1]} : vector<16x26xbf16> to vector<16x16xbf16>
    %c80_173 = arith.constant 80 : index
    %c112_174 = arith.constant 112 : index
    %193 = vector.load %arg9[%c80_173, %c112_174] : memref<432x128xbf16, #tpu.memory_space<vmem>>, vector<16x16xbf16>
    tpu.vector_store %arg9[%c80_173, %c112_174], %192 {strides = array<i32>} : memref<432x128xbf16, #tpu.memory_space<vmem>>, vector<16x16xbf16>,
    %c0_i32_175 = arith.constant 0 : i32
    %194 = arith.addi %1, %c0_i32_175 : i32
    %c5_i32_176 = arith.constant 5 : i32
    %195 = arith.addi %194, %c5_i32_176 : i32
    %c1_i32_177 = arith.constant 1 : i32
    %196 = arith.addi %195, %c1_i32_177 : i32
    %c0_178 = arith.constant 0 : index
    %197 = arith.index_cast %196 : i32 to index
    %c0_179 = arith.constant 0 : index
    %c0_180 = arith.constant 0 : index
    %198 = vector.load %arg2[%c0_178, %197, %c0_179, %c0_180] : memref<1x26x16x26xbf16, #tpu.memory_space<vmem>>, vector<1x1x16x26xbf16>
    %199 = vector.shape_cast %198 : vector<1x1x16x26xbf16> to vector<16x26xbf16>
    %200 = vector.extract_strided_slice %199 {offsets = [0, 4], sizes = [16, 16], strides = [1, 1]} : vector<16x26xbf16> to vector<16x16xbf16>
    %c96_181 = arith.constant 96 : index
    %c0_182 = arith.constant 0 : index
    %201 = vector.load %arg9[%c96_181, %c0_182] : memref<432x128xbf16, #tpu.memory_space<vmem>>, vector<16x16xbf16>
    tpu.vector_store %arg9[%c96_181, %c0_182], %200 {strides = array<i32>} : memref<432x128xbf16, #tpu.memory_space<vmem>>, vector<16x16xbf16>,
    %202 = vector.extract_strided_slice %199 {offsets = [0, 5], sizes = [16, 16], strides = [1, 1]} : vector<16x26xbf16> to vector<16x16xbf16>
    %c112_183 = arith.constant 112 : index
    %c0_184 = arith.constant 0 : index
    %203 = vector.load %arg9[%c112_183, %c0_184] : memref<432x128xbf16, #tpu.memory_space<vmem>>, vector<16x16xbf16>
    tpu.vector_store %arg9[%c112_183, %c0_184], %202 {strides = array<i32>} : memref<432x128xbf16, #tpu.memory_space<vmem>>, vector<16x16xbf16>,
    %204 = vector.extract_strided_slice %199 {offsets = [0, 6], sizes = [16, 16], strides = [1, 1]} : vector<16x26xbf16> to vector<16x16xbf16>
    %c128 = arith.constant 128 : index
    %c0_185 = arith.constant 0 : index
    %205 = vector.load %arg9[%c128, %c0_185] : memref<432x128xbf16, #tpu.memory_space<vmem>>, vector<16x16xbf16>
    tpu.vector_store %arg9[%c128, %c0_185], %204 {strides = array<i32>} : memref<432x128xbf16, #tpu.memory_space<vmem>>, vector<16x16xbf16>,
    %c1_i32_186 = arith.constant 1 : i32
    %206 = arith.addi %1, %c1_i32_186 : i32
    %c5_i32_187 = arith.constant 5 : i32
    %207 = arith.addi %206, %c5_i32_187 : i32
    %c1_i32_188 = arith.constant 1 : i32
    %208 = arith.addi %207, %c1_i32_188 : i32
    %c0_189 = arith.constant 0 : index
    %209 = arith.index_cast %208 : i32 to index
    %c0_190 = arith.constant 0 : index
    %c0_191 = arith.constant 0 : index
    %210 = vector.load %arg2[%c0_189, %209, %c0_190, %c0_191] : memref<1x26x16x26xbf16, #tpu.memory_space<vmem>>, vector<1x1x16x26xbf16>
    %211 = vector.shape_cast %210 : vector<1x1x16x26xbf16> to vector<16x26xbf16>
    %212 = vector.extract_strided_slice %211 {offsets = [0, 4], sizes = [16, 16], strides = [1, 1]} : vector<16x26xbf16> to vector<16x16xbf16>
    %c96_192 = arith.constant 96 : index
    %c16_193 = arith.constant 16 : index
    %213 = vector.load %arg9[%c96_192, %c16_193] : memref<432x128xbf16, #tpu.memory_space<vmem>>, vector<16x16xbf16>
    tpu.vector_store %arg9[%c96_192, %c16_193], %212 {strides = array<i32>} : memref<432x128xbf16, #tpu.memory_space<vmem>>, vector<16x16xbf16>,
    %214 = vector.extract_strided_slice %211 {offsets = [0, 5], sizes = [16, 16], strides = [1, 1]} : vector<16x26xbf16> to vector<16x16xbf16>
    %c112_194 = arith.constant 112 : index
    %c16_195 = arith.constant 16 : index
    %215 = vector.load %arg9[%c112_194, %c16_195] : memref<432x128xbf16, #tpu.memory_space<vmem>>, vector<16x16xbf16>
    tpu.vector_store %arg9[%c112_194, %c16_195], %214 {strides = array<i32>} : memref<432x128xbf16, #tpu.memory_space<vmem>>, vector<16x16xbf16>,
    %216 = vector.extract_strided_slice %211 {offsets = [0, 6], sizes = [16, 16], strides = [1, 1]} : vector<16x26xbf16> to vector<16x16xbf16>
    %c128_196 = arith.constant 128 : index
    %c16_197 = arith.constant 16 : index
    %217 = vector.load %arg9[%c128_196, %c16_197] : memref<432x128xbf16, #tpu.memory_space<vmem>>, vector<16x16xbf16>
    tpu.vector_store %arg9[%c128_196, %c16_197], %216 {strides = array<i32>} : memref<432x128xbf16, #tpu.memory_space<vmem>>, vector<16x16xbf16>,
    %c2_i32_198 = arith.constant 2 : i32
    %218 = arith.addi %1, %c2_i32_198 : i32
    %c5_i32_199 = arith.constant 5 : i32
    %219 = arith.addi %218, %c5_i32_199 : i32
    %c1_i32_200 = arith.constant 1 : i32
    %220 = arith.addi %219, %c1_i32_200 : i32
    %c0_201 = arith.constant 0 : index
    %221 = arith.index_cast %220 : i32 to index
    %c0_202 = arith.constant 0 : index
    %c0_203 = arith.constant 0 : index
    %222 = vector.load %arg2[%c0_201, %221, %c0_202, %c0_203] : memref<1x26x16x26xbf16, #tpu.memory_space<vmem>>, vector<1x1x16x26xbf16>
    %223 = vector.shape_cast %222 : vector<1x1x16x26xbf16> to vector<16x26xbf16>
    %224 = vector.extract_strided_slice %223 {offsets = [0, 4], sizes = [16, 16], strides = [1, 1]} : vector<16x26xbf16> to vector<16x16xbf16>
    %c96_204 = arith.constant 96 : index
    %c32_205 = arith.constant 32 : index
    %225 = vector.load %arg9[%c96_204, %c32_205] : memref<432x128xbf16, #tpu.memory_space<vmem>>, vector<16x16xbf16>
    tpu.vector_store %arg9[%c96_204, %c32_205], %224 {strides = array<i32>} : memref<432x128xbf16, #tpu.memory_space<vmem>>, vector<16x16xbf16>,
    %226 = vector.extract_strided_slice %223 {offsets = [0, 5], sizes = [16, 16], strides = [1, 1]} : vector<16x26xbf16> to vector<16x16xbf16>
    %c112_206 = arith.constant 112 : index
    %c32_207 = arith.constant 32 : index
    %227 = vector.load %arg9[%c112_206, %c32_207] : memref<432x128xbf16, #tpu.memory_space<vmem>>, vector<16x16xbf16>
    tpu.vector_store %arg9[%c112_206, %c32_207], %226 {strides = array<i32>} : memref<432x128xbf16, #tpu.memory_space<vmem>>, vector<16x16xbf16>,
    %228 = vector.extract_strided_slice %223 {offsets = [0, 6], sizes = [16, 16], strides = [1, 1]} : vector<16x26xbf16> to vector<16x16xbf16>
    %c128_208 = arith.constant 128 : index
    %c32_209 = arith.constant 32 : index
    %229 = vector.load %arg9[%c128_208, %c32_209] : memref<432x128xbf16, #tpu.memory_space<vmem>>, vector<16x16xbf16>
    tpu.vector_store %arg9[%c128_208, %c32_209], %228 {strides = array<i32>} : memref<432x128xbf16, #tpu.memory_space<vmem>>, vector<16x16xbf16>,
    %c3_i32_210 = arith.constant 3 : i32
    %230 = arith.addi %1, %c3_i32_210 : i32
    %c5_i32_211 = arith.constant 5 : i32
    %231 = arith.addi %230, %c5_i32_211 : i32
    %c1_i32_212 = arith.constant 1 : i32
    %232 = arith.addi %231, %c1_i32_212 : i32
    %c0_213 = arith.constant 0 : index
    %233 = arith.index_cast %232 : i32 to index
    %c0_214 = arith.constant 0 : index
    %c0_215 = arith.constant 0 : index
    %234 = vector.load %arg2[%c0_213, %233, %c0_214, %c0_215] : memref<1x26x16x26xbf16, #tpu.memory_space<vmem>>, vector<1x1x16x26xbf16>
    %235 = vector.shape_cast %234 : vector<1x1x16x26xbf16> to vector<16x26xbf16>
    %236 = vector.extract_strided_slice %235 {offsets = [0, 4], sizes = [16, 16], strides = [1, 1]} : vector<16x26xbf16> to vector<16x16xbf16>
    %c96_216 = arith.constant 96 : index
    %c48_217 = arith.constant 48 : index
    %237 = vector.load %arg9[%c96_216, %c48_217] : memref<432x128xbf16, #tpu.memory_space<vmem>>, vector<16x16xbf16>
    tpu.vector_store %arg9[%c96_216, %c48_217], %236 {strides = array<i32>} : memref<432x128xbf16, #tpu.memory_space<vmem>>, vector<16x16xbf16>,
    %238 = vector.extract_strided_slice %235 {offsets = [0, 5], sizes = [16, 16], strides = [1, 1]} : vector<16x26xbf16> to vector<16x16xbf16>
    %c112_218 = arith.constant 112 : index
    %c48_219 = arith.constant 48 : index
    %239 = vector.load %arg9[%c112_218, %c48_219] : memref<432x128xbf16, #tpu.memory_space<vmem>>, vector<16x16xbf16>
    tpu.vector_store %arg9[%c112_218, %c48_219], %238 {strides = array<i32>} : memref<432x128xbf16, #tpu.memory_space<vmem>>, vector<16x16xbf16>,
    %240 = vector.extract_strided_slice %235 {offsets = [0, 6], sizes = [16, 16], strides = [1, 1]} : vector<16x26xbf16> to vector<16x16xbf16>
    %c128_220 = arith.constant 128 : index
    %c48_221 = arith.constant 48 : index
    %241 = vector.load %arg9[%c128_220, %c48_221] : memref<432x128xbf16, #tpu.memory_space<vmem>>, vector<16x16xbf16>
    tpu.vector_store %arg9[%c128_220, %c48_221], %240 {strides = array<i32>} : memref<432x128xbf16, #tpu.memory_space<vmem>>, vector<16x16xbf16>,
    %c4_i32_222 = arith.constant 4 : i32
    %242 = arith.addi %1, %c4_i32_222 : i32
    %c5_i32_223 = arith.constant 5 : i32
    %243 = arith.addi %242, %c5_i32_223 : i32
    %c1_i32_224 = arith.constant 1 : i32
    %244 = arith.addi %243, %c1_i32_224 : i32
    %c0_225 = arith.constant 0 : index
    %245 = arith.index_cast %244 : i32 to index
    %c0_226 = arith.constant 0 : index
    %c0_227 = arith.constant 0 : index
    %246 = vector.load %arg2[%c0_225, %245, %c0_226, %c0_227] : memref<1x26x16x26xbf16, #tpu.memory_space<vmem>>, vector<1x1x16x26xbf16>
    %247 = vector.shape_cast %246 : vector<1x1x16x26xbf16> to vector<16x26xbf16>
    %248 = vector.extract_strided_slice %247 {offsets = [0, 4], sizes = [16, 16], strides = [1, 1]} : vector<16x26xbf16> to vector<16x16xbf16>
    %c96_228 = arith.constant 96 : index
    %c64_229 = arith.constant 64 : index
    %249 = vector.load %arg9[%c96_228, %c64_229] : memref<432x128xbf16, #tpu.memory_space<vmem>>, vector<16x16xbf16>
    tpu.vector_store %arg9[%c96_228, %c64_229], %248 {strides = array<i32>} : memref<432x128xbf16, #tpu.memory_space<vmem>>, vector<16x16xbf16>,
    %250 = vector.extract_strided_slice %247 {offsets = [0, 5], sizes = [16, 16], strides = [1, 1]} : vector<16x26xbf16> to vector<16x16xbf16>
    %c112_230 = arith.constant 112 : index
    %c64_231 = arith.constant 64 : index
    %251 = vector.load %arg9[%c112_230, %c64_231] : memref<432x128xbf16, #tpu.memory_space<vmem>>, vector<16x16xbf16>
    tpu.vector_store %arg9[%c112_230, %c64_231], %250 {strides = array<i32>} : memref<432x128xbf16, #tpu.memory_space<vmem>>, vector<16x16xbf16>,
    %252 = vector.extract_strided_slice %247 {offsets = [0, 6], sizes = [16, 16], strides = [1, 1]} : vector<16x26xbf16> to vector<16x16xbf16>
    %c128_232 = arith.constant 128 : index
    %c64_233 = arith.constant 64 : index
    %253 = vector.load %arg9[%c128_232, %c64_233] : memref<432x128xbf16, #tpu.memory_space<vmem>>, vector<16x16xbf16>
    tpu.vector_store %arg9[%c128_232, %c64_233], %252 {strides = array<i32>} : memref<432x128xbf16, #tpu.memory_space<vmem>>, vector<16x16xbf16>,
    %c5_i32_234 = arith.constant 5 : i32
    %254 = arith.addi %1, %c5_i32_234 : i32
    %c5_i32_235 = arith.constant 5 : i32
    %255 = arith.addi %254, %c5_i32_235 : i32
    %c1_i32_236 = arith.constant 1 : i32
    %256 = arith.addi %255, %c1_i32_236 : i32
    %c0_237 = arith.constant 0 : index
    %257 = arith.index_cast %256 : i32 to index
    %c0_238 = arith.constant 0 : index
    %c0_239 = arith.constant 0 : index
    %258 = vector.load %arg2[%c0_237, %257, %c0_238, %c0_239] : memref<1x26x16x26xbf16, #tpu.memory_space<vmem>>, vector<1x1x16x26xbf16>
    %259 = vector.shape_cast %258 : vector<1x1x16x26xbf16> to vector<16x26xbf16>
    %260 = vector.extract_strided_slice %259 {offsets = [0, 4], sizes = [16, 16], strides = [1, 1]} : vector<16x26xbf16> to vector<16x16xbf16>
    %c96_240 = arith.constant 96 : index
    %c80_241 = arith.constant 80 : index
    %261 = vector.load %arg9[%c96_240, %c80_241] : memref<432x128xbf16, #tpu.memory_space<vmem>>, vector<16x16xbf16>
    tpu.vector_store %arg9[%c96_240, %c80_241], %260 {strides = array<i32>} : memref<432x128xbf16, #tpu.memory_space<vmem>>, vector<16x16xbf16>,
    %262 = vector.extract_strided_slice %259 {offsets = [0, 5], sizes = [16, 16], strides = [1, 1]} : vector<16x26xbf16> to vector<16x16xbf16>
    %c112_242 = arith.constant 112 : index
    %c80_243 = arith.constant 80 : index
    %263 = vector.load %arg9[%c112_242, %c80_243] : memref<432x128xbf16, #tpu.memory_space<vmem>>, vector<16x16xbf16>
    tpu.vector_store %arg9[%c112_242, %c80_243], %262 {strides = array<i32>} : memref<432x128xbf16, #tpu.memory_space<vmem>>, vector<16x16xbf16>,
    %264 = vector.extract_strided_slice %259 {offsets = [0, 6], sizes = [16, 16], strides = [1, 1]} : vector<16x26xbf16> to vector<16x16xbf16>
    %c128_244 = arith.constant 128 : index
    %c80_245 = arith.constant 80 : index
    %265 = vector.load %arg9[%c128_244, %c80_245] : memref<432x128xbf16, #tpu.memory_space<vmem>>, vector<16x16xbf16>
    tpu.vector_store %arg9[%c128_244, %c80_245], %264 {strides = array<i32>} : memref<432x128xbf16, #tpu.memory_space<vmem>>, vector<16x16xbf16>,
    %c6_i32_246 = arith.constant 6 : i32
    %266 = arith.addi %1, %c6_i32_246 : i32
    %c5_i32_247 = arith.constant 5 : i32
    %267 = arith.addi %266, %c5_i32_247 : i32
    %c1_i32_248 = arith.constant 1 : i32
    %268 = arith.addi %267, %c1_i32_248 : i32
    %c0_249 = arith.constant 0 : index
    %269 = arith.index_cast %268 : i32 to index
    %c0_250 = arith.constant 0 : index
    %c0_251 = arith.constant 0 : index
    %270 = vector.load %arg2[%c0_249, %269, %c0_250, %c0_251] : memref<1x26x16x26xbf16, #tpu.memory_space<vmem>>, vector<1x1x16x26xbf16>
    %271 = vector.shape_cast %270 : vector<1x1x16x26xbf16> to vector<16x26xbf16>
    %272 = vector.extract_strided_slice %271 {offsets = [0, 4], sizes = [16, 16], strides = [1, 1]} : vector<16x26xbf16> to vector<16x16xbf16>
    %c96_252 = arith.constant 96 : index
    %c96_253 = arith.constant 96 : index
    %273 = vector.load %arg9[%c96_252, %c96_253] : memref<432x128xbf16, #tpu.memory_space<vmem>>, vector<16x16xbf16>
    tpu.vector_store %arg9[%c96_252, %c96_253], %272 {strides = array<i32>} : memref<432x128xbf16, #tpu.memory_space<vmem>>, vector<16x16xbf16>,
    %274 = vector.extract_strided_slice %271 {offsets = [0, 5], sizes = [16, 16], strides = [1, 1]} : vector<16x26xbf16> to vector<16x16xbf16>
    %c112_254 = arith.constant 112 : index
    %c96_255 = arith.constant 96 : index
    %275 = vector.load %arg9[%c112_254, %c96_255] : memref<432x128xbf16, #tpu.memory_space<vmem>>, vector<16x16xbf16>
    tpu.vector_store %arg9[%c112_254, %c96_255], %274 {strides = array<i32>} : memref<432x128xbf16, #tpu.memory_space<vmem>>, vector<16x16xbf16>,
    %276 = vector.extract_strided_slice %271 {offsets = [0, 6], sizes = [16, 16], strides = [1, 1]} : vector<16x26xbf16> to vector<16x16xbf16>
    %c128_256 = arith.constant 128 : index
    %c96_257 = arith.constant 96 : index
    %277 = vector.load %arg9[%c128_256, %c96_257] : memref<432x128xbf16, #tpu.memory_space<vmem>>, vector<16x16xbf16>
    tpu.vector_store %arg9[%c128_256, %c96_257], %276 {strides = array<i32>} : memref<432x128xbf16, #tpu.memory_space<vmem>>, vector<16x16xbf16>,
    %c7_i32_258 = arith.constant 7 : i32
    %278 = arith.addi %1, %c7_i32_258 : i32
    %c5_i32_259 = arith.constant 5 : i32
    %279 = arith.addi %278, %c5_i32_259 : i32
    %c1_i32_260 = arith.constant 1 : i32
    %280 = arith.addi %279, %c1_i32_260 : i32
    %c0_261 = arith.constant 0 : index
    %281 = arith.index_cast %280 : i32 to index
    %c0_262 = arith.constant 0 : index
    %c0_263 = arith.constant 0 : index
    %282 = vector.load %arg2[%c0_261, %281, %c0_262, %c0_263] : memref<1x26x16x26xbf16, #tpu.memory_space<vmem>>, vector<1x1x16x26xbf16>
    %283 = vector.shape_cast %282 : vector<1x1x16x26xbf16> to vector<16x26xbf16>
    %284 = vector.extract_strided_slice %283 {offsets = [0, 4], sizes = [16, 16], strides = [1, 1]} : vector<16x26xbf16> to vector<16x16xbf16>
    %c96_264 = arith.constant 96 : index
    %c112_265 = arith.constant 112 : index
    %285 = vector.load %arg9[%c96_264, %c112_265] : memref<432x128xbf16, #tpu.memory_space<vmem>>, vector<16x16xbf16>
    tpu.vector_store %arg9[%c96_264, %c112_265], %284 {strides = array<i32>} : memref<432x128xbf16, #tpu.memory_space<vmem>>, vector<16x16xbf16>,
    %286 = vector.extract_strided_slice %283 {offsets = [0, 5], sizes = [16, 16], strides = [1, 1]} : vector<16x26xbf16> to vector<16x16xbf16>
    %c112_266 = arith.constant 112 : index
    %c112_267 = arith.constant 112 : index
    %287 = vector.load %arg9[%c112_266, %c112_267] : memref<432x128xbf16, #tpu.memory_space<vmem>>, vector<16x16xbf16>
    tpu.vector_store %arg9[%c112_266, %c112_267], %286 {strides = array<i32>} : memref<432x128xbf16, #tpu.memory_space<vmem>>, vector<16x16xbf16>,
    %288 = vector.extract_strided_slice %283 {offsets = [0, 6], sizes = [16, 16], strides = [1, 1]} : vector<16x26xbf16> to vector<16x16xbf16>
    %c128_268 = arith.constant 128 : index
    %c112_269 = arith.constant 112 : index
    %289 = vector.load %arg9[%c128_268, %c112_269] : memref<432x128xbf16, #tpu.memory_space<vmem>>, vector<16x16xbf16>
    tpu.vector_store %arg9[%c128_268, %c112_269], %288 {strides = array<i32>} : memref<432x128xbf16, #tpu.memory_space<vmem>>, vector<16x16xbf16>,
    %c0_i32_270 = arith.constant 0 : i32
    %290 = arith.addi %1, %c0_i32_270 : i32
    %c5_i32_271 = arith.constant 5 : i32
    %291 = arith.addi %290, %c5_i32_271 : i32
    %c-3_i32 = arith.constant -3 : i32
    %292 = arith.addi %291, %c-3_i32 : i32
    %c0_272 = arith.constant 0 : index
    %293 = arith.index_cast %292 : i32 to index
    %c0_273 = arith.constant 0 : index
    %c0_274 = arith.constant 0 : index
    %294 = vector.load %arg2[%c0_272, %293, %c0_273, %c0_274] : memref<1x26x16x26xbf16, #tpu.memory_space<vmem>>, vector<1x1x16x26xbf16>
    %295 = vector.shape_cast %294 : vector<1x1x16x26xbf16> to vector<16x26xbf16>
    %296 = vector.extract_strided_slice %295 {offsets = [0, 2], sizes = [16, 16], strides = [1, 1]} : vector<16x26xbf16> to vector<16x16xbf16>
    %c144 = arith.constant 144 : index
    %c0_275 = arith.constant 0 : index
    %297 = vector.load %arg9[%c144, %c0_275] : memref<432x128xbf16, #tpu.memory_space<vmem>>, vector<16x16xbf16>
    tpu.vector_store %arg9[%c144, %c0_275], %296 {strides = array<i32>} : memref<432x128xbf16, #tpu.memory_space<vmem>>, vector<16x16xbf16>,
    %298 = vector.extract_strided_slice %295 {offsets = [0, 5], sizes = [16, 16], strides = [1, 1]} : vector<16x26xbf16> to vector<16x16xbf16>
    %c160 = arith.constant 160 : index
    %c0_276 = arith.constant 0 : index
    %299 = vector.load %arg9[%c160, %c0_276] : memref<432x128xbf16, #tpu.memory_space<vmem>>, vector<16x16xbf16>
    tpu.vector_store %arg9[%c160, %c0_276], %298 {strides = array<i32>} : memref<432x128xbf16, #tpu.memory_space<vmem>>, vector<16x16xbf16>,
    %300 = vector.extract_strided_slice %295 {offsets = [0, 8], sizes = [16, 16], strides = [1, 1]} : vector<16x26xbf16> to vector<16x16xbf16>
    %c176 = arith.constant 176 : index
    %c0_277 = arith.constant 0 : index
    %301 = vector.load %arg9[%c176, %c0_277] : memref<432x128xbf16, #tpu.memory_space<vmem>>, vector<16x16xbf16>
    tpu.vector_store %arg9[%c176, %c0_277], %300 {strides = array<i32>} : memref<432x128xbf16, #tpu.memory_space<vmem>>, vector<16x16xbf16>,
    %c1_i32_278 = arith.constant 1 : i32
    %302 = arith.addi %1, %c1_i32_278 : i32
    %c5_i32_279 = arith.constant 5 : i32
    %303 = arith.addi %302, %c5_i32_279 : i32
    %c-3_i32_280 = arith.constant -3 : i32
    %304 = arith.addi %303, %c-3_i32_280 : i32
    %c0_281 = arith.constant 0 : index
    %305 = arith.index_cast %304 : i32 to index
    %c0_282 = arith.constant 0 : index
    %c0_283 = arith.constant 0 : index
    %306 = vector.load %arg2[%c0_281, %305, %c0_282, %c0_283] : memref<1x26x16x26xbf16, #tpu.memory_space<vmem>>, vector<1x1x16x26xbf16>
    %307 = vector.shape_cast %306 : vector<1x1x16x26xbf16> to vector<16x26xbf16>
    %308 = vector.extract_strided_slice %307 {offsets = [0, 2], sizes = [16, 16], strides = [1, 1]} : vector<16x26xbf16> to vector<16x16xbf16>
    %c144_284 = arith.constant 144 : index
    %c16_285 = arith.constant 16 : index
    %309 = vector.load %arg9[%c144_284, %c16_285] : memref<432x128xbf16, #tpu.memory_space<vmem>>, vector<16x16xbf16>
    tpu.vector_store %arg9[%c144_284, %c16_285], %308 {strides = array<i32>} : memref<432x128xbf16, #tpu.memory_space<vmem>>, vector<16x16xbf16>,
    %310 = vector.extract_strided_slice %307 {offsets = [0, 5], sizes = [16, 16], strides = [1, 1]} : vector<16x26xbf16> to vector<16x16xbf16>
    %c160_286 = arith.constant 160 : index
    %c16_287 = arith.constant 16 : index
    %311 = vector.load %arg9[%c160_286, %c16_287] : memref<432x128xbf16, #tpu.memory_space<vmem>>, vector<16x16xbf16>
    tpu.vector_store %arg9[%c160_286, %c16_287], %310 {strides = array<i32>} : memref<432x128xbf16, #tpu.memory_space<vmem>>, vector<16x16xbf16>,
    %312 = vector.extract_strided_slice %307 {offsets = [0, 8], sizes = [16, 16], strides = [1, 1]} : vector<16x26xbf16> to vector<16x16xbf16>
    %c176_288 = arith.constant 176 : index
    %c16_289 = arith.constant 16 : index
    %313 = vector.load %arg9[%c176_288, %c16_289] : memref<432x128xbf16, #tpu.memory_space<vmem>>, vector<16x16xbf16>
    tpu.vector_store %arg9[%c176_288, %c16_289], %312 {strides = array<i32>} : memref<432x128xbf16, #tpu.memory_space<vmem>>, vector<16x16xbf16>,
    %c2_i32_290 = arith.constant 2 : i32
    %314 = arith.addi %1, %c2_i32_290 : i32
    %c5_i32_291 = arith.constant 5 : i32
    %315 = arith.addi %314, %c5_i32_291 : i32
    %c-3_i32_292 = arith.constant -3 : i32
    %316 = arith.addi %315, %c-3_i32_292 : i32
    %c0_293 = arith.constant 0 : index
    %317 = arith.index_cast %316 : i32 to index
    %c0_294 = arith.constant 0 : index
    %c0_295 = arith.constant 0 : index
    %318 = vector.load %arg2[%c0_293, %317, %c0_294, %c0_295] : memref<1x26x16x26xbf16, #tpu.memory_space<vmem>>, vector<1x1x16x26xbf16>
    %319 = vector.shape_cast %318 : vector<1x1x16x26xbf16> to vector<16x26xbf16>
    %320 = vector.extract_strided_slice %319 {offsets = [0, 2], sizes = [16, 16], strides = [1, 1]} : vector<16x26xbf16> to vector<16x16xbf16>
    %c144_296 = arith.constant 144 : index
    %c32_297 = arith.constant 32 : index
    %321 = vector.load %arg9[%c144_296, %c32_297] : memref<432x128xbf16, #tpu.memory_space<vmem>>, vector<16x16xbf16>
    tpu.vector_store %arg9[%c144_296, %c32_297], %320 {strides = array<i32>} : memref<432x128xbf16, #tpu.memory_space<vmem>>, vector<16x16xbf16>,
    %322 = vector.extract_strided_slice %319 {offsets = [0, 5], sizes = [16, 16], strides = [1, 1]} : vector<16x26xbf16> to vector<16x16xbf16>
    %c160_298 = arith.constant 160 : index
    %c32_299 = arith.constant 32 : index
    %323 = vector.load %arg9[%c160_298, %c32_299] : memref<432x128xbf16, #tpu.memory_space<vmem>>, vector<16x16xbf16>
    tpu.vector_store %arg9[%c160_298, %c32_299], %322 {strides = array<i32>} : memref<432x128xbf16, #tpu.memory_space<vmem>>, vector<16x16xbf16>,
    %324 = vector.extract_strided_slice %319 {offsets = [0, 8], sizes = [16, 16], strides = [1, 1]} : vector<16x26xbf16> to vector<16x16xbf16>
    %c176_300 = arith.constant 176 : index
    %c32_301 = arith.constant 32 : index
    %325 = vector.load %arg9[%c176_300, %c32_301] : memref<432x128xbf16, #tpu.memory_space<vmem>>, vector<16x16xbf16>
    tpu.vector_store %arg9[%c176_300, %c32_301], %324 {strides = array<i32>} : memref<432x128xbf16, #tpu.memory_space<vmem>>, vector<16x16xbf16>,
    %c3_i32_302 = arith.constant 3 : i32
    %326 = arith.addi %1, %c3_i32_302 : i32
    %c5_i32_303 = arith.constant 5 : i32
    %327 = arith.addi %326, %c5_i32_303 : i32
    %c-3_i32_304 = arith.constant -3 : i32
    %328 = arith.addi %327, %c-3_i32_304 : i32
    %c0_305 = arith.constant 0 : index
    %329 = arith.index_cast %328 : i32 to index
    %c0_306 = arith.constant 0 : index
    %c0_307 = arith.constant 0 : index
    %330 = vector.load %arg2[%c0_305, %329, %c0_306, %c0_307] : memref<1x26x16x26xbf16, #tpu.memory_space<vmem>>, vector<1x1x16x26xbf16>
    %331 = vector.shape_cast %330 : vector<1x1x16x26xbf16> to vector<16x26xbf16>
    %332 = vector.extract_strided_slice %331 {offsets = [0, 2], sizes = [16, 16], strides = [1, 1]} : vector<16x26xbf16> to vector<16x16xbf16>
    %c144_308 = arith.constant 144 : index
    %c48_309 = arith.constant 48 : index
    %333 = vector.load %arg9[%c144_308, %c48_309] : memref<432x128xbf16, #tpu.memory_space<vmem>>, vector<16x16xbf16>
    tpu.vector_store %arg9[%c144_308, %c48_309], %332 {strides = array<i32>} : memref<432x128xbf16, #tpu.memory_space<vmem>>, vector<16x16xbf16>,
    %334 = vector.extract_strided_slice %331 {offsets = [0, 5], sizes = [16, 16], strides = [1, 1]} : vector<16x26xbf16> to vector<16x16xbf16>
    %c160_310 = arith.constant 160 : index
    %c48_311 = arith.constant 48 : index
    %335 = vector.load %arg9[%c160_310, %c48_311] : memref<432x128xbf16, #tpu.memory_space<vmem>>, vector<16x16xbf16>
    tpu.vector_store %arg9[%c160_310, %c48_311], %334 {strides = array<i32>} : memref<432x128xbf16, #tpu.memory_space<vmem>>, vector<16x16xbf16>,
    %336 = vector.extract_strided_slice %331 {offsets = [0, 8], sizes = [16, 16], strides = [1, 1]} : vector<16x26xbf16> to vector<16x16xbf16>
    %c176_312 = arith.constant 176 : index
    %c48_313 = arith.constant 48 : index
    %337 = vector.load %arg9[%c176_312, %c48_313] : memref<432x128xbf16, #tpu.memory_space<vmem>>, vector<16x16xbf16>
    tpu.vector_store %arg9[%c176_312, %c48_313], %336 {strides = array<i32>} : memref<432x128xbf16, #tpu.memory_space<vmem>>, vector<16x16xbf16>,
    %c4_i32_314 = arith.constant 4 : i32
    %338 = arith.addi %1, %c4_i32_314 : i32
    %c5_i32_315 = arith.constant 5 : i32
    %339 = arith.addi %338, %c5_i32_315 : i32
    %c-3_i32_316 = arith.constant -3 : i32
    %340 = arith.addi %339, %c-3_i32_316 : i32
    %c0_317 = arith.constant 0 : index
    %341 = arith.index_cast %340 : i32 to index
    %c0_318 = arith.constant 0 : index
    %c0_319 = arith.constant 0 : index
    %342 = vector.load %arg2[%c0_317, %341, %c0_318, %c0_319] : memref<1x26x16x26xbf16, #tpu.memory_space<vmem>>, vector<1x1x16x26xbf16>
    %343 = vector.shape_cast %342 : vector<1x1x16x26xbf16> to vector<16x26xbf16>
    %344 = vector.extract_strided_slice %343 {offsets = [0, 2], sizes = [16, 16], strides = [1, 1]} : vector<16x26xbf16> to vector<16x16xbf16>
    %c144_320 = arith.constant 144 : index
    %c64_321 = arith.constant 64 : index
    %345 = vector.load %arg9[%c144_320, %c64_321] : memref<432x128xbf16, #tpu.memory_space<vmem>>, vector<16x16xbf16>
    tpu.vector_store %arg9[%c144_320, %c64_321], %344 {strides = array<i32>} : memref<432x128xbf16, #tpu.memory_space<vmem>>, vector<16x16xbf16>,
    %346 = vector.extract_strided_slice %343 {offsets = [0, 5], sizes = [16, 16], strides = [1, 1]} : vector<16x26xbf16> to vector<16x16xbf16>
    %c160_322 = arith.constant 160 : index
    %c64_323 = arith.constant 64 : index
    %347 = vector.load %arg9[%c160_322, %c64_323] : memref<432x128xbf16, #tpu.memory_space<vmem>>, vector<16x16xbf16>
    tpu.vector_store %arg9[%c160_322, %c64_323], %346 {strides = array<i32>} : memref<432x128xbf16, #tpu.memory_space<vmem>>, vector<16x16xbf16>,
    %348 = vector.extract_strided_slice %343 {offsets = [0, 8], sizes = [16, 16], strides = [1, 1]} : vector<16x26xbf16> to vector<16x16xbf16>
    %c176_324 = arith.constant 176 : index
    %c64_325 = arith.constant 64 : index
    %349 = vector.load %arg9[%c176_324, %c64_325] : memref<432x128xbf16, #tpu.memory_space<vmem>>, vector<16x16xbf16>
    tpu.vector_store %arg9[%c176_324, %c64_325], %348 {strides = array<i32>} : memref<432x128xbf16, #tpu.memory_space<vmem>>, vector<16x16xbf16>,
    %c5_i32_326 = arith.constant 5 : i32
    %350 = arith.addi %1, %c5_i32_326 : i32
    %c5_i32_327 = arith.constant 5 : i32
    %351 = arith.addi %350, %c5_i32_327 : i32
    %c-3_i32_328 = arith.constant -3 : i32
    %352 = arith.addi %351, %c-3_i32_328 : i32
    %c0_329 = arith.constant 0 : index
    %353 = arith.index_cast %352 : i32 to index
    %c0_330 = arith.constant 0 : index
    %c0_331 = arith.constant 0 : index
    %354 = vector.load %arg2[%c0_329, %353, %c0_330, %c0_331] : memref<1x26x16x26xbf16, #tpu.memory_space<vmem>>, vector<1x1x16x26xbf16>
    %355 = vector.shape_cast %354 : vector<1x1x16x26xbf16> to vector<16x26xbf16>
    %356 = vector.extract_strided_slice %355 {offsets = [0, 2], sizes = [16, 16], strides = [1, 1]} : vector<16x26xbf16> to vector<16x16xbf16>
    %c144_332 = arith.constant 144 : index
    %c80_333 = arith.constant 80 : index
    %357 = vector.load %arg9[%c144_332, %c80_333] : memref<432x128xbf16, #tpu.memory_space<vmem>>, vector<16x16xbf16>
    tpu.vector_store %arg9[%c144_332, %c80_333], %356 {strides = array<i32>} : memref<432x128xbf16, #tpu.memory_space<vmem>>, vector<16x16xbf16>,
    %358 = vector.extract_strided_slice %355 {offsets = [0, 5], sizes = [16, 16], strides = [1, 1]} : vector<16x26xbf16> to vector<16x16xbf16>
    %c160_334 = arith.constant 160 : index
    %c80_335 = arith.constant 80 : index
    %359 = vector.load %arg9[%c160_334, %c80_335] : memref<432x128xbf16, #tpu.memory_space<vmem>>, vector<16x16xbf16>
    tpu.vector_store %arg9[%c160_334, %c80_335], %358 {strides = array<i32>} : memref<432x128xbf16, #tpu.memory_space<vmem>>, vector<16x16xbf16>,
    %360 = vector.extract_strided_slice %355 {offsets = [0, 8], sizes = [16, 16], strides = [1, 1]} : vector<16x26xbf16> to vector<16x16xbf16>
    %c176_336 = arith.constant 176 : index
    %c80_337 = arith.constant 80 : index
    %361 = vector.load %arg9[%c176_336, %c80_337] : memref<432x128xbf16, #tpu.memory_space<vmem>>, vector<16x16xbf16>
    tpu.vector_store %arg9[%c176_336, %c80_337], %360 {strides = array<i32>} : memref<432x128xbf16, #tpu.memory_space<vmem>>, vector<16x16xbf16>,
    %c6_i32_338 = arith.constant 6 : i32
    %362 = arith.addi %1, %c6_i32_338 : i32
    %c5_i32_339 = arith.constant 5 : i32
    %363 = arith.addi %362, %c5_i32_339 : i32
    %c-3_i32_340 = arith.constant -3 : i32
    %364 = arith.addi %363, %c-3_i32_340 : i32
    %c0_341 = arith.constant 0 : index
    %365 = arith.index_cast %364 : i32 to index
    %c0_342 = arith.constant 0 : index
    %c0_343 = arith.constant 0 : index
    %366 = vector.load %arg2[%c0_341, %365, %c0_342, %c0_343] : memref<1x26x16x26xbf16, #tpu.memory_space<vmem>>, vector<1x1x16x26xbf16>
    %367 = vector.shape_cast %366 : vector<1x1x16x26xbf16> to vector<16x26xbf16>
    %368 = vector.extract_strided_slice %367 {offsets = [0, 2], sizes = [16, 16], strides = [1, 1]} : vector<16x26xbf16> to vector<16x16xbf16>
    %c144_344 = arith.constant 144 : index
    %c96_345 = arith.constant 96 : index
    %369 = vector.load %arg9[%c144_344, %c96_345] : memref<432x128xbf16, #tpu.memory_space<vmem>>, vector<16x16xbf16>
    tpu.vector_store %arg9[%c144_344, %c96_345], %368 {strides = array<i32>} : memref<432x128xbf16, #tpu.memory_space<vmem>>, vector<16x16xbf16>,
    %370 = vector.extract_strided_slice %367 {offsets = [0, 5], sizes = [16, 16], strides = [1, 1]} : vector<16x26xbf16> to vector<16x16xbf16>
    %c160_346 = arith.constant 160 : index
    %c96_347 = arith.constant 96 : index
    %371 = vector.load %arg9[%c160_346, %c96_347] : memref<432x128xbf16, #tpu.memory_space<vmem>>, vector<16x16xbf16>
    tpu.vector_store %arg9[%c160_346, %c96_347], %370 {strides = array<i32>} : memref<432x128xbf16, #tpu.memory_space<vmem>>, vector<16x16xbf16>,
    %372 = vector.extract_strided_slice %367 {offsets = [0, 8], sizes = [16, 16], strides = [1, 1]} : vector<16x26xbf16> to vector<16x16xbf16>
    %c176_348 = arith.constant 176 : index
    %c96_349 = arith.constant 96 : index
    %373 = vector.load %arg9[%c176_348, %c96_349] : memref<432x128xbf16, #tpu.memory_space<vmem>>, vector<16x16xbf16>
    tpu.vector_store %arg9[%c176_348, %c96_349], %372 {strides = array<i32>} : memref<432x128xbf16, #tpu.memory_space<vmem>>, vector<16x16xbf16>,
    %c7_i32_350 = arith.constant 7 : i32
    %374 = arith.addi %1, %c7_i32_350 : i32
    %c5_i32_351 = arith.constant 5 : i32
    %375 = arith.addi %374, %c5_i32_351 : i32
    %c-3_i32_352 = arith.constant -3 : i32
    %376 = arith.addi %375, %c-3_i32_352 : i32
    %c0_353 = arith.constant 0 : index
    %377 = arith.index_cast %376 : i32 to index
    %c0_354 = arith.constant 0 : index
    %c0_355 = arith.constant 0 : index
    %378 = vector.load %arg2[%c0_353, %377, %c0_354, %c0_355] : memref<1x26x16x26xbf16, #tpu.memory_space<vmem>>, vector<1x1x16x26xbf16>
    %379 = vector.shape_cast %378 : vector<1x1x16x26xbf16> to vector<16x26xbf16>
    %380 = vector.extract_strided_slice %379 {offsets = [0, 2], sizes = [16, 16], strides = [1, 1]} : vector<16x26xbf16> to vector<16x16xbf16>
    %c144_356 = arith.constant 144 : index
    %c112_357 = arith.constant 112 : index
    %381 = vector.load %arg9[%c144_356, %c112_357] : memref<432x128xbf16, #tpu.memory_space<vmem>>, vector<16x16xbf16>
    tpu.vector_store %arg9[%c144_356, %c112_357], %380 {strides = array<i32>} : memref<432x128xbf16, #tpu.memory_space<vmem>>, vector<16x16xbf16>,
    %382 = vector.extract_strided_slice %379 {offsets = [0, 5], sizes = [16, 16], strides = [1, 1]} : vector<16x26xbf16> to vector<16x16xbf16>
    %c160_358 = arith.constant 160 : index
    %c112_359 = arith.constant 112 : index
    %383 = vector.load %arg9[%c160_358, %c112_359] : memref<432x128xbf16, #tpu.memory_space<vmem>>, vector<16x16xbf16>
    tpu.vector_store %arg9[%c160_358, %c112_359], %382 {strides = array<i32>} : memref<432x128xbf16, #tpu.memory_space<vmem>>, vector<16x16xbf16>,
    %384 = vector.extract_strided_slice %379 {offsets = [0, 8], sizes = [16, 16], strides = [1, 1]} : vector<16x26xbf16> to vector<16x16xbf16>
    %c176_360 = arith.constant 176 : index
    %c112_361 = arith.constant 112 : index
    %385 = vector.load %arg9[%c176_360, %c112_361] : memref<432x128xbf16, #tpu.memory_space<vmem>>, vector<16x16xbf16>
    tpu.vector_store %arg9[%c176_360, %c112_361], %384 {strides = array<i32>} : memref<432x128xbf16, #tpu.memory_space<vmem>>, vector<16x16xbf16>,
    %c0_i32_362 = arith.constant 0 : i32
    %386 = arith.addi %1, %c0_i32_362 : i32
    %c5_i32_363 = arith.constant 5 : i32
    %387 = arith.addi %386, %c5_i32_363 : i32
    %c0_i32_364 = arith.constant 0 : i32
    %388 = arith.addi %387, %c0_i32_364 : i32
    %c0_365 = arith.constant 0 : index
    %389 = arith.index_cast %388 : i32 to index
    %c0_366 = arith.constant 0 : index
    %c0_367 = arith.constant 0 : index
    %390 = vector.load %arg2[%c0_365, %389, %c0_366, %c0_367] : memref<1x26x16x26xbf16, #tpu.memory_space<vmem>>, vector<1x1x16x26xbf16>
    %391 = vector.shape_cast %390 : vector<1x1x16x26xbf16> to vector<16x26xbf16>
    %392 = vector.extract_strided_slice %391 {offsets = [0, 2], sizes = [16, 16], strides = [1, 1]} : vector<16x26xbf16> to vector<16x16xbf16>
    %c192 = arith.constant 192 : index
    %c0_368 = arith.constant 0 : index
    %393 = vector.load %arg9[%c192, %c0_368] : memref<432x128xbf16, #tpu.memory_space<vmem>>, vector<16x16xbf16>
    tpu.vector_store %arg9[%c192, %c0_368], %392 {strides = array<i32>} : memref<432x128xbf16, #tpu.memory_space<vmem>>, vector<16x16xbf16>,
    %394 = vector.extract_strided_slice %391 {offsets = [0, 5], sizes = [16, 16], strides = [1, 1]} : vector<16x26xbf16> to vector<16x16xbf16>
    %c208 = arith.constant 208 : index
    %c0_369 = arith.constant 0 : index
    %395 = vector.load %arg9[%c208, %c0_369] : memref<432x128xbf16, #tpu.memory_space<vmem>>, vector<16x16xbf16>
    tpu.vector_store %arg9[%c208, %c0_369], %394 {strides = array<i32>} : memref<432x128xbf16, #tpu.memory_space<vmem>>, vector<16x16xbf16>,
    %396 = vector.extract_strided_slice %391 {offsets = [0, 8], sizes = [16, 16], strides = [1, 1]} : vector<16x26xbf16> to vector<16x16xbf16>
    %c224 = arith.constant 224 : index
    %c0_370 = arith.constant 0 : index
    %397 = vector.load %arg9[%c224, %c0_370] : memref<432x128xbf16, #tpu.memory_space<vmem>>, vector<16x16xbf16>
    tpu.vector_store %arg9[%c224, %c0_370], %396 {strides = array<i32>} : memref<432x128xbf16, #tpu.memory_space<vmem>>, vector<16x16xbf16>,
    %c1_i32_371 = arith.constant 1 : i32
    %398 = arith.addi %1, %c1_i32_371 : i32
    %c5_i32_372 = arith.constant 5 : i32
    %399 = arith.addi %398, %c5_i32_372 : i32
    %c0_i32_373 = arith.constant 0 : i32
    %400 = arith.addi %399, %c0_i32_373 : i32
    %c0_374 = arith.constant 0 : index
    %401 = arith.index_cast %400 : i32 to index
    %c0_375 = arith.constant 0 : index
    %c0_376 = arith.constant 0 : index
    %402 = vector.load %arg2[%c0_374, %401, %c0_375, %c0_376] : memref<1x26x16x26xbf16, #tpu.memory_space<vmem>>, vector<1x1x16x26xbf16>
    %403 = vector.shape_cast %402 : vector<1x1x16x26xbf16> to vector<16x26xbf16>
    %404 = vector.extract_strided_slice %403 {offsets = [0, 2], sizes = [16, 16], strides = [1, 1]} : vector<16x26xbf16> to vector<16x16xbf16>
    %c192_377 = arith.constant 192 : index
    %c16_378 = arith.constant 16 : index
    %405 = vector.load %arg9[%c192_377, %c16_378] : memref<432x128xbf16, #tpu.memory_space<vmem>>, vector<16x16xbf16>
    tpu.vector_store %arg9[%c192_377, %c16_378], %404 {strides = array<i32>} : memref<432x128xbf16, #tpu.memory_space<vmem>>, vector<16x16xbf16>,
    %406 = vector.extract_strided_slice %403 {offsets = [0, 5], sizes = [16, 16], strides = [1, 1]} : vector<16x26xbf16> to vector<16x16xbf16>
    %c208_379 = arith.constant 208 : index
    %c16_380 = arith.constant 16 : index
    %407 = vector.load %arg9[%c208_379, %c16_380] : memref<432x128xbf16, #tpu.memory_space<vmem>>, vector<16x16xbf16>
    tpu.vector_store %arg9[%c208_379, %c16_380], %406 {strides = array<i32>} : memref<432x128xbf16, #tpu.memory_space<vmem>>, vector<16x16xbf16>,
    %408 = vector.extract_strided_slice %403 {offsets = [0, 8], sizes = [16, 16], strides = [1, 1]} : vector<16x26xbf16> to vector<16x16xbf16>
    %c224_381 = arith.constant 224 : index
    %c16_382 = arith.constant 16 : index
    %409 = vector.load %arg9[%c224_381, %c16_382] : memref<432x128xbf16, #tpu.memory_space<vmem>>, vector<16x16xbf16>
    tpu.vector_store %arg9[%c224_381, %c16_382], %408 {strides = array<i32>} : memref<432x128xbf16, #tpu.memory_space<vmem>>, vector<16x16xbf16>,
    %c2_i32_383 = arith.constant 2 : i32
    %410 = arith.addi %1, %c2_i32_383 : i32
    %c5_i32_384 = arith.constant 5 : i32
    %411 = arith.addi %410, %c5_i32_384 : i32
    %c0_i32_385 = arith.constant 0 : i32
    %412 = arith.addi %411, %c0_i32_385 : i32
    %c0_386 = arith.constant 0 : index
    %413 = arith.index_cast %412 : i32 to index
    %c0_387 = arith.constant 0 : index
    %c0_388 = arith.constant 0 : index
    %414 = vector.load %arg2[%c0_386, %413, %c0_387, %c0_388] : memref<1x26x16x26xbf16, #tpu.memory_space<vmem>>, vector<1x1x16x26xbf16>
    %415 = vector.shape_cast %414 : vector<1x1x16x26xbf16> to vector<16x26xbf16>
    %416 = vector.extract_strided_slice %415 {offsets = [0, 2], sizes = [16, 16], strides = [1, 1]} : vector<16x26xbf16> to vector<16x16xbf16>
    %c192_389 = arith.constant 192 : index
    %c32_390 = arith.constant 32 : index
    %417 = vector.load %arg9[%c192_389, %c32_390] : memref<432x128xbf16, #tpu.memory_space<vmem>>, vector<16x16xbf16>
    tpu.vector_store %arg9[%c192_389, %c32_390], %416 {strides = array<i32>} : memref<432x128xbf16, #tpu.memory_space<vmem>>, vector<16x16xbf16>,
    %418 = vector.extract_strided_slice %415 {offsets = [0, 5], sizes = [16, 16], strides = [1, 1]} : vector<16x26xbf16> to vector<16x16xbf16>
    %c208_391 = arith.constant 208 : index
    %c32_392 = arith.constant 32 : index
    %419 = vector.load %arg9[%c208_391, %c32_392] : memref<432x128xbf16, #tpu.memory_space<vmem>>, vector<16x16xbf16>
    tpu.vector_store %arg9[%c208_391, %c32_392], %418 {strides = array<i32>} : memref<432x128xbf16, #tpu.memory_space<vmem>>, vector<16x16xbf16>,
    %420 = vector.extract_strided_slice %415 {offsets = [0, 8], sizes = [16, 16], strides = [1, 1]} : vector<16x26xbf16> to vector<16x16xbf16>
    %c224_393 = arith.constant 224 : index
    %c32_394 = arith.constant 32 : index
    %421 = vector.load %arg9[%c224_393, %c32_394] : memref<432x128xbf16, #tpu.memory_space<vmem>>, vector<16x16xbf16>
    tpu.vector_store %arg9[%c224_393, %c32_394], %420 {strides = array<i32>} : memref<432x128xbf16, #tpu.memory_space<vmem>>, vector<16x16xbf16>,
    %c3_i32_395 = arith.constant 3 : i32
    %422 = arith.addi %1, %c3_i32_395 : i32
    %c5_i32_396 = arith.constant 5 : i32
    %423 = arith.addi %422, %c5_i32_396 : i32
    %c0_i32_397 = arith.constant 0 : i32
    %424 = arith.addi %423, %c0_i32_397 : i32
    %c0_398 = arith.constant 0 : index
    %425 = arith.index_cast %424 : i32 to index
    %c0_399 = arith.constant 0 : index
    %c0_400 = arith.constant 0 : index
    %426 = vector.load %arg2[%c0_398, %425, %c0_399, %c0_400] : memref<1x26x16x26xbf16, #tpu.memory_space<vmem>>, vector<1x1x16x26xbf16>
    %427 = vector.shape_cast %426 : vector<1x1x16x26xbf16> to vector<16x26xbf16>
    %428 = vector.extract_strided_slice %427 {offsets = [0, 2], sizes = [16, 16], strides = [1, 1]} : vector<16x26xbf16> to vector<16x16xbf16>
    %c192_401 = arith.constant 192 : index
    %c48_402 = arith.constant 48 : index
    %429 = vector.load %arg9[%c192_401, %c48_402] : memref<432x128xbf16, #tpu.memory_space<vmem>>, vector<16x16xbf16>
    tpu.vector_store %arg9[%c192_401, %c48_402], %428 {strides = array<i32>} : memref<432x128xbf16, #tpu.memory_space<vmem>>, vector<16x16xbf16>,
    %430 = vector.extract_strided_slice %427 {offsets = [0, 5], sizes = [16, 16], strides = [1, 1]} : vector<16x26xbf16> to vector<16x16xbf16>
    %c208_403 = arith.constant 208 : index
    %c48_404 = arith.constant 48 : index
    %431 = vector.load %arg9[%c208_403, %c48_404] : memref<432x128xbf16, #tpu.memory_space<vmem>>, vector<16x16xbf16>
    tpu.vector_store %arg9[%c208_403, %c48_404], %430 {strides = array<i32>} : memref<432x128xbf16, #tpu.memory_space<vmem>>, vector<16x16xbf16>,
    %432 = vector.extract_strided_slice %427 {offsets = [0, 8], sizes = [16, 16], strides = [1, 1]} : vector<16x26xbf16> to vector<16x16xbf16>
    %c224_405 = arith.constant 224 : index
    %c48_406 = arith.constant 48 : index
    %433 = vector.load %arg9[%c224_405, %c48_406] : memref<432x128xbf16, #tpu.memory_space<vmem>>, vector<16x16xbf16>
    tpu.vector_store %arg9[%c224_405, %c48_406], %432 {strides = array<i32>} : memref<432x128xbf16, #tpu.memory_space<vmem>>, vector<16x16xbf16>,
    %c4_i32_407 = arith.constant 4 : i32
    %434 = arith.addi %1, %c4_i32_407 : i32
    %c5_i32_408 = arith.constant 5 : i32
    %435 = arith.addi %434, %c5_i32_408 : i32
    %c0_i32_409 = arith.constant 0 : i32
    %436 = arith.addi %435, %c0_i32_409 : i32
    %c0_410 = arith.constant 0 : index
    %437 = arith.index_cast %436 : i32 to index
    %c0_411 = arith.constant 0 : index
    %c0_412 = arith.constant 0 : index
    %438 = vector.load %arg2[%c0_410, %437, %c0_411, %c0_412] : memref<1x26x16x26xbf16, #tpu.memory_space<vmem>>, vector<1x1x16x26xbf16>
    %439 = vector.shape_cast %438 : vector<1x1x16x26xbf16> to vector<16x26xbf16>
    %440 = vector.extract_strided_slice %439 {offsets = [0, 2], sizes = [16, 16], strides = [1, 1]} : vector<16x26xbf16> to vector<16x16xbf16>
    %c192_413 = arith.constant 192 : index
    %c64_414 = arith.constant 64 : index
    %441 = vector.load %arg9[%c192_413, %c64_414] : memref<432x128xbf16, #tpu.memory_space<vmem>>, vector<16x16xbf16>
    tpu.vector_store %arg9[%c192_413, %c64_414], %440 {strides = array<i32>} : memref<432x128xbf16, #tpu.memory_space<vmem>>, vector<16x16xbf16>,
    %442 = vector.extract_strided_slice %439 {offsets = [0, 5], sizes = [16, 16], strides = [1, 1]} : vector<16x26xbf16> to vector<16x16xbf16>
    %c208_415 = arith.constant 208 : index
    %c64_416 = arith.constant 64 : index
    %443 = vector.load %arg9[%c208_415, %c64_416] : memref<432x128xbf16, #tpu.memory_space<vmem>>, vector<16x16xbf16>
    tpu.vector_store %arg9[%c208_415, %c64_416], %442 {strides = array<i32>} : memref<432x128xbf16, #tpu.memory_space<vmem>>, vector<16x16xbf16>,
    %444 = vector.extract_strided_slice %439 {offsets = [0, 8], sizes = [16, 16], strides = [1, 1]} : vector<16x26xbf16> to vector<16x16xbf16>
    %c224_417 = arith.constant 224 : index
    %c64_418 = arith.constant 64 : index
    %445 = vector.load %arg9[%c224_417, %c64_418] : memref<432x128xbf16, #tpu.memory_space<vmem>>, vector<16x16xbf16>
    tpu.vector_store %arg9[%c224_417, %c64_418], %444 {strides = array<i32>} : memref<432x128xbf16, #tpu.memory_space<vmem>>, vector<16x16xbf16>,
    %c5_i32_419 = arith.constant 5 : i32
    %446 = arith.addi %1, %c5_i32_419 : i32
    %c5_i32_420 = arith.constant 5 : i32
    %447 = arith.addi %446, %c5_i32_420 : i32
    %c0_i32_421 = arith.constant 0 : i32
    %448 = arith.addi %447, %c0_i32_421 : i32
    %c0_422 = arith.constant 0 : index
    %449 = arith.index_cast %448 : i32 to index
    %c0_423 = arith.constant 0 : index
    %c0_424 = arith.constant 0 : index
    %450 = vector.load %arg2[%c0_422, %449, %c0_423, %c0_424] : memref<1x26x16x26xbf16, #tpu.memory_space<vmem>>, vector<1x1x16x26xbf16>
    %451 = vector.shape_cast %450 : vector<1x1x16x26xbf16> to vector<16x26xbf16>
    %452 = vector.extract_strided_slice %451 {offsets = [0, 2], sizes = [16, 16], strides = [1, 1]} : vector<16x26xbf16> to vector<16x16xbf16>
    %c192_425 = arith.constant 192 : index
    %c80_426 = arith.constant 80 : index
    %453 = vector.load %arg9[%c192_425, %c80_426] : memref<432x128xbf16, #tpu.memory_space<vmem>>, vector<16x16xbf16>
    tpu.vector_store %arg9[%c192_425, %c80_426], %452 {strides = array<i32>} : memref<432x128xbf16, #tpu.memory_space<vmem>>, vector<16x16xbf16>,
    %454 = vector.extract_strided_slice %451 {offsets = [0, 5], sizes = [16, 16], strides = [1, 1]} : vector<16x26xbf16> to vector<16x16xbf16>
    %c208_427 = arith.constant 208 : index
    %c80_428 = arith.constant 80 : index
    %455 = vector.load %arg9[%c208_427, %c80_428] : memref<432x128xbf16, #tpu.memory_space<vmem>>, vector<16x16xbf16>
    tpu.vector_store %arg9[%c208_427, %c80_428], %454 {strides = array<i32>} : memref<432x128xbf16, #tpu.memory_space<vmem>>, vector<16x16xbf16>,
    %456 = vector.extract_strided_slice %451 {offsets = [0, 8], sizes = [16, 16], strides = [1, 1]} : vector<16x26xbf16> to vector<16x16xbf16>
    %c224_429 = arith.constant 224 : index
    %c80_430 = arith.constant 80 : index
    %457 = vector.load %arg9[%c224_429, %c80_430] : memref<432x128xbf16, #tpu.memory_space<vmem>>, vector<16x16xbf16>
    tpu.vector_store %arg9[%c224_429, %c80_430], %456 {strides = array<i32>} : memref<432x128xbf16, #tpu.memory_space<vmem>>, vector<16x16xbf16>,
    %c6_i32_431 = arith.constant 6 : i32
    %458 = arith.addi %1, %c6_i32_431 : i32
    %c5_i32_432 = arith.constant 5 : i32
    %459 = arith.addi %458, %c5_i32_432 : i32
    %c0_i32_433 = arith.constant 0 : i32
    %460 = arith.addi %459, %c0_i32_433 : i32
    %c0_434 = arith.constant 0 : index
    %461 = arith.index_cast %460 : i32 to index
    %c0_435 = arith.constant 0 : index
    %c0_436 = arith.constant 0 : index
    %462 = vector.load %arg2[%c0_434, %461, %c0_435, %c0_436] : memref<1x26x16x26xbf16, #tpu.memory_space<vmem>>, vector<1x1x16x26xbf16>
    %463 = vector.shape_cast %462 : vector<1x1x16x26xbf16> to vector<16x26xbf16>
    %464 = vector.extract_strided_slice %463 {offsets = [0, 2], sizes = [16, 16], strides = [1, 1]} : vector<16x26xbf16> to vector<16x16xbf16>
    %c192_437 = arith.constant 192 : index
    %c96_438 = arith.constant 96 : index
    %465 = vector.load %arg9[%c192_437, %c96_438] : memref<432x128xbf16, #tpu.memory_space<vmem>>, vector<16x16xbf16>
    tpu.vector_store %arg9[%c192_437, %c96_438], %464 {strides = array<i32>} : memref<432x128xbf16, #tpu.memory_space<vmem>>, vector<16x16xbf16>,
    %466 = vector.extract_strided_slice %463 {offsets = [0, 5], sizes = [16, 16], strides = [1, 1]} : vector<16x26xbf16> to vector<16x16xbf16>
    %c208_439 = arith.constant 208 : index
    %c96_440 = arith.constant 96 : index
    %467 = vector.load %arg9[%c208_439, %c96_440] : memref<432x128xbf16, #tpu.memory_space<vmem>>, vector<16x16xbf16>
    tpu.vector_store %arg9[%c208_439, %c96_440], %466 {strides = array<i32>} : memref<432x128xbf16, #tpu.memory_space<vmem>>, vector<16x16xbf16>,
    %468 = vector.extract_strided_slice %463 {offsets = [0, 8], sizes = [16, 16], strides = [1, 1]} : vector<16x26xbf16> to vector<16x16xbf16>
    %c224_441 = arith.constant 224 : index
    %c96_442 = arith.constant 96 : index
    %469 = vector.load %arg9[%c224_441, %c96_442] : memref<432x128xbf16, #tpu.memory_space<vmem>>, vector<16x16xbf16>
    tpu.vector_store %arg9[%c224_441, %c96_442], %468 {strides = array<i32>} : memref<432x128xbf16, #tpu.memory_space<vmem>>, vector<16x16xbf16>,
    %c7_i32_443 = arith.constant 7 : i32
    %470 = arith.addi %1, %c7_i32_443 : i32
    %c5_i32_444 = arith.constant 5 : i32
    %471 = arith.addi %470, %c5_i32_444 : i32
    %c0_i32_445 = arith.constant 0 : i32
    %472 = arith.addi %471, %c0_i32_445 : i32
    %c0_446 = arith.constant 0 : index
    %473 = arith.index_cast %472 : i32 to index
    %c0_447 = arith.constant 0 : index
    %c0_448 = arith.constant 0 : index
    %474 = vector.load %arg2[%c0_446, %473, %c0_447, %c0_448] : memref<1x26x16x26xbf16, #tpu.memory_space<vmem>>, vector<1x1x16x26xbf16>
    %475 = vector.shape_cast %474 : vector<1x1x16x26xbf16> to vector<16x26xbf16>
    %476 = vector.extract_strided_slice %475 {offsets = [0, 2], sizes = [16, 16], strides = [1, 1]} : vector<16x26xbf16> to vector<16x16xbf16>
    %c192_449 = arith.constant 192 : index
    %c112_450 = arith.constant 112 : index
    %477 = vector.load %arg9[%c192_449, %c112_450] : memref<432x128xbf16, #tpu.memory_space<vmem>>, vector<16x16xbf16>
    tpu.vector_store %arg9[%c192_449, %c112_450], %476 {strides = array<i32>} : memref<432x128xbf16, #tpu.memory_space<vmem>>, vector<16x16xbf16>,
    %478 = vector.extract_strided_slice %475 {offsets = [0, 5], sizes = [16, 16], strides = [1, 1]} : vector<16x26xbf16> to vector<16x16xbf16>
    %c208_451 = arith.constant 208 : index
    %c112_452 = arith.constant 112 : index
    %479 = vector.load %arg9[%c208_451, %c112_452] : memref<432x128xbf16, #tpu.memory_space<vmem>>, vector<16x16xbf16>
    tpu.vector_store %arg9[%c208_451, %c112_452], %478 {strides = array<i32>} : memref<432x128xbf16, #tpu.memory_space<vmem>>, vector<16x16xbf16>,
    %480 = vector.extract_strided_slice %475 {offsets = [0, 8], sizes = [16, 16], strides = [1, 1]} : vector<16x26xbf16> to vector<16x16xbf16>
    %c224_453 = arith.constant 224 : index
    %c112_454 = arith.constant 112 : index
    %481 = vector.load %arg9[%c224_453, %c112_454] : memref<432x128xbf16, #tpu.memory_space<vmem>>, vector<16x16xbf16>
    tpu.vector_store %arg9[%c224_453, %c112_454], %480 {strides = array<i32>} : memref<432x128xbf16, #tpu.memory_space<vmem>>, vector<16x16xbf16>,
    %c0_i32_455 = arith.constant 0 : i32
    %482 = arith.addi %1, %c0_i32_455 : i32
    %c5_i32_456 = arith.constant 5 : i32
    %483 = arith.addi %482, %c5_i32_456 : i32
    %c3_i32_457 = arith.constant 3 : i32
    %484 = arith.addi %483, %c3_i32_457 : i32
    %c0_458 = arith.constant 0 : index
    %485 = arith.index_cast %484 : i32 to index
    %c0_459 = arith.constant 0 : index
    %c0_460 = arith.constant 0 : index
    %486 = vector.load %arg2[%c0_458, %485, %c0_459, %c0_460] : memref<1x26x16x26xbf16, #tpu.memory_space<vmem>>, vector<1x1x16x26xbf16>
    %487 = vector.shape_cast %486 : vector<1x1x16x26xbf16> to vector<16x26xbf16>
    %488 = vector.extract_strided_slice %487 {offsets = [0, 2], sizes = [16, 16], strides = [1, 1]} : vector<16x26xbf16> to vector<16x16xbf16>
    %c240 = arith.constant 240 : index
    %c0_461 = arith.constant 0 : index
    %489 = vector.load %arg9[%c240, %c0_461] : memref<432x128xbf16, #tpu.memory_space<vmem>>, vector<16x16xbf16>
    tpu.vector_store %arg9[%c240, %c0_461], %488 {strides = array<i32>} : memref<432x128xbf16, #tpu.memory_space<vmem>>, vector<16x16xbf16>,
    %490 = vector.extract_strided_slice %487 {offsets = [0, 5], sizes = [16, 16], strides = [1, 1]} : vector<16x26xbf16> to vector<16x16xbf16>
    %c256 = arith.constant 256 : index
    %c0_462 = arith.constant 0 : index
    %491 = vector.load %arg9[%c256, %c0_462] : memref<432x128xbf16, #tpu.memory_space<vmem>>, vector<16x16xbf16>
    tpu.vector_store %arg9[%c256, %c0_462], %490 {strides = array<i32>} : memref<432x128xbf16, #tpu.memory_space<vmem>>, vector<16x16xbf16>,
    %492 = vector.extract_strided_slice %487 {offsets = [0, 8], sizes = [16, 16], strides = [1, 1]} : vector<16x26xbf16> to vector<16x16xbf16>
    %c272 = arith.constant 272 : index
    %c0_463 = arith.constant 0 : index
    %493 = vector.load %arg9[%c272, %c0_463] : memref<432x128xbf16, #tpu.memory_space<vmem>>, vector<16x16xbf16>
    tpu.vector_store %arg9[%c272, %c0_463], %492 {strides = array<i32>} : memref<432x128xbf16, #tpu.memory_space<vmem>>, vector<16x16xbf16>,
    %c1_i32_464 = arith.constant 1 : i32
    %494 = arith.addi %1, %c1_i32_464 : i32
    %c5_i32_465 = arith.constant 5 : i32
    %495 = arith.addi %494, %c5_i32_465 : i32
    %c3_i32_466 = arith.constant 3 : i32
    %496 = arith.addi %495, %c3_i32_466 : i32
    %c0_467 = arith.constant 0 : index
    %497 = arith.index_cast %496 : i32 to index
    %c0_468 = arith.constant 0 : index
    %c0_469 = arith.constant 0 : index
    %498 = vector.load %arg2[%c0_467, %497, %c0_468, %c0_469] : memref<1x26x16x26xbf16, #tpu.memory_space<vmem>>, vector<1x1x16x26xbf16>
    %499 = vector.shape_cast %498 : vector<1x1x16x26xbf16> to vector<16x26xbf16>
    %500 = vector.extract_strided_slice %499 {offsets = [0, 2], sizes = [16, 16], strides = [1, 1]} : vector<16x26xbf16> to vector<16x16xbf16>
    %c240_470 = arith.constant 240 : index
    %c16_471 = arith.constant 16 : index
    %501 = vector.load %arg9[%c240_470, %c16_471] : memref<432x128xbf16, #tpu.memory_space<vmem>>, vector<16x16xbf16>
    tpu.vector_store %arg9[%c240_470, %c16_471], %500 {strides = array<i32>} : memref<432x128xbf16, #tpu.memory_space<vmem>>, vector<16x16xbf16>,
    %502 = vector.extract_strided_slice %499 {offsets = [0, 5], sizes = [16, 16], strides = [1, 1]} : vector<16x26xbf16> to vector<16x16xbf16>
    %c256_472 = arith.constant 256 : index
    %c16_473 = arith.constant 16 : index
    %503 = vector.load %arg9[%c256_472, %c16_473] : memref<432x128xbf16, #tpu.memory_space<vmem>>, vector<16x16xbf16>
    tpu.vector_store %arg9[%c256_472, %c16_473], %502 {strides = array<i32>} : memref<432x128xbf16, #tpu.memory_space<vmem>>, vector<16x16xbf16>,
    %504 = vector.extract_strided_slice %499 {offsets = [0, 8], sizes = [16, 16], strides = [1, 1]} : vector<16x26xbf16> to vector<16x16xbf16>
    %c272_474 = arith.constant 272 : index
    %c16_475 = arith.constant 16 : index
    %505 = vector.load %arg9[%c272_474, %c16_475] : memref<432x128xbf16, #tpu.memory_space<vmem>>, vector<16x16xbf16>
    tpu.vector_store %arg9[%c272_474, %c16_475], %504 {strides = array<i32>} : memref<432x128xbf16, #tpu.memory_space<vmem>>, vector<16x16xbf16>,
    %c2_i32_476 = arith.constant 2 : i32
    %506 = arith.addi %1, %c2_i32_476 : i32
    %c5_i32_477 = arith.constant 5 : i32
    %507 = arith.addi %506, %c5_i32_477 : i32
    %c3_i32_478 = arith.constant 3 : i32
    %508 = arith.addi %507, %c3_i32_478 : i32
    %c0_479 = arith.constant 0 : index
    %509 = arith.index_cast %508 : i32 to index
    %c0_480 = arith.constant 0 : index
    %c0_481 = arith.constant 0 : index
    %510 = vector.load %arg2[%c0_479, %509, %c0_480, %c0_481] : memref<1x26x16x26xbf16, #tpu.memory_space<vmem>>, vector<1x1x16x26xbf16>
    %511 = vector.shape_cast %510 : vector<1x1x16x26xbf16> to vector<16x26xbf16>
    %512 = vector.extract_strided_slice %511 {offsets = [0, 2], sizes = [16, 16], strides = [1, 1]} : vector<16x26xbf16> to vector<16x16xbf16>
    %c240_482 = arith.constant 240 : index
    %c32_483 = arith.constant 32 : index
    %513 = vector.load %arg9[%c240_482, %c32_483] : memref<432x128xbf16, #tpu.memory_space<vmem>>, vector<16x16xbf16>
    tpu.vector_store %arg9[%c240_482, %c32_483], %512 {strides = array<i32>} : memref<432x128xbf16, #tpu.memory_space<vmem>>, vector<16x16xbf16>,
    %514 = vector.extract_strided_slice %511 {offsets = [0, 5], sizes = [16, 16], strides = [1, 1]} : vector<16x26xbf16> to vector<16x16xbf16>
    %c256_484 = arith.constant 256 : index
    %c32_485 = arith.constant 32 : index
    %515 = vector.load %arg9[%c256_484, %c32_485] : memref<432x128xbf16, #tpu.memory_space<vmem>>, vector<16x16xbf16>
    tpu.vector_store %arg9[%c256_484, %c32_485], %514 {strides = array<i32>} : memref<432x128xbf16, #tpu.memory_space<vmem>>, vector<16x16xbf16>,
    %516 = vector.extract_strided_slice %511 {offsets = [0, 8], sizes = [16, 16], strides = [1, 1]} : vector<16x26xbf16> to vector<16x16xbf16>
    %c272_486 = arith.constant 272 : index
    %c32_487 = arith.constant 32 : index
    %517 = vector.load %arg9[%c272_486, %c32_487] : memref<432x128xbf16, #tpu.memory_space<vmem>>, vector<16x16xbf16>
    tpu.vector_store %arg9[%c272_486, %c32_487], %516 {strides = array<i32>} : memref<432x128xbf16, #tpu.memory_space<vmem>>, vector<16x16xbf16>,
    %c3_i32_488 = arith.constant 3 : i32
    %518 = arith.addi %1, %c3_i32_488 : i32
    %c5_i32_489 = arith.constant 5 : i32
    %519 = arith.addi %518, %c5_i32_489 : i32
    %c3_i32_490 = arith.constant 3 : i32
    %520 = arith.addi %519, %c3_i32_490 : i32
    %c0_491 = arith.constant 0 : index
    %521 = arith.index_cast %520 : i32 to index
    %c0_492 = arith.constant 0 : index
    %c0_493 = arith.constant 0 : index
    %522 = vector.load %arg2[%c0_491, %521, %c0_492, %c0_493] : memref<1x26x16x26xbf16, #tpu.memory_space<vmem>>, vector<1x1x16x26xbf16>
    %523 = vector.shape_cast %522 : vector<1x1x16x26xbf16> to vector<16x26xbf16>
    %524 = vector.extract_strided_slice %523 {offsets = [0, 2], sizes = [16, 16], strides = [1, 1]} : vector<16x26xbf16> to vector<16x16xbf16>
    %c240_494 = arith.constant 240 : index
    %c48_495 = arith.constant 48 : index
    %525 = vector.load %arg9[%c240_494, %c48_495] : memref<432x128xbf16, #tpu.memory_space<vmem>>, vector<16x16xbf16>
    tpu.vector_store %arg9[%c240_494, %c48_495], %524 {strides = array<i32>} : memref<432x128xbf16, #tpu.memory_space<vmem>>, vector<16x16xbf16>,
    %526 = vector.extract_strided_slice %523 {offsets = [0, 5], sizes = [16, 16], strides = [1, 1]} : vector<16x26xbf16> to vector<16x16xbf16>
    %c256_496 = arith.constant 256 : index
    %c48_497 = arith.constant 48 : index
    %527 = vector.load %arg9[%c256_496, %c48_497] : memref<432x128xbf16, #tpu.memory_space<vmem>>, vector<16x16xbf16>
    tpu.vector_store %arg9[%c256_496, %c48_497], %526 {strides = array<i32>} : memref<432x128xbf16, #tpu.memory_space<vmem>>, vector<16x16xbf16>,
    %528 = vector.extract_strided_slice %523 {offsets = [0, 8], sizes = [16, 16], strides = [1, 1]} : vector<16x26xbf16> to vector<16x16xbf16>
    %c272_498 = arith.constant 272 : index
    %c48_499 = arith.constant 48 : index
    %529 = vector.load %arg9[%c272_498, %c48_499] : memref<432x128xbf16, #tpu.memory_space<vmem>>, vector<16x16xbf16>
    tpu.vector_store %arg9[%c272_498, %c48_499], %528 {strides = array<i32>} : memref<432x128xbf16, #tpu.memory_space<vmem>>, vector<16x16xbf16>,
    %c4_i32_500 = arith.constant 4 : i32
    %530 = arith.addi %1, %c4_i32_500 : i32
    %c5_i32_501 = arith.constant 5 : i32
    %531 = arith.addi %530, %c5_i32_501 : i32
    %c3_i32_502 = arith.constant 3 : i32
    %532 = arith.addi %531, %c3_i32_502 : i32
    %c0_503 = arith.constant 0 : index
    %533 = arith.index_cast %532 : i32 to index
    %c0_504 = arith.constant 0 : index
    %c0_505 = arith.constant 0 : index
    %534 = vector.load %arg2[%c0_503, %533, %c0_504, %c0_505] : memref<1x26x16x26xbf16, #tpu.memory_space<vmem>>, vector<1x1x16x26xbf16>
    %535 = vector.shape_cast %534 : vector<1x1x16x26xbf16> to vector<16x26xbf16>
    %536 = vector.extract_strided_slice %535 {offsets = [0, 2], sizes = [16, 16], strides = [1, 1]} : vector<16x26xbf16> to vector<16x16xbf16>
    %c240_506 = arith.constant 240 : index
    %c64_507 = arith.constant 64 : index
    %537 = vector.load %arg9[%c240_506, %c64_507] : memref<432x128xbf16, #tpu.memory_space<vmem>>, vector<16x16xbf16>
    tpu.vector_store %arg9[%c240_506, %c64_507], %536 {strides = array<i32>} : memref<432x128xbf16, #tpu.memory_space<vmem>>, vector<16x16xbf16>,
    %538 = vector.extract_strided_slice %535 {offsets = [0, 5], sizes = [16, 16], strides = [1, 1]} : vector<16x26xbf16> to vector<16x16xbf16>
    %c256_508 = arith.constant 256 : index
    %c64_509 = arith.constant 64 : index
    %539 = vector.load %arg9[%c256_508, %c64_509] : memref<432x128xbf16, #tpu.memory_space<vmem>>, vector<16x16xbf16>
    tpu.vector_store %arg9[%c256_508, %c64_509], %538 {strides = array<i32>} : memref<432x128xbf16, #tpu.memory_space<vmem>>, vector<16x16xbf16>,
    %540 = vector.extract_strided_slice %535 {offsets = [0, 8], sizes = [16, 16], strides = [1, 1]} : vector<16x26xbf16> to vector<16x16xbf16>
    %c272_510 = arith.constant 272 : index
    %c64_511 = arith.constant 64 : index
    %541 = vector.load %arg9[%c272_510, %c64_511] : memref<432x128xbf16, #tpu.memory_space<vmem>>, vector<16x16xbf16>
    tpu.vector_store %arg9[%c272_510, %c64_511], %540 {strides = array<i32>} : memref<432x128xbf16, #tpu.memory_space<vmem>>, vector<16x16xbf16>,
    %c5_i32_512 = arith.constant 5 : i32
    %542 = arith.addi %1, %c5_i32_512 : i32
    %c5_i32_513 = arith.constant 5 : i32
    %543 = arith.addi %542, %c5_i32_513 : i32
    %c3_i32_514 = arith.constant 3 : i32
    %544 = arith.addi %543, %c3_i32_514 : i32
    %c0_515 = arith.constant 0 : index
    %545 = arith.index_cast %544 : i32 to index
    %c0_516 = arith.constant 0 : index
    %c0_517 = arith.constant 0 : index
    %546 = vector.load %arg2[%c0_515, %545, %c0_516, %c0_517] : memref<1x26x16x26xbf16, #tpu.memory_space<vmem>>, vector<1x1x16x26xbf16>
    %547 = vector.shape_cast %546 : vector<1x1x16x26xbf16> to vector<16x26xbf16>
    %548 = vector.extract_strided_slice %547 {offsets = [0, 2], sizes = [16, 16], strides = [1, 1]} : vector<16x26xbf16> to vector<16x16xbf16>
    %c240_518 = arith.constant 240 : index
    %c80_519 = arith.constant 80 : index
    %549 = vector.load %arg9[%c240_518, %c80_519] : memref<432x128xbf16, #tpu.memory_space<vmem>>, vector<16x16xbf16>
    tpu.vector_store %arg9[%c240_518, %c80_519], %548 {strides = array<i32>} : memref<432x128xbf16, #tpu.memory_space<vmem>>, vector<16x16xbf16>,
    %550 = vector.extract_strided_slice %547 {offsets = [0, 5], sizes = [16, 16], strides = [1, 1]} : vector<16x26xbf16> to vector<16x16xbf16>
    %c256_520 = arith.constant 256 : index
    %c80_521 = arith.constant 80 : index
    %551 = vector.load %arg9[%c256_520, %c80_521] : memref<432x128xbf16, #tpu.memory_space<vmem>>, vector<16x16xbf16>
    tpu.vector_store %arg9[%c256_520, %c80_521], %550 {strides = array<i32>} : memref<432x128xbf16, #tpu.memory_space<vmem>>, vector<16x16xbf16>,
    %552 = vector.extract_strided_slice %547 {offsets = [0, 8], sizes = [16, 16], strides = [1, 1]} : vector<16x26xbf16> to vector<16x16xbf16>
    %c272_522 = arith.constant 272 : index
    %c80_523 = arith.constant 80 : index
    %553 = vector.load %arg9[%c272_522, %c80_523] : memref<432x128xbf16, #tpu.memory_space<vmem>>, vector<16x16xbf16>
    tpu.vector_store %arg9[%c272_522, %c80_523], %552 {strides = array<i32>} : memref<432x128xbf16, #tpu.memory_space<vmem>>, vector<16x16xbf16>,
    %c6_i32_524 = arith.constant 6 : i32
    %554 = arith.addi %1, %c6_i32_524 : i32
    %c5_i32_525 = arith.constant 5 : i32
    %555 = arith.addi %554, %c5_i32_525 : i32
    %c3_i32_526 = arith.constant 3 : i32
    %556 = arith.addi %555, %c3_i32_526 : i32
    %c0_527 = arith.constant 0 : index
    %557 = arith.index_cast %556 : i32 to index
    %c0_528 = arith.constant 0 : index
    %c0_529 = arith.constant 0 : index
    %558 = vector.load %arg2[%c0_527, %557, %c0_528, %c0_529] : memref<1x26x16x26xbf16, #tpu.memory_space<vmem>>, vector<1x1x16x26xbf16>
    %559 = vector.shape_cast %558 : vector<1x1x16x26xbf16> to vector<16x26xbf16>
    %560 = vector.extract_strided_slice %559 {offsets = [0, 2], sizes = [16, 16], strides = [1, 1]} : vector<16x26xbf16> to vector<16x16xbf16>
    %c240_530 = arith.constant 240 : index
    %c96_531 = arith.constant 96 : index
    %561 = vector.load %arg9[%c240_530, %c96_531] : memref<432x128xbf16, #tpu.memory_space<vmem>>, vector<16x16xbf16>
    tpu.vector_store %arg9[%c240_530, %c96_531], %560 {strides = array<i32>} : memref<432x128xbf16, #tpu.memory_space<vmem>>, vector<16x16xbf16>,
    %562 = vector.extract_strided_slice %559 {offsets = [0, 5], sizes = [16, 16], strides = [1, 1]} : vector<16x26xbf16> to vector<16x16xbf16>
    %c256_532 = arith.constant 256 : index
    %c96_533 = arith.constant 96 : index
    %563 = vector.load %arg9[%c256_532, %c96_533] : memref<432x128xbf16, #tpu.memory_space<vmem>>, vector<16x16xbf16>
    tpu.vector_store %arg9[%c256_532, %c96_533], %562 {strides = array<i32>} : memref<432x128xbf16, #tpu.memory_space<vmem>>, vector<16x16xbf16>,
    %564 = vector.extract_strided_slice %559 {offsets = [0, 8], sizes = [16, 16], strides = [1, 1]} : vector<16x26xbf16> to vector<16x16xbf16>
    %c272_534 = arith.constant 272 : index
    %c96_535 = arith.constant 96 : index
    %565 = vector.load %arg9[%c272_534, %c96_535] : memref<432x128xbf16, #tpu.memory_space<vmem>>, vector<16x16xbf16>
    tpu.vector_store %arg9[%c272_534, %c96_535], %564 {strides = array<i32>} : memref<432x128xbf16, #tpu.memory_space<vmem>>, vector<16x16xbf16>,
    %c7_i32_536 = arith.constant 7 : i32
    %566 = arith.addi %1, %c7_i32_536 : i32
    %c5_i32_537 = arith.constant 5 : i32
    %567 = arith.addi %566, %c5_i32_537 : i32
    %c3_i32_538 = arith.constant 3 : i32
    %568 = arith.addi %567, %c3_i32_538 : i32
    %c0_539 = arith.constant 0 : index
    %569 = arith.index_cast %568 : i32 to index
    %c0_540 = arith.constant 0 : index
    %c0_541 = arith.constant 0 : index
    %570 = vector.load %arg2[%c0_539, %569, %c0_540, %c0_541] : memref<1x26x16x26xbf16, #tpu.memory_space<vmem>>, vector<1x1x16x26xbf16>
    %571 = vector.shape_cast %570 : vector<1x1x16x26xbf16> to vector<16x26xbf16>
    %572 = vector.extract_strided_slice %571 {offsets = [0, 2], sizes = [16, 16], strides = [1, 1]} : vector<16x26xbf16> to vector<16x16xbf16>
    %c240_542 = arith.constant 240 : index
    %c112_543 = arith.constant 112 : index
    %573 = vector.load %arg9[%c240_542, %c112_543] : memref<432x128xbf16, #tpu.memory_space<vmem>>, vector<16x16xbf16>
    tpu.vector_store %arg9[%c240_542, %c112_543], %572 {strides = array<i32>} : memref<432x128xbf16, #tpu.memory_space<vmem>>, vector<16x16xbf16>,
    %574 = vector.extract_strided_slice %571 {offsets = [0, 5], sizes = [16, 16], strides = [1, 1]} : vector<16x26xbf16> to vector<16x16xbf16>
    %c256_544 = arith.constant 256 : index
    %c112_545 = arith.constant 112 : index
    %575 = vector.load %arg9[%c256_544, %c112_545] : memref<432x128xbf16, #tpu.memory_space<vmem>>, vector<16x16xbf16>
    tpu.vector_store %arg9[%c256_544, %c112_545], %574 {strides = array<i32>} : memref<432x128xbf16, #tpu.memory_space<vmem>>, vector<16x16xbf16>,
    %576 = vector.extract_strided_slice %571 {offsets = [0, 8], sizes = [16, 16], strides = [1, 1]} : vector<16x26xbf16> to vector<16x16xbf16>
    %c272_546 = arith.constant 272 : index
    %c112_547 = arith.constant 112 : index
    %577 = vector.load %arg9[%c272_546, %c112_547] : memref<432x128xbf16, #tpu.memory_space<vmem>>, vector<16x16xbf16>
    tpu.vector_store %arg9[%c272_546, %c112_547], %576 {strides = array<i32>} : memref<432x128xbf16, #tpu.memory_space<vmem>>, vector<16x16xbf16>,
    %c0_i32_548 = arith.constant 0 : i32
    %578 = arith.addi %1, %c0_i32_548 : i32
    %c5_i32_549 = arith.constant 5 : i32
    %579 = arith.addi %578, %c5_i32_549 : i32
    %c-5_i32 = arith.constant -5 : i32
    %580 = arith.addi %579, %c-5_i32 : i32
    %c0_550 = arith.constant 0 : index
    %581 = arith.index_cast %580 : i32 to index
    %c0_551 = arith.constant 0 : index
    %c0_552 = arith.constant 0 : index
    %582 = vector.load %arg2[%c0_550, %581, %c0_551, %c0_552] : memref<1x26x16x26xbf16, #tpu.memory_space<vmem>>, vector<1x1x16x26xbf16>
    %583 = vector.shape_cast %582 : vector<1x1x16x26xbf16> to vector<16x26xbf16>
    %584 = vector.extract_strided_slice %583 {offsets = [0, 0], sizes = [16, 16], strides = [1, 1]} : vector<16x26xbf16> to vector<16x16xbf16>
    %c288 = arith.constant 288 : index
    %c0_553 = arith.constant 0 : index
    %585 = vector.load %arg9[%c288, %c0_553] : memref<432x128xbf16, #tpu.memory_space<vmem>>, vector<16x16xbf16>
    tpu.vector_store %arg9[%c288, %c0_553], %584 {strides = array<i32>} : memref<432x128xbf16, #tpu.memory_space<vmem>>, vector<16x16xbf16>,
    %586 = vector.extract_strided_slice %583 {offsets = [0, 5], sizes = [16, 16], strides = [1, 1]} : vector<16x26xbf16> to vector<16x16xbf16>
    %c304 = arith.constant 304 : index
    %c0_554 = arith.constant 0 : index
    %587 = vector.load %arg9[%c304, %c0_554] : memref<432x128xbf16, #tpu.memory_space<vmem>>, vector<16x16xbf16>
    tpu.vector_store %arg9[%c304, %c0_554], %586 {strides = array<i32>} : memref<432x128xbf16, #tpu.memory_space<vmem>>, vector<16x16xbf16>,
    %588 = vector.extract_strided_slice %583 {offsets = [0, 10], sizes = [16, 16], strides = [1, 1]} : vector<16x26xbf16> to vector<16x16xbf16>
    %c320 = arith.constant 320 : index
    %c0_555 = arith.constant 0 : index
    %589 = vector.load %arg9[%c320, %c0_555] : memref<432x128xbf16, #tpu.memory_space<vmem>>, vector<16x16xbf16>
    tpu.vector_store %arg9[%c320, %c0_555], %588 {strides = array<i32>} : memref<432x128xbf16, #tpu.memory_space<vmem>>, vector<16x16xbf16>,
    %c1_i32_556 = arith.constant 1 : i32
    %590 = arith.addi %1, %c1_i32_556 : i32
    %c5_i32_557 = arith.constant 5 : i32
    %591 = arith.addi %590, %c5_i32_557 : i32
    %c-5_i32_558 = arith.constant -5 : i32
    %592 = arith.addi %591, %c-5_i32_558 : i32
    %c0_559 = arith.constant 0 : index
    %593 = arith.index_cast %592 : i32 to index
    %c0_560 = arith.constant 0 : index
    %c0_561 = arith.constant 0 : index
    %594 = vector.load %arg2[%c0_559, %593, %c0_560, %c0_561] : memref<1x26x16x26xbf16, #tpu.memory_space<vmem>>, vector<1x1x16x26xbf16>
    %595 = vector.shape_cast %594 : vector<1x1x16x26xbf16> to vector<16x26xbf16>
    %596 = vector.extract_strided_slice %595 {offsets = [0, 0], sizes = [16, 16], strides = [1, 1]} : vector<16x26xbf16> to vector<16x16xbf16>
    %c288_562 = arith.constant 288 : index
    %c16_563 = arith.constant 16 : index
    %597 = vector.load %arg9[%c288_562, %c16_563] : memref<432x128xbf16, #tpu.memory_space<vmem>>, vector<16x16xbf16>
    tpu.vector_store %arg9[%c288_562, %c16_563], %596 {strides = array<i32>} : memref<432x128xbf16, #tpu.memory_space<vmem>>, vector<16x16xbf16>,
    %598 = vector.extract_strided_slice %595 {offsets = [0, 5], sizes = [16, 16], strides = [1, 1]} : vector<16x26xbf16> to vector<16x16xbf16>
    %c304_564 = arith.constant 304 : index
    %c16_565 = arith.constant 16 : index
    %599 = vector.load %arg9[%c304_564, %c16_565] : memref<432x128xbf16, #tpu.memory_space<vmem>>, vector<16x16xbf16>
    tpu.vector_store %arg9[%c304_564, %c16_565], %598 {strides = array<i32>} : memref<432x128xbf16, #tpu.memory_space<vmem>>, vector<16x16xbf16>,
    %600 = vector.extract_strided_slice %595 {offsets = [0, 10], sizes = [16, 16], strides = [1, 1]} : vector<16x26xbf16> to vector<16x16xbf16>
    %c320_566 = arith.constant 320 : index
    %c16_567 = arith.constant 16 : index
    %601 = vector.load %arg9[%c320_566, %c16_567] : memref<432x128xbf16, #tpu.memory_space<vmem>>, vector<16x16xbf16>
    tpu.vector_store %arg9[%c320_566, %c16_567], %600 {strides = array<i32>} : memref<432x128xbf16, #tpu.memory_space<vmem>>, vector<16x16xbf16>,
    %c2_i32_568 = arith.constant 2 : i32
    %602 = arith.addi %1, %c2_i32_568 : i32
    %c5_i32_569 = arith.constant 5 : i32
    %603 = arith.addi %602, %c5_i32_569 : i32
    %c-5_i32_570 = arith.constant -5 : i32
    %604 = arith.addi %603, %c-5_i32_570 : i32
    %c0_571 = arith.constant 0 : index
    %605 = arith.index_cast %604 : i32 to index
    %c0_572 = arith.constant 0 : index
    %c0_573 = arith.constant 0 : index
    %606 = vector.load %arg2[%c0_571, %605, %c0_572, %c0_573] : memref<1x26x16x26xbf16, #tpu.memory_space<vmem>>, vector<1x1x16x26xbf16>
    %607 = vector.shape_cast %606 : vector<1x1x16x26xbf16> to vector<16x26xbf16>
    %608 = vector.extract_strided_slice %607 {offsets = [0, 0], sizes = [16, 16], strides = [1, 1]} : vector<16x26xbf16> to vector<16x16xbf16>
    %c288_574 = arith.constant 288 : index
    %c32_575 = arith.constant 32 : index
    %609 = vector.load %arg9[%c288_574, %c32_575] : memref<432x128xbf16, #tpu.memory_space<vmem>>, vector<16x16xbf16>
    tpu.vector_store %arg9[%c288_574, %c32_575], %608 {strides = array<i32>} : memref<432x128xbf16, #tpu.memory_space<vmem>>, vector<16x16xbf16>,
    %610 = vector.extract_strided_slice %607 {offsets = [0, 5], sizes = [16, 16], strides = [1, 1]} : vector<16x26xbf16> to vector<16x16xbf16>
    %c304_576 = arith.constant 304 : index
    %c32_577 = arith.constant 32 : index
    %611 = vector.load %arg9[%c304_576, %c32_577] : memref<432x128xbf16, #tpu.memory_space<vmem>>, vector<16x16xbf16>
    tpu.vector_store %arg9[%c304_576, %c32_577], %610 {strides = array<i32>} : memref<432x128xbf16, #tpu.memory_space<vmem>>, vector<16x16xbf16>,
    %612 = vector.extract_strided_slice %607 {offsets = [0, 10], sizes = [16, 16], strides = [1, 1]} : vector<16x26xbf16> to vector<16x16xbf16>
    %c320_578 = arith.constant 320 : index
    %c32_579 = arith.constant 32 : index
    %613 = vector.load %arg9[%c320_578, %c32_579] : memref<432x128xbf16, #tpu.memory_space<vmem>>, vector<16x16xbf16>
    tpu.vector_store %arg9[%c320_578, %c32_579], %612 {strides = array<i32>} : memref<432x128xbf16, #tpu.memory_space<vmem>>, vector<16x16xbf16>,
    %c3_i32_580 = arith.constant 3 : i32
    %614 = arith.addi %1, %c3_i32_580 : i32
    %c5_i32_581 = arith.constant 5 : i32
    %615 = arith.addi %614, %c5_i32_581 : i32
    %c-5_i32_582 = arith.constant -5 : i32
    %616 = arith.addi %615, %c-5_i32_582 : i32
    %c0_583 = arith.constant 0 : index
    %617 = arith.index_cast %616 : i32 to index
    %c0_584 = arith.constant 0 : index
    %c0_585 = arith.constant 0 : index
    %618 = vector.load %arg2[%c0_583, %617, %c0_584, %c0_585] : memref<1x26x16x26xbf16, #tpu.memory_space<vmem>>, vector<1x1x16x26xbf16>
    %619 = vector.shape_cast %618 : vector<1x1x16x26xbf16> to vector<16x26xbf16>
    %620 = vector.extract_strided_slice %619 {offsets = [0, 0], sizes = [16, 16], strides = [1, 1]} : vector<16x26xbf16> to vector<16x16xbf16>
    %c288_586 = arith.constant 288 : index
    %c48_587 = arith.constant 48 : index
    %621 = vector.load %arg9[%c288_586, %c48_587] : memref<432x128xbf16, #tpu.memory_space<vmem>>, vector<16x16xbf16>
    tpu.vector_store %arg9[%c288_586, %c48_587], %620 {strides = array<i32>} : memref<432x128xbf16, #tpu.memory_space<vmem>>, vector<16x16xbf16>,
    %622 = vector.extract_strided_slice %619 {offsets = [0, 5], sizes = [16, 16], strides = [1, 1]} : vector<16x26xbf16> to vector<16x16xbf16>
    %c304_588 = arith.constant 304 : index
    %c48_589 = arith.constant 48 : index
    %623 = vector.load %arg9[%c304_588, %c48_589] : memref<432x128xbf16, #tpu.memory_space<vmem>>, vector<16x16xbf16>
    tpu.vector_store %arg9[%c304_588, %c48_589], %622 {strides = array<i32>} : memref<432x128xbf16, #tpu.memory_space<vmem>>, vector<16x16xbf16>,
    %624 = vector.extract_strided_slice %619 {offsets = [0, 10], sizes = [16, 16], strides = [1, 1]} : vector<16x26xbf16> to vector<16x16xbf16>
    %c320_590 = arith.constant 320 : index
    %c48_591 = arith.constant 48 : index
    %625 = vector.load %arg9[%c320_590, %c48_591] : memref<432x128xbf16, #tpu.memory_space<vmem>>, vector<16x16xbf16>
    tpu.vector_store %arg9[%c320_590, %c48_591], %624 {strides = array<i32>} : memref<432x128xbf16, #tpu.memory_space<vmem>>, vector<16x16xbf16>,
    %c4_i32_592 = arith.constant 4 : i32
    %626 = arith.addi %1, %c4_i32_592 : i32
    %c5_i32_593 = arith.constant 5 : i32
    %627 = arith.addi %626, %c5_i32_593 : i32
    %c-5_i32_594 = arith.constant -5 : i32
    %628 = arith.addi %627, %c-5_i32_594 : i32
    %c0_595 = arith.constant 0 : index
    %629 = arith.index_cast %628 : i32 to index
    %c0_596 = arith.constant 0 : index
    %c0_597 = arith.constant 0 : index
    %630 = vector.load %arg2[%c0_595, %629, %c0_596, %c0_597] : memref<1x26x16x26xbf16, #tpu.memory_space<vmem>>, vector<1x1x16x26xbf16>
    %631 = vector.shape_cast %630 : vector<1x1x16x26xbf16> to vector<16x26xbf16>
    %632 = vector.extract_strided_slice %631 {offsets = [0, 0], sizes = [16, 16], strides = [1, 1]} : vector<16x26xbf16> to vector<16x16xbf16>
    %c288_598 = arith.constant 288 : index
    %c64_599 = arith.constant 64 : index
    %633 = vector.load %arg9[%c288_598, %c64_599] : memref<432x128xbf16, #tpu.memory_space<vmem>>, vector<16x16xbf16>
    tpu.vector_store %arg9[%c288_598, %c64_599], %632 {strides = array<i32>} : memref<432x128xbf16, #tpu.memory_space<vmem>>, vector<16x16xbf16>,
    %634 = vector.extract_strided_slice %631 {offsets = [0, 5], sizes = [16, 16], strides = [1, 1]} : vector<16x26xbf16> to vector<16x16xbf16>
    %c304_600 = arith.constant 304 : index
    %c64_601 = arith.constant 64 : index
    %635 = vector.load %arg9[%c304_600, %c64_601] : memref<432x128xbf16, #tpu.memory_space<vmem>>, vector<16x16xbf16>
    tpu.vector_store %arg9[%c304_600, %c64_601], %634 {strides = array<i32>} : memref<432x128xbf16, #tpu.memory_space<vmem>>, vector<16x16xbf16>,
    %636 = vector.extract_strided_slice %631 {offsets = [0, 10], sizes = [16, 16], strides = [1, 1]} : vector<16x26xbf16> to vector<16x16xbf16>
    %c320_602 = arith.constant 320 : index
    %c64_603 = arith.constant 64 : index
    %637 = vector.load %arg9[%c320_602, %c64_603] : memref<432x128xbf16, #tpu.memory_space<vmem>>, vector<16x16xbf16>
    tpu.vector_store %arg9[%c320_602, %c64_603], %636 {strides = array<i32>} : memref<432x128xbf16, #tpu.memory_space<vmem>>, vector<16x16xbf16>,
    %c5_i32_604 = arith.constant 5 : i32
    %638 = arith.addi %1, %c5_i32_604 : i32
    %c5_i32_605 = arith.constant 5 : i32
    %639 = arith.addi %638, %c5_i32_605 : i32
    %c-5_i32_606 = arith.constant -5 : i32
    %640 = arith.addi %639, %c-5_i32_606 : i32
    %c0_607 = arith.constant 0 : index
    %641 = arith.index_cast %640 : i32 to index
    %c0_608 = arith.constant 0 : index
    %c0_609 = arith.constant 0 : index
    %642 = vector.load %arg2[%c0_607, %641, %c0_608, %c0_609] : memref<1x26x16x26xbf16, #tpu.memory_space<vmem>>, vector<1x1x16x26xbf16>
    %643 = vector.shape_cast %642 : vector<1x1x16x26xbf16> to vector<16x26xbf16>
    %644 = vector.extract_strided_slice %643 {offsets = [0, 0], sizes = [16, 16], strides = [1, 1]} : vector<16x26xbf16> to vector<16x16xbf16>
    %c288_610 = arith.constant 288 : index
    %c80_611 = arith.constant 80 : index
    %645 = vector.load %arg9[%c288_610, %c80_611] : memref<432x128xbf16, #tpu.memory_space<vmem>>, vector<16x16xbf16>
    tpu.vector_store %arg9[%c288_610, %c80_611], %644 {strides = array<i32>} : memref<432x128xbf16, #tpu.memory_space<vmem>>, vector<16x16xbf16>,
    %646 = vector.extract_strided_slice %643 {offsets = [0, 5], sizes = [16, 16], strides = [1, 1]} : vector<16x26xbf16> to vector<16x16xbf16>
    %c304_612 = arith.constant 304 : index
    %c80_613 = arith.constant 80 : index
    %647 = vector.load %arg9[%c304_612, %c80_613] : memref<432x128xbf16, #tpu.memory_space<vmem>>, vector<16x16xbf16>
    tpu.vector_store %arg9[%c304_612, %c80_613], %646 {strides = array<i32>} : memref<432x128xbf16, #tpu.memory_space<vmem>>, vector<16x16xbf16>,
    %648 = vector.extract_strided_slice %643 {offsets = [0, 10], sizes = [16, 16], strides = [1, 1]} : vector<16x26xbf16> to vector<16x16xbf16>
    %c320_614 = arith.constant 320 : index
    %c80_615 = arith.constant 80 : index
    %649 = vector.load %arg9[%c320_614, %c80_615] : memref<432x128xbf16, #tpu.memory_space<vmem>>, vector<16x16xbf16>
    tpu.vector_store %arg9[%c320_614, %c80_615], %648 {strides = array<i32>} : memref<432x128xbf16, #tpu.memory_space<vmem>>, vector<16x16xbf16>,
    %c6_i32_616 = arith.constant 6 : i32
    %650 = arith.addi %1, %c6_i32_616 : i32
    %c5_i32_617 = arith.constant 5 : i32
    %651 = arith.addi %650, %c5_i32_617 : i32
    %c-5_i32_618 = arith.constant -5 : i32
    %652 = arith.addi %651, %c-5_i32_618 : i32
    %c0_619 = arith.constant 0 : index
    %653 = arith.index_cast %652 : i32 to index
    %c0_620 = arith.constant 0 : index
    %c0_621 = arith.constant 0 : index
    %654 = vector.load %arg2[%c0_619, %653, %c0_620, %c0_621] : memref<1x26x16x26xbf16, #tpu.memory_space<vmem>>, vector<1x1x16x26xbf16>
    %655 = vector.shape_cast %654 : vector<1x1x16x26xbf16> to vector<16x26xbf16>
    %656 = vector.extract_strided_slice %655 {offsets = [0, 0], sizes = [16, 16], strides = [1, 1]} : vector<16x26xbf16> to vector<16x16xbf16>
    %c288_622 = arith.constant 288 : index
    %c96_623 = arith.constant 96 : index
    %657 = vector.load %arg9[%c288_622, %c96_623] : memref<432x128xbf16, #tpu.memory_space<vmem>>, vector<16x16xbf16>
    tpu.vector_store %arg9[%c288_622, %c96_623], %656 {strides = array<i32>} : memref<432x128xbf16, #tpu.memory_space<vmem>>, vector<16x16xbf16>,
    %658 = vector.extract_strided_slice %655 {offsets = [0, 5], sizes = [16, 16], strides = [1, 1]} : vector<16x26xbf16> to vector<16x16xbf16>
    %c304_624 = arith.constant 304 : index
    %c96_625 = arith.constant 96 : index
    %659 = vector.load %arg9[%c304_624, %c96_625] : memref<432x128xbf16, #tpu.memory_space<vmem>>, vector<16x16xbf16>
    tpu.vector_store %arg9[%c304_624, %c96_625], %658 {strides = array<i32>} : memref<432x128xbf16, #tpu.memory_space<vmem>>, vector<16x16xbf16>,
    %660 = vector.extract_strided_slice %655 {offsets = [0, 10], sizes = [16, 16], strides = [1, 1]} : vector<16x26xbf16> to vector<16x16xbf16>
    %c320_626 = arith.constant 320 : index
    %c96_627 = arith.constant 96 : index
    %661 = vector.load %arg9[%c320_626, %c96_627] : memref<432x128xbf16, #tpu.memory_space<vmem>>, vector<16x16xbf16>
    tpu.vector_store %arg9[%c320_626, %c96_627], %660 {strides = array<i32>} : memref<432x128xbf16, #tpu.memory_space<vmem>>, vector<16x16xbf16>,
    %c7_i32_628 = arith.constant 7 : i32
    %662 = arith.addi %1, %c7_i32_628 : i32
    %c5_i32_629 = arith.constant 5 : i32
    %663 = arith.addi %662, %c5_i32_629 : i32
    %c-5_i32_630 = arith.constant -5 : i32
    %664 = arith.addi %663, %c-5_i32_630 : i32
    %c0_631 = arith.constant 0 : index
    %665 = arith.index_cast %664 : i32 to index
    %c0_632 = arith.constant 0 : index
    %c0_633 = arith.constant 0 : index
    %666 = vector.load %arg2[%c0_631, %665, %c0_632, %c0_633] : memref<1x26x16x26xbf16, #tpu.memory_space<vmem>>, vector<1x1x16x26xbf16>
    %667 = vector.shape_cast %666 : vector<1x1x16x26xbf16> to vector<16x26xbf16>
    %668 = vector.extract_strided_slice %667 {offsets = [0, 0], sizes = [16, 16], strides = [1, 1]} : vector<16x26xbf16> to vector<16x16xbf16>
    %c288_634 = arith.constant 288 : index
    %c112_635 = arith.constant 112 : index
    %669 = vector.load %arg9[%c288_634, %c112_635] : memref<432x128xbf16, #tpu.memory_space<vmem>>, vector<16x16xbf16>
    tpu.vector_store %arg9[%c288_634, %c112_635], %668 {strides = array<i32>} : memref<432x128xbf16, #tpu.memory_space<vmem>>, vector<16x16xbf16>,
    %670 = vector.extract_strided_slice %667 {offsets = [0, 5], sizes = [16, 16], strides = [1, 1]} : vector<16x26xbf16> to vector<16x16xbf16>
    %c304_636 = arith.constant 304 : index
    %c112_637 = arith.constant 112 : index
    %671 = vector.load %arg9[%c304_636, %c112_637] : memref<432x128xbf16, #tpu.memory_space<vmem>>, vector<16x16xbf16>
    tpu.vector_store %arg9[%c304_636, %c112_637], %670 {strides = array<i32>} : memref<432x128xbf16, #tpu.memory_space<vmem>>, vector<16x16xbf16>,
    %672 = vector.extract_strided_slice %667 {offsets = [0, 10], sizes = [16, 16], strides = [1, 1]} : vector<16x26xbf16> to vector<16x16xbf16>
    %c320_638 = arith.constant 320 : index
    %c112_639 = arith.constant 112 : index
    %673 = vector.load %arg9[%c320_638, %c112_639] : memref<432x128xbf16, #tpu.memory_space<vmem>>, vector<16x16xbf16>
    tpu.vector_store %arg9[%c320_638, %c112_639], %672 {strides = array<i32>} : memref<432x128xbf16, #tpu.memory_space<vmem>>, vector<16x16xbf16>,
    %c0_i32_640 = arith.constant 0 : i32
    %674 = arith.addi %1, %c0_i32_640 : i32
    %c5_i32_641 = arith.constant 5 : i32
    %675 = arith.addi %674, %c5_i32_641 : i32
    %c0_i32_642 = arith.constant 0 : i32
    %676 = arith.addi %675, %c0_i32_642 : i32
    %c0_643 = arith.constant 0 : index
    %677 = arith.index_cast %676 : i32 to index
    %c0_644 = arith.constant 0 : index
    %c0_645 = arith.constant 0 : index
    %678 = vector.load %arg2[%c0_643, %677, %c0_644, %c0_645] : memref<1x26x16x26xbf16, #tpu.memory_space<vmem>>, vector<1x1x16x26xbf16>
    %679 = vector.shape_cast %678 : vector<1x1x16x26xbf16> to vector<16x26xbf16>
    %680 = vector.extract_strided_slice %679 {offsets = [0, 0], sizes = [16, 16], strides = [1, 1]} : vector<16x26xbf16> to vector<16x16xbf16>
    %c336 = arith.constant 336 : index
    %c0_646 = arith.constant 0 : index
    %681 = vector.load %arg9[%c336, %c0_646] : memref<432x128xbf16, #tpu.memory_space<vmem>>, vector<16x16xbf16>
    tpu.vector_store %arg9[%c336, %c0_646], %680 {strides = array<i32>} : memref<432x128xbf16, #tpu.memory_space<vmem>>, vector<16x16xbf16>,
    %682 = vector.extract_strided_slice %679 {offsets = [0, 5], sizes = [16, 16], strides = [1, 1]} : vector<16x26xbf16> to vector<16x16xbf16>
    %c352 = arith.constant 352 : index
    %c0_647 = arith.constant 0 : index
    %683 = vector.load %arg9[%c352, %c0_647] : memref<432x128xbf16, #tpu.memory_space<vmem>>, vector<16x16xbf16>
    tpu.vector_store %arg9[%c352, %c0_647], %682 {strides = array<i32>} : memref<432x128xbf16, #tpu.memory_space<vmem>>, vector<16x16xbf16>,
    %684 = vector.extract_strided_slice %679 {offsets = [0, 10], sizes = [16, 16], strides = [1, 1]} : vector<16x26xbf16> to vector<16x16xbf16>
    %c368 = arith.constant 368 : index
    %c0_648 = arith.constant 0 : index
    %685 = vector.load %arg9[%c368, %c0_648] : memref<432x128xbf16, #tpu.memory_space<vmem>>, vector<16x16xbf16>
    tpu.vector_store %arg9[%c368, %c0_648], %684 {strides = array<i32>} : memref<432x128xbf16, #tpu.memory_space<vmem>>, vector<16x16xbf16>,
    %c1_i32_649 = arith.constant 1 : i32
    %686 = arith.addi %1, %c1_i32_649 : i32
    %c5_i32_650 = arith.constant 5 : i32
    %687 = arith.addi %686, %c5_i32_650 : i32
    %c0_i32_651 = arith.constant 0 : i32
    %688 = arith.addi %687, %c0_i32_651 : i32
    %c0_652 = arith.constant 0 : index
    %689 = arith.index_cast %688 : i32 to index
    %c0_653 = arith.constant 0 : index
    %c0_654 = arith.constant 0 : index
    %690 = vector.load %arg2[%c0_652, %689, %c0_653, %c0_654] : memref<1x26x16x26xbf16, #tpu.memory_space<vmem>>, vector<1x1x16x26xbf16>
    %691 = vector.shape_cast %690 : vector<1x1x16x26xbf16> to vector<16x26xbf16>
    %692 = vector.extract_strided_slice %691 {offsets = [0, 0], sizes = [16, 16], strides = [1, 1]} : vector<16x26xbf16> to vector<16x16xbf16>
    %c336_655 = arith.constant 336 : index
    %c16_656 = arith.constant 16 : index
    %693 = vector.load %arg9[%c336_655, %c16_656] : memref<432x128xbf16, #tpu.memory_space<vmem>>, vector<16x16xbf16>
    tpu.vector_store %arg9[%c336_655, %c16_656], %692 {strides = array<i32>} : memref<432x128xbf16, #tpu.memory_space<vmem>>, vector<16x16xbf16>,
    %694 = vector.extract_strided_slice %691 {offsets = [0, 5], sizes = [16, 16], strides = [1, 1]} : vector<16x26xbf16> to vector<16x16xbf16>
    %c352_657 = arith.constant 352 : index
    %c16_658 = arith.constant 16 : index
    %695 = vector.load %arg9[%c352_657, %c16_658] : memref<432x128xbf16, #tpu.memory_space<vmem>>, vector<16x16xbf16>
    tpu.vector_store %arg9[%c352_657, %c16_658], %694 {strides = array<i32>} : memref<432x128xbf16, #tpu.memory_space<vmem>>, vector<16x16xbf16>,
    %696 = vector.extract_strided_slice %691 {offsets = [0, 10], sizes = [16, 16], strides = [1, 1]} : vector<16x26xbf16> to vector<16x16xbf16>
    %c368_659 = arith.constant 368 : index
    %c16_660 = arith.constant 16 : index
    %697 = vector.load %arg9[%c368_659, %c16_660] : memref<432x128xbf16, #tpu.memory_space<vmem>>, vector<16x16xbf16>
    tpu.vector_store %arg9[%c368_659, %c16_660], %696 {strides = array<i32>} : memref<432x128xbf16, #tpu.memory_space<vmem>>, vector<16x16xbf16>,
    %c2_i32_661 = arith.constant 2 : i32
    %698 = arith.addi %1, %c2_i32_661 : i32
    %c5_i32_662 = arith.constant 5 : i32
    %699 = arith.addi %698, %c5_i32_662 : i32
    %c0_i32_663 = arith.constant 0 : i32
    %700 = arith.addi %699, %c0_i32_663 : i32
    %c0_664 = arith.constant 0 : index
    %701 = arith.index_cast %700 : i32 to index
    %c0_665 = arith.constant 0 : index
    %c0_666 = arith.constant 0 : index
    %702 = vector.load %arg2[%c0_664, %701, %c0_665, %c0_666] : memref<1x26x16x26xbf16, #tpu.memory_space<vmem>>, vector<1x1x16x26xbf16>
    %703 = vector.shape_cast %702 : vector<1x1x16x26xbf16> to vector<16x26xbf16>
    %704 = vector.extract_strided_slice %703 {offsets = [0, 0], sizes = [16, 16], strides = [1, 1]} : vector<16x26xbf16> to vector<16x16xbf16>
    %c336_667 = arith.constant 336 : index
    %c32_668 = arith.constant 32 : index
    %705 = vector.load %arg9[%c336_667, %c32_668] : memref<432x128xbf16, #tpu.memory_space<vmem>>, vector<16x16xbf16>
    tpu.vector_store %arg9[%c336_667, %c32_668], %704 {strides = array<i32>} : memref<432x128xbf16, #tpu.memory_space<vmem>>, vector<16x16xbf16>,
    %706 = vector.extract_strided_slice %703 {offsets = [0, 5], sizes = [16, 16], strides = [1, 1]} : vector<16x26xbf16> to vector<16x16xbf16>
    %c352_669 = arith.constant 352 : index
    %c32_670 = arith.constant 32 : index
    %707 = vector.load %arg9[%c352_669, %c32_670] : memref<432x128xbf16, #tpu.memory_space<vmem>>, vector<16x16xbf16>
    tpu.vector_store %arg9[%c352_669, %c32_670], %706 {strides = array<i32>} : memref<432x128xbf16, #tpu.memory_space<vmem>>, vector<16x16xbf16>,
    %708 = vector.extract_strided_slice %703 {offsets = [0, 10], sizes = [16, 16], strides = [1, 1]} : vector<16x26xbf16> to vector<16x16xbf16>
    %c368_671 = arith.constant 368 : index
    %c32_672 = arith.constant 32 : index
    %709 = vector.load %arg9[%c368_671, %c32_672] : memref<432x128xbf16, #tpu.memory_space<vmem>>, vector<16x16xbf16>
    tpu.vector_store %arg9[%c368_671, %c32_672], %708 {strides = array<i32>} : memref<432x128xbf16, #tpu.memory_space<vmem>>, vector<16x16xbf16>,
    %c3_i32_673 = arith.constant 3 : i32
    %710 = arith.addi %1, %c3_i32_673 : i32
    %c5_i32_674 = arith.constant 5 : i32
    %711 = arith.addi %710, %c5_i32_674 : i32
    %c0_i32_675 = arith.constant 0 : i32
    %712 = arith.addi %711, %c0_i32_675 : i32
    %c0_676 = arith.constant 0 : index
    %713 = arith.index_cast %712 : i32 to index
    %c0_677 = arith.constant 0 : index
    %c0_678 = arith.constant 0 : index
    %714 = vector.load %arg2[%c0_676, %713, %c0_677, %c0_678] : memref<1x26x16x26xbf16, #tpu.memory_space<vmem>>, vector<1x1x16x26xbf16>
    %715 = vector.shape_cast %714 : vector<1x1x16x26xbf16> to vector<16x26xbf16>
    %716 = vector.extract_strided_slice %715 {offsets = [0, 0], sizes = [16, 16], strides = [1, 1]} : vector<16x26xbf16> to vector<16x16xbf16>
    %c336_679 = arith.constant 336 : index
    %c48_680 = arith.constant 48 : index
    %717 = vector.load %arg9[%c336_679, %c48_680] : memref<432x128xbf16, #tpu.memory_space<vmem>>, vector<16x16xbf16>
    tpu.vector_store %arg9[%c336_679, %c48_680], %716 {strides = array<i32>} : memref<432x128xbf16, #tpu.memory_space<vmem>>, vector<16x16xbf16>,
    %718 = vector.extract_strided_slice %715 {offsets = [0, 5], sizes = [16, 16], strides = [1, 1]} : vector<16x26xbf16> to vector<16x16xbf16>
    %c352_681 = arith.constant 352 : index
    %c48_682 = arith.constant 48 : index
    %719 = vector.load %arg9[%c352_681, %c48_682] : memref<432x128xbf16, #tpu.memory_space<vmem>>, vector<16x16xbf16>
    tpu.vector_store %arg9[%c352_681, %c48_682], %718 {strides = array<i32>} : memref<432x128xbf16, #tpu.memory_space<vmem>>, vector<16x16xbf16>,
    %720 = vector.extract_strided_slice %715 {offsets = [0, 10], sizes = [16, 16], strides = [1, 1]} : vector<16x26xbf16> to vector<16x16xbf16>
    %c368_683 = arith.constant 368 : index
    %c48_684 = arith.constant 48 : index
    %721 = vector.load %arg9[%c368_683, %c48_684] : memref<432x128xbf16, #tpu.memory_space<vmem>>, vector<16x16xbf16>
    tpu.vector_store %arg9[%c368_683, %c48_684], %720 {strides = array<i32>} : memref<432x128xbf16, #tpu.memory_space<vmem>>, vector<16x16xbf16>,
    %c4_i32_685 = arith.constant 4 : i32
    %722 = arith.addi %1, %c4_i32_685 : i32
    %c5_i32_686 = arith.constant 5 : i32
    %723 = arith.addi %722, %c5_i32_686 : i32
    %c0_i32_687 = arith.constant 0 : i32
    %724 = arith.addi %723, %c0_i32_687 : i32
    %c0_688 = arith.constant 0 : index
    %725 = arith.index_cast %724 : i32 to index
    %c0_689 = arith.constant 0 : index
    %c0_690 = arith.constant 0 : index
    %726 = vector.load %arg2[%c0_688, %725, %c0_689, %c0_690] : memref<1x26x16x26xbf16, #tpu.memory_space<vmem>>, vector<1x1x16x26xbf16>
    %727 = vector.shape_cast %726 : vector<1x1x16x26xbf16> to vector<16x26xbf16>
    %728 = vector.extract_strided_slice %727 {offsets = [0, 0], sizes = [16, 16], strides = [1, 1]} : vector<16x26xbf16> to vector<16x16xbf16>
    %c336_691 = arith.constant 336 : index
    %c64_692 = arith.constant 64 : index
    %729 = vector.load %arg9[%c336_691, %c64_692] : memref<432x128xbf16, #tpu.memory_space<vmem>>, vector<16x16xbf16>
    tpu.vector_store %arg9[%c336_691, %c64_692], %728 {strides = array<i32>} : memref<432x128xbf16, #tpu.memory_space<vmem>>, vector<16x16xbf16>,
    %730 = vector.extract_strided_slice %727 {offsets = [0, 5], sizes = [16, 16], strides = [1, 1]} : vector<16x26xbf16> to vector<16x16xbf16>
    %c352_693 = arith.constant 352 : index
    %c64_694 = arith.constant 64 : index
    %731 = vector.load %arg9[%c352_693, %c64_694] : memref<432x128xbf16, #tpu.memory_space<vmem>>, vector<16x16xbf16>
    tpu.vector_store %arg9[%c352_693, %c64_694], %730 {strides = array<i32>} : memref<432x128xbf16, #tpu.memory_space<vmem>>, vector<16x16xbf16>,
    %732 = vector.extract_strided_slice %727 {offsets = [0, 10], sizes = [16, 16], strides = [1, 1]} : vector<16x26xbf16> to vector<16x16xbf16>
    %c368_695 = arith.constant 368 : index
    %c64_696 = arith.constant 64 : index
    %733 = vector.load %arg9[%c368_695, %c64_696] : memref<432x128xbf16, #tpu.memory_space<vmem>>, vector<16x16xbf16>
    tpu.vector_store %arg9[%c368_695, %c64_696], %732 {strides = array<i32>} : memref<432x128xbf16, #tpu.memory_space<vmem>>, vector<16x16xbf16>,
    %c5_i32_697 = arith.constant 5 : i32
    %734 = arith.addi %1, %c5_i32_697 : i32
    %c5_i32_698 = arith.constant 5 : i32
    %735 = arith.addi %734, %c5_i32_698 : i32
    %c0_i32_699 = arith.constant 0 : i32
    %736 = arith.addi %735, %c0_i32_699 : i32
    %c0_700 = arith.constant 0 : index
    %737 = arith.index_cast %736 : i32 to index
    %c0_701 = arith.constant 0 : index
    %c0_702 = arith.constant 0 : index
    %738 = vector.load %arg2[%c0_700, %737, %c0_701, %c0_702] : memref<1x26x16x26xbf16, #tpu.memory_space<vmem>>, vector<1x1x16x26xbf16>
    %739 = vector.shape_cast %738 : vector<1x1x16x26xbf16> to vector<16x26xbf16>
    %740 = vector.extract_strided_slice %739 {offsets = [0, 0], sizes = [16, 16], strides = [1, 1]} : vector<16x26xbf16> to vector<16x16xbf16>
    %c336_703 = arith.constant 336 : index
    %c80_704 = arith.constant 80 : index
    %741 = vector.load %arg9[%c336_703, %c80_704] : memref<432x128xbf16, #tpu.memory_space<vmem>>, vector<16x16xbf16>
    tpu.vector_store %arg9[%c336_703, %c80_704], %740 {strides = array<i32>} : memref<432x128xbf16, #tpu.memory_space<vmem>>, vector<16x16xbf16>,
    %742 = vector.extract_strided_slice %739 {offsets = [0, 5], sizes = [16, 16], strides = [1, 1]} : vector<16x26xbf16> to vector<16x16xbf16>
    %c352_705 = arith.constant 352 : index
    %c80_706 = arith.constant 80 : index
    %743 = vector.load %arg9[%c352_705, %c80_706] : memref<432x128xbf16, #tpu.memory_space<vmem>>, vector<16x16xbf16>
    tpu.vector_store %arg9[%c352_705, %c80_706], %742 {strides = array<i32>} : memref<432x128xbf16, #tpu.memory_space<vmem>>, vector<16x16xbf16>,
    %744 = vector.extract_strided_slice %739 {offsets = [0, 10], sizes = [16, 16], strides = [1, 1]} : vector<16x26xbf16> to vector<16x16xbf16>
    %c368_707 = arith.constant 368 : index
    %c80_708 = arith.constant 80 : index
    %745 = vector.load %arg9[%c368_707, %c80_708] : memref<432x128xbf16, #tpu.memory_space<vmem>>, vector<16x16xbf16>
    tpu.vector_store %arg9[%c368_707, %c80_708], %744 {strides = array<i32>} : memref<432x128xbf16, #tpu.memory_space<vmem>>, vector<16x16xbf16>,
    %c6_i32_709 = arith.constant 6 : i32
    %746 = arith.addi %1, %c6_i32_709 : i32
    %c5_i32_710 = arith.constant 5 : i32
    %747 = arith.addi %746, %c5_i32_710 : i32
    %c0_i32_711 = arith.constant 0 : i32
    %748 = arith.addi %747, %c0_i32_711 : i32
    %c0_712 = arith.constant 0 : index
    %749 = arith.index_cast %748 : i32 to index
    %c0_713 = arith.constant 0 : index
    %c0_714 = arith.constant 0 : index
    %750 = vector.load %arg2[%c0_712, %749, %c0_713, %c0_714] : memref<1x26x16x26xbf16, #tpu.memory_space<vmem>>, vector<1x1x16x26xbf16>
    %751 = vector.shape_cast %750 : vector<1x1x16x26xbf16> to vector<16x26xbf16>
    %752 = vector.extract_strided_slice %751 {offsets = [0, 0], sizes = [16, 16], strides = [1, 1]} : vector<16x26xbf16> to vector<16x16xbf16>
    %c336_715 = arith.constant 336 : index
    %c96_716 = arith.constant 96 : index
    %753 = vector.load %arg9[%c336_715, %c96_716] : memref<432x128xbf16, #tpu.memory_space<vmem>>, vector<16x16xbf16>
    tpu.vector_store %arg9[%c336_715, %c96_716], %752 {strides = array<i32>} : memref<432x128xbf16, #tpu.memory_space<vmem>>, vector<16x16xbf16>,
    %754 = vector.extract_strided_slice %751 {offsets = [0, 5], sizes = [16, 16], strides = [1, 1]} : vector<16x26xbf16> to vector<16x16xbf16>
    %c352_717 = arith.constant 352 : index
    %c96_718 = arith.constant 96 : index
    %755 = vector.load %arg9[%c352_717, %c96_718] : memref<432x128xbf16, #tpu.memory_space<vmem>>, vector<16x16xbf16>
    tpu.vector_store %arg9[%c352_717, %c96_718], %754 {strides = array<i32>} : memref<432x128xbf16, #tpu.memory_space<vmem>>, vector<16x16xbf16>,
    %756 = vector.extract_strided_slice %751 {offsets = [0, 10], sizes = [16, 16], strides = [1, 1]} : vector<16x26xbf16> to vector<16x16xbf16>
    %c368_719 = arith.constant 368 : index
    %c96_720 = arith.constant 96 : index
    %757 = vector.load %arg9[%c368_719, %c96_720] : memref<432x128xbf16, #tpu.memory_space<vmem>>, vector<16x16xbf16>
    tpu.vector_store %arg9[%c368_719, %c96_720], %756 {strides = array<i32>} : memref<432x128xbf16, #tpu.memory_space<vmem>>, vector<16x16xbf16>,
    %c7_i32_721 = arith.constant 7 : i32
    %758 = arith.addi %1, %c7_i32_721 : i32
    %c5_i32_722 = arith.constant 5 : i32
    %759 = arith.addi %758, %c5_i32_722 : i32
    %c0_i32_723 = arith.constant 0 : i32
    %760 = arith.addi %759, %c0_i32_723 : i32
    %c0_724 = arith.constant 0 : index
    %761 = arith.index_cast %760 : i32 to index
    %c0_725 = arith.constant 0 : index
    %c0_726 = arith.constant 0 : index
    %762 = vector.load %arg2[%c0_724, %761, %c0_725, %c0_726] : memref<1x26x16x26xbf16, #tpu.memory_space<vmem>>, vector<1x1x16x26xbf16>
    %763 = vector.shape_cast %762 : vector<1x1x16x26xbf16> to vector<16x26xbf16>
    %764 = vector.extract_strided_slice %763 {offsets = [0, 0], sizes = [16, 16], strides = [1, 1]} : vector<16x26xbf16> to vector<16x16xbf16>
    %c336_727 = arith.constant 336 : index
    %c112_728 = arith.constant 112 : index
    %765 = vector.load %arg9[%c336_727, %c112_728] : memref<432x128xbf16, #tpu.memory_space<vmem>>, vector<16x16xbf16>
    tpu.vector_store %arg9[%c336_727, %c112_728], %764 {strides = array<i32>} : memref<432x128xbf16, #tpu.memory_space<vmem>>, vector<16x16xbf16>,
    %766 = vector.extract_strided_slice %763 {offsets = [0, 5], sizes = [16, 16], strides = [1, 1]} : vector<16x26xbf16> to vector<16x16xbf16>
    %c352_729 = arith.constant 352 : index
    %c112_730 = arith.constant 112 : index
    %767 = vector.load %arg9[%c352_729, %c112_730] : memref<432x128xbf16, #tpu.memory_space<vmem>>, vector<16x16xbf16>
    tpu.vector_store %arg9[%c352_729, %c112_730], %766 {strides = array<i32>} : memref<432x128xbf16, #tpu.memory_space<vmem>>, vector<16x16xbf16>,
    %768 = vector.extract_strided_slice %763 {offsets = [0, 10], sizes = [16, 16], strides = [1, 1]} : vector<16x26xbf16> to vector<16x16xbf16>
    %c368_731 = arith.constant 368 : index
    %c112_732 = arith.constant 112 : index
    %769 = vector.load %arg9[%c368_731, %c112_732] : memref<432x128xbf16, #tpu.memory_space<vmem>>, vector<16x16xbf16>
    tpu.vector_store %arg9[%c368_731, %c112_732], %768 {strides = array<i32>} : memref<432x128xbf16, #tpu.memory_space<vmem>>, vector<16x16xbf16>,
    %c0_i32_733 = arith.constant 0 : i32
    %770 = arith.addi %1, %c0_i32_733 : i32
    %c5_i32_734 = arith.constant 5 : i32
    %771 = arith.addi %770, %c5_i32_734 : i32
    %c5_i32_735 = arith.constant 5 : i32
    %772 = arith.addi %771, %c5_i32_735 : i32
    %c0_736 = arith.constant 0 : index
    %773 = arith.index_cast %772 : i32 to index
    %c0_737 = arith.constant 0 : index
    %c0_738 = arith.constant 0 : index
    %774 = vector.load %arg2[%c0_736, %773, %c0_737, %c0_738] : memref<1x26x16x26xbf16, #tpu.memory_space<vmem>>, vector<1x1x16x26xbf16>
    %775 = vector.shape_cast %774 : vector<1x1x16x26xbf16> to vector<16x26xbf16>
    %776 = vector.extract_strided_slice %775 {offsets = [0, 0], sizes = [16, 16], strides = [1, 1]} : vector<16x26xbf16> to vector<16x16xbf16>
    %c384 = arith.constant 384 : index
    %c0_739 = arith.constant 0 : index
    %777 = vector.load %arg9[%c384, %c0_739] : memref<432x128xbf16, #tpu.memory_space<vmem>>, vector<16x16xbf16>
    tpu.vector_store %arg9[%c384, %c0_739], %776 {strides = array<i32>} : memref<432x128xbf16, #tpu.memory_space<vmem>>, vector<16x16xbf16>,
    %778 = vector.extract_strided_slice %775 {offsets = [0, 5], sizes = [16, 16], strides = [1, 1]} : vector<16x26xbf16> to vector<16x16xbf16>
    %c400 = arith.constant 400 : index
    %c0_740 = arith.constant 0 : index
    %779 = vector.load %arg9[%c400, %c0_740] : memref<432x128xbf16, #tpu.memory_space<vmem>>, vector<16x16xbf16>
    tpu.vector_store %arg9[%c400, %c0_740], %778 {strides = array<i32>} : memref<432x128xbf16, #tpu.memory_space<vmem>>, vector<16x16xbf16>,
    %780 = vector.extract_strided_slice %775 {offsets = [0, 10], sizes = [16, 16], strides = [1, 1]} : vector<16x26xbf16> to vector<16x16xbf16>
    %c416 = arith.constant 416 : index
    %c0_741 = arith.constant 0 : index
    %781 = vector.load %arg9[%c416, %c0_741] : memref<432x128xbf16, #tpu.memory_space<vmem>>, vector<16x16xbf16>
    tpu.vector_store %arg9[%c416, %c0_741], %780 {strides = array<i32>} : memref<432x128xbf16, #tpu.memory_space<vmem>>, vector<16x16xbf16>,
    %c1_i32_742 = arith.constant 1 : i32
    %782 = arith.addi %1, %c1_i32_742 : i32
    %c5_i32_743 = arith.constant 5 : i32
    %783 = arith.addi %782, %c5_i32_743 : i32
    %c5_i32_744 = arith.constant 5 : i32
    %784 = arith.addi %783, %c5_i32_744 : i32
    %c0_745 = arith.constant 0 : index
    %785 = arith.index_cast %784 : i32 to index
    %c0_746 = arith.constant 0 : index
    %c0_747 = arith.constant 0 : index
    %786 = vector.load %arg2[%c0_745, %785, %c0_746, %c0_747] : memref<1x26x16x26xbf16, #tpu.memory_space<vmem>>, vector<1x1x16x26xbf16>
    %787 = vector.shape_cast %786 : vector<1x1x16x26xbf16> to vector<16x26xbf16>
    %788 = vector.extract_strided_slice %787 {offsets = [0, 0], sizes = [16, 16], strides = [1, 1]} : vector<16x26xbf16> to vector<16x16xbf16>
    %c384_748 = arith.constant 384 : index
    %c16_749 = arith.constant 16 : index
    %789 = vector.load %arg9[%c384_748, %c16_749] : memref<432x128xbf16, #tpu.memory_space<vmem>>, vector<16x16xbf16>
    tpu.vector_store %arg9[%c384_748, %c16_749], %788 {strides = array<i32>} : memref<432x128xbf16, #tpu.memory_space<vmem>>, vector<16x16xbf16>,
    %790 = vector.extract_strided_slice %787 {offsets = [0, 5], sizes = [16, 16], strides = [1, 1]} : vector<16x26xbf16> to vector<16x16xbf16>
    %c400_750 = arith.constant 400 : index
    %c16_751 = arith.constant 16 : index
    %791 = vector.load %arg9[%c400_750, %c16_751] : memref<432x128xbf16, #tpu.memory_space<vmem>>, vector<16x16xbf16>
    tpu.vector_store %arg9[%c400_750, %c16_751], %790 {strides = array<i32>} : memref<432x128xbf16, #tpu.memory_space<vmem>>, vector<16x16xbf16>,
    %792 = vector.extract_strided_slice %787 {offsets = [0, 10], sizes = [16, 16], strides = [1, 1]} : vector<16x26xbf16> to vector<16x16xbf16>
    %c416_752 = arith.constant 416 : index
    %c16_753 = arith.constant 16 : index
    %793 = vector.load %arg9[%c416_752, %c16_753] : memref<432x128xbf16, #tpu.memory_space<vmem>>, vector<16x16xbf16>
    tpu.vector_store %arg9[%c416_752, %c16_753], %792 {strides = array<i32>} : memref<432x128xbf16, #tpu.memory_space<vmem>>, vector<16x16xbf16>,
    %c2_i32_754 = arith.constant 2 : i32
    %794 = arith.addi %1, %c2_i32_754 : i32
    %c5_i32_755 = arith.constant 5 : i32
    %795 = arith.addi %794, %c5_i32_755 : i32
    %c5_i32_756 = arith.constant 5 : i32
    %796 = arith.addi %795, %c5_i32_756 : i32
    %c0_757 = arith.constant 0 : index
    %797 = arith.index_cast %796 : i32 to index
    %c0_758 = arith.constant 0 : index
    %c0_759 = arith.constant 0 : index
    %798 = vector.load %arg2[%c0_757, %797, %c0_758, %c0_759] : memref<1x26x16x26xbf16, #tpu.memory_space<vmem>>, vector<1x1x16x26xbf16>
    %799 = vector.shape_cast %798 : vector<1x1x16x26xbf16> to vector<16x26xbf16>
    %800 = vector.extract_strided_slice %799 {offsets = [0, 0], sizes = [16, 16], strides = [1, 1]} : vector<16x26xbf16> to vector<16x16xbf16>
    %c384_760 = arith.constant 384 : index
    %c32_761 = arith.constant 32 : index
    %801 = vector.load %arg9[%c384_760, %c32_761] : memref<432x128xbf16, #tpu.memory_space<vmem>>, vector<16x16xbf16>
    tpu.vector_store %arg9[%c384_760, %c32_761], %800 {strides = array<i32>} : memref<432x128xbf16, #tpu.memory_space<vmem>>, vector<16x16xbf16>,
    %802 = vector.extract_strided_slice %799 {offsets = [0, 5], sizes = [16, 16], strides = [1, 1]} : vector<16x26xbf16> to vector<16x16xbf16>
    %c400_762 = arith.constant 400 : index
    %c32_763 = arith.constant 32 : index
    %803 = vector.load %arg9[%c400_762, %c32_763] : memref<432x128xbf16, #tpu.memory_space<vmem>>, vector<16x16xbf16>
    tpu.vector_store %arg9[%c400_762, %c32_763], %802 {strides = array<i32>} : memref<432x128xbf16, #tpu.memory_space<vmem>>, vector<16x16xbf16>,
    %804 = vector.extract_strided_slice %799 {offsets = [0, 10], sizes = [16, 16], strides = [1, 1]} : vector<16x26xbf16> to vector<16x16xbf16>
    %c416_764 = arith.constant 416 : index
    %c32_765 = arith.constant 32 : index
    %805 = vector.load %arg9[%c416_764, %c32_765] : memref<432x128xbf16, #tpu.memory_space<vmem>>, vector<16x16xbf16>
    tpu.vector_store %arg9[%c416_764, %c32_765], %804 {strides = array<i32>} : memref<432x128xbf16, #tpu.memory_space<vmem>>, vector<16x16xbf16>,
    %c3_i32_766 = arith.constant 3 : i32
    %806 = arith.addi %1, %c3_i32_766 : i32
    %c5_i32_767 = arith.constant 5 : i32
    %807 = arith.addi %806, %c5_i32_767 : i32
    %c5_i32_768 = arith.constant 5 : i32
    %808 = arith.addi %807, %c5_i32_768 : i32
    %c0_769 = arith.constant 0 : index
    %809 = arith.index_cast %808 : i32 to index
    %c0_770 = arith.constant 0 : index
    %c0_771 = arith.constant 0 : index
    %810 = vector.load %arg2[%c0_769, %809, %c0_770, %c0_771] : memref<1x26x16x26xbf16, #tpu.memory_space<vmem>>, vector<1x1x16x26xbf16>
    %811 = vector.shape_cast %810 : vector<1x1x16x26xbf16> to vector<16x26xbf16>
    %812 = vector.extract_strided_slice %811 {offsets = [0, 0], sizes = [16, 16], strides = [1, 1]} : vector<16x26xbf16> to vector<16x16xbf16>
    %c384_772 = arith.constant 384 : index
    %c48_773 = arith.constant 48 : index
    %813 = vector.load %arg9[%c384_772, %c48_773] : memref<432x128xbf16, #tpu.memory_space<vmem>>, vector<16x16xbf16>
    tpu.vector_store %arg9[%c384_772, %c48_773], %812 {strides = array<i32>} : memref<432x128xbf16, #tpu.memory_space<vmem>>, vector<16x16xbf16>,
    %814 = vector.extract_strided_slice %811 {offsets = [0, 5], sizes = [16, 16], strides = [1, 1]} : vector<16x26xbf16> to vector<16x16xbf16>
    %c400_774 = arith.constant 400 : index
    %c48_775 = arith.constant 48 : index
    %815 = vector.load %arg9[%c400_774, %c48_775] : memref<432x128xbf16, #tpu.memory_space<vmem>>, vector<16x16xbf16>
    tpu.vector_store %arg9[%c400_774, %c48_775], %814 {strides = array<i32>} : memref<432x128xbf16, #tpu.memory_space<vmem>>, vector<16x16xbf16>,
    %816 = vector.extract_strided_slice %811 {offsets = [0, 10], sizes = [16, 16], strides = [1, 1]} : vector<16x26xbf16> to vector<16x16xbf16>
    %c416_776 = arith.constant 416 : index
    %c48_777 = arith.constant 48 : index
    %817 = vector.load %arg9[%c416_776, %c48_777] : memref<432x128xbf16, #tpu.memory_space<vmem>>, vector<16x16xbf16>
    tpu.vector_store %arg9[%c416_776, %c48_777], %816 {strides = array<i32>} : memref<432x128xbf16, #tpu.memory_space<vmem>>, vector<16x16xbf16>,
    %c4_i32_778 = arith.constant 4 : i32
    %818 = arith.addi %1, %c4_i32_778 : i32
    %c5_i32_779 = arith.constant 5 : i32
    %819 = arith.addi %818, %c5_i32_779 : i32
    %c5_i32_780 = arith.constant 5 : i32
    %820 = arith.addi %819, %c5_i32_780 : i32
    %c0_781 = arith.constant 0 : index
    %821 = arith.index_cast %820 : i32 to index
    %c0_782 = arith.constant 0 : index
    %c0_783 = arith.constant 0 : index
    %822 = vector.load %arg2[%c0_781, %821, %c0_782, %c0_783] : memref<1x26x16x26xbf16, #tpu.memory_space<vmem>>, vector<1x1x16x26xbf16>
    %823 = vector.shape_cast %822 : vector<1x1x16x26xbf16> to vector<16x26xbf16>
    %824 = vector.extract_strided_slice %823 {offsets = [0, 0], sizes = [16, 16], strides = [1, 1]} : vector<16x26xbf16> to vector<16x16xbf16>
    %c384_784 = arith.constant 384 : index
    %c64_785 = arith.constant 64 : index
    %825 = vector.load %arg9[%c384_784, %c64_785] : memref<432x128xbf16, #tpu.memory_space<vmem>>, vector<16x16xbf16>
    tpu.vector_store %arg9[%c384_784, %c64_785], %824 {strides = array<i32>} : memref<432x128xbf16, #tpu.memory_space<vmem>>, vector<16x16xbf16>,
    %826 = vector.extract_strided_slice %823 {offsets = [0, 5], sizes = [16, 16], strides = [1, 1]} : vector<16x26xbf16> to vector<16x16xbf16>
    %c400_786 = arith.constant 400 : index
    %c64_787 = arith.constant 64 : index
    %827 = vector.load %arg9[%c400_786, %c64_787] : memref<432x128xbf16, #tpu.memory_space<vmem>>, vector<16x16xbf16>
    tpu.vector_store %arg9[%c400_786, %c64_787], %826 {strides = array<i32>} : memref<432x128xbf16, #tpu.memory_space<vmem>>, vector<16x16xbf16>,
    %828 = vector.extract_strided_slice %823 {offsets = [0, 10], sizes = [16, 16], strides = [1, 1]} : vector<16x26xbf16> to vector<16x16xbf16>
    %c416_788 = arith.constant 416 : index
    %c64_789 = arith.constant 64 : index
    %829 = vector.load %arg9[%c416_788, %c64_789] : memref<432x128xbf16, #tpu.memory_space<vmem>>, vector<16x16xbf16>
    tpu.vector_store %arg9[%c416_788, %c64_789], %828 {strides = array<i32>} : memref<432x128xbf16, #tpu.memory_space<vmem>>, vector<16x16xbf16>,
    %c5_i32_790 = arith.constant 5 : i32
    %830 = arith.addi %1, %c5_i32_790 : i32
    %c5_i32_791 = arith.constant 5 : i32
    %831 = arith.addi %830, %c5_i32_791 : i32
    %c5_i32_792 = arith.constant 5 : i32
    %832 = arith.addi %831, %c5_i32_792 : i32
    %c0_793 = arith.constant 0 : index
    %833 = arith.index_cast %832 : i32 to index
    %c0_794 = arith.constant 0 : index
    %c0_795 = arith.constant 0 : index
    %834 = vector.load %arg2[%c0_793, %833, %c0_794, %c0_795] : memref<1x26x16x26xbf16, #tpu.memory_space<vmem>>, vector<1x1x16x26xbf16>
    %835 = vector.shape_cast %834 : vector<1x1x16x26xbf16> to vector<16x26xbf16>
    %836 = vector.extract_strided_slice %835 {offsets = [0, 0], sizes = [16, 16], strides = [1, 1]} : vector<16x26xbf16> to vector<16x16xbf16>
    %c384_796 = arith.constant 384 : index
    %c80_797 = arith.constant 80 : index
    %837 = vector.load %arg9[%c384_796, %c80_797] : memref<432x128xbf16, #tpu.memory_space<vmem>>, vector<16x16xbf16>
    tpu.vector_store %arg9[%c384_796, %c80_797], %836 {strides = array<i32>} : memref<432x128xbf16, #tpu.memory_space<vmem>>, vector<16x16xbf16>,
    %838 = vector.extract_strided_slice %835 {offsets = [0, 5], sizes = [16, 16], strides = [1, 1]} : vector<16x26xbf16> to vector<16x16xbf16>
    %c400_798 = arith.constant 400 : index
    %c80_799 = arith.constant 80 : index
    %839 = vector.load %arg9[%c400_798, %c80_799] : memref<432x128xbf16, #tpu.memory_space<vmem>>, vector<16x16xbf16>
    tpu.vector_store %arg9[%c400_798, %c80_799], %838 {strides = array<i32>} : memref<432x128xbf16, #tpu.memory_space<vmem>>, vector<16x16xbf16>,
    %840 = vector.extract_strided_slice %835 {offsets = [0, 10], sizes = [16, 16], strides = [1, 1]} : vector<16x26xbf16> to vector<16x16xbf16>
    %c416_800 = arith.constant 416 : index
    %c80_801 = arith.constant 80 : index
    %841 = vector.load %arg9[%c416_800, %c80_801] : memref<432x128xbf16, #tpu.memory_space<vmem>>, vector<16x16xbf16>
    tpu.vector_store %arg9[%c416_800, %c80_801], %840 {strides = array<i32>} : memref<432x128xbf16, #tpu.memory_space<vmem>>, vector<16x16xbf16>,
    %c6_i32_802 = arith.constant 6 : i32
    %842 = arith.addi %1, %c6_i32_802 : i32
    %c5_i32_803 = arith.constant 5 : i32
    %843 = arith.addi %842, %c5_i32_803 : i32
    %c5_i32_804 = arith.constant 5 : i32
    %844 = arith.addi %843, %c5_i32_804 : i32
    %c0_805 = arith.constant 0 : index
    %845 = arith.index_cast %844 : i32 to index
    %c0_806 = arith.constant 0 : index
    %c0_807 = arith.constant 0 : index
    %846 = vector.load %arg2[%c0_805, %845, %c0_806, %c0_807] : memref<1x26x16x26xbf16, #tpu.memory_space<vmem>>, vector<1x1x16x26xbf16>
    %847 = vector.shape_cast %846 : vector<1x1x16x26xbf16> to vector<16x26xbf16>
    %848 = vector.extract_strided_slice %847 {offsets = [0, 0], sizes = [16, 16], strides = [1, 1]} : vector<16x26xbf16> to vector<16x16xbf16>
    %c384_808 = arith.constant 384 : index
    %c96_809 = arith.constant 96 : index
    %849 = vector.load %arg9[%c384_808, %c96_809] : memref<432x128xbf16, #tpu.memory_space<vmem>>, vector<16x16xbf16>
    tpu.vector_store %arg9[%c384_808, %c96_809], %848 {strides = array<i32>} : memref<432x128xbf16, #tpu.memory_space<vmem>>, vector<16x16xbf16>,
    %850 = vector.extract_strided_slice %847 {offsets = [0, 5], sizes = [16, 16], strides = [1, 1]} : vector<16x26xbf16> to vector<16x16xbf16>
    %c400_810 = arith.constant 400 : index
    %c96_811 = arith.constant 96 : index
    %851 = vector.load %arg9[%c400_810, %c96_811] : memref<432x128xbf16, #tpu.memory_space<vmem>>, vector<16x16xbf16>
    tpu.vector_store %arg9[%c400_810, %c96_811], %850 {strides = array<i32>} : memref<432x128xbf16, #tpu.memory_space<vmem>>, vector<16x16xbf16>,
    %852 = vector.extract_strided_slice %847 {offsets = [0, 10], sizes = [16, 16], strides = [1, 1]} : vector<16x26xbf16> to vector<16x16xbf16>
    %c416_812 = arith.constant 416 : index
    %c96_813 = arith.constant 96 : index
    %853 = vector.load %arg9[%c416_812, %c96_813] : memref<432x128xbf16, #tpu.memory_space<vmem>>, vector<16x16xbf16>
    tpu.vector_store %arg9[%c416_812, %c96_813], %852 {strides = array<i32>} : memref<432x128xbf16, #tpu.memory_space<vmem>>, vector<16x16xbf16>,
    %c7_i32_814 = arith.constant 7 : i32
    %854 = arith.addi %1, %c7_i32_814 : i32
    %c5_i32_815 = arith.constant 5 : i32
    %855 = arith.addi %854, %c5_i32_815 : i32
    %c5_i32_816 = arith.constant 5 : i32
    %856 = arith.addi %855, %c5_i32_816 : i32
    %c0_817 = arith.constant 0 : index
    %857 = arith.index_cast %856 : i32 to index
    %c0_818 = arith.constant 0 : index
    %c0_819 = arith.constant 0 : index
    %858 = vector.load %arg2[%c0_817, %857, %c0_818, %c0_819] : memref<1x26x16x26xbf16, #tpu.memory_space<vmem>>, vector<1x1x16x26xbf16>
    %859 = vector.shape_cast %858 : vector<1x1x16x26xbf16> to vector<16x26xbf16>
    %860 = vector.extract_strided_slice %859 {offsets = [0, 0], sizes = [16, 16], strides = [1, 1]} : vector<16x26xbf16> to vector<16x16xbf16>
    %c384_820 = arith.constant 384 : index
    %c112_821 = arith.constant 112 : index
    %861 = vector.load %arg9[%c384_820, %c112_821] : memref<432x128xbf16, #tpu.memory_space<vmem>>, vector<16x16xbf16>
    tpu.vector_store %arg9[%c384_820, %c112_821], %860 {strides = array<i32>} : memref<432x128xbf16, #tpu.memory_space<vmem>>, vector<16x16xbf16>,
    %862 = vector.extract_strided_slice %859 {offsets = [0, 5], sizes = [16, 16], strides = [1, 1]} : vector<16x26xbf16> to vector<16x16xbf16>
    %c400_822 = arith.constant 400 : index
    %c112_823 = arith.constant 112 : index
    %863 = vector.load %arg9[%c400_822, %c112_823] : memref<432x128xbf16, #tpu.memory_space<vmem>>, vector<16x16xbf16>
    tpu.vector_store %arg9[%c400_822, %c112_823], %862 {strides = array<i32>} : memref<432x128xbf16, #tpu.memory_space<vmem>>, vector<16x16xbf16>,
    %864 = vector.extract_strided_slice %859 {offsets = [0, 10], sizes = [16, 16], strides = [1, 1]} : vector<16x26xbf16> to vector<16x16xbf16>
    %c416_824 = arith.constant 416 : index
    %c112_825 = arith.constant 112 : index
    %865 = vector.load %arg9[%c416_824, %c112_825] : memref<432x128xbf16, #tpu.memory_space<vmem>>, vector<16x16xbf16>
    tpu.vector_store %arg9[%c416_824, %c112_825], %864 {strides = array<i32>} : memref<432x128xbf16, #tpu.memory_space<vmem>>, vector<16x16xbf16>,
    %c0_826 = arith.constant 0 : index
    %c0_827 = arith.constant 0 : index
    %c0_828 = arith.constant 0 : index
    %866 = vector.load %arg3[%c0_826, %c0_827, %c0_828] : memref<3x4x144xbf16, #tpu.memory_space<vmem>>, vector<1x4x144xbf16>
    %867 = vector.shape_cast %866 : vector<1x4x144xbf16> to vector<4x144xbf16>
    %c0_829 = arith.constant 0 : index
    %c0_830 = arith.constant 0 : index
    %868 = vector.load %arg9[%c0_829, %c0_830] : memref<432x128xbf16, #tpu.memory_space<vmem>>, vector<144x128xbf16>
    %cst = arith.constant dense<0.000000e+00> : vector<4x128xf32>
    %869 = tpu.matmul %867, %868, %cst {dimension_numbers = #tpu.dot_dimension_numbers<[1], [0], [0], [1], [0, 0, 1, 1], [], []>} : vector<4x144xbf16>, vector<144x128xbf16>, vector<4x128xf32> -> vector<4x128xf32>
    %c0_831 = arith.constant 0 : index
    %c0_832 = arith.constant 0 : index
    %c0_833 = arith.constant 0 : index
    %870 = vector.load %arg5[%c0_831, %c0_832, %c0_833] : memref<4x4x1xf32, #tpu.memory_space<vmem>>, vector<1x4x1xf32>
    %871 = vector.shape_cast %870 : vector<1x4x1xf32> to vector<4x1xf32>
    %872 = vector.broadcast %871 : vector<4x1xf32> to vector<4x128xf32>
    %873 = arith.addf %869, %872 : vector<4x128xf32>
    %cst_834 = arith.constant 0.000000e+00 : f32
    %874 = vector.broadcast %cst_834 : f32 to vector<4x128xf32>
    %875 = arith.maximumf %873, %874 : vector<4x128xf32>
    %c1 = arith.constant 1 : index
    %c0_835 = arith.constant 0 : index
    %c0_836 = arith.constant 0 : index
    %876 = vector.load %arg3[%c1, %c0_835, %c0_836] : memref<3x4x144xbf16, #tpu.memory_space<vmem>>, vector<1x4x144xbf16>
    %877 = vector.shape_cast %876 : vector<1x4x144xbf16> to vector<4x144xbf16>
    %c144_837 = arith.constant 144 : index
    %c0_838 = arith.constant 0 : index
    %878 = vector.load %arg9[%c144_837, %c0_838] : memref<432x128xbf16, #tpu.memory_space<vmem>>, vector<144x128xbf16>
    %cst_839 = arith.constant dense<0.000000e+00> : vector<4x128xf32>
    %879 = tpu.matmul %877, %878, %cst_839 {dimension_numbers = #tpu.dot_dimension_numbers<[1], [0], [0], [1], [0, 0, 1, 1], [], []>} : vector<4x144xbf16>, vector<144x128xbf16>, vector<4x128xf32> -> vector<4x128xf32>
    %c1_840 = arith.constant 1 : index
    %c0_841 = arith.constant 0 : index
    %c0_842 = arith.constant 0 : index
    %880 = vector.load %arg5[%c1_840, %c0_841, %c0_842] : memref<4x4x1xf32, #tpu.memory_space<vmem>>, vector<1x4x1xf32>
    %881 = vector.shape_cast %880 : vector<1x4x1xf32> to vector<4x1xf32>
    %882 = vector.broadcast %881 : vector<4x1xf32> to vector<4x128xf32>
    %883 = arith.addf %879, %882 : vector<4x128xf32>
    %cst_843 = arith.constant 0.000000e+00 : f32
    %884 = vector.broadcast %cst_843 : f32 to vector<4x128xf32>
    %885 = arith.maximumf %883, %884 : vector<4x128xf32>
    %c2 = arith.constant 2 : index
    %c0_844 = arith.constant 0 : index
    %c0_845 = arith.constant 0 : index
    %886 = vector.load %arg3[%c2, %c0_844, %c0_845] : memref<3x4x144xbf16, #tpu.memory_space<vmem>>, vector<1x4x144xbf16>
    %887 = vector.shape_cast %886 : vector<1x4x144xbf16> to vector<4x144xbf16>
    %c288_846 = arith.constant 288 : index
    %c0_847 = arith.constant 0 : index
    %888 = vector.load %arg9[%c288_846, %c0_847] : memref<432x128xbf16, #tpu.memory_space<vmem>>, vector<144x128xbf16>
    %cst_848 = arith.constant dense<0.000000e+00> : vector<4x128xf32>
    %889 = tpu.matmul %887, %888, %cst_848 {dimension_numbers = #tpu.dot_dimension_numbers<[1], [0], [0], [1], [0, 0, 1, 1], [], []>} : vector<4x144xbf16>, vector<144x128xbf16>, vector<4x128xf32> -> vector<4x128xf32>
    %c2_849 = arith.constant 2 : index
    %c0_850 = arith.constant 0 : index
    %c0_851 = arith.constant 0 : index
    %890 = vector.load %arg5[%c2_849, %c0_850, %c0_851] : memref<4x4x1xf32, #tpu.memory_space<vmem>>, vector<1x4x1xf32>
    %891 = vector.shape_cast %890 : vector<1x4x1xf32> to vector<4x1xf32>
    %892 = vector.broadcast %891 : vector<4x1xf32> to vector<4x128xf32>
    %893 = arith.addf %889, %892 : vector<4x128xf32>
    %cst_852 = arith.constant 0.000000e+00 : f32
    %894 = vector.broadcast %cst_852 : f32 to vector<4x128xf32>
    %895 = arith.maximumf %893, %894 : vector<4x128xf32>
    %c0_853 = arith.constant 0 : index
    %c0_854 = arith.constant 0 : index
    %896 = vector.load %arg4[%c0_853, %c0_854] : memref<4x16xbf16, #tpu.memory_space<vmem>>, vector<4x16xbf16>
    %c64_855 = arith.constant 64 : index
    %c0_856 = arith.constant 0 : index
    %897 = vector.load %arg9[%c64_855, %c0_856] : memref<432x128xbf16, #tpu.memory_space<vmem>>, vector<16x128xbf16>
    %cst_857 = arith.constant dense<0.000000e+00> : vector<4x128xf32>
    %898 = tpu.matmul %896, %897, %cst_857 {dimension_numbers = #tpu.dot_dimension_numbers<[1], [0], [0], [1], [0, 0, 1, 1], [], []>} : vector<4x16xbf16>, vector<16x128xbf16>, vector<4x128xf32> -> vector<4x128xf32>
    %c3 = arith.constant 3 : index
    %c0_858 = arith.constant 0 : index
    %c0_859 = arith.constant 0 : index
    %899 = vector.load %arg5[%c3, %c0_858, %c0_859] : memref<4x4x1xf32, #tpu.memory_space<vmem>>, vector<1x4x1xf32>
    %900 = vector.shape_cast %899 : vector<1x4x1xf32> to vector<4x1xf32>
    %901 = vector.broadcast %900 : vector<4x1xf32> to vector<4x128xf32>
    %902 = arith.addf %898, %901 : vector<4x128xf32>
    %cst_860 = arith.constant 0.000000e+00 : f32
    %903 = vector.broadcast %cst_860 : f32 to vector<4x128xf32>
    %904 = arith.maximumf %902, %903 : vector<4x128xf32>
    %905 = arith.addf %875, %885 : vector<4x128xf32>
    %906 = arith.addf %905, %895 : vector<4x128xf32>
    %c0_861 = arith.constant 0 : index
    %c0_862 = arith.constant 0 : index
    %c0_863 = arith.constant 0 : index
    %907 = vector.load %arg6[%c0_861, %c0_862, %c0_863] : memref<1x4x128xf32, #tpu.memory_space<vmem>>, vector<1x4x128xf32>
    %908 = vector.shape_cast %907 : vector<1x4x128xf32> to vector<4x128xf32>
    %909 = vector.shape_cast %906 : vector<4x128xf32> to vector<1x4x128xf32>
    tpu.vector_store %arg6[%c0_861, %c0_862, %c0_863], %909 {strides = array<i32>} : memref<1x4x128xf32, #tpu.memory_space<vmem>>, vector<1x4x128xf32>,
    %c0_864 = arith.constant 0 : index
    %c0_865 = arith.constant 0 : index
    %c0_866 = arith.constant 0 : index
    %910 = vector.load %arg7[%c0_864, %c0_865, %c0_866] : memref<1x4x128xf32, #tpu.memory_space<vmem>>, vector<1x4x128xf32>
    %911 = vector.shape_cast %910 : vector<1x4x128xf32> to vector<4x128xf32>
    %912 = vector.shape_cast %904 : vector<4x128xf32> to vector<1x4x128xf32>
    tpu.vector_store %arg7[%c0_864, %c0_865, %c0_866], %912 {strides = array<i32>} : memref<1x4x128xf32, #tpu.memory_space<vmem>>, vector<1x4x128xf32>,
    %cst_867 = arith.constant dense<0.000000e+00> : vector<4xf32>
    %913 = vector.multi_reduction <add>, %906, %cst_867 [1] : vector<4x128xf32> to vector<4xf32>
    %914 = vector.shape_cast %913 : vector<4xf32> to vector<4x1xf32>
    %c0_i32_868 = arith.constant 0 : i32
    %915 = arith.cmpi eq, %arg1, %c0_i32_868 : i32
    %916 = arith.extui %915 : i1 to i32
    %c0_i32_869 = arith.constant 0 : i32
    %917 = arith.cmpi ne, %916, %c0_i32_869 : i32
    scf.if %917 {
      %c0_872 = arith.constant 0 : index
      %c0_873 = arith.constant 0 : index
      %c0_874 = arith.constant 0 : index
      %921 = vector.load %arg8[%c0_872, %c0_873, %c0_874] : memref<1x4x1xf32, #tpu.memory_space<vmem>>, vector<1x4x1xf32>
      %922 = vector.shape_cast %921 : vector<1x4x1xf32> to vector<4x1xf32>
      %923 = vector.shape_cast %914 : vector<4x1xf32> to vector<1x4x1xf32>
      tpu.vector_store %arg8[%c0_872, %c0_873, %c0_874], %923 {strides = array<i32>} : memref<1x4x1xf32, #tpu.memory_space<vmem>>, vector<1x4x1xf32>,
    } else {
    }
    %c0_i32_870 = arith.constant 0 : i32
    %918 = arith.cmpi sgt, %arg1, %c0_i32_870 : i32
    %919 = arith.extui %918 : i1 to i32
    %c0_i32_871 = arith.constant 0 : i32
    %920 = arith.cmpi ne, %919, %c0_i32_871 : i32
    scf.if %920 {
      %c0_872 = arith.constant 0 : index
      %c0_873 = arith.constant 0 : index
      %c0_874 = arith.constant 0 : index
      %921 = vector.load %arg8[%c0_872, %c0_873, %c0_874] : memref<1x4x1xf32, #tpu.memory_space<vmem>>, vector<1x4x1xf32>
      %922 = vector.shape_cast %921 : vector<1x4x1xf32> to vector<4x1xf32>
      %923 = arith.addf %922, %914 : vector<4x1xf32>
      %c0_875 = arith.constant 0 : index
      %c0_876 = arith.constant 0 : index
      %c0_877 = arith.constant 0 : index
      %924 = vector.load %arg8[%c0_875, %c0_876, %c0_877] : memref<1x4x1xf32, #tpu.memory_space<vmem>>, vector<1x4x1xf32>
      %925 = vector.shape_cast %924 : vector<1x4x1xf32> to vector<4x1xf32>
      %926 = vector.shape_cast %923 : vector<4x1xf32> to vector<1x4x1xf32>
      tpu.vector_store %arg8[%c0_875, %c0_876, %c0_877], %926 {strides = array<i32>} : memref<1x4x1xf32, #tpu.memory_space<vmem>>, vector<1x4x1xf32>,
    } else {
    }
    return
  }
  func.func @transform_0(%arg0: i32, %arg1: i32) -> (i32, i32, i32, i32) {
    %c0_i32 = arith.constant 0 : i32
    %c0_i32_0 = arith.constant 0 : i32
    %c0_i32_1 = arith.constant 0 : i32
    %c0_i32_2 = arith.constant 0 : i32
    return %arg0, %c0_i32, %c0_i32_0, %c0_i32_1 : i32, i32, i32, i32
  }
  func.func @transform_1(%arg0: i32, %arg1: i32) -> (i32, i32, i32) {
    %c0_i32 = arith.constant 0 : i32
    %c0_i32_0 = arith.constant 0 : i32
    %c0_i32_1 = arith.constant 0 : i32
    %c0_i32_2 = arith.constant 0 : i32
    return %c0_i32, %c0_i32_0, %c0_i32_1 : i32, i32, i32
  }
  func.func @transform_2(%arg0: i32, %arg1: i32) -> (i32, i32) {
    %c0_i32 = arith.constant 0 : i32
    %c0_i32_0 = arith.constant 0 : i32
    %c0_i32_1 = arith.constant 0 : i32
    return %c0_i32, %c0_i32_0 : i32, i32
  }
  func.func @transform_3(%arg0: i32, %arg1: i32) -> (i32, i32, i32) {
    %c0_i32 = arith.constant 0 : i32
    %c0_i32_0 = arith.constant 0 : i32
    %c0_i32_1 = arith.constant 0 : i32
    %c0_i32_2 = arith.constant 0 : i32
    return %c0_i32, %c0_i32_0, %c0_i32_1 : i32, i32, i32
  }
  func.func @transform_4(%arg0: i32, %arg1: i32) -> (i32, i32, i32) {
    %c0_i32 = arith.constant 0 : i32
    %c0_i32_0 = arith.constant 0 : i32
    return %arg0, %c0_i32, %arg1 : i32, i32, i32
  }
  func.func @transform_5(%arg0: i32, %arg1: i32) -> (i32, i32, i32) {
    %c0_i32 = arith.constant 0 : i32
    %c0_i32_0 = arith.constant 0 : i32
    return %arg0, %c0_i32, %arg1 : i32, i32, i32
  }
  func.func @transform_6(%arg0: i32, %arg1: i32) -> (i32, i32, i32) {
    %c0_i32 = arith.constant 0 : i32
    %c0_i32_0 = arith.constant 0 : i32
    %c0_i32_1 = arith.constant 0 : i32
    return %arg0, %c0_i32, %c0_i32_0 : i32, i32, i32
  }
}

</mosaic_0001>

<bundles_post_ra>
// kernel: tpu_custom_call.1
= control target key start
LH: loop header
LB: loop body
LE: loop exit
PB: predicated region body
PF: predicated region fallthrough
CT: control target
= control target key end

     0   :  { %s5193_s0 = inlined_call_operand.hbm [shape: bf16[2,26,16,26], index: 0, kind: input, shape index: {}]   ;;  %s5194_s1 = inlined_call_operand.vmem [shape: bf16[3,4,144], index: 1, kind: input, shape index: {}]   ;;  %s5195_s2 = inlined_call_operand.vmem [shape: bf16[4,16], index: 2, kind: input, shape index: {}]   ;;  %s5196_s3 = inlined_call_operand.vmem [shape: f32[4,4,1], index: 3, kind: input, shape index: {}]   ;;  %s5197_s4 = inlined_call_operand.hbm [shape: f32[2,4,256], index: 4, kind: output, shape index: {0}]   ;;  %s5198_s5 = inlined_call_operand.hbm [shape: f32[2,4,256], index: 5, kind: output, shape index: {1}]   ;;  %s5199_s6 = inlined_call_operand.vmem [shape: f32[2,4,1], index: 6, kind: output, shape index: {2}]  }
   0x1   :  { %5291 = sst [smem:[#allocation24_spill]] %s5193_s0 }
   0x2   :  { %5292 = sst [smem:[#allocation25_spill]] %s5197_s4 }
   0x3   :  { %5293 = sst [smem:[#allocation26_spill]] %s5198_s5 }
   0x4   :  { %5294 = sst [smem:[#allocation27_spill]] %s5199_s6 }
   0x5   :  { %12 = vsyncpa [#allocation4], 0 }
   0x6   :  { %14 = vsyncpa [#allocation4 + $0x1], 0 }
   0x7   :  { %15 = vsyncpa [#allocation5], 0 }
   0x8   :  { %17 = vsyncpa [#allocation5 + $0x1], 0 }
   0x9   :  { %18 = vsyncpa [#allocation8], 0 }
   0xa   :  { %20 = vsyncpa [#allocation8 + $0x1], 0  ;;  %s3861_s21 = smov 0   ;;  %s3863_s22 = smov 0  }
   0xb   :  { %s3865_s23 = smov 0   ;;  %s3867_s24 = smov 0  }
   0xc   :  { %s3869_s25 = smov 0   ;;  %s3871_s26 = smov 0  }
   0xd   :  { %s3873_s27 = smov 0   ;;  %s3875_s28 = smov 0  }
   0xe   :  { %s3877_s29 = smov 0   ;;  %s3879_s30 = smov 0  }
   0xf   :  { %s3881_s7 = smov 0  }
  0x10 LB: > { %5295 = sst [smem:[#allocation12_spill]] %s3726_s21  ;;  %s3045_s8 = sadd.s32 4294967295, %s3766_s7   ;;  %s3766_s7 = sphi %s3881_s7, %s26_s7   ;;  %s3762_s30 = sphi %s3879_s30, %s5365_s30   ;;  %s3758_s29 = sphi %s3877_s29, %s5364_s29   ;;  %s3754_s28 = sphi %s3875_s28, %s5363_s28   ;;  %s3750_s27 = sphi %s3873_s27, %s5362_s27   ;;  %s3746_s26 = sphi %s3871_s26, %s5361_s26   ;;  %s3742_s25 = sphi %s3869_s25, %s5360_s25   ;;  %s3738_s24 = sphi %s3867_s24, %s5359_s24   ;;  %s3734_s23 = sphi %s3865_s23, %s5358_s23   ;;  %s3730_s22 = sphi %s3863_s22, %s5367_s22   ;;  %s3726_s21 = sphi %s3861_s21, %s5366_s21  }
  0x11   : > { %5296 = sst [smem:[#allocation13_spill]] %s3734_s23  ;;  %s3046_s9 = sadd.s32 4294967294, %s3766_s7  }
  0x12   : > { %5297 = sst [smem:[#allocation14_spill]] %s3742_s25  ;;  %s35_s10 = sadd.s32 1, %s3758_s29 }
  0x13   : > { %5298 = sst [smem:[#allocation15_spill]] %s3746_s26  ;;  %s38_s11 = sadd.s32 1, %s3762_s30 }
  0x14   : > { %5299 = sst [smem:[#allocation16_spill]] %s3758_s29  ;;  %p36_p0 = scmp.ge.s32.totalorder %s35_s10, 2 }
  0x15   : > { %5300 = sst [smem:[#allocation17_spill]] %s3762_s30  ;;  %s45_s12 = sadd.s32 1, %s3746_s26 }
  0x16   : > { %5301 = sst [smem:[#allocation18_spill]] %s3766_s7  ;;  %p52_p1 = scmp.ne.s32.totalorder %s3746_s26, %s3742_s25 }
  0x17   : > { %p53_p2 = scmp.eq.s32.totalorder %s3766_s7, 0  ;;  %s5369_s10 = smov (%p36_p0, %s35_s10), 0 }
  0x18   : > { %5302 = sst [smem:[#allocation19_spill]] %s5369_s10  ;;  %s5371_s11 = smov (!%p36_p0, %s38_s11), %s3762_s30 }
  0x19   : > { %p3925_p3 = por %p53_p2, %p52_p1  ;;  %p58_p4 = scmp.ne.s32.totalorder %s3742_s25, %s3738_s24 }
  0x1a   : > { %p40_p5 = scmp.ge.s32.totalorder %s5371_s11, 2  ;;  %p59_p6 = scmp.eq.s32.totalorder %s3045_s8, 0 }
  0x1b   : > { %s132_s14 = ssub.s32 %s3758_s29, %s5369_s10  ;;  %s136_s15 = sadd.s32 1, %s3734_s23 }
  0x1c   : > { %s5373_s11 = smov (%p40_p5, %s5371_s11), 0  ;;  %p3935_p7 = por %p59_p6, %p58_p4 }
  0x1d   : > { %5304 = sst [smem:[#allocation20_spill]] %s5373_s11  ;;  %p146_p8 = scmp.ne.s32.totalorder %s3734_s23, %s3730_s22 }
  0x1e   : > { %s42_s17 = ssub.s32 %s3762_s30, %s5373_s11  ;;  %p147_p9 = scmp.eq.s32.totalorder %s3045_s8, 3 }
  0x1f   : > { %p43_p10 = scmp.eq.s32.totalorder %s42_s17, 0  ;;  %s133_s18 = sor.u32 %s132_s14, %s42_s17 }
  0x20   : > { %p134_p11 = scmp.eq.s32.totalorder %s133_s18, 0  ;;  %p3943_p12 = por %p147_p9, %p146_p8 }
  0x21   : > { %s3948_s20 = scalar_select %p43_p10, %s3746_s26, %s45_s12  }
  0x22   : > { %s3951_s24 = scalar_select %p134_p11, %s3734_s23, %s136_s15  }
  0x23   : > { %5307 = sst [smem:[#allocation21_spill]] %s3948_s20  ;;  %p152_p13 = scmp.ne.s32.totalorder %s3730_s22, %s3726_s21 }
  0x24   : > { %5308 = sst [smem:[#allocation22_spill]] %s3951_s24  ;;  %p153_p0 = scmp.eq.s32.totalorder %s3046_s9, 3 }
  0x25   : > { %p3431_p1 = scmp.lt.s32.totalorder %s3766_s7, 4  ;;  %s236_s8 = sand.u32 1, %s3746_s26  }
  0x26   : > { %p3956_p2 = por %p153_p0, %p152_p13  ;;  %s3411_s14 = smul.u32 208, %s236_s8 }
  0x27   : > { %s3412_s17 = smul.u32 208, %s3762_s30  ;;  %p3421_p4 = pnand %p3431_p1, %p3925_p3 }
  0x28   : > { %s5309_s10 = scalar_select %p3956_p2, 1, 0 }
  0x29   : > { %s5311_s0 = sld [smem:[#allocation24_spill]]  ;;  %s240_s29 = scalar_lea.vmem [#allocation3], %s3411_s14 }
  0x2a   : > { %5310 = sst [smem:[#allocation23_spill]] %s5309_s10  ;;  %s248_s15 = sshll.u32 %s240_s29, 4  ;;  %s249_s15 = int_to_ptr.vmem [resolvable:$true] %s248_s15 }
  0x2b   : > { %p3050_p5 = scmp.ge.s32.totalorder %s3766_s7, 1  ;;  %s237_s9 = scalar_lea.sflag [#allocation4], %s236_s8 }
  0x2c   : > { %s3768_s24 = smov 64   ;;  %s3769_s23 = smov 4  }
  0x2d   : > { %p256_p6 = scmp.lt.s32.totalorder %s3766_s7, 5 }
  0x2f   : > { %s245_s12 = scalar_lea.hbm %s5311_s0, %s3412_s17  ;;  %p257_p8 = pnand %p3050_p5, %p256_p6 }
  0x30   : > { %s246_s20 = sshll.u32 %s245_s12, 4  ;;  %s262_s13 = sand.u32 (!%p257_p8), 1, %s3742_s25   ;;  %s247_s20 = int_to_ptr.hbm [resolvable:$true] %s246_s20 }
  0x31   : > { %3423 = dma.hbm_to_vmem [thread:$0]  (!%p3421_p4), %s247_s20, 3328, %s249_s15, %s237_s9, %s3768_s24, %s3768_s24, %s3769_s23  }
  0x32   : > { %260 = sbr.rel (%p257_p8) target bundleno = 1617 (0x651), region = 36  ;;  %s263_s26 = scalar_lea.sflag (!%p257_p8), [#allocation4], %s262_s13 }
  0x33   : > { %s3413_s30 = smul.u32 (!%p257_p8), 208, %s262_s13 }
  0x35   : > { %s266_s11 = scalar_lea.vmem (!%p257_p8), [#allocation3], %s3413_s30 }
  0x37   : > { %3713 = dma.done.wait (%p3935_p7), %s263_s26, 3328  }
  0x38   : > { %3715 = vsyncadd (%p3935_p7), %s263_s26, 4294963968  ;;  %s3364_s29 = sshll.u32 %s3750_s27, 6  ;;  %s5246_s23 = smov 123   ;;  %vm325_vm0 = vcmask 125952   ;;  %vm358_vm1 = vcmask 257152   ;;  %vm391_vm2 = vcmask 388352  }
  0x39   : > { %s3975_s8 = scalar_lea.vmem %s266_s11, %s3364_s29 [#allocation3]  ;;  %s3771_s20 = smov 124   ;;  %vm424_vm3 = vcmask 519552   ;;  %vm457_vm4 = vcmask 650752   ;;  %vm490_vm5 = vcmask 781952   ;;  %vm523_vm6 = vcmask 913152  }
  0x3a   : > { %v3057_v0 = vld [vmem:[%s3975_s8 + $0x20] sm:$0xf]  ;;  %s5240_s30 = smov 122   ;;  %v3058_v1 = vld [vmem:[%s3975_s8 + $0x24] sm:$0xf]  ;;  %s5238_s26 = smov 12  }
  0x3b   : > { %328 = vrot.lane.b32.xlu1 %v3057_v0, %s5246_s23  ;;  %319 = vrot.lane.b32.xlu0 %v3057_v0, %s3771_s20  ;;  %v3062_v2 = vld [vmem:[%s3975_s8 + $0x2c] sm:$0xf]  ;;  %v3061_v3 = vld [vmem:[%s3975_s8 + $0x28] sm:$0xf]  ;;  %s5234_s16 = smov 11   ;;  %s5232_s24 = smov 10  }
  0x3c   : > { %336 = vrot.lane.b32.xlu2 %v3057_v0, %s5240_s30  ;;  %v3066_v4 = vld [vmem:[%s3975_s8 + $0x34] sm:$0xf]  ;;  %v3065_v5 = vld [vmem:[%s3975_s8 + $0x30] sm:$0xf]  ;;  %s5224_s14 = smov 28   ;;  %s5230_s17 = smov 27  }
  0x3d   : > { %s5226_s18 = smov 26   ;;  %v3070_v6 = vld [vmem:[%s3975_s8 + $0x3c] sm:$0xf]  ;;  %v3069_v7 = vld [vmem:[%s3975_s8 + $0x38] sm:$0xf]  ;;  %s5228_s12 = smov 44  }
  0x3e   : > { %s5210_s15 = smov 43   ;;  %s5206_s9 = smov 42   ;;  %v3074_v8 = vld [vmem:[%s3975_s8 + $0x44] sm:$0xf]  ;;  %v3073_v9 = vld [vmem:[%s3975_s8 + $0x40] sm:$0xf] }
  0x3f   : > { %s5208_s13 = smov 60   ;;  %s5236_s11 = smov 59   ;;  %v3078_v10 = vld [vmem:[%s3975_s8 + $0x4c] sm:$0xf]  ;;  %v3077_v11 = vld [vmem:[%s3975_s8 + $0x48] sm:$0xf] }
  0x40   : > { %s5212_s29 = smov 58   ;;  %v3082_v13 = vld [vmem:[%s3975_s8 + $0x54] sm:$0xf]  ;;  %v3081_v14 = vld [vmem:[%s3975_s8 + $0x50] sm:$0xf]  ;;  %vm556_vm7 = vcmask 1044352  }
  0x41   : > { %v3086_v17 = vld [vmem:[%s3975_s8 + $0x5c] sm:$0xf]  ;;  %v3085_v18 = vld [vmem:[%s3975_s8 + $0x58] sm:$0xf]  ;;  %v3088_v25 = vld [vmem:[%s3975_s8 + $0x2c] sm:$0xf] }
  0x42   : > { %v3087_v26 = vld [vmem:[%s3975_s8 + $0x28] sm:$0xf]  ;;  %v3090_v33 = vld [vmem:[%s3975_s8 + $0x34] sm:$0xf]  ;;  %v3089_v34 = vld [vmem:[%s3975_s8 + $0x30] sm:$0xf] }
  0x43   : > { %330 = vrot.lane.b32.xlu1 %v3058_v1, %s5246_s23  ;;  %321 = vrot.lane.b32.xlu0 %v3058_v1, %s3771_s20  ;;  %v3092_v41 = vld [vmem:[%s3975_s8 + $0x3c] sm:$0xf]  ;;  %v3091_v42 = vld [vmem:[%s3975_s8 + $0x38] sm:$0xf]  ;;  %p305_p3 = scmp.lt.s32.totalorder %s3754_s28, 1  ;;  %s5332_s6 = sld [smem:[#allocation27_spill]] }
  0x44   : > { %338 = vrot.lane.b32.xlu2 %v3058_v1, %s5240_s30  ;;  %v3094_v49 = vld [vmem:[%s3975_s8 + $0x44] sm:$0xf]  ;;  %v3093_v50 = vld [vmem:[%s3975_s8 + $0x40] sm:$0xf]  ;;  %v3096_v57 = vld [vmem:[%s3975_s8 + $0x4c] sm:$0xf] }
  0x45   : > { %v3095_v58 = vld [vmem:[%s3975_s8 + $0x48] sm:$0xf]  ;;  %v3098_v1 = vld [vmem:[%s3975_s8 + $0x54] sm:$0xf]  ;;  %s5341_s0 = smov 72   ;;  %s5343_s25 = smov 91  }
  0x46   : > { %s5344_s10 = smov 88   ;;  %s5345_s21 = smov 110   ;;  %vm2472_vm8 = vcmask 130048   ;;  %vm2769_vm9 = vcmask 1043456  }
  0x47   : > { %s5346_s7 = smov 104   ;;  %s5347_s5 = smov 126  }
  0x48   : > { %s5348_s4 = smov 120   ;;  %p3354_p7 = scmp.ne.s32.totalorder %s3750_s27, 0 }
  0x4b   : > { %354 = vrot.lane.b32.xlu1 %v3062_v2, %s5238_s26  ;;  %352 = vrot.lane.b32.xlu0 %v3061_v3, %s5238_s26 }
  0x4c   : > { %361 = vrot.lane.b32.xlu2 %v3061_v3, %s5234_s16 }
  0x53   : > { %369 = vrot.lane.b32.xlu1 %v3061_v3, %s5232_s24  ;;  %363 = vrot.lane.b32.xlu0 %v3062_v2, %s5234_s16 }
  0x54   : > { %371 = vrot.lane.b32.xlu2 %v3062_v2, %s5232_s24  ;;  %v3097_v2 = vld [vmem:[%s3975_s8 + $0x50] sm:$0xf] }
  0x5b   : > { %387 = vrot.lane.b32.xlu1 %v3066_v4, %s5224_s14  ;;  %385 = vrot.lane.b32.xlu0 %v3065_v5, %s5224_s14 }
  0x5c   : > { %394 = vrot.lane.b32.xlu2 %v3065_v5, %s5230_s17 }
  0x63   : > { %402 = vrot.lane.b32.xlu1 %v3065_v5, %s5226_s18  ;;  %396 = vrot.lane.b32.xlu0 %v3066_v4, %s5230_s17 }
  0x64   : > { %404 = vrot.lane.b32.xlu2 %v3066_v4, %s5226_s18 }
  0x6b   : > { %420 = vrot.lane.b32.xlu1 %v3070_v6, %s5228_s12  ;;  %418 = vrot.lane.b32.xlu0 %v3069_v7, %s5228_s12 }
  0x6c   : > { %427 = vrot.lane.b32.xlu2 %v3069_v7, %s5210_s15 }
  0x73   : > { %435 = vrot.lane.b32.xlu1 %v3069_v7, %s5206_s9  ;;  %429 = vrot.lane.b32.xlu0 %v3070_v6, %s5210_s15  ;;  %s5216_s15 = smov 74  }
  0x74   : > { %437 = vrot.lane.b32.xlu2 %v3070_v6, %s5206_s9  ;;  %s5214_s9 = smov 76  }
  0x7b   : > { %453 = vrot.lane.b32.xlu1 %v3074_v8, %s5208_s13  ;;  %451 = vrot.lane.b32.xlu0 %v3073_v9, %s5208_s13  ;;  %s5218_s13 = smov 75  }
  0x7c   : > { %460 = vrot.lane.b32.xlu2 %v3073_v9, %s5236_s11 }
  0x83   : > { %468 = vrot.lane.b32.xlu1 %v3073_v9, %s5212_s29  ;;  %462 = vrot.lane.b32.xlu0 %v3074_v8, %s5236_s11  ;;  %v3100_v9 = vld [vmem:[%s3975_s8 + $0x5c] sm:$0xf] }
  0x84   : > { %470 = vrot.lane.b32.xlu2 %v3074_v8, %s5212_s29  ;;  %s5220_s29 = smov 92  }
  0x8b   : > { %486 = vrot.lane.b32.xlu1 %v3078_v10, %s5214_s9  ;;  %484 = vrot.lane.b32.xlu0 %v3077_v11, %s5214_s9  ;;  %s5280_s9 = smov 91  }
  0x8c   : > { %493 = vrot.lane.b32.xlu2 %v3077_v11, %s5218_s13 }
  0x93   : > { %501 = vrot.lane.b32.xlu1 %v3077_v11, %s5216_s15  ;;  %495 = vrot.lane.b32.xlu0 %v3078_v10, %s5218_s13  ;;  %s3791_s13 = smov 108  }
  0x94   : > { %503 = vrot.lane.b32.xlu2 %v3078_v10, %s5216_s15  ;;  %s5222_s15 = smov 90   ;;  %v3099_v10 = vld [vmem:[%s3975_s8 + $0x58] sm:$0xf] }
  0x96   : > { %v337_v12 = vpop.permute.xlu2 %336 }
  0x97   : > { %342 = vst.msk [vmem:[#allocation2 + $0x10] sm:$0xf] %vm325_vm0, %v337_v12 }
  0x9b   : > { %519 = vrot.lane.b32.xlu1 %v3082_v13, %s5220_s29  ;;  %517 = vrot.lane.b32.xlu0 %v3081_v14, %s5220_s29  ;;  %s5244_s29 = smov 107  }
  0x9c   : > { %526 = vrot.lane.b32.xlu2 %v3081_v14, %s5280_s9 }
  0x9e   : > { %v339_v15 = vpop.permute.xlu2 %338 }
  0x9f   : > { %343 = vst.msk [vmem:[#allocation2 + $0x14] sm:$0xf] %vm325_vm0, %v339_v15 }
  0xa3   : > { %534 = vrot.lane.b32.xlu1 %v3081_v14, %s5222_s15  ;;  %528 = vrot.lane.b32.xlu0 %v3082_v13, %s5280_s9 }
  0xa4   : > { %536 = vrot.lane.b32.xlu2 %v3082_v13, %s5222_s15  ;;  %s5242_s15 = smov 106  }
  0xa6   : > { %v362_v16 = vpop.permute.xlu2 %361 }
  0xab   : > { %552 = vrot.lane.b32.xlu1 %v3086_v17, %s3791_s13  ;;  %550 = vrot.lane.b32.xlu0 %v3085_v18, %s3791_s13 }
  0xac   : > { %559 = vrot.lane.b32.xlu2 %v3085_v18, %s5244_s29 }
  0xad   : > { %v329_v19 = vpop.permute.xlu1 %328  ;;  %v320_v20 = vpop.permute.xlu0 %319 }
  0xae   : > { %334 = vst.msk [vmem:[#allocation2 + $0x8] sm:$0xf] %vm325_vm0, %v329_v19  ;;  %v372_v21 = vpop.permute.xlu2 %371 }
  0xaf   : > { %326 = vst.msk [vmem:[#allocation2] sm:$0xf] %vm325_vm0, %v320_v20 }
  0xb0   : > { %367 = vst.msk [vmem:[#allocation2 + $0x8] sm:$0xf] %vm358_vm1, %v362_v16 }
  0xb1   : > { %376 = vst.msk [vmem:[#allocation2 + $0x14] sm:$0xf] %vm358_vm1, %v372_v21 }
  0xb3   : > { %567 = vrot.lane.b32.xlu1 %v3085_v18, %s5242_s15  ;;  %561 = vrot.lane.b32.xlu0 %v3086_v17, %s5244_s29  ;;  %v3103_v18 = vld [vmem:[%s3975_s8 + $0x60] sm:$0xf] }
  0xb4   : > { %569 = vrot.lane.b32.xlu2 %v3086_v17, %s5242_s15  ;;  %v3104_v17 = vld [vmem:[%s3975_s8 + $0x64] sm:$0xf] }
  0xb5   : > { %v331_v22 = vpop.permute.xlu1 %330  ;;  %v322_v23 = vpop.permute.xlu0 %321 }
  0xb6   : > { %335 = vst.msk [vmem:[#allocation2 + $0xc] sm:$0xf] %vm325_vm0, %v331_v22  ;;  %v395_v24 = vpop.permute.xlu2 %394 }
  0xb7   : > { %327 = vst.msk [vmem:[#allocation2 + $0x4] sm:$0xf] %vm325_vm0, %v322_v23 }
  0xb8   : > { %400 = vst.msk [vmem:[#allocation2 + $0x8] sm:$0xf] %vm391_vm2, %v395_v24 }
  0xbb   : > { %581 = vrot.lane.b32.xlu1 %v3088_v25, %s3771_s20  ;;  %579 = vrot.lane.b32.xlu0 %v3087_v26, %s3771_s20 }
  0xbc   : > { %587 = vrot.lane.b32.xlu2 %v3087_v26, %s5246_s23 }
  0xbd   : > { %v355_v27 = vpop.permute.xlu1 %354  ;;  %v353_v28 = vpop.permute.xlu0 %352 }
  0xbe   : > { %360 = vst.msk [vmem:[#allocation2 + $0x4] sm:$0xf] %vm358_vm1, %v355_v27  ;;  %v405_v29 = vpop.permute.xlu2 %404 }
  0xbf   : > { %359 = vst.msk [vmem:[#allocation2] sm:$0xf] %vm358_vm1, %v353_v28 }
  0xc0   : > { %409 = vst.msk [vmem:[#allocation2 + $0x14] sm:$0xf] %vm391_vm2, %v405_v29 }
  0xc3   : > { %595 = vrot.lane.b32.xlu1 %v3087_v26, %s5240_s30  ;;  %589 = vrot.lane.b32.xlu0 %v3088_v25, %s5246_s23  ;;  %v3105_v26 = vld [vmem:[%s3975_s8 + $0x30] sm:$0xf] }
  0xc4   : > { %597 = vrot.lane.b32.xlu2 %v3088_v25, %s5240_s30  ;;  %s5320_s30 = smov 90   ;;  %v3106_v25 = vld [vmem:[%s3975_s8 + $0x34] sm:$0xf] }
  0xc5   : > { %v370_v30 = vpop.permute.xlu1 %369  ;;  %v364_v31 = vpop.permute.xlu0 %363 }
  0xc6   : > { %375 = vst.msk [vmem:[#allocation2 + $0x10] sm:$0xf] %vm358_vm1, %v370_v30  ;;  %v428_v32 = vpop.permute.xlu2 %427 }
  0xc7   : > { %368 = vst.msk [vmem:[#allocation2 + $0xc] sm:$0xf] %vm358_vm1, %v364_v31 }
  0xc8   : > { %433 = vst.msk [vmem:[#allocation2 + $0x8] sm:$0xf] %vm424_vm3, %v428_v32 }
  0xcb   : > { %609 = vrot.lane.b32.xlu1 %v3090_v33, %s5238_s26  ;;  %607 = vrot.lane.b32.xlu0 %v3089_v34, %s5238_s26  ;;  %s5319_s26 = smov 92  }
  0xcc   : > { %615 = vrot.lane.b32.xlu2 %v3089_v34, %s5234_s16 }
  0xcd   : > { %v388_v35 = vpop.permute.xlu1 %387  ;;  %v386_v36 = vpop.permute.xlu0 %385 }
  0xce   : > { %393 = vst.msk [vmem:[#allocation2 + $0x4] sm:$0xf] %vm391_vm2, %v388_v35  ;;  %v438_v37 = vpop.permute.xlu2 %437 }
  0xcf   : > { %392 = vst.msk [vmem:[#allocation2] sm:$0xf] %vm391_vm2, %v386_v36 }
  0xd0   : > { %442 = vst.msk [vmem:[#allocation2 + $0x14] sm:$0xf] %vm424_vm3, %v438_v37 }
  0xd3   : > { %623 = vrot.lane.b32.xlu1 %v3089_v34, %s5232_s24  ;;  %617 = vrot.lane.b32.xlu0 %v3090_v33, %s5234_s16  ;;  %s5317_s16 = smov 75   ;;  %v3107_v34 = vld [vmem:[%s3975_s8 + $0x38] sm:$0xf] }
  0xd4   : > { %625 = vrot.lane.b32.xlu2 %v3090_v33, %s5232_s24  ;;  %s5316_s24 = smov 76   ;;  %v3108_v33 = vld [vmem:[%s3975_s8 + $0x3c] sm:$0xf] }
  0xd5   : > { %v403_v38 = vpop.permute.xlu1 %402  ;;  %v397_v39 = vpop.permute.xlu0 %396 }
  0xd6   : > { %408 = vst.msk [vmem:[#allocation2 + $0x10] sm:$0xf] %vm391_vm2, %v403_v38  ;;  %v461_v40 = vpop.permute.xlu2 %460 }
  0xd7   : > { %401 = vst.msk [vmem:[#allocation2 + $0xc] sm:$0xf] %vm391_vm2, %v397_v39 }
  0xd8   : > { %466 = vst.msk [vmem:[#allocation2 + $0x8] sm:$0xf] %vm457_vm4, %v461_v40 }
  0xdb   : > { %637 = vrot.lane.b32.xlu1 %v3092_v41, %s5224_s14  ;;  %635 = vrot.lane.b32.xlu0 %v3091_v42, %s5224_s14  ;;  %s5312_s14 = smov 43  }
  0xdc   : > { %643 = vrot.lane.b32.xlu2 %v3091_v42, %s5230_s17 }
  0xdd   : > { %v421_v43 = vpop.permute.xlu1 %420  ;;  %v419_v44 = vpop.permute.xlu0 %418 }
  0xde   : > { %426 = vst.msk [vmem:[#allocation2 + $0x4] sm:$0xf] %vm424_vm3, %v421_v43  ;;  %v471_v45 = vpop.permute.xlu2 %470 }
  0xdf   : > { %425 = vst.msk [vmem:[#allocation2] sm:$0xf] %vm424_vm3, %v419_v44 }
  0xe0   : > { %475 = vst.msk [vmem:[#allocation2 + $0x14] sm:$0xf] %vm457_vm4, %v471_v45 }
  0xe3   : > { %651 = vrot.lane.b32.xlu1 %v3091_v42, %s5226_s18  ;;  %645 = vrot.lane.b32.xlu0 %v3092_v41, %s5230_s17  ;;  %s5315_s17 = smov 58   ;;  %v3109_v42 = vld [vmem:[%s3975_s8 + $0x40] sm:$0xf] }
  0xe4   : > { %653 = vrot.lane.b32.xlu2 %v3092_v41, %s5226_s18  ;;  %s5313_s18 = smov 42   ;;  %v3110_v41 = vld [vmem:[%s3975_s8 + $0x44] sm:$0xf] }
  0xe5   : > { %v436_v46 = vpop.permute.xlu1 %435  ;;  %v430_v47 = vpop.permute.xlu0 %429 }
  0xe6   : > { %441 = vst.msk [vmem:[#allocation2 + $0x10] sm:$0xf] %vm424_vm3, %v436_v46  ;;  %v494_v48 = vpop.permute.xlu2 %493 }
  0xe7   : > { %434 = vst.msk [vmem:[#allocation2 + $0xc] sm:$0xf] %vm424_vm3, %v430_v47 }
  0xe8   : > { %499 = vst.msk [vmem:[#allocation2 + $0x8] sm:$0xf] %vm490_vm5, %v494_v48 }
  0xeb   : > { %665 = vrot.lane.b32.xlu1 %v3094_v49, %s5228_s12  ;;  %663 = vrot.lane.b32.xlu0 %v3093_v50, %s5228_s12  ;;  %s5314_s12 = smov 60  }
  0xec   : > { %671 = vrot.lane.b32.xlu2 %v3093_v50, %s5312_s14 }
  0xed   : > { %v454_v51 = vpop.permute.xlu1 %453  ;;  %v452_v52 = vpop.permute.xlu0 %451 }
  0xee   : > { %459 = vst.msk [vmem:[#allocation2 + $0x4] sm:$0xf] %vm457_vm4, %v454_v51  ;;  %v504_v53 = vpop.permute.xlu2 %503 }
  0xef   : > { %458 = vst.msk [vmem:[#allocation2] sm:$0xf] %vm457_vm4, %v452_v52 }
  0xf0   : > { %508 = vst.msk [vmem:[#allocation2 + $0x14] sm:$0xf] %vm490_vm5, %v504_v53 }
  0xf3   : > { %679 = vrot.lane.b32.xlu1 %v3093_v50, %s5313_s18  ;;  %673 = vrot.lane.b32.xlu0 %v3094_v49, %s5312_s14  ;;  %v3111_v50 = vld [vmem:[%s3975_s8 + $0x48] sm:$0xf] }
  0xf4   : > { %681 = vrot.lane.b32.xlu2 %v3094_v49, %s5313_s18  ;;  %v3112_v49 = vld [vmem:[%s3975_s8 + $0x4c] sm:$0xf] }
  0xf5   : > { %v469_v54 = vpop.permute.xlu1 %468  ;;  %v463_v55 = vpop.permute.xlu0 %462 }
  0xf6   : > { %474 = vst.msk [vmem:[#allocation2 + $0x10] sm:$0xf] %vm457_vm4, %v469_v54  ;;  %v527_v56 = vpop.permute.xlu2 %526 }
  0xf7   : > { %467 = vst.msk [vmem:[#allocation2 + $0xc] sm:$0xf] %vm457_vm4, %v463_v55 }
  0xf8   : > { %532 = vst.msk [vmem:[#allocation2 + $0x8] sm:$0xf] %vm523_vm6, %v527_v56 }
  0xfb   : > { %693 = vrot.lane.b32.xlu1 %v3096_v57, %s5314_s12  ;;  %691 = vrot.lane.b32.xlu0 %v3095_v58, %s5314_s12 }
  0xfc   : > { %699 = vrot.lane.b32.xlu2 %v3095_v58, %s5236_s11 }
  0xfd   : > { %v487_v59 = vpop.permute.xlu1 %486  ;;  %v485_v60 = vpop.permute.xlu0 %484 }
  0xfe   : > { %492 = vst.msk [vmem:[#allocation2 + $0x4] sm:$0xf] %vm490_vm5, %v487_v59  ;;  %v537_v61 = vpop.permute.xlu2 %536 }
  0xff   : > { %491 = vst.msk [vmem:[#allocation2] sm:$0xf] %vm490_vm5, %v485_v60 }
 0x100   : > { %541 = vst.msk [vmem:[#allocation2 + $0x14] sm:$0xf] %vm523_vm6, %v537_v61 }
 0x103   : > { %707 = vrot.lane.b32.xlu1 %v3095_v58, %s5315_s17  ;;  %701 = vrot.lane.b32.xlu0 %v3096_v57, %s5236_s11  ;;  %s5318_s11 = smov 74   ;;  %v3113_v58 = vld [vmem:[%s3975_s8 + $0x50] sm:$0xf] }
 0x104   : > { %709 = vrot.lane.b32.xlu2 %v3096_v57, %s5315_s17  ;;  %v3114_v57 = vld [vmem:[%s3975_s8 + $0x54] sm:$0xf] }
 0x105   : > { %v502_v62 = vpop.permute.xlu1 %501  ;;  %v496_v63 = vpop.permute.xlu0 %495 }
 0x106   : > { %507 = vst.msk [vmem:[#allocation2 + $0x10] sm:$0xf] %vm490_vm5, %v502_v62  ;;  %v560_v0 = vpop.permute.xlu2 %559 }
 0x107   : > { %500 = vst.msk [vmem:[#allocation2 + $0xc] sm:$0xf] %vm490_vm5, %v496_v63 }
 0x108   : > { %565 = vst.msk [vmem:[#allocation2 + $0x8] sm:$0xf] %vm556_vm7, %v560_v0 }
 0x10b   : > { %721 = vrot.lane.b32.xlu1 %v3098_v1, %s5316_s24  ;;  %719 = vrot.lane.b32.xlu0 %v3097_v2, %s5316_s24 }
 0x10c   : > { %727 = vrot.lane.b32.xlu2 %v3097_v2, %s5317_s16 }
 0x10d   : > { %v520_v3 = vpop.permute.xlu1 %519  ;;  %v518_v4 = vpop.permute.xlu0 %517 }
 0x10e   : > { %525 = vst.msk [vmem:[#allocation2 + $0x4] sm:$0xf] %vm523_vm6, %v520_v3  ;;  %v570_v5 = vpop.permute.xlu2 %569 }
 0x10f   : > { %524 = vst.msk [vmem:[#allocation2] sm:$0xf] %vm523_vm6, %v518_v4 }
 0x110   : > { %574 = vst.msk [vmem:[#allocation2 + $0x14] sm:$0xf] %vm556_vm7, %v570_v5 }
 0x113   : > { %735 = vrot.lane.b32.xlu1 %v3097_v2, %s5318_s11  ;;  %729 = vrot.lane.b32.xlu0 %v3098_v1, %s5317_s16  ;;  %v3115_v2 = vld [vmem:[%s3975_s8 + $0x58] sm:$0xf] }
 0x114   : > { %737 = vrot.lane.b32.xlu2 %v3098_v1, %s5318_s11  ;;  %v3116_v1 = vld [vmem:[%s3975_s8 + $0x5c] sm:$0xf] }
 0x115   : > { %v535_v6 = vpop.permute.xlu1 %534  ;;  %v529_v7 = vpop.permute.xlu0 %528 }
 0x116   : > { %540 = vst.msk [vmem:[#allocation2 + $0x10] sm:$0xf] %vm523_vm6, %v535_v6  ;;  %v588_v8 = vpop.permute.xlu2 %587 }
 0x117   : > { %533 = vst.msk [vmem:[#allocation2 + $0xc] sm:$0xf] %vm523_vm6, %v529_v7 }
 0x118   : > { %593 = vst.msk [vmem:[#allocation2 + $0x20] sm:$0xf] %vm325_vm0, %v588_v8 }
 0x11b   : > { %749 = vrot.lane.b32.xlu1 %v3100_v9, %s5319_s26  ;;  %747 = vrot.lane.b32.xlu0 %v3099_v10, %s5319_s26 }
 0x11c   : > { %755 = vrot.lane.b32.xlu2 %v3099_v10, %s5280_s9 }
 0x11d   : > { %v553_v11 = vpop.permute.xlu1 %552  ;;  %v551_v12 = vpop.permute.xlu0 %550 }
 0x11e   : > { %558 = vst.msk [vmem:[#allocation2 + $0x4] sm:$0xf] %vm556_vm7, %v553_v11  ;;  %v598_v13 = vpop.permute.xlu2 %597 }
 0x11f   : > { %557 = vst.msk [vmem:[#allocation2] sm:$0xf] %vm556_vm7, %v551_v12 }
 0x120   : > { %602 = vst.msk [vmem:[#allocation2 + $0x2c] sm:$0xf] %vm325_vm0, %v598_v13 }
 0x123   : > { %763 = vrot.lane.b32.xlu1 %v3099_v10, %s5320_s30  ;;  %757 = vrot.lane.b32.xlu0 %v3100_v9, %s5280_s9  ;;  %v3117_v10 = vld [vmem:[%s3975_s8 + $0x60] sm:$0xf] }
 0x124   : > { %765 = vrot.lane.b32.xlu2 %v3100_v9, %s5320_s30  ;;  %v3118_v9 = vld [vmem:[%s3975_s8 + $0x64] sm:$0xf] }
 0x125   : > { %v568_v14 = vpop.permute.xlu1 %567  ;;  %v562_v15 = vpop.permute.xlu0 %561 }
 0x126   : > { %573 = vst.msk [vmem:[#allocation2 + $0x10] sm:$0xf] %vm556_vm7, %v568_v14  ;;  %v616_v16 = vpop.permute.xlu2 %615 }
 0x127   : > { %566 = vst.msk [vmem:[#allocation2 + $0xc] sm:$0xf] %vm556_vm7, %v562_v15 }
 0x128   : > { %621 = vst.msk [vmem:[#allocation2 + $0x20] sm:$0xf] %vm358_vm1, %v616_v16 }
 0x12b   : > { %781 = vrot.lane.b32.xlu1 %v3104_v17, %s3791_s13  ;;  %779 = vrot.lane.b32.xlu0 %v3103_v18, %s3791_s13 }
 0x12c   : > { %787 = vrot.lane.b32.xlu2 %v3103_v18, %s5244_s29 }
 0x12d   : > { %v582_v19 = vpop.permute.xlu1 %581  ;;  %v580_v20 = vpop.permute.xlu0 %579 }
 0x12e   : > { %586 = vst.msk [vmem:[#allocation2 + $0x1c] sm:$0xf] %vm325_vm0, %v582_v19  ;;  %v626_v21 = vpop.permute.xlu2 %625 }
 0x12f   : > { %585 = vst.msk [vmem:[#allocation2 + $0x18] sm:$0xf] %vm325_vm0, %v580_v20 }
 0x130   : > { %630 = vst.msk [vmem:[#allocation2 + $0x2c] sm:$0xf] %vm358_vm1, %v626_v21 }
 0x133   : > { %795 = vrot.lane.b32.xlu1 %v3103_v18, %s5242_s15  ;;  %789 = vrot.lane.b32.xlu0 %v3104_v17, %s5244_s29  ;;  %s5323_s29 = smov 11   ;;  %v3121_v18 = vld [vmem:[%s3975_s8 + $0x68] sm:$0xf] }
 0x134   : > { %797 = vrot.lane.b32.xlu2 %v3104_v17, %s5242_s15  ;;  %s5321_s15 = smov 122   ;;  %v3122_v17 = vld [vmem:[%s3975_s8 + $0x6c] sm:$0xf] }
 0x135   : > { %v596_v22 = vpop.permute.xlu1 %595  ;;  %v590_v23 = vpop.permute.xlu0 %589 }
 0x136   : > { %601 = vst.msk [vmem:[#allocation2 + $0x28] sm:$0xf] %vm325_vm0, %v596_v22  ;;  %v644_v24 = vpop.permute.xlu2 %643 }
 0x137   : > { %594 = vst.msk [vmem:[#allocation2 + $0x24] sm:$0xf] %vm325_vm0, %v590_v23 }
 0x138   : > { %649 = vst.msk [vmem:[#allocation2 + $0x20] sm:$0xf] %vm391_vm2, %v644_v24 }
 0x13b   : > { %809 = vrot.lane.b32.xlu1 %v3106_v25, %s3771_s20  ;;  %807 = vrot.lane.b32.xlu0 %v3105_v26, %s3771_s20  ;;  %s5322_s20 = smov 12  }
 0x13c   : > { %815 = vrot.lane.b32.xlu2 %v3105_v26, %s5246_s23 }
 0x13d   : > { %v610_v27 = vpop.permute.xlu1 %609  ;;  %v608_v28 = vpop.permute.xlu0 %607 }
 0x13e   : > { %614 = vst.msk [vmem:[#allocation2 + $0x1c] sm:$0xf] %vm358_vm1, %v610_v27  ;;  %v654_v29 = vpop.permute.xlu2 %653 }
 0x13f   : > { %613 = vst.msk [vmem:[#allocation2 + $0x18] sm:$0xf] %vm358_vm1, %v608_v28 }
 0x140   : > { %658 = vst.msk [vmem:[#allocation2 + $0x2c] sm:$0xf] %vm391_vm2, %v654_v29 }
 0x143   : > { %823 = vrot.lane.b32.xlu1 %v3105_v26, %s5321_s15  ;;  %817 = vrot.lane.b32.xlu0 %v3106_v25, %s5246_s23  ;;  %s5326_s23 = smov 27   ;;  %v3125_v26 = vld [vmem:[%s3975_s8 + $0x10] sm:$0xf] }
 0x144   : > { %825 = vrot.lane.b32.xlu2 %v3106_v25, %s5321_s15  ;;  %s5324_s15 = smov 10   ;;  %v3126_v25 = vld [vmem:[%s3975_s8 + $0x14] sm:$0xf] }
 0x145   : > { %v624_v30 = vpop.permute.xlu1 %623  ;;  %v618_v31 = vpop.permute.xlu0 %617 }
 0x146   : > { %629 = vst.msk [vmem:[#allocation2 + $0x28] sm:$0xf] %vm358_vm1, %v624_v30  ;;  %v672_v32 = vpop.permute.xlu2 %671 }
 0x147   : > { %622 = vst.msk [vmem:[#allocation2 + $0x24] sm:$0xf] %vm358_vm1, %v618_v31 }
 0x148   : > { %677 = vst.msk [vmem:[#allocation2 + $0x20] sm:$0xf] %vm424_vm3, %v672_v32 }
 0x14b   : > { %837 = vrot.lane.b32.xlu1 %v3108_v33, %s5322_s20  ;;  %835 = vrot.lane.b32.xlu0 %v3107_v34, %s5322_s20  ;;  %s5325_s20 = smov 28  }
 0x14c   : > { %843 = vrot.lane.b32.xlu2 %v3107_v34, %s5323_s29 }
 0x14d   : > { %v638_v35 = vpop.permute.xlu1 %637  ;;  %v636_v36 = vpop.permute.xlu0 %635 }
 0x14e   : > { %642 = vst.msk [vmem:[#allocation2 + $0x1c] sm:$0xf] %vm391_vm2, %v638_v35  ;;  %v682_v37 = vpop.permute.xlu2 %681 }
 0x14f   : > { %641 = vst.msk [vmem:[#allocation2 + $0x18] sm:$0xf] %vm391_vm2, %v636_v36 }
 0x150   : > { %686 = vst.msk [vmem:[#allocation2 + $0x2c] sm:$0xf] %vm424_vm3, %v682_v37 }
 0x153   : > { %851 = vrot.lane.b32.xlu1 %v3107_v34, %s5324_s15  ;;  %845 = vrot.lane.b32.xlu0 %v3108_v33, %s5323_s29  ;;  %v3129_v34 = vld [vmem:[%s3975_s8 + $0x18] sm:$0xf] }
 0x154   : > { %853 = vrot.lane.b32.xlu2 %v3108_v33, %s5324_s15  ;;  %s5327_s15 = smov 26   ;;  %v3130_v33 = vld [vmem:[%s3975_s8 + $0x1c] sm:$0xf] }
 0x155   : > { %v652_v38 = vpop.permute.xlu1 %651  ;;  %v646_v39 = vpop.permute.xlu0 %645 }
 0x156   : > { %657 = vst.msk [vmem:[#allocation2 + $0x28] sm:$0xf] %vm391_vm2, %v652_v38  ;;  %v700_v40 = vpop.permute.xlu2 %699 }
 0x157   : > { %650 = vst.msk [vmem:[#allocation2 + $0x24] sm:$0xf] %vm391_vm2, %v646_v39 }
 0x158   : > { %705 = vst.msk [vmem:[#allocation2 + $0x20] sm:$0xf] %vm457_vm4, %v700_v40 }
 0x15b   : > { %865 = vrot.lane.b32.xlu1 %v3110_v41, %s5325_s20  ;;  %863 = vrot.lane.b32.xlu0 %v3109_v42, %s5325_s20  ;;  %s5328_s20 = smov 44  }
 0x15c   : > { %871 = vrot.lane.b32.xlu2 %v3109_v42, %s5326_s23 }
 0x15d   : > { %v666_v43 = vpop.permute.xlu1 %665  ;;  %v664_v44 = vpop.permute.xlu0 %663 }
 0x15e   : > { %670 = vst.msk [vmem:[#allocation2 + $0x1c] sm:$0xf] %vm424_vm3, %v666_v43  ;;  %v710_v45 = vpop.permute.xlu2 %709 }
 0x15f   : > { %669 = vst.msk [vmem:[#allocation2 + $0x18] sm:$0xf] %vm424_vm3, %v664_v44 }
 0x160   : > { %714 = vst.msk [vmem:[#allocation2 + $0x2c] sm:$0xf] %vm457_vm4, %v710_v45 }
 0x163   : > { %879 = vrot.lane.b32.xlu1 %v3109_v42, %s5327_s15  ;;  %873 = vrot.lane.b32.xlu0 %v3110_v41, %s5326_s23  ;;  %v3131_v42 = vld [vmem:[%s3975_s8 + $0x20] sm:$0xf] }
 0x164   : > { %881 = vrot.lane.b32.xlu2 %v3110_v41, %s5327_s15  ;;  %s5329_s15 = smov 59   ;;  %v3132_v41 = vld [vmem:[%s3975_s8 + $0x24] sm:$0xf] }
 0x165   : > { %v680_v46 = vpop.permute.xlu1 %679  ;;  %v674_v47 = vpop.permute.xlu0 %673 }
 0x166   : > { %685 = vst.msk [vmem:[#allocation2 + $0x28] sm:$0xf] %vm424_vm3, %v680_v46  ;;  %v728_v48 = vpop.permute.xlu2 %727 }
 0x167   : > { %678 = vst.msk [vmem:[#allocation2 + $0x24] sm:$0xf] %vm424_vm3, %v674_v47 }
 0x168   : > { %733 = vst.msk [vmem:[#allocation2 + $0x20] sm:$0xf] %vm490_vm5, %v728_v48 }
 0x16b   : > { %893 = vrot.lane.b32.xlu1 %v3112_v49, %s5328_s20  ;;  %891 = vrot.lane.b32.xlu0 %v3111_v50, %s5328_s20  ;;  %s5333_s20 = smov 123  }
 0x16c   : > { %899 = vrot.lane.b32.xlu2 %v3111_v50, %s5312_s14 }
 0x16d   : > { %v694_v51 = vpop.permute.xlu1 %693  ;;  %v692_v52 = vpop.permute.xlu0 %691 }
 0x16e   : > { %698 = vst.msk [vmem:[#allocation2 + $0x1c] sm:$0xf] %vm457_vm4, %v694_v51  ;;  %v738_v53 = vpop.permute.xlu2 %737 }
 0x16f   : > { %697 = vst.msk [vmem:[#allocation2 + $0x18] sm:$0xf] %vm457_vm4, %v692_v52 }
 0x170   : > { %742 = vst.msk [vmem:[#allocation2 + $0x2c] sm:$0xf] %vm490_vm5, %v738_v53 }
 0x173   : > { %907 = vrot.lane.b32.xlu1 %v3111_v50, %s5313_s18  ;;  %901 = vrot.lane.b32.xlu0 %v3112_v49, %s5312_s14  ;;  %v3133_v50 = vld [vmem:[%s3975_s8 + $0x28] sm:$0xf] }
 0x174   : > { %909 = vrot.lane.b32.xlu2 %v3112_v49, %s5313_s18  ;;  %s5248_s18 = smov 30   ;;  %v3134_v49 = vld [vmem:[%s3975_s8 + $0x2c] sm:$0xf] }
 0x175   : > { %v708_v54 = vpop.permute.xlu1 %707  ;;  %v702_v55 = vpop.permute.xlu0 %701 }
 0x176   : > { %713 = vst.msk [vmem:[#allocation2 + $0x28] sm:$0xf] %vm457_vm4, %v708_v54  ;;  %v756_v56 = vpop.permute.xlu2 %755 }
 0x177   : > { %706 = vst.msk [vmem:[#allocation2 + $0x24] sm:$0xf] %vm457_vm4, %v702_v55 }
 0x178   : > { %761 = vst.msk [vmem:[#allocation2 + $0x20] sm:$0xf] %vm523_vm6, %v756_v56 }
 0x17b   : > { %921 = vrot.lane.b32.xlu1 %v3114_v57, %s5314_s12  ;;  %919 = vrot.lane.b32.xlu0 %v3113_v58, %s5314_s12  ;;  %s5250_s12 = smov 24  }
 0x17c   : > { %927 = vrot.lane.b32.xlu2 %v3113_v58, %s5329_s15 }
 0x17d   : > { %v722_v59 = vpop.permute.xlu1 %721  ;;  %v720_v60 = vpop.permute.xlu0 %719 }
 0x17e   : > { %726 = vst.msk [vmem:[#allocation2 + $0x1c] sm:$0xf] %vm490_vm5, %v722_v59  ;;  %v766_v61 = vpop.permute.xlu2 %765 }
 0x17f   : > { %725 = vst.msk [vmem:[#allocation2 + $0x18] sm:$0xf] %vm490_vm5, %v720_v60 }
 0x180   : > { %770 = vst.msk [vmem:[#allocation2 + $0x2c] sm:$0xf] %vm523_vm6, %v766_v61 }
 0x183   : > { %935 = vrot.lane.b32.xlu1 %v3113_v58, %s5315_s17  ;;  %929 = vrot.lane.b32.xlu0 %v3114_v57, %s5329_s15  ;;  %v3135_v58 = vld [vmem:[%s3975_s8 + $0x30] sm:$0xf] }
 0x184   : > { %937 = vrot.lane.b32.xlu2 %v3114_v57, %s5315_s17  ;;  %v3136_v57 = vld [vmem:[%s3975_s8 + $0x34] sm:$0xf] }
 0x185   : > { %v736_v62 = vpop.permute.xlu1 %735  ;;  %v730_v63 = vpop.permute.xlu0 %729 }
 0x186   : > { %741 = vst.msk [vmem:[#allocation2 + $0x28] sm:$0xf] %vm490_vm5, %v736_v62  ;;  %v788_v0 = vpop.permute.xlu2 %787 }
 0x187   : > { %734 = vst.msk [vmem:[#allocation2 + $0x24] sm:$0xf] %vm490_vm5, %v730_v63 }
 0x188   : > { %793 = vst.msk [vmem:[#allocation2 + $0x20] sm:$0xf] %vm556_vm7, %v788_v0 }
 0x18b   : > { %949 = vrot.lane.b32.xlu1 %v3116_v1, %s5316_s24  ;;  %947 = vrot.lane.b32.xlu0 %v3115_v2, %s5316_s24  ;;  %s5331_s24 = smov 106  }
 0x18c   : > { %955 = vrot.lane.b32.xlu2 %v3115_v2, %s5317_s16 }
 0x18d   : > { %v750_v3 = vpop.permute.xlu1 %749  ;;  %v748_v4 = vpop.permute.xlu0 %747 }
 0x18e   : > { %754 = vst.msk [vmem:[#allocation2 + $0x1c] sm:$0xf] %vm523_vm6, %v750_v3  ;;  %v798_v5 = vpop.permute.xlu2 %797 }
 0x18f   : > { %753 = vst.msk [vmem:[#allocation2 + $0x18] sm:$0xf] %vm523_vm6, %v748_v4 }
 0x190   : > { %802 = vst.msk [vmem:[#allocation2 + $0x2c] sm:$0xf] %vm556_vm7, %v798_v5 }
 0x193   : > { %963 = vrot.lane.b32.xlu1 %v3115_v2, %s5318_s11  ;;  %957 = vrot.lane.b32.xlu0 %v3116_v1, %s5317_s16  ;;  %v3137_v2 = vld [vmem:[%s3975_s8 + $0x38] sm:$0xf] }
 0x194   : > { %965 = vrot.lane.b32.xlu2 %v3116_v1, %s5318_s11  ;;  %s5274_s11 = smov 126   ;;  %v3138_v1 = vld [vmem:[%s3975_s8 + $0x3c] sm:$0xf] }
 0x195   : > { %v764_v6 = vpop.permute.xlu1 %763  ;;  %v758_v7 = vpop.permute.xlu0 %757 }
 0x196   : > { %769 = vst.msk [vmem:[#allocation2 + $0x28] sm:$0xf] %vm523_vm6, %v764_v6  ;;  %v816_v8 = vpop.permute.xlu2 %815 }
 0x197   : > { %762 = vst.msk [vmem:[#allocation2 + $0x24] sm:$0xf] %vm523_vm6, %v758_v7 }
 0x198   : > { %821 = vst.msk [vmem:[#allocation2 + $0x38] sm:$0xf] %vm325_vm0, %v816_v8 }
 0x19b   : > { %977 = vrot.lane.b32.xlu1 %v3118_v9, %s5319_s26  ;;  %975 = vrot.lane.b32.xlu0 %v3117_v10, %s5319_s26  ;;  %s5330_s26 = smov 107  }
 0x19c   : > { %983 = vrot.lane.b32.xlu2 %v3117_v10, %s5280_s9 }
 0x19d   : > { %v782_v11 = vpop.permute.xlu1 %781  ;;  %v780_v12 = vpop.permute.xlu0 %779 }
 0x19e   : > { %786 = vst.msk [vmem:[#allocation2 + $0x1c] sm:$0xf] %vm556_vm7, %v782_v11  ;;  %v826_v13 = vpop.permute.xlu2 %825 }
 0x19f   : > { %785 = vst.msk [vmem:[#allocation2 + $0x18] sm:$0xf] %vm556_vm7, %v780_v12 }
 0x1a0   : > { %830 = vst.msk [vmem:[#allocation2 + $0x44] sm:$0xf] %vm325_vm0, %v826_v13 }
 0x1a3   : > { %991 = vrot.lane.b32.xlu1 %v3117_v10, %s5320_s30  ;;  %985 = vrot.lane.b32.xlu0 %v3118_v9, %s5280_s9  ;;  %v3139_v10 = vld [vmem:[%s3975_s8 + $0x40] sm:$0xf] }
 0x1a4   : > { %993 = vrot.lane.b32.xlu2 %v3118_v9, %s5320_s30  ;;  %s306_s30 = scalar_select %p305_p3, %s3754_s28, 1  ;;  %v3140_v9 = vld [vmem:[%s3975_s8 + $0x44] sm:$0xf] }
 0x1a5   : > { %v796_v14 = vpop.permute.xlu1 %795  ;;  %v790_v15 = vpop.permute.xlu0 %789 }
 0x1a6   : > { %801 = vst.msk [vmem:[#allocation2 + $0x28] sm:$0xf] %vm556_vm7, %v796_v14  ;;  %v844_v16 = vpop.permute.xlu2 %843  ;;  %s3053_s17 = sshll.u32 %s306_s30, 2  ;;  %s5272_s30 = smov 120  }
 0x1a7   : > { %794 = vst.msk [vmem:[#allocation2 + $0x24] sm:$0xf] %vm556_vm7, %v790_v15 }
 0x1a8   : > { %849 = vst.msk [vmem:[#allocation2 + $0x38] sm:$0xf] %vm358_vm1, %v844_v16 }
 0x1ab   : > { %1009 = vrot.lane.b32.xlu1 %v3122_v17, %s3791_s13  ;;  %1007 = vrot.lane.b32.xlu0 %v3121_v18, %s3791_s13  ;;  %s4276_s13 = scalar_lea.vmem %s5332_s6, %s3053_s17  ;;  %s5270_s17 = smov 8  }
 0x1ac   : > { %1015 = vrot.lane.b32.xlu2 %v3121_v18, %s5330_s26  ;;  %s5342_s6 = smov 94  }
 0x1ad   : > { %v810_v19 = vpop.permute.xlu1 %809  ;;  %v808_v20 = vpop.permute.xlu0 %807 }
 0x1ae   : > { %814 = vst.msk [vmem:[#allocation2 + $0x34] sm:$0xf] %vm325_vm0, %v810_v19  ;;  %v854_v21 = vpop.permute.xlu2 %853 }
 0x1af   : > { %813 = vst.msk [vmem:[#allocation2 + $0x30] sm:$0xf] %vm325_vm0, %v808_v20 }
 0x1b0   : > { %858 = vst.msk [vmem:[#allocation2 + $0x44] sm:$0xf] %vm358_vm1, %v854_v21 }
 0x1b3   : > { %1023 = vrot.lane.b32.xlu1 %v3121_v18, %s5331_s24  ;;  %1017 = vrot.lane.b32.xlu0 %v3122_v17, %s5330_s26  ;;  %v3141_v18 = vld [vmem:[%s3975_s8 + $0x48] sm:$0xf] }
 0x1b4   : > { %1025 = vrot.lane.b32.xlu2 %v3122_v17, %s5331_s24  ;;  %s5268_s24 = smov 14   ;;  %v3142_v17 = vld [vmem:[%s3975_s8 + $0x4c] sm:$0xf] }
 0x1b5   : > { %v824_v22 = vpop.permute.xlu1 %823  ;;  %v818_v23 = vpop.permute.xlu0 %817 }
 0x1b6   : > { %829 = vst.msk [vmem:[#allocation2 + $0x40] sm:$0xf] %vm325_vm0, %v824_v22  ;;  %v872_v24 = vpop.permute.xlu2 %871 }
 0x1b7   : > { %822 = vst.msk [vmem:[#allocation2 + $0x3c] sm:$0xf] %vm325_vm0, %v818_v23 }
 0x1b8   : > { %877 = vst.msk [vmem:[#allocation2 + $0x38] sm:$0xf] %vm391_vm2, %v872_v24 }
 0x1bb   : > { %1041 = vrot.lane.b32.xlu1 %v3126_v25, %s5274_s11  ;;  %1039 = vrot.lane.b32.xlu0 %v3125_v26, %s5274_s11 }
 0x1bc   : > { %1047 = vrot.lane.b32.xlu2 %v3125_v26, %s5333_s20 }
 0x1bd   : > { %v838_v27 = vpop.permute.xlu1 %837  ;;  %v836_v28 = vpop.permute.xlu0 %835 }
 0x1be   : > { %842 = vst.msk [vmem:[#allocation2 + $0x34] sm:$0xf] %vm358_vm1, %v838_v27  ;;  %v882_v29 = vpop.permute.xlu2 %881  ;;  %v3388_v27 = vld [vmem:[#allocation2 + $0x28] sm:$0xff] }
 0x1bf   : > { %841 = vst.msk [vmem:[#allocation2 + $0x30] sm:$0xf] %vm358_vm1, %v836_v28 }
 0x1c0   : > { %886 = vst.msk [vmem:[#allocation2 + $0x44] sm:$0xf] %vm391_vm2, %v882_v29  ;;  %v3144_v29 = vld [vmem:[%s3975_s8 + $0x2c] sm:$0xf] }
 0x1c3   : > { %1055 = vrot.lane.b32.xlu1 %v3125_v26, %s5272_s30  ;;  %1049 = vrot.lane.b32.xlu0 %v3126_v25, %s5333_s20 }
 0x1c4   : > { %1057 = vrot.lane.b32.xlu2 %v3126_v25, %s5272_s30 }
 0x1c5   : > { %v852_v30 = vpop.permute.xlu1 %851  ;;  %v846_v31 = vpop.permute.xlu0 %845 }
 0x1c6   : > { %857 = vst.msk [vmem:[#allocation2 + $0x40] sm:$0xf] %vm358_vm1, %v852_v30  ;;  %v900_v32 = vpop.permute.xlu2 %899  ;;  %v3143_v30 = vld [vmem:[%s3975_s8 + $0x28] sm:$0xf] }
 0x1c7   : > { %850 = vst.msk [vmem:[#allocation2 + $0x3c] sm:$0xf] %vm358_vm1, %v846_v31  ;;  %v3387_v31 = vld [vmem:[#allocation2 + $0x20] sm:$0xff] }
 0x1c8   : > { %905 = vst.msk [vmem:[#allocation2 + $0x38] sm:$0xf] %vm424_vm3, %v900_v32 }
 0x1cb   : > { %1073 = vrot.lane.b32.xlu1 %v3130_v33, %s5268_s24  ;;  %1071 = vrot.lane.b32.xlu0 %v3129_v34, %s5268_s24 }
 0x1cc   : > { %1079 = vrot.lane.b32.xlu2 %v3129_v34, %s5323_s29 }
 0x1cd   : > { %v866_v35 = vpop.permute.xlu1 %865  ;;  %v864_v36 = vpop.permute.xlu0 %863 }
 0x1ce   : > { %870 = vst.msk [vmem:[#allocation2 + $0x34] sm:$0xf] %vm391_vm2, %v866_v35  ;;  %v910_v37 = vpop.permute.xlu2 %909 }
 0x1cf   : > { %869 = vst.msk [vmem:[#allocation2 + $0x30] sm:$0xf] %vm391_vm2, %v864_v36  ;;  %v3385_v36 = vld [vmem:[#allocation2 + $0x10] sm:$0xff] }
 0x1d0   : > { %914 = vst.msk [vmem:[#allocation2 + $0x44] sm:$0xf] %vm424_vm3, %v910_v37 }
 0x1d3   : > { %1087 = vrot.lane.b32.xlu1 %v3129_v34, %s5270_s17  ;;  %1081 = vrot.lane.b32.xlu0 %v3130_v33, %s5323_s29  ;;  %v3386_v34 = vld [vmem:[#allocation2 + $0x18] sm:$0xff] }
 0x1d4   : > { %1089 = vrot.lane.b32.xlu2 %v3130_v33, %s5270_s17 }
 0x1d5   : > { %v880_v38 = vpop.permute.xlu1 %879  ;;  %v874_v39 = vpop.permute.xlu0 %873 }
 0x1d6   : > { %885 = vst.msk [vmem:[#allocation2 + $0x40] sm:$0xf] %vm391_vm2, %v880_v38  ;;  %v928_v40 = vpop.permute.xlu2 %927 }
 0x1d7   : > { %878 = vst.msk [vmem:[#allocation2 + $0x3c] sm:$0xf] %vm391_vm2, %v874_v39  ;;  %v3384_v39 = vld [vmem:[#allocation2 + $0x8] sm:$0xff] }
 0x1d8   : > { %933 = vst.msk [vmem:[#allocation2 + $0x38] sm:$0xf] %vm457_vm4, %v928_v40 }
 0x1db   : > { %1101 = vrot.lane.b32.xlu1 %v3132_v41, %s5248_s18  ;;  %1099 = vrot.lane.b32.xlu0 %v3131_v42, %s5248_s18  ;;  %s5252_s18 = smov 46  }
 0x1dc   : > { %1107 = vrot.lane.b32.xlu2 %v3131_v42, %s5326_s23 }
 0x1dd   : > { %v894_v43 = vpop.permute.xlu1 %893  ;;  %v892_v44 = vpop.permute.xlu0 %891 }
 0x1de   : > { %898 = vst.msk [vmem:[#allocation2 + $0x34] sm:$0xf] %vm424_vm3, %v894_v43  ;;  %v938_v45 = vpop.permute.xlu2 %937  ;;  %v3383_v43 = vld [vmem:[#allocation2] sm:$0xff] }
 0x1df   : > { %897 = vst.msk [vmem:[#allocation2 + $0x30] sm:$0xf] %vm424_vm3, %v892_v44 }
 0x1e0   : > { %942 = vst.msk [vmem:[#allocation2 + $0x44] sm:$0xf] %vm457_vm4, %v938_v45 }
 0x1e3   : > { %1115 = vrot.lane.b32.xlu1 %v3131_v42, %s5250_s12  ;;  %1109 = vrot.lane.b32.xlu0 %v3132_v41, %s5326_s23  ;;  %v3145_v42 = vld [vmem:[%s3975_s8 + $0x30] sm:$0xf] }
 0x1e4   : > { %1117 = vrot.lane.b32.xlu2 %v3132_v41, %s5250_s12  ;;  %s5254_s12 = smov 40   ;;  %v3146_v41 = vld [vmem:[%s3975_s8 + $0x34] sm:$0xf] }
 0x1e5   : > { %v908_v46 = vpop.permute.xlu1 %907  ;;  %v902_v47 = vpop.permute.xlu0 %901 }
 0x1e6   : > { %913 = vst.msk [vmem:[#allocation2 + $0x40] sm:$0xf] %vm424_vm3, %v908_v46  ;;  %v956_v48 = vpop.permute.xlu2 %955 }
 0x1e7   : > { %906 = vst.msk [vmem:[#allocation2 + $0x3c] sm:$0xf] %vm424_vm3, %v902_v47 }
 0x1e8   : > { %961 = vst.msk [vmem:[#allocation2 + $0x38] sm:$0xf] %vm490_vm5, %v956_v48 }
 0x1eb   : > { %1129 = vrot.lane.b32.xlu1 %v3134_v49, %s5252_s18  ;;  %1127 = vrot.lane.b32.xlu0 %v3133_v50, %s5252_s18  ;;  %s5256_s18 = smov 62  }
 0x1ec   : > { %1135 = vrot.lane.b32.xlu2 %v3133_v50, %s5312_s14 }
 0x1ed   : > { %v922_v51 = vpop.permute.xlu1 %921  ;;  %v920_v52 = vpop.permute.xlu0 %919 }
 0x1ee   : > { %926 = vst.msk [vmem:[#allocation2 + $0x34] sm:$0xf] %vm457_vm4, %v922_v51  ;;  %v966_v53 = vpop.permute.xlu2 %965  ;;  %v3147_v51 = vld [vmem:[%s3975_s8 + $0x38] sm:$0xf] }
 0x1ef   : > { %925 = vst.msk [vmem:[#allocation2 + $0x30] sm:$0xf] %vm457_vm4, %v920_v52 }
 0x1f0   : > { %970 = vst.msk [vmem:[#allocation2 + $0x44] sm:$0xf] %vm490_vm5, %v966_v53 }
 0x1f3   : > { %1143 = vrot.lane.b32.xlu1 %v3133_v50, %s5254_s12  ;;  %1137 = vrot.lane.b32.xlu0 %v3134_v49, %s5312_s14  ;;  %v3148_v50 = vld [vmem:[%s3975_s8 + $0x3c] sm:$0xf] }
 0x1f4   : > { %1145 = vrot.lane.b32.xlu2 %v3134_v49, %s5254_s12  ;;  %s5258_s12 = smov 56  }
 0x1f5   : > { %v936_v54 = vpop.permute.xlu1 %935  ;;  %v930_v55 = vpop.permute.xlu0 %929 }
 0x1f6   : > { %941 = vst.msk [vmem:[#allocation2 + $0x40] sm:$0xf] %vm457_vm4, %v936_v54  ;;  %v984_v56 = vpop.permute.xlu2 %983 }
 0x1f7   : > { %934 = vst.msk [vmem:[#allocation2 + $0x3c] sm:$0xf] %vm457_vm4, %v930_v55 }
 0x1f8   : > { %989 = vst.msk [vmem:[#allocation2 + $0x38] sm:$0xf] %vm523_vm6, %v984_v56 }
 0x1fb   : > { %1157 = vrot.lane.b32.xlu1 %v3136_v57, %s5256_s18  ;;  %1155 = vrot.lane.b32.xlu0 %v3135_v58, %s5256_s18  ;;  %s5260_s18 = smov 78  }
 0x1fc   : > { %1163 = vrot.lane.b32.xlu2 %v3135_v58, %s5329_s15 }
 0x1fd   : > { %v950_v59 = vpop.permute.xlu1 %949  ;;  %v948_v60 = vpop.permute.xlu0 %947 }
 0x1fe   : > { %954 = vst.msk [vmem:[#allocation2 + $0x34] sm:$0xf] %vm490_vm5, %v950_v59  ;;  %v994_v61 = vpop.permute.xlu2 %993  ;;  %v3149_v59 = vld [vmem:[%s3975_s8 + $0x40] sm:$0xf] }
 0x1ff   : > { %953 = vst.msk [vmem:[#allocation2 + $0x30] sm:$0xf] %vm490_vm5, %v948_v60 }
 0x200   : > { %998 = vst.msk [vmem:[#allocation2 + $0x44] sm:$0xf] %vm523_vm6, %v994_v61 }
 0x203   : > { %1171 = vrot.lane.b32.xlu1 %v3135_v58, %s5258_s12  ;;  %1165 = vrot.lane.b32.xlu0 %v3136_v57, %s5329_s15  ;;  %v3150_v58 = vld [vmem:[%s3975_s8 + $0x44] sm:$0xf] }
 0x204   : > { %1173 = vrot.lane.b32.xlu2 %v3136_v57, %s5258_s12  ;;  %s5262_s12 = smov 72  }
 0x205   : > { %v964_v62 = vpop.permute.xlu1 %963  ;;  %v958_v63 = vpop.permute.xlu0 %957 }
 0x206   : > { %969 = vst.msk [vmem:[#allocation2 + $0x40] sm:$0xf] %vm490_vm5, %v964_v62  ;;  %v1016_v0 = vpop.permute.xlu2 %1015 }
 0x207   : > { %962 = vst.msk [vmem:[#allocation2 + $0x3c] sm:$0xf] %vm490_vm5, %v958_v63 }
 0x208   : > { %1021 = vst.msk [vmem:[#allocation2 + $0x38] sm:$0xf] %vm556_vm7, %v1016_v0 }
 0x20b   : > { %1185 = vrot.lane.b32.xlu1 %v3138_v1, %s5260_s18  ;;  %1183 = vrot.lane.b32.xlu0 %v3137_v2, %s5260_s18  ;;  %s5264_s18 = smov 94  }
 0x20c   : > { %1191 = vrot.lane.b32.xlu2 %v3137_v2, %s5317_s16 }
 0x20d   : > { %v978_v3 = vpop.permute.xlu1 %977  ;;  %v976_v4 = vpop.permute.xlu0 %975 }
 0x20e   : > { %982 = vst.msk [vmem:[#allocation2 + $0x34] sm:$0xf] %vm523_vm6, %v978_v3  ;;  %v1026_v5 = vpop.permute.xlu2 %1025  ;;  %v3151_v3 = vld [vmem:[%s3975_s8 + $0x48] sm:$0xf] }
 0x20f   : > { %981 = vst.msk [vmem:[#allocation2 + $0x30] sm:$0xf] %vm523_vm6, %v976_v4 }
 0x210   : > { %1030 = vst.msk [vmem:[#allocation2 + $0x44] sm:$0xf] %vm556_vm7, %v1026_v5 }
 0x213   : > { %1199 = vrot.lane.b32.xlu1 %v3137_v2, %s5262_s12  ;;  %1193 = vrot.lane.b32.xlu0 %v3138_v1, %s5317_s16  ;;  %v3152_v2 = vld [vmem:[%s3975_s8 + $0x4c] sm:$0xf] }
 0x214   : > { %1201 = vrot.lane.b32.xlu2 %v3138_v1, %s5262_s12  ;;  %s5266_s12 = smov 88  }
 0x215   : > { %v992_v6 = vpop.permute.xlu1 %991  ;;  %v986_v7 = vpop.permute.xlu0 %985 }
 0x216   : > { %997 = vst.msk [vmem:[#allocation2 + $0x40] sm:$0xf] %vm523_vm6, %v992_v6  ;;  %v1048_v8 = vpop.permute.xlu2 %1047 }
 0x217   : > { %990 = vst.msk [vmem:[#allocation2 + $0x3c] sm:$0xf] %vm523_vm6, %v986_v7 }
 0x218   : > { %1053 = vst.msk [vmem:[#allocation2 + $0x50] sm:$0xf] %vm325_vm0, %v1048_v8 }
 0x21b   : > { %1213 = vrot.lane.b32.xlu1 %v3140_v9, %s5264_s18  ;;  %1211 = vrot.lane.b32.xlu0 %v3139_v10, %s5264_s18  ;;  %s5278_s18 = smov 110  }
 0x21c   : > { %1219 = vrot.lane.b32.xlu2 %v3139_v10, %s5280_s9 }
 0x21d   : > { %v1010_v11 = vpop.permute.xlu1 %1009  ;;  %v1008_v12 = vpop.permute.xlu0 %1007 }
 0x21e   : > { %1014 = vst.msk [vmem:[#allocation2 + $0x34] sm:$0xf] %vm556_vm7, %v1010_v11  ;;  %v1058_v13 = vpop.permute.xlu2 %1057  ;;  %v3153_v11 = vld [vmem:[%s3975_s8 + $0x50] sm:$0xf] }
 0x21f   : > { %1013 = vst.msk [vmem:[#allocation2 + $0x30] sm:$0xf] %vm556_vm7, %v1008_v12 }
 0x220   : > { %1062 = vst.msk [vmem:[#allocation2 + $0x5c] sm:$0xf] %vm325_vm0, %v1058_v13 }
 0x223   : > { %1227 = vrot.lane.b32.xlu1 %v3139_v10, %s5266_s12  ;;  %1221 = vrot.lane.b32.xlu0 %v3140_v9, %s5280_s9  ;;  %v3154_v10 = vld [vmem:[%s3975_s8 + $0x54] sm:$0xf]  ;;  %s5340_s9 = smov 78  }
 0x224   : > { %1229 = vrot.lane.b32.xlu2 %v3140_v9, %s5266_s12  ;;  %s5276_s12 = smov 104  }
 0x225   : > { %v1024_v14 = vpop.permute.xlu1 %1023  ;;  %v1018_v15 = vpop.permute.xlu0 %1017 }
 0x226   : > { %1029 = vst.msk [vmem:[#allocation2 + $0x40] sm:$0xf] %vm556_vm7, %v1024_v14  ;;  %v1080_v16 = vpop.permute.xlu2 %1079  ;;  %v3389_v24 = vld [vmem:[#allocation2 + $0x30] sm:$0xff] }
 0x227   : > { %1022 = vst.msk [vmem:[#allocation2 + $0x3c] sm:$0xf] %vm556_vm7, %v1018_v15 }
 0x228   : > { %1085 = vst.msk [vmem:[#allocation2 + $0x50] sm:$0xf] %vm358_vm1, %v1080_v16 }
 0x22b   : > { %1241 = vrot.lane.b32.xlu1 %v3142_v17, %s5278_s18  ;;  %1239 = vrot.lane.b32.xlu0 %v3141_v18, %s5278_s18  ;;  %s5339_s18 = smov 56  }
 0x22c   : > { %1247 = vrot.lane.b32.xlu2 %v3141_v18, %s5330_s26 }
 0x22d   : > { %v1042_v19 = vpop.permute.xlu1 %1041  ;;  %v1040_v20 = vpop.permute.xlu0 %1039  ;;  %v3391_v21 = vld [vmem:[#allocation2 + $0x40] sm:$0xff] }
 0x22e   : > { %1046 = vst.msk [vmem:[#allocation2 + $0x4c] sm:$0xf] %vm325_vm0, %v1042_v19  ;;  %v3390_v22 = vld [vmem:[#allocation2 + $0x38] sm:$0xff]  ;;  %v1090_v23 = vpop.permute.xlu2 %1089  ;;  %2495 = vmatpush.bf16.msra.mxu1 %v3391_v21  ;;  %v3155_v19 = vld [vmem:[%s3975_s8 + $0x58] sm:$0xf] }
 0x22f   : > { %1045 = vst.msk [vmem:[#allocation2 + $0x48] sm:$0xf] %vm325_vm0, %v1040_v20  ;;  %2475 = vmatpush.bf16.msra.mxu0 %v3390_v22 }
 0x230   : > { %1094 = vst.msk [vmem:[#allocation2 + $0x5c] sm:$0xf] %vm358_vm1, %v1090_v23 }
 0x233   : > { %1255 = vrot.lane.b32.xlu1 %v3141_v18, %s5276_s12  ;;  %1249 = vrot.lane.b32.xlu0 %v3142_v17, %s5330_s26  ;;  %v3156_v18 = vld [vmem:[%s3975_s8 + $0x5c] sm:$0xf] }
 0x234   : > { %2476 = vmatpush.bf16.msra.mxu0 %v3389_v24  ;;  %1257 = vrot.lane.b32.xlu2 %v3142_v17, %s5276_s12  ;;  %s5338_s12 = smov 62  }
 0x235   : > { %v1056_v25 = vpop.permute.xlu1 %1055  ;;  %v1050_v26 = vpop.permute.xlu0 %1049 }
 0x236   : > { %1061 = vst.msk [vmem:[#allocation2 + $0x58] sm:$0xf] %vm325_vm0, %v1056_v25  ;;  %v1108_v28 = vpop.permute.xlu2 %1107 }
 0x237   : > { %1054 = vst.msk [vmem:[#allocation2 + $0x54] sm:$0xf] %vm325_vm0, %v1050_v26  ;;  %v3158_v26 = vld [vmem:[%s3975_s8 + $0x64] sm:$0xf] }
 0x238   : > { %2477 = vmatpush.bf16.msra.mxu0 %v3388_v27  ;;  %1113 = vst.msk [vmem:[#allocation2 + $0x50] sm:$0xf] %vm391_vm2, %v1108_v28  ;;  %v3157_v27 = vld [vmem:[%s3975_s8 + $0x60] sm:$0xf] }
 0x23b   : > { %1269 = vrot.lane.b32.xlu1 %v3144_v29, %s5274_s11  ;;  %1267 = vrot.lane.b32.xlu0 %v3143_v30, %s5274_s11  ;;  %s5337_s11 = smov 40  }
 0x23c   : > { %2478 = vmatpush.bf16.msra.mxu0 %v3387_v31  ;;  %1275 = vrot.lane.b32.xlu2 %v3143_v30, %s5333_s20 }
 0x23d   : > { %v1074_v32 = vpop.permute.xlu1 %1073  ;;  %v1072_v33 = vpop.permute.xlu0 %1071 }
 0x23e   : > { %1078 = vst.msk [vmem:[#allocation2 + $0x4c] sm:$0xf] %vm358_vm1, %v1074_v32  ;;  %v1118_v35 = vpop.permute.xlu2 %1117 }
 0x23f   : > { %1077 = vst.msk [vmem:[#allocation2 + $0x48] sm:$0xf] %vm358_vm1, %v1072_v33 }
 0x240   : > { %2479 = vmatpush.bf16.msra.mxu0 %v3386_v34  ;;  %1122 = vst.msk [vmem:[#allocation2 + $0x5c] sm:$0xf] %vm391_vm2, %v1118_v35  ;;  %v3160_v34 = vld [vmem:[%s3975_s8 + $0x44] sm:$0xf]  ;;  %v3159_v35 = vld [vmem:[%s3975_s8 + $0x40] sm:$0xf] }
 0x243   : > { %1283 = vrot.lane.b32.xlu1 %v3143_v30, %s5272_s30  ;;  %1277 = vrot.lane.b32.xlu0 %v3144_v29, %s5333_s20 }
 0x244   : > { %2480 = vmatpush.bf16.msra.mxu0 %v3385_v36  ;;  %1285 = vrot.lane.b32.xlu2 %v3144_v29, %s5272_s30  ;;  %s5336_s30 = smov 46  }
 0x245   : > { %v1088_v37 = vpop.permute.xlu1 %1087  ;;  %v1082_v38 = vpop.permute.xlu0 %1081 }
 0x246   : > { %1093 = vst.msk [vmem:[#allocation2 + $0x58] sm:$0xf] %vm358_vm1, %v1088_v37  ;;  %v1136_v40 = vpop.permute.xlu2 %1135 }
 0x247   : > { %1086 = vst.msk [vmem:[#allocation2 + $0x54] sm:$0xf] %vm358_vm1, %v1082_v38 }
 0x248   : > { %2481 = vmatpush.bf16.msra.mxu0 %v3384_v39  ;;  %1141 = vst.msk [vmem:[#allocation2 + $0x50] sm:$0xf] %vm424_vm3, %v1136_v40 }
 0x24b   : > { %1297 = vrot.lane.b32.xlu1 %v3146_v41, %s5268_s24  ;;  %1295 = vrot.lane.b32.xlu0 %v3145_v42, %s5268_s24  ;;  %s5334_s24 = smov 30  }
 0x24c   : > { %2482 = vmatpush.bf16.msra.mxu0 %v3383_v43  ;;  %1303 = vrot.lane.b32.xlu2 %v3145_v42, %s5323_s29  ;;  %v3161_v43 = vld [vmem:[%s3975_s8 + $0x48] sm:$0xf] }
 0x24d   : > { %v1102_v44 = vpop.permute.xlu1 %1101  ;;  %v1100_v45 = vpop.permute.xlu0 %1099 }
 0x24e   : > { %1106 = vst.msk [vmem:[#allocation2 + $0x4c] sm:$0xf] %vm391_vm2, %v1102_v44  ;;  %v1146_v46 = vpop.permute.xlu2 %1145 }
 0x24f   : > { %1105 = vst.msk [vmem:[#allocation2 + $0x48] sm:$0xf] %vm391_vm2, %v1100_v45 }
 0x250   : > { %1150 = vst.msk [vmem:[#allocation2 + $0x5c] sm:$0xf] %vm424_vm3, %v1146_v46 }
 0x253   : > { %1311 = vrot.lane.b32.xlu1 %v3145_v42, %s5270_s17  ;;  %1305 = vrot.lane.b32.xlu0 %v3146_v41, %s5323_s29  ;;  %v3162_v42 = vld [vmem:[%s3975_s8 + $0x4c] sm:$0xf] }
 0x254   : > { %1313 = vrot.lane.b32.xlu2 %v3146_v41, %s5270_s17  ;;  %s5335_s17 = smov 24  }
 0x255   : > { %v1116_v47 = vpop.permute.xlu1 %1115  ;;  %v1110_v48 = vpop.permute.xlu0 %1109 }
 0x256   : > { %1121 = vst.msk [vmem:[#allocation2 + $0x58] sm:$0xf] %vm391_vm2, %v1116_v47  ;;  %v1164_v49 = vpop.permute.xlu2 %1163 }
 0x257   : > { %1114 = vst.msk [vmem:[#allocation2 + $0x54] sm:$0xf] %vm391_vm2, %v1110_v48 }
 0x258   : > { %1169 = vst.msk [vmem:[#allocation2 + $0x50] sm:$0xf] %vm457_vm4, %v1164_v49 }
 0x25b   : > { %1325 = vrot.lane.b32.xlu1 %v3148_v50, %s5334_s24  ;;  %1323 = vrot.lane.b32.xlu0 %v3147_v51, %s5334_s24 }
 0x25c   : > { %1331 = vrot.lane.b32.xlu2 %v3147_v51, %s5326_s23 }
 0x25d   : > { %v1130_v52 = vpop.permute.xlu1 %1129  ;;  %v1128_v53 = vpop.permute.xlu0 %1127 }
 0x25e   : > { %1134 = vst.msk [vmem:[#allocation2 + $0x4c] sm:$0xf] %vm424_vm3, %v1130_v52  ;;  %v1174_v54 = vpop.permute.xlu2 %1173 }
 0x25f   : > { %1133 = vst.msk [vmem:[#allocation2 + $0x48] sm:$0xf] %vm424_vm3, %v1128_v53 }
 0x260   : > { %1178 = vst.msk [vmem:[#allocation2 + $0x5c] sm:$0xf] %vm457_vm4, %v1174_v54 }
 0x263   : > { %1339 = vrot.lane.b32.xlu1 %v3147_v51, %s5335_s17  ;;  %1333 = vrot.lane.b32.xlu0 %v3148_v50, %s5326_s23  ;;  %v3163_v51 = vld [vmem:[%s3975_s8 + $0x50] sm:$0xf] }
 0x264   : > { %1341 = vrot.lane.b32.xlu2 %v3148_v50, %s5335_s17  ;;  %v3164_v50 = vld [vmem:[%s3975_s8 + $0x54] sm:$0xf] }
 0x265   : > { %v1144_v55 = vpop.permute.xlu1 %1143  ;;  %v1138_v56 = vpop.permute.xlu0 %1137 }
 0x266   : > { %1149 = vst.msk [vmem:[#allocation2 + $0x58] sm:$0xf] %vm424_vm3, %v1144_v55  ;;  %v1192_v57 = vpop.permute.xlu2 %1191 }
 0x267   : > { %1142 = vst.msk [vmem:[#allocation2 + $0x54] sm:$0xf] %vm424_vm3, %v1138_v56 }
 0x268   : > { %1197 = vst.msk [vmem:[#allocation2 + $0x50] sm:$0xf] %vm490_vm5, %v1192_v57 }
 0x26b   : > { %1353 = vrot.lane.b32.xlu1 %v3150_v58, %s5336_s30  ;;  %1351 = vrot.lane.b32.xlu0 %v3149_v59, %s5336_s30 }
 0x26c   : > { %1359 = vrot.lane.b32.xlu2 %v3149_v59, %s5312_s14 }
 0x26d   : > { %v1158_v60 = vpop.permute.xlu1 %1157  ;;  %v1156_v61 = vpop.permute.xlu0 %1155 }
 0x26e   : > { %1162 = vst.msk [vmem:[#allocation2 + $0x4c] sm:$0xf] %vm457_vm4, %v1158_v60  ;;  %v1202_v62 = vpop.permute.xlu2 %1201 }
 0x26f   : > { %1161 = vst.msk [vmem:[#allocation2 + $0x48] sm:$0xf] %vm457_vm4, %v1156_v61 }
 0x270   : > { %1206 = vst.msk [vmem:[#allocation2 + $0x5c] sm:$0xf] %vm490_vm5, %v1202_v62 }
 0x273   : > { %1367 = vrot.lane.b32.xlu1 %v3149_v59, %s5337_s11  ;;  %1361 = vrot.lane.b32.xlu0 %v3150_v58, %s5312_s14  ;;  %v3165_v59 = vld [vmem:[%s3975_s8 + $0x58] sm:$0xf] }
 0x274   : > { %1369 = vrot.lane.b32.xlu2 %v3150_v58, %s5337_s11  ;;  %v3166_v58 = vld [vmem:[%s3975_s8 + $0x5c] sm:$0xf] }
 0x275   : > { %v1172_v63 = vpop.permute.xlu1 %1171  ;;  %v1166_v0 = vpop.permute.xlu0 %1165 }
 0x276   : > { %1177 = vst.msk [vmem:[#allocation2 + $0x58] sm:$0xf] %vm457_vm4, %v1172_v63  ;;  %v1220_v1 = vpop.permute.xlu2 %1219 }
 0x277   : > { %1170 = vst.msk [vmem:[#allocation2 + $0x54] sm:$0xf] %vm457_vm4, %v1166_v0 }
 0x278   : > { %1225 = vst.msk [vmem:[#allocation2 + $0x50] sm:$0xf] %vm523_vm6, %v1220_v1 }
 0x27b   : > { %1381 = vrot.lane.b32.xlu1 %v3152_v2, %s5338_s12  ;;  %1379 = vrot.lane.b32.xlu0 %v3151_v3, %s5338_s12 }
 0x27c   : > { %1387 = vrot.lane.b32.xlu2 %v3151_v3, %s5329_s15 }
 0x27d   : > { %v1186_v4 = vpop.permute.xlu1 %1185  ;;  %v1184_v5 = vpop.permute.xlu0 %1183 }
 0x27e   : > { %1190 = vst.msk [vmem:[#allocation2 + $0x4c] sm:$0xf] %vm490_vm5, %v1186_v4  ;;  %v1230_v6 = vpop.permute.xlu2 %1229 }
 0x27f   : > { %1189 = vst.msk [vmem:[#allocation2 + $0x48] sm:$0xf] %vm490_vm5, %v1184_v5 }
 0x280   : > { %1234 = vst.msk [vmem:[#allocation2 + $0x5c] sm:$0xf] %vm523_vm6, %v1230_v6 }
 0x283   : > { %1395 = vrot.lane.b32.xlu1 %v3151_v3, %s5339_s18  ;;  %1389 = vrot.lane.b32.xlu0 %v3152_v2, %s5329_s15  ;;  %v3167_v3 = vld [vmem:[%s3975_s8 + $0x60] sm:$0xf] }
 0x284   : > { %1397 = vrot.lane.b32.xlu2 %v3152_v2, %s5339_s18  ;;  %v3168_v2 = vld [vmem:[%s3975_s8 + $0x64] sm:$0xf] }
 0x285   : > { %v1200_v7 = vpop.permute.xlu1 %1199  ;;  %v1194_v8 = vpop.permute.xlu0 %1193 }
 0x286   : > { %1205 = vst.msk [vmem:[#allocation2 + $0x58] sm:$0xf] %vm490_vm5, %v1200_v7  ;;  %v1248_v9 = vpop.permute.xlu2 %1247 }
 0x287   : > { %1198 = vst.msk [vmem:[#allocation2 + $0x54] sm:$0xf] %vm490_vm5, %v1194_v8 }
 0x288   : > { %1253 = vst.msk [vmem:[#allocation2 + $0x50] sm:$0xf] %vm556_vm7, %v1248_v9 }
 0x28b   : > { %1409 = vrot.lane.b32.xlu1 %v3154_v10, %s5340_s9  ;;  %1407 = vrot.lane.b32.xlu0 %v3153_v11, %s5340_s9 }
 0x28c   : > { %1415 = vrot.lane.b32.xlu2 %v3153_v11, %s5317_s16 }
 0x28d   : > { %v1214_v12 = vpop.permute.xlu1 %1213  ;;  %v1212_v13 = vpop.permute.xlu0 %1211 }
 0x28e   : > { %1218 = vst.msk [vmem:[#allocation2 + $0x4c] sm:$0xf] %vm523_vm6, %v1214_v12  ;;  %v1258_v14 = vpop.permute.xlu2 %1257 }
 0x28f   : > { %1217 = vst.msk [vmem:[#allocation2 + $0x48] sm:$0xf] %vm523_vm6, %v1212_v13 }
 0x290   : > { %1262 = vst.msk [vmem:[#allocation2 + $0x5c] sm:$0xf] %vm556_vm7, %v1258_v14 }
 0x293   : > { %1423 = vrot.lane.b32.xlu1 %v3153_v11, %s5341_s0  ;;  %1417 = vrot.lane.b32.xlu0 %v3154_v10, %s5317_s16  ;;  %v3169_v11 = vld [vmem:[%s3975_s8 + $0x68] sm:$0xf] }
 0x294   : > { %1425 = vrot.lane.b32.xlu2 %v3154_v10, %s5341_s0  ;;  %v3170_v10 = vld [vmem:[%s3975_s8 + $0x6c] sm:$0xf] }
 0x295   : > { %v1228_v15 = vpop.permute.xlu1 %1227  ;;  %v1222_v16 = vpop.permute.xlu0 %1221 }
 0x296   : > { %1233 = vst.msk [vmem:[#allocation2 + $0x58] sm:$0xf] %vm523_vm6, %v1228_v15  ;;  %v1276_v17 = vpop.permute.xlu2 %1275 }
 0x297   : > { %1226 = vst.msk [vmem:[#allocation2 + $0x54] sm:$0xf] %vm523_vm6, %v1222_v16 }
 0x298   : > { %1281 = vst.msk [vmem:[#allocation2 + $0x68] sm:$0xf] %vm325_vm0, %v1276_v17 }
 0x29b   : > { %1437 = vrot.lane.b32.xlu1 %v3156_v18, %s5342_s6  ;;  %1435 = vrot.lane.b32.xlu0 %v3155_v19, %s5342_s6 }
 0x29c   : > { %1443 = vrot.lane.b32.xlu2 %v3155_v19, %s5343_s25 }
 0x29d   : > { %v1242_v20 = vpop.permute.xlu1 %1241  ;;  %v1240_v21 = vpop.permute.xlu0 %1239 }
 0x29e   : > { %1246 = vst.msk [vmem:[#allocation2 + $0x4c] sm:$0xf] %vm556_vm7, %v1242_v20  ;;  %v1286_v22 = vpop.permute.xlu2 %1285  ;;  %v1723_v20 = vld [vmem:[%s3975_s8 + $0x4] sm:$0xf] }
 0x29f   : > { %1245 = vst.msk [vmem:[#allocation2 + $0x48] sm:$0xf] %vm556_vm7, %v1240_v21  ;;  %v1722_v21 = vld [vmem:[%s3975_s8] sm:$0xf] }
 0x2a0   : > { %1290 = vst.msk [vmem:[#allocation2 + $0x74] sm:$0xf] %vm325_vm0, %v1286_v22 }
 0x2a1   : > { %1725 = vst.msk [vmem:[#allocation2 + $0x94] sm:$0xf] %vm325_vm0, %v1723_v20 }
 0x2a2   : > { %1724 = vst.msk [vmem:[#allocation2 + $0x90] sm:$0xf] %vm325_vm0, %v1722_v21 }
 0x2a3   : > { %1451 = vrot.lane.b32.xlu1 %v3155_v19, %s5344_s10  ;;  %1445 = vrot.lane.b32.xlu0 %v3156_v18, %s5343_s25  ;;  %v3173_v19 = vld [vmem:[%s3975_s8 + $0x70] sm:$0xf] }
 0x2a4   : > { %1453 = vrot.lane.b32.xlu2 %v3156_v18, %s5344_s10  ;;  %v3174_v18 = vld [vmem:[%s3975_s8 + $0x74] sm:$0xf] }
 0x2a5   : > { %v1256_v23 = vpop.permute.xlu1 %1255  ;;  %v1250_v24 = vpop.permute.xlu0 %1249 }
 0x2a6   : > { %1261 = vst.msk [vmem:[#allocation2 + $0x58] sm:$0xf] %vm556_vm7, %v1256_v23  ;;  %v1304_v25 = vpop.permute.xlu2 %1303 }
 0x2a7   : > { %1254 = vst.msk [vmem:[#allocation2 + $0x54] sm:$0xf] %vm556_vm7, %v1250_v24 }
 0x2a8   : > { %1309 = vst.msk [vmem:[#allocation2 + $0x68] sm:$0xf] %vm358_vm1, %v1304_v25 }
 0x2ab   : > { %1465 = vrot.lane.b32.xlu1 %v3158_v26, %s5345_s21  ;;  %1463 = vrot.lane.b32.xlu0 %v3157_v27, %s5345_s21 }
 0x2ac   : > { %1471 = vrot.lane.b32.xlu2 %v3157_v27, %s5330_s26 }
 0x2ad   : > { %v1270_v28 = vpop.permute.xlu1 %1269  ;;  %v1268_v29 = vpop.permute.xlu0 %1267 }
 0x2ae   : > { %1274 = vst.msk [vmem:[#allocation2 + $0x64] sm:$0xf] %vm325_vm0, %v1270_v28  ;;  %v1314_v30 = vpop.permute.xlu2 %1313  ;;  %v3178_v28 = vld [vmem:[%s3975_s8 + $0x7c] sm:$0xf] }
 0x2af   : > { %1273 = vst.msk [vmem:[#allocation2 + $0x60] sm:$0xf] %vm325_vm0, %v1268_v29  ;;  %v3177_v29 = vld [vmem:[%s3975_s8 + $0x78] sm:$0xf] }
 0x2b0   : > { %1318 = vst.msk [vmem:[#allocation2 + $0x74] sm:$0xf] %vm358_vm1, %v1314_v30 }
 0x2b3   : > { %1479 = vrot.lane.b32.xlu1 %v3157_v27, %s5346_s7  ;;  %1473 = vrot.lane.b32.xlu0 %v3158_v26, %s5330_s26 }
 0x2b4   : > { %1481 = vrot.lane.b32.xlu2 %v3158_v26, %s5346_s7 }
 0x2b5   : > { %v1284_v31 = vpop.permute.xlu1 %1283  ;;  %v1278_v32 = vpop.permute.xlu0 %1277 }
 0x2b6   : > { %1289 = vst.msk [vmem:[#allocation2 + $0x70] sm:$0xf] %vm325_vm0, %v1284_v31  ;;  %v1332_v33 = vpop.permute.xlu2 %1331 }
 0x2b7   : > { %1282 = vst.msk [vmem:[#allocation2 + $0x6c] sm:$0xf] %vm325_vm0, %v1278_v32 }
 0x2b8   : > { %1337 = vst.msk [vmem:[#allocation2 + $0x68] sm:$0xf] %vm391_vm2, %v1332_v33 }
 0x2bb   : > { %1493 = vrot.lane.b32.xlu1 %v3160_v34, %s5347_s5  ;;  %1491 = vrot.lane.b32.xlu0 %v3159_v35, %s5347_s5  ;;  %s5349_s5 = smov 14  }
 0x2bc   : > { %1499 = vrot.lane.b32.xlu2 %v3159_v35, %s5333_s20 }
 0x2bd   : > { %v1298_v36 = vpop.permute.xlu1 %1297  ;;  %v1296_v37 = vpop.permute.xlu0 %1295 }
 0x2be   : > { %1302 = vst.msk [vmem:[#allocation2 + $0x64] sm:$0xf] %vm358_vm1, %v1298_v36  ;;  %v1342_v38 = vpop.permute.xlu2 %1341 }
 0x2bf   : > { %1301 = vst.msk [vmem:[#allocation2 + $0x60] sm:$0xf] %vm358_vm1, %v1296_v37 }
 0x2c0   : > { %1346 = vst.msk [vmem:[#allocation2 + $0x74] sm:$0xf] %vm391_vm2, %v1342_v38 }
 0x2c3   : > { %1507 = vrot.lane.b32.xlu1 %v3159_v35, %s5348_s4  ;;  %1501 = vrot.lane.b32.xlu0 %v3160_v34, %s5333_s20 }
 0x2c4   : > { %1509 = vrot.lane.b32.xlu2 %v3160_v34, %s5348_s4  ;;  %s5350_s4 = smov 8  }
 0x2c5   : > { %v1312_v39 = vpop.permute.xlu1 %1311  ;;  %v1306_v40 = vpop.permute.xlu0 %1305 }
 0x2c6   : > { %1317 = vst.msk [vmem:[#allocation2 + $0x70] sm:$0xf] %vm358_vm1, %v1312_v39  ;;  %v1360_v41 = vpop.permute.xlu2 %1359  ;;  %v3183_v39 = vld [vmem:[%s3975_s8 + $0x8] sm:$0xf] }
 0x2c7   : > { %1310 = vst.msk [vmem:[#allocation2 + $0x6c] sm:$0xf] %vm358_vm1, %v1306_v40  ;;  %v3184_v40 = vld [vmem:[%s3975_s8 + $0xc] sm:$0xf] }
 0x2c8   : > { %1365 = vst.msk [vmem:[#allocation2 + $0x68] sm:$0xf] %vm424_vm3, %v1360_v41 }
 0x2cb   : > { %1521 = vrot.lane.b32.xlu1 %v3162_v42, %s5349_s5  ;;  %1519 = vrot.lane.b32.xlu0 %v3161_v43, %s5349_s5  ;;  %s3822_s5 = smov 86  }
 0x2cc   : > { %1527 = vrot.lane.b32.xlu2 %v3161_v43, %s5323_s29 }
 0x2cd   : > { %v1326_v44 = vpop.permute.xlu1 %1325  ;;  %v1324_v45 = vpop.permute.xlu0 %1323 }
 0x2ce   : > { %1330 = vst.msk [vmem:[#allocation2 + $0x64] sm:$0xf] %vm391_vm2, %v1326_v44  ;;  %v1370_v46 = vpop.permute.xlu2 %1369 }
 0x2cf   : > { %1329 = vst.msk [vmem:[#allocation2 + $0x60] sm:$0xf] %vm391_vm2, %v1324_v45 }
 0x2d0   : > { %1374 = vst.msk [vmem:[#allocation2 + $0x74] sm:$0xf] %vm424_vm3, %v1370_v46 }
 0x2d3   : > { %1535 = vrot.lane.b32.xlu1 %v3161_v43, %s5350_s4  ;;  %1529 = vrot.lane.b32.xlu0 %v3162_v42, %s5323_s29 }
 0x2d4   : > { %1537 = vrot.lane.b32.xlu2 %v3162_v42, %s5350_s4  ;;  %s3823_s4 = smov 112  }
 0x2d5   : > { %v1340_v47 = vpop.permute.xlu1 %1339  ;;  %v1334_v48 = vpop.permute.xlu0 %1333 }
 0x2d6   : > { %1345 = vst.msk [vmem:[#allocation2 + $0x70] sm:$0xf] %vm391_vm2, %v1340_v47  ;;  %v1388_v49 = vpop.permute.xlu2 %1387  ;;  %v3185_v47 = vld [vmem:[%s3975_s8 + $0x10] sm:$0xf] }
 0x2d7   : > { %1338 = vst.msk [vmem:[#allocation2 + $0x6c] sm:$0xf] %vm391_vm2, %v1334_v48  ;;  %v3186_v48 = vld [vmem:[%s3975_s8 + $0x14] sm:$0xf] }
 0x2d8   : > { %1393 = vst.msk [vmem:[#allocation2 + $0x68] sm:$0xf] %vm457_vm4, %v1388_v49 }
 0x2db   : > { %1549 = vrot.lane.b32.xlu1 %v3164_v50, %s5334_s24  ;;  %1547 = vrot.lane.b32.xlu0 %v3163_v51, %s5334_s24  ;;  %s3818_s24 = smov 54  }
 0x2dc   : > { %1555 = vrot.lane.b32.xlu2 %v3163_v51, %s5326_s23 }
 0x2dd   : > { %v1354_v52 = vpop.permute.xlu1 %1353  ;;  %v1352_v53 = vpop.permute.xlu0 %1351 }
 0x2de   : > { %1358 = vst.msk [vmem:[#allocation2 + $0x64] sm:$0xf] %vm424_vm3, %v1354_v52  ;;  %v1398_v54 = vpop.permute.xlu2 %1397 }
 0x2df   : > { %1357 = vst.msk [vmem:[#allocation2 + $0x60] sm:$0xf] %vm424_vm3, %v1352_v53 }
 0x2e0   : > { %1402 = vst.msk [vmem:[#allocation2 + $0x74] sm:$0xf] %vm457_vm4, %v1398_v54 }
 0x2e3   : > { %1563 = vrot.lane.b32.xlu1 %v3163_v51, %s5335_s17  ;;  %1557 = vrot.lane.b32.xlu0 %v3164_v50, %s5326_s23 }
 0x2e4   : > { %1565 = vrot.lane.b32.xlu2 %v3164_v50, %s5335_s17  ;;  %s3819_s17 = smov 80  }
 0x2e5   : > { %v1368_v55 = vpop.permute.xlu1 %1367  ;;  %v1362_v56 = vpop.permute.xlu0 %1361 }
 0x2e6   : > { %1373 = vst.msk [vmem:[#allocation2 + $0x70] sm:$0xf] %vm424_vm3, %v1368_v55  ;;  %v1416_v57 = vpop.permute.xlu2 %1415  ;;  %v3187_v55 = vld [vmem:[%s3975_s8 + $0x18] sm:$0xf] }
 0x2e7   : > { %1366 = vst.msk [vmem:[#allocation2 + $0x6c] sm:$0xf] %vm424_vm3, %v1362_v56  ;;  %v3188_v56 = vld [vmem:[%s3975_s8 + $0x1c] sm:$0xf] }
 0x2e8   : > { %1421 = vst.msk [vmem:[#allocation2 + $0x68] sm:$0xf] %vm490_vm5, %v1416_v57 }
 0x2eb   : > { %1577 = vrot.lane.b32.xlu1 %v3166_v58, %s5336_s30  ;;  %1575 = vrot.lane.b32.xlu0 %v3165_v59, %s5336_s30  ;;  %s3817_s30 = smov 64  }
 0x2ec   : > { %1583 = vrot.lane.b32.xlu2 %v3165_v59, %s5312_s14 }
 0x2ed   : > { %v1382_v60 = vpop.permute.xlu1 %1381  ;;  %v1380_v61 = vpop.permute.xlu0 %1379 }
 0x2ee   : > { %1386 = vst.msk [vmem:[#allocation2 + $0x64] sm:$0xf] %vm457_vm4, %v1382_v60  ;;  %v1426_v62 = vpop.permute.xlu2 %1425 }
 0x2ef   : > { %1385 = vst.msk [vmem:[#allocation2 + $0x60] sm:$0xf] %vm457_vm4, %v1380_v61 }
 0x2f0   : > { %1430 = vst.msk [vmem:[#allocation2 + $0x74] sm:$0xf] %vm490_vm5, %v1426_v62 }
 0x2f3   : > { %1591 = vrot.lane.b32.xlu1 %v3165_v59, %s5337_s11  ;;  %1585 = vrot.lane.b32.xlu0 %v3166_v58, %s5312_s14 }
 0x2f4   : > { %1593 = vrot.lane.b32.xlu2 %v3166_v58, %s5337_s11  ;;  %s3816_s11 = smov 38  }
 0x2f5   : > { %v1396_v63 = vpop.permute.xlu1 %1395  ;;  %v1390_v0 = vpop.permute.xlu0 %1389 }
 0x2f6   : > { %1401 = vst.msk [vmem:[#allocation2 + $0x70] sm:$0xf] %vm457_vm4, %v1396_v63  ;;  %v1444_v1 = vpop.permute.xlu2 %1443  ;;  %v3189_v63 = vld [vmem:[%s3975_s8 + $0x20] sm:$0xf] }
 0x2f7   : > { %1394 = vst.msk [vmem:[#allocation2 + $0x6c] sm:$0xf] %vm457_vm4, %v1390_v0  ;;  %v3190_v0 = vld [vmem:[%s3975_s8 + $0x24] sm:$0xf] }
 0x2f8   : > { %1449 = vst.msk [vmem:[#allocation2 + $0x68] sm:$0xf] %vm523_vm6, %v1444_v1 }
 0x2fb   : > { %1605 = vrot.lane.b32.xlu1 %v3168_v2, %s5338_s12  ;;  %1603 = vrot.lane.b32.xlu0 %v3167_v3, %s5338_s12  ;;  %s3821_s12 = smov 96  }
 0x2fc   : > { %1611 = vrot.lane.b32.xlu2 %v3167_v3, %s5329_s15 }
 0x2fd   : > { %v1410_v4 = vpop.permute.xlu1 %1409  ;;  %v1408_v5 = vpop.permute.xlu0 %1407 }
 0x2fe   : > { %1414 = vst.msk [vmem:[#allocation2 + $0x64] sm:$0xf] %vm490_vm5, %v1410_v4  ;;  %v1454_v6 = vpop.permute.xlu2 %1453 }
 0x2ff   : > { %1413 = vst.msk [vmem:[#allocation2 + $0x60] sm:$0xf] %vm490_vm5, %v1408_v5 }
 0x300   : > { %1458 = vst.msk [vmem:[#allocation2 + $0x74] sm:$0xf] %vm523_vm6, %v1454_v6 }
 0x303   : > { %1619 = vrot.lane.b32.xlu1 %v3167_v3, %s5339_s18  ;;  %1613 = vrot.lane.b32.xlu0 %v3168_v2, %s5329_s15 }
 0x304   : > { %1621 = vrot.lane.b32.xlu2 %v3168_v2, %s5339_s18  ;;  %s5289_s18 = smov 70  }
 0x305   : > { %v1424_v7 = vpop.permute.xlu1 %1423  ;;  %v1418_v8 = vpop.permute.xlu0 %1417 }
 0x306   : > { %1429 = vst.msk [vmem:[#allocation2 + $0x70] sm:$0xf] %vm490_vm5, %v1424_v7  ;;  %v1472_v9 = vpop.permute.xlu2 %1471  ;;  %v3191_v7 = vld [vmem:[%s3975_s8 + $0x28] sm:$0xf] }
 0x307   : > { %1422 = vst.msk [vmem:[#allocation2 + $0x6c] sm:$0xf] %vm490_vm5, %v1418_v8  ;;  %v3192_v8 = vld [vmem:[%s3975_s8 + $0x2c] sm:$0xf] }
 0x308   : > { %1477 = vst.msk [vmem:[#allocation2 + $0x68] sm:$0xf] %vm556_vm7, %v1472_v9 }
 0x30b   : > { %1633 = vrot.lane.b32.xlu1 %v3170_v10, %s5340_s9  ;;  %1631 = vrot.lane.b32.xlu0 %v3169_v11, %s5340_s9  ;;  %s3815_s9 = smov 48  }
 0x30c   : > { %1639 = vrot.lane.b32.xlu2 %v3169_v11, %s5317_s16 }
 0x30d   : > { %v1438_v12 = vpop.permute.xlu1 %1437  ;;  %v1436_v13 = vpop.permute.xlu0 %1435 }
 0x30e   : > { %1442 = vst.msk [vmem:[#allocation2 + $0x64] sm:$0xf] %vm523_vm6, %v1438_v12  ;;  %v1482_v14 = vpop.permute.xlu2 %1481 }
 0x30f   : > { %1441 = vst.msk [vmem:[#allocation2 + $0x60] sm:$0xf] %vm523_vm6, %v1436_v13 }
 0x310   : > { %1486 = vst.msk [vmem:[#allocation2 + $0x74] sm:$0xf] %vm556_vm7, %v1482_v14 }
 0x313   : > { %1647 = vrot.lane.b32.xlu1 %v3169_v11, %s5341_s0  ;;  %1641 = vrot.lane.b32.xlu0 %v3170_v10, %s5317_s16 }
 0x314   : > { %1649 = vrot.lane.b32.xlu2 %v3170_v10, %s5341_s0  ;;  %s3810_s0 = smov 118  }
 0x315   : > { %v1452_v15 = vpop.permute.xlu1 %1451  ;;  %v1446_v16 = vpop.permute.xlu0 %1445 }
 0x316   : > { %1457 = vst.msk [vmem:[#allocation2 + $0x70] sm:$0xf] %vm523_vm6, %v1452_v15  ;;  %v1500_v17 = vpop.permute.xlu2 %1499  ;;  %v3193_v15 = vld [vmem:[%s3975_s8 + $0x30] sm:$0xf] }
 0x317   : > { %1450 = vst.msk [vmem:[#allocation2 + $0x6c] sm:$0xf] %vm523_vm6, %v1446_v16  ;;  %v4699_v16 = vld [vmem:[%s3975_s8 + $0x28] sm:$0xf] }
 0x318   : > { %1505 = vst.msk [vmem:[#allocation2 + $0x80] sm:$0xf] %vm325_vm0, %v1500_v17  ;;  %v3194_v17 = vld [vmem:[%s3975_s8 + $0x34] sm:$0xf] }
 0x319   : > { %1946 = vst.msk [vmem:[#allocation2 + $0xa8] sm:$0xf] %vm325_vm0, %v4699_v16 }
 0x31b   : > { %1665 = vrot.lane.b32.xlu1 %v3174_v18, %s5342_s6  ;;  %1663 = vrot.lane.b32.xlu0 %v3173_v19, %s5342_s6  ;;  %s3811_s6 = smov 16  }
 0x31c   : > { %1671 = vrot.lane.b32.xlu2 %v3173_v19, %s5343_s25 }
 0x31d   : > { %v1466_v22 = vpop.permute.xlu1 %1465  ;;  %v1464_v23 = vpop.permute.xlu0 %1463 }
 0x31e   : > { %1470 = vst.msk [vmem:[#allocation2 + $0x64] sm:$0xf] %vm556_vm7, %v1466_v22  ;;  %v1510_v24 = vpop.permute.xlu2 %1509 }
 0x31f   : > { %1469 = vst.msk [vmem:[#allocation2 + $0x60] sm:$0xf] %vm556_vm7, %v1464_v23 }
 0x320   : > { %1514 = vst.msk [vmem:[#allocation2 + $0x8c] sm:$0xf] %vm325_vm0, %v1510_v24 }
 0x323   : > { %1679 = vrot.lane.b32.xlu1 %v3173_v19, %s5344_s10  ;;  %1673 = vrot.lane.b32.xlu0 %v3174_v18, %s5343_s25 }
 0x324   : > { %1681 = vrot.lane.b32.xlu2 %v3174_v18, %s5344_s10  ;;  %s3814_s10 = smov 22  }
 0x325   : > { %v1480_v25 = vpop.permute.xlu1 %1479  ;;  %v1474_v26 = vpop.permute.xlu0 %1473 }
 0x326   : > { %1485 = vst.msk [vmem:[#allocation2 + $0x70] sm:$0xf] %vm556_vm7, %v1480_v25  ;;  %v1528_v27 = vpop.permute.xlu2 %1527  ;;  %v3195_v25 = vld [vmem:[%s3975_s8 + $0x38] sm:$0xf] }
 0x327   : > { %1478 = vst.msk [vmem:[#allocation2 + $0x6c] sm:$0xf] %vm556_vm7, %v1474_v26  ;;  %v3196_v26 = vld [vmem:[%s3975_s8 + $0x3c] sm:$0xf] }
 0x328   : > { %1533 = vst.msk [vmem:[#allocation2 + $0x80] sm:$0xf] %vm358_vm1, %v1528_v27 }
 0x32b   : > { %1697 = vrot.lane.b32.xlu1 %v3178_v28, %s5345_s21  ;;  %1695 = vrot.lane.b32.xlu0 %v3177_v29, %s5345_s21  ;;  %s3812_s21 = smov 6  }
 0x32c   : > { %1703 = vrot.lane.b32.xlu2 %v3177_v29, %s5330_s26 }
 0x32d   : > { %v1494_v30 = vpop.permute.xlu1 %1493  ;;  %v1492_v31 = vpop.permute.xlu0 %1491 }
 0x32e   : > { %1498 = vst.msk [vmem:[#allocation2 + $0x7c] sm:$0xf] %vm325_vm0, %v1494_v30  ;;  %v1538_v32 = vpop.permute.xlu2 %1537 }
 0x32f   : > { %1497 = vst.msk [vmem:[#allocation2 + $0x78] sm:$0xf] %vm325_vm0, %v1492_v31 }
 0x330   : > { %1542 = vst.msk [vmem:[#allocation2 + $0x8c] sm:$0xf] %vm358_vm1, %v1538_v32 }
 0x333   : > { %1711 = vrot.lane.b32.xlu1 %v3177_v29, %s5346_s7  ;;  %1705 = vrot.lane.b32.xlu0 %v3178_v28, %s5330_s26 }
 0x334   : > { %1713 = vrot.lane.b32.xlu2 %v3178_v28, %s5346_s7  ;;  %s3813_s7 = smov 32  }
 0x335   : > { %v1508_v33 = vpop.permute.xlu1 %1507  ;;  %v1502_v34 = vpop.permute.xlu0 %1501 }
 0x336   : > { %1513 = vst.msk [vmem:[#allocation2 + $0x88] sm:$0xf] %vm325_vm0, %v1508_v33  ;;  %v1556_v35 = vpop.permute.xlu2 %1555 }
 0x337   : > { %1506 = vst.msk [vmem:[#allocation2 + $0x84] sm:$0xf] %vm325_vm0, %v1502_v34 }
 0x338   : > { %1561 = vst.msk [vmem:[#allocation2 + $0x80] sm:$0xf] %vm391_vm2, %v1556_v35 }
 0x33b   : > { %1730 = vrot.lane.b32.xlu1 %v1723_v20, %s5333_s20  ;;  %1728 = vrot.lane.b32.xlu0 %v1722_v21, %s5333_s20 }
 0x33c   : > { %1736 = vrot.lane.b32.xlu2 %v1722_v21, %s3810_s0  ;;  %v3198_v21 = vld [vmem:[%s3975_s8 + $0x2c] sm:$0xf] }
 0x33d   : > { %v1522_v36 = vpop.permute.xlu1 %1521  ;;  %v1520_v37 = vpop.permute.xlu0 %1519  ;;  %1947 = vst.msk [vmem:[#allocation2 + $0xac] sm:$0xf] %vm325_vm0, %v3198_v21 }
 0x33e   : > { %1526 = vst.msk [vmem:[#allocation2 + $0x7c] sm:$0xf] %vm358_vm1, %v1522_v36  ;;  %v1566_v38 = vpop.permute.xlu2 %1565 }
 0x33f   : > { %1525 = vst.msk [vmem:[#allocation2 + $0x78] sm:$0xf] %vm358_vm1, %v1520_v37 }
 0x340   : > { %1570 = vst.msk [vmem:[#allocation2 + $0x8c] sm:$0xf] %vm391_vm2, %v1566_v38  ;;  %v3397_v38 = vld [vmem:[#allocation2 + $0x70] sm:$0xff] }
 0x343   : > { %1752 = vrot.lane.b32.xlu1 %v3183_v39, %s3811_s6  ;;  %1738 = vrot.lane.b32.xlu0 %v1723_v20, %s3810_s0 }
 0x344   : > { %1754 = vrot.lane.b32.xlu2 %v3184_v40, %s3811_s6 }
 0x345   : > { %v1536_v41 = vpop.permute.xlu1 %1535  ;;  %v1530_v42 = vpop.permute.xlu0 %1529 }
 0x346   : > { %1541 = vst.msk [vmem:[#allocation2 + $0x88] sm:$0xf] %vm358_vm1, %v1536_v41  ;;  %v1584_v43 = vpop.permute.xlu2 %1583  ;;  %v3199_v41 = vld [vmem:[%s3975_s8 + $0x30] sm:$0xf] }
 0x347   : > { %1534 = vst.msk [vmem:[#allocation2 + $0x84] sm:$0xf] %vm358_vm1, %v1530_v42 }
 0x348   : > { %1589 = vst.msk [vmem:[#allocation2 + $0x80] sm:$0xf] %vm424_vm3, %v1584_v43 }
 0x34b   : > { %1762 = vrot.lane.b32.xlu1 %v3184_v40, %s5323_s29  ;;  %1760 = vrot.lane.b32.xlu0 %v3183_v39, %s5323_s29 }
 0x34c   : > { %1768 = vrot.lane.b32.xlu2 %v3183_v39, %s3812_s21 }
 0x34d   : > { %v1550_v44 = vpop.permute.xlu1 %1549  ;;  %v1548_v45 = vpop.permute.xlu0 %1547 }
 0x34e   : > { %1554 = vst.msk [vmem:[#allocation2 + $0x7c] sm:$0xf] %vm391_vm2, %v1550_v44  ;;  %v1594_v46 = vpop.permute.xlu2 %1593  ;;  %v3395_v44 = vld [vmem:[#allocation2 + $0x60] sm:$0xff] }
 0x34f   : > { %1553 = vst.msk [vmem:[#allocation2 + $0x78] sm:$0xf] %vm391_vm2, %v1548_v45 }
 0x350   : > { %1598 = vst.msk [vmem:[#allocation2 + $0x8c] sm:$0xf] %vm424_vm3, %v1594_v46  ;;  %v3200_v46 = vld [vmem:[%s3975_s8 + $0x34] sm:$0xf] }
 0x353   : > { %1780 = vrot.lane.b32.xlu1 %v3185_v47, %s3813_s7  ;;  %1770 = vrot.lane.b32.xlu0 %v3184_v40, %s3812_s21  ;;  %v3396_v40 = vld [vmem:[#allocation2 + $0x68] sm:$0xff] }
 0x354   : > { %1782 = vrot.lane.b32.xlu2 %v3186_v48, %s3813_s7 }
 0x355   : > { %v1564_v49 = vpop.permute.xlu1 %1563  ;;  %v1558_v50 = vpop.permute.xlu0 %1557 }
 0x356   : > { %1569 = vst.msk [vmem:[#allocation2 + $0x88] sm:$0xf] %vm391_vm2, %v1564_v49  ;;  %v1612_v51 = vpop.permute.xlu2 %1611 }
 0x357   : > { %1562 = vst.msk [vmem:[#allocation2 + $0x84] sm:$0xf] %vm391_vm2, %v1558_v50 }
 0x358   : > { %1617 = vst.msk [vmem:[#allocation2 + $0x80] sm:$0xf] %vm457_vm4, %v1612_v51  ;;  %v3393_v51 = vld [vmem:[#allocation2 + $0x50] sm:$0xff] }
 0x35b   : > { %1790 = vrot.lane.b32.xlu1 %v3186_v48, %s5326_s23  ;;  %1788 = vrot.lane.b32.xlu0 %v3185_v47, %s5326_s23 }
 0x35c   : > { %1796 = vrot.lane.b32.xlu2 %v3185_v47, %s3814_s10  ;;  %v4749_v47 = vld [vmem:[%s3975_s8 + $0x50] sm:$0xf] }
 0x35d   : > { %v1578_v52 = vpop.permute.xlu1 %1577  ;;  %v1576_v53 = vpop.permute.xlu0 %1575  ;;  %2164 = vst.msk [vmem:[#allocation2 + $0xc0] sm:$0xf] %vm325_vm0, %v4749_v47 }
 0x35e   : > { %1582 = vst.msk [vmem:[#allocation2 + $0x7c] sm:$0xf] %vm424_vm3, %v1578_v52  ;;  %v1622_v54 = vpop.permute.xlu2 %1621 }
 0x35f   : > { %1581 = vst.msk [vmem:[#allocation2 + $0x78] sm:$0xf] %vm424_vm3, %v1576_v53  ;;  %v3392_v53 = vld [vmem:[#allocation2 + $0x48] sm:$0xff] }
 0x360   : > { %1626 = vst.msk [vmem:[#allocation2 + $0x8c] sm:$0xf] %vm457_vm4, %v1622_v54  ;;  %v3201_v54 = vld [vmem:[%s3975_s8 + $0x38] sm:$0xf] }
 0x363   : > { %1808 = vrot.lane.b32.xlu1 %v3187_v55, %s3815_s9  ;;  %1798 = vrot.lane.b32.xlu0 %v3186_v48, %s3814_s10  ;;  %v3394_v48 = vld [vmem:[#allocation2 + $0x58] sm:$0xff] }
 0x364   : > { %1810 = vrot.lane.b32.xlu2 %v3188_v56, %s3815_s9 }
 0x365   : > { %v1592_v57 = vpop.permute.xlu1 %1591  ;;  %v1586_v58 = vpop.permute.xlu0 %1585 }
 0x366   : > { %1597 = vst.msk [vmem:[#allocation2 + $0x88] sm:$0xf] %vm424_vm3, %v1592_v57  ;;  %v1640_v59 = vpop.permute.xlu2 %1639 }
 0x367   : > { %1590 = vst.msk [vmem:[#allocation2 + $0x84] sm:$0xf] %vm424_vm3, %v1586_v58  ;;  %v3202_v58 = vld [vmem:[%s3975_s8 + $0x3c] sm:$0xf] }
 0x368   : > { %1645 = vst.msk [vmem:[#allocation2 + $0x80] sm:$0xf] %vm490_vm5, %v1640_v59 }
 0x36b   : > { %1818 = vrot.lane.b32.xlu1 %v3188_v56, %s5312_s14  ;;  %1816 = vrot.lane.b32.xlu0 %v3187_v55, %s5312_s14 }
 0x36c   : > { %1824 = vrot.lane.b32.xlu2 %v3187_v55, %s3816_s11 }
 0x36d   : > { %v1606_v60 = vpop.permute.xlu1 %1605  ;;  %v1604_v61 = vpop.permute.xlu0 %1603 }
 0x36e   : > { %1610 = vst.msk [vmem:[#allocation2 + $0x7c] sm:$0xf] %vm457_vm4, %v1606_v60  ;;  %v1650_v62 = vpop.permute.xlu2 %1649 }
 0x36f   : > { %1609 = vst.msk [vmem:[#allocation2 + $0x78] sm:$0xf] %vm457_vm4, %v1604_v61 }
 0x370   : > { %1654 = vst.msk [vmem:[#allocation2 + $0x8c] sm:$0xf] %vm490_vm5, %v1650_v62  ;;  %v4774_v62 = vld [vmem:[%s3975_s8 + $0x40] sm:$0xf] }
 0x373   : > { %1836 = vrot.lane.b32.xlu1 %v3189_v63, %s3817_s30  ;;  %1826 = vrot.lane.b32.xlu0 %v3188_v56, %s3816_s11 }
 0x374   : > { %1838 = vrot.lane.b32.xlu2 %v3190_v0, %s3817_s30 }
 0x375   : > { %v1620_v1 = vpop.permute.xlu1 %1619  ;;  %v1614_v2 = vpop.permute.xlu0 %1613 }
 0x376   : > { %1625 = vst.msk [vmem:[#allocation2 + $0x88] sm:$0xf] %vm457_vm4, %v1620_v1  ;;  %v1672_v3 = vpop.permute.xlu2 %1671 }
 0x377   : > { %1618 = vst.msk [vmem:[#allocation2 + $0x84] sm:$0xf] %vm457_vm4, %v1614_v2 }
 0x378   : > { %1677 = vst.msk [vmem:[#allocation2 + $0x80] sm:$0xf] %vm523_vm6, %v1672_v3  ;;  %v4788_v3 = vld [vmem:[%s3975_s8 + $0x44] sm:$0xf] }
 0x37b   : > { %1846 = vrot.lane.b32.xlu1 %v3190_v0, %s5329_s15  ;;  %1844 = vrot.lane.b32.xlu0 %v3189_v63, %s5329_s15 }
 0x37c   : > { %1852 = vrot.lane.b32.xlu2 %v3189_v63, %s3818_s24  ;;  %v4779_v63 = vld [vmem:[%s3975_s8 + $0x54] sm:$0xf] }
 0x37d   : > { %v1634_v4 = vpop.permute.xlu1 %1633  ;;  %v1632_v5 = vpop.permute.xlu0 %1631  ;;  %2165 = vst.msk [vmem:[#allocation2 + $0xc4] sm:$0xf] %vm325_vm0, %v4779_v63 }
 0x37e   : > { %1638 = vst.msk [vmem:[#allocation2 + $0x7c] sm:$0xf] %vm490_vm5, %v1634_v4  ;;  %v1682_v6 = vpop.permute.xlu2 %1681 }
 0x37f   : > { %1637 = vst.msk [vmem:[#allocation2 + $0x78] sm:$0xf] %vm490_vm5, %v1632_v5 }
 0x380   : > { %1686 = vst.msk [vmem:[#allocation2 + $0x8c] sm:$0xf] %vm523_vm6, %v1682_v6 }
 0x383   : > { %1864 = vrot.lane.b32.xlu1 %v3191_v7, %s3819_s17  ;;  %1854 = vrot.lane.b32.xlu0 %v3190_v0, %s3818_s24 }
 0x384   : > { %1866 = vrot.lane.b32.xlu2 %v3192_v8, %s3819_s17 }
 0x385   : > { %v1648_v9 = vpop.permute.xlu1 %1647  ;;  %v1642_v10 = vpop.permute.xlu0 %1641 }
 0x386   : > { %1653 = vst.msk [vmem:[#allocation2 + $0x88] sm:$0xf] %vm490_vm5, %v1648_v9  ;;  %v1704_v11 = vpop.permute.xlu2 %1703  ;;  %v4807_v9 = vld [vmem:[%s3975_s8 + $0x60] sm:$0xf] }
 0x387   : > { %1646 = vst.msk [vmem:[#allocation2 + $0x84] sm:$0xf] %vm490_vm5, %v1642_v10 }
 0x388   : > { %1709 = vst.msk [vmem:[#allocation2 + $0x80] sm:$0xf] %vm556_vm7, %v1704_v11 }
 0x38b   : > { %1874 = vrot.lane.b32.xlu1 %v3192_v8, %s5317_s16  ;;  %1872 = vrot.lane.b32.xlu0 %v3191_v7, %s5317_s16 }
 0x38c   : > { %1880 = vrot.lane.b32.xlu2 %v3191_v7, %s5289_s18  ;;  %v4800_v7 = vld [vmem:[%s3975_s8 + $0x5c] sm:$0xf] }
 0x38d   : > { %v1666_v12 = vpop.permute.xlu1 %1665  ;;  %v1664_v13 = vpop.permute.xlu0 %1663 }
 0x38e   : > { %1670 = vst.msk [vmem:[#allocation2 + $0x7c] sm:$0xf] %vm523_vm6, %v1666_v12  ;;  %v1714_v14 = vpop.permute.xlu2 %1713 }
 0x38f   : > { %1669 = vst.msk [vmem:[#allocation2 + $0x78] sm:$0xf] %vm523_vm6, %v1664_v13  ;;  %v4818_v13 = vld [vmem:[%s3975_s8 + $0x68] sm:$0xf] }
 0x390   : > { %1718 = vst.msk [vmem:[#allocation2 + $0x8c] sm:$0xf] %vm556_vm7, %v1714_v14  ;;  %v4821_v14 = vld [vmem:[%s3975_s8 + $0x64] sm:$0xf] }
 0x393   : > { %1892 = vrot.lane.b32.xlu1 %v3193_v15, %s3821_s12  ;;  %1882 = vrot.lane.b32.xlu0 %v3192_v8, %s5289_s18  ;;  %s3824_s18 = smov 102   ;;  %v4803_v8 = vld [vmem:[%s3975_s8 + $0x58] sm:$0xf] }
 0x394   : > { %1894 = vrot.lane.b32.xlu2 %v3194_v17, %s3821_s12 }
 0x395   : > { %v1680_v18 = vpop.permute.xlu1 %1679  ;;  %v1674_v19 = vpop.permute.xlu0 %1673 }
 0x396   : > { %1685 = vst.msk [vmem:[#allocation2 + $0x88] sm:$0xf] %vm523_vm6, %v1680_v18  ;;  %v1737_v20 = vpop.permute.xlu2 %1736 }
 0x397   : > { %1678 = vst.msk [vmem:[#allocation2 + $0x84] sm:$0xf] %vm523_vm6, %v1674_v19  ;;  %v4836_v19 = vld [vmem:[%s3975_s8 + $0x74] sm:$0xf] }
 0x398   : > { %1742 = vst.msk [vmem:[#allocation2 + $0xa0] sm:$0xf] %vm325_vm0, %v1737_v20  ;;  %v4839_v20 = vld [vmem:[%s3975_s8 + $0x70] sm:$0xf] }
 0x39b   : > { %1902 = vrot.lane.b32.xlu1 %v3194_v17, %s5343_s25  ;;  %1900 = vrot.lane.b32.xlu0 %v3193_v15, %s5343_s25 }
 0x39c   : > { %1908 = vrot.lane.b32.xlu2 %v3193_v15, %s3822_s5  ;;  %v4825_v15 = vld [vmem:[%s3975_s8 + $0x6c] sm:$0xf] }
 0x39d   : > { %v1698_v22 = vpop.permute.xlu1 %1697  ;;  %v1696_v23 = vpop.permute.xlu0 %1695 }
 0x39e   : > { %1702 = vst.msk [vmem:[#allocation2 + $0x7c] sm:$0xf] %vm556_vm7, %v1698_v22  ;;  %v1755_v24 = vpop.permute.xlu2 %1754 }
 0x39f   : > { %1701 = vst.msk [vmem:[#allocation2 + $0x78] sm:$0xf] %vm556_vm7, %v1696_v23 }
 0x3a0   : > { %1759 = vst.msk [vmem:[#allocation2 + $0x94] sm:$0xf] %vm358_vm1, %v1755_v24  ;;  %v4851_v24 = vld [vmem:[%s3975_s8 + $0x78] sm:$0xf] }
 0x3a3   : > { %1920 = vrot.lane.b32.xlu1 %v3195_v25, %s3823_s4  ;;  %1910 = vrot.lane.b32.xlu0 %v3194_v17, %s3822_s5 }
 0x3a4   : > { %1922 = vrot.lane.b32.xlu2 %v3196_v26, %s3823_s4 }
 0x3a5   : > { %v1712_v27 = vpop.permute.xlu1 %1711  ;;  %v1706_v28 = vpop.permute.xlu0 %1705 }
 0x3a6   : > { %1717 = vst.msk [vmem:[#allocation2 + $0x88] sm:$0xf] %vm556_vm7, %v1712_v27  ;;  %v1769_v29 = vpop.permute.xlu2 %1768  ;;  %v3398_v35 = vld [vmem:[#allocation2 + $0x78] sm:$0xff] }
 0x3a7   : > { %1710 = vst.msk [vmem:[#allocation2 + $0x84] sm:$0xf] %vm556_vm7, %v1706_v28 }
 0x3a8   : > { %1774 = vst.msk [vmem:[#allocation2 + $0xa0] sm:$0xf] %vm358_vm1, %v1769_v29  ;;  %v4867_v29 = vld [vmem:[%s3975_s8 + $0x80] sm:$0xf] }
 0x3ab   : > { %1930 = vrot.lane.b32.xlu1 %v3196_v26, %s5330_s26  ;;  %1928 = vrot.lane.b32.xlu0 %v3195_v25, %s5330_s26 }
 0x3ac   : > { %1936 = vrot.lane.b32.xlu2 %v3195_v25, %s3824_s18  ;;  %v4855_v25 = vld [vmem:[%s3975_s8 + $0x7c] sm:$0xf] }
 0x3ad   : > { %v1731_v30 = vpop.permute.xlu1 %1730  ;;  %v1729_v31 = vpop.permute.xlu0 %1728  ;;  %v3400_v32 = vld [vmem:[#allocation2 + $0x88] sm:$0xff] }
 0x3ae   : > { %1735 = vst.msk [vmem:[#allocation2 + $0x9c] sm:$0xf] %vm325_vm0, %v1731_v30  ;;  %v3399_v33 = vld [vmem:[#allocation2 + $0x80] sm:$0xff]  ;;  %v1783_v34 = vpop.permute.xlu2 %1782  ;;  %2610 = vmatpush.bf16.msra.mxu3 %v3400_v32 }
 0x3af   : > { %1734 = vst.msk [vmem:[#allocation2 + $0x98] sm:$0xf] %vm325_vm0, %v1729_v31  ;;  %2590 = vmatpush.bf16.msra.mxu2 %v3399_v33  ;;  %v4878_v33 = vld [vmem:[%s3975_s8 + $0x84] sm:$0xf] }
 0x3b0   : > { %1787 = vst.msk [vmem:[#allocation2 + $0x94] sm:$0xf] %vm391_vm2, %v1783_v34 }
 0x3b3   : > { %1950 = vrot.lane.b32.xlu1 %v4699_v16, %s5333_s20  ;;  %1938 = vrot.lane.b32.xlu0 %v3196_v26, %s3824_s18 }
 0x3b4   : > { %2591 = vmatpush.bf16.msra.mxu2 %v3398_v35  ;;  %1952 = vrot.lane.b32.xlu2 %v3198_v21, %s5333_s20 }
 0x3b5   : > { %v1753_v36 = vpop.permute.xlu1 %1752  ;;  %v1739_v37 = vpop.permute.xlu0 %1738 }
 0x3b6   : > { %1758 = vst.msk [vmem:[#allocation2 + $0x90] sm:$0xf] %vm358_vm1, %v1753_v36  ;;  %v1797_v39 = vpop.permute.xlu2 %1796 }
 0x3b7   : > { %1743 = vst.msk [vmem:[#allocation2 + $0xa4] sm:$0xf] %vm325_vm0, %v1739_v37  ;;  %v4890_v37 = vld [vmem:[%s3975_s8 + $0x8c] sm:$0xf] }
 0x3b8   : > { %2592 = vmatpush.bf16.msra.mxu2 %v3397_v38  ;;  %1802 = vst.msk [vmem:[#allocation2 + $0xa0] sm:$0xf] %vm391_vm2, %v1797_v39  ;;  %v4893_v38 = vld [vmem:[%s3975_s8 + $0x88] sm:$0xf] }
 0x3bb   : > { %1960 = vrot.lane.b32.xlu1 %v3198_v21, %s3810_s0  ;;  %1958 = vrot.lane.b32.xlu0 %v4699_v16, %s3810_s0 }
 0x3bc   : > { %2593 = vmatpush.bf16.msra.mxu2 %v3396_v40  ;;  %1970 = vrot.lane.b32.xlu2 %v3199_v41, %s3811_s6 }
 0x3bd   : > { %v1763_v42 = vpop.permute.xlu1 %1762  ;;  %v1761_v43 = vpop.permute.xlu0 %1760 }
 0x3be   : > { %1767 = vst.msk [vmem:[#allocation2 + $0x9c] sm:$0xf] %vm358_vm1, %v1763_v42  ;;  %v1811_v45 = vpop.permute.xlu2 %1810 }
 0x3bf   : > { %1766 = vst.msk [vmem:[#allocation2 + $0x98] sm:$0xf] %vm358_vm1, %v1761_v43 }
 0x3c0   : > { %2594 = vmatpush.bf16.msra.mxu2 %v3395_v44  ;;  %1815 = vst.msk [vmem:[#allocation2 + $0x94] sm:$0xf] %vm424_vm3, %v1811_v45 }
 0x3c3   : > { %1978 = vrot.lane.b32.xlu1 %v3199_v41, %s5323_s29  ;;  %1972 = vrot.lane.b32.xlu0 %v3200_v46, %s3811_s6 }
 0x3c4   : > { %2595 = vmatpush.bf16.msra.mxu2 %v3394_v48  ;;  %1980 = vrot.lane.b32.xlu2 %v3200_v46, %s5323_s29 }
 0x3c5   : > { %v1781_v49 = vpop.permute.xlu1 %1780  ;;  %v1771_v50 = vpop.permute.xlu0 %1770 }
 0x3c6   : > { %1786 = vst.msk [vmem:[#allocation2 + $0x90] sm:$0xf] %vm391_vm2, %v1781_v49  ;;  %v1825_v52 = vpop.permute.xlu2 %1824 }
 0x3c7   : > { %1775 = vst.msk [vmem:[#allocation2 + $0xa4] sm:$0xf] %vm358_vm1, %v1771_v50 }
 0x3c8   : > { %2596 = vmatpush.bf16.msra.mxu2 %v3393_v51  ;;  %1830 = vst.msk [vmem:[#allocation2 + $0xa0] sm:$0xf] %vm424_vm3, %v1825_v52  ;;  %v3206_v52 = vld [vmem:[%s3975_s8 + $0x4c] sm:$0xf] }
 0x3cb   : > { %1988 = vrot.lane.b32.xlu1 %v3200_v46, %s3812_s21  ;;  %1986 = vrot.lane.b32.xlu0 %v3199_v41, %s3812_s21 }
 0x3cc   : > { %2597 = vmatpush.bf16.msra.mxu2 %v3392_v53  ;;  %1998 = vrot.lane.b32.xlu2 %v3201_v54, %s3813_s7  ;;  %v3205_v53 = vld [vmem:[%s3975_s8 + $0x48] sm:$0xf] }
 0x3cd   : > { %v1791_v55 = vpop.permute.xlu1 %1790  ;;  %v1789_v56 = vpop.permute.xlu0 %1788 }
 0x3ce   : > { %1795 = vst.msk [vmem:[#allocation2 + $0x9c] sm:$0xf] %vm391_vm2, %v1791_v55  ;;  %v1839_v57 = vpop.permute.xlu2 %1838 }
 0x3cf   : > { %1794 = vst.msk [vmem:[#allocation2 + $0x98] sm:$0xf] %vm391_vm2, %v1789_v56 }
 0x3d0   : > { %1843 = vst.msk [vmem:[#allocation2 + $0x94] sm:$0xf] %vm457_vm4, %v1839_v57 }
 0x3d3   : > { %2006 = vrot.lane.b32.xlu1 %v3201_v54, %s5326_s23  ;;  %2000 = vrot.lane.b32.xlu0 %v3202_v58, %s3813_s7 }
 0x3d4   : > { %2008 = vrot.lane.b32.xlu2 %v3202_v58, %s5326_s23 }
 0x3d5   : > { %v1809_v59 = vpop.permute.xlu1 %1808  ;;  %v1799_v60 = vpop.permute.xlu0 %1798 }
 0x3d6   : > { %1814 = vst.msk [vmem:[#allocation2 + $0x90] sm:$0xf] %vm424_vm3, %v1809_v59  ;;  %v1853_v61 = vpop.permute.xlu2 %1852  ;;  %v3208_v59 = vld [vmem:[%s3975_s8 + $0x54] sm:$0xf] }
 0x3d7   : > { %1803 = vst.msk [vmem:[#allocation2 + $0xa4] sm:$0xf] %vm391_vm2, %v1799_v60  ;;  %v3210_v60 = vld [vmem:[%s3975_s8 + $0x5c] sm:$0xf] }
 0x3d8   : > { %1858 = vst.msk [vmem:[#allocation2 + $0xa0] sm:$0xf] %vm457_vm4, %v1853_v61 }
 0x3db   : > { %2016 = vrot.lane.b32.xlu1 %v3202_v58, %s3814_s10  ;;  %2014 = vrot.lane.b32.xlu0 %v3201_v54, %s3814_s10  ;;  %v3207_v54 = vld [vmem:[%s3975_s8 + $0x50] sm:$0xf]  ;;  %v3209_v58 = vld [vmem:[%s3975_s8 + $0x58] sm:$0xf] }
 0x3dc   : > { %2026 = vrot.lane.b32.xlu2 %v4774_v62, %s3815_s9 }
 0x3dd   : > { %v1819_v0 = vpop.permute.xlu1 %1818  ;;  %v1817_v1 = vpop.permute.xlu0 %1816 }
 0x3de   : > { %1823 = vst.msk [vmem:[#allocation2 + $0x9c] sm:$0xf] %vm424_vm3, %v1819_v0  ;;  %v1867_v2 = vpop.permute.xlu2 %1866 }
 0x3df   : > { %1822 = vst.msk [vmem:[#allocation2 + $0x98] sm:$0xf] %vm424_vm3, %v1817_v1 }
 0x3e0   : > { %1871 = vst.msk [vmem:[#allocation2 + $0x94] sm:$0xf] %vm490_vm5, %v1867_v2  ;;  %v3211_v2 = vld [vmem:[%s3975_s8 + $0x60] sm:$0xf] }
 0x3e3   : > { %2168 = vrot.lane.b32.xlu1 %v4749_v47, %s5333_s20  ;;  %2028 = vrot.lane.b32.xlu0 %v4788_v3, %s3815_s9 }
 0x3e4   : > { %2170 = vrot.lane.b32.xlu2 %v4779_v63, %s5333_s20 }
 0x3e5   : > { %v1837_v4 = vpop.permute.xlu1 %1836  ;;  %v1827_v5 = vpop.permute.xlu0 %1826 }
 0x3e6   : > { %1842 = vst.msk [vmem:[#allocation2 + $0x90] sm:$0xf] %vm457_vm4, %v1837_v4  ;;  %v1881_v6 = vpop.permute.xlu2 %1880 }
 0x3e7   : > { %1831 = vst.msk [vmem:[#allocation2 + $0xa4] sm:$0xf] %vm424_vm3, %v1827_v5 }
 0x3e8   : > { %1886 = vst.msk [vmem:[#allocation2 + $0xa0] sm:$0xf] %vm490_vm5, %v1881_v6 }
 0x3eb   : > { %2198 = vrot.lane.b32.xlu1 %v4800_v7, %s5323_s29  ;;  %2196 = vrot.lane.b32.xlu0 %v4803_v8, %s5323_s29 }
 0x3ec   : > { %2224 = vrot.lane.b32.xlu2 %v4807_v9, %s5326_s23 }
 0x3ed   : > { %v1847_v10 = vpop.permute.xlu1 %1846  ;;  %v1845_v11 = vpop.permute.xlu0 %1844 }
 0x3ee   : > { %1851 = vst.msk [vmem:[#allocation2 + $0x9c] sm:$0xf] %vm457_vm4, %v1847_v10  ;;  %v1895_v12 = vpop.permute.xlu2 %1894  ;;  %v3212_v10 = vld [vmem:[%s3975_s8 + $0x64] sm:$0xf] }
 0x3ef   : > { %1850 = vst.msk [vmem:[#allocation2 + $0x98] sm:$0xf] %vm457_vm4, %v1845_v11 }
 0x3f0   : > { %1899 = vst.msk [vmem:[#allocation2 + $0x94] sm:$0xf] %vm523_vm6, %v1895_v12 }
 0x3f3   : > { %2252 = vrot.lane.b32.xlu1 %v4818_v13, %s5312_s14  ;;  %2226 = vrot.lane.b32.xlu0 %v4821_v14, %s5326_s23  ;;  %s5351_s23 = smov 70  }
 0x3f4   : > { %2254 = vrot.lane.b32.xlu2 %v4825_v15, %s5312_s14 }
 0x3f5   : > { %v1865_v16 = vpop.permute.xlu1 %1864  ;;  %v1855_v17 = vpop.permute.xlu0 %1854 }
 0x3f6   : > { %1870 = vst.msk [vmem:[#allocation2 + $0x90] sm:$0xf] %vm490_vm5, %v1865_v16  ;;  %v1909_v18 = vpop.permute.xlu2 %1908 }
 0x3f7   : > { %1859 = vst.msk [vmem:[#allocation2 + $0xa4] sm:$0xf] %vm457_vm4, %v1855_v17 }
 0x3f8   : > { %1914 = vst.msk [vmem:[#allocation2 + $0xa0] sm:$0xf] %vm523_vm6, %v1909_v18 }
 0x3fb   : > { %2282 = vrot.lane.b32.xlu1 %v4836_v19, %s5329_s15  ;;  %2280 = vrot.lane.b32.xlu0 %v4839_v20, %s5329_s15 }
 0x3fc   : > { %2188 = vrot.lane.b32.xlu2 %v4803_v8, %s3811_s6 }
 0x3fd   : > { %v1875_v21 = vpop.permute.xlu1 %1874  ;;  %v1873_v22 = vpop.permute.xlu0 %1872 }
 0x3fe   : > { %1879 = vst.msk [vmem:[#allocation2 + $0x9c] sm:$0xf] %vm490_vm5, %v1875_v21  ;;  %v1923_v23 = vpop.permute.xlu2 %1922 }
 0x3ff   : > { %1878 = vst.msk [vmem:[#allocation2 + $0x98] sm:$0xf] %vm490_vm5, %v1873_v22 }
 0x400   : > { %1927 = vst.msk [vmem:[#allocation2 + $0x94] sm:$0xf] %vm556_vm7, %v1923_v23 }
 0x403   : > { %2308 = vrot.lane.b32.xlu1 %v4851_v24, %s5317_s16  ;;  %2190 = vrot.lane.b32.xlu0 %v4800_v7, %s3811_s6 }
 0x404   : > { %2310 = vrot.lane.b32.xlu2 %v4855_v25, %s5317_s16 }
 0x405   : > { %v1893_v26 = vpop.permute.xlu1 %1892  ;;  %v1883_v27 = vpop.permute.xlu0 %1882 }
 0x406   : > { %1898 = vst.msk [vmem:[#allocation2 + $0x90] sm:$0xf] %vm523_vm6, %v1893_v26  ;;  %v1937_v28 = vpop.permute.xlu2 %1936 }
 0x407   : > { %1887 = vst.msk [vmem:[#allocation2 + $0xa4] sm:$0xf] %vm490_vm5, %v1883_v27 }
 0x408   : > { %1942 = vst.msk [vmem:[#allocation2 + $0xa0] sm:$0xf] %vm556_vm7, %v1937_v28 }
 0x40b   : > { %2218 = vrot.lane.b32.xlu1 %v4821_v14, %s3813_s7  ;;  %2216 = vrot.lane.b32.xlu0 %v4807_v9, %s3813_s7 }
 0x40c   : > { %2340 = vrot.lane.b32.xlu2 %v4867_v29, %s5343_s25 }
 0x40d   : > { %v1903_v30 = vpop.permute.xlu1 %1902  ;;  %v1901_v31 = vpop.permute.xlu0 %1900 }
 0x40e   : > { %1907 = vst.msk [vmem:[#allocation2 + $0x9c] sm:$0xf] %vm523_vm6, %v1903_v30  ;;  %v1953_v32 = vpop.permute.xlu2 %1952 }
 0x40f   : > { %1906 = vst.msk [vmem:[#allocation2 + $0x98] sm:$0xf] %vm523_vm6, %v1901_v31 }
 0x410   : > { %1957 = vst.msk [vmem:[#allocation2 + $0xb4] sm:$0xf] %vm325_vm0, %v1953_v32 }
 0x413   : > { %2244 = vrot.lane.b32.xlu1 %v4818_v13, %s3815_s9  ;;  %2342 = vrot.lane.b32.xlu0 %v4878_v33, %s5343_s25 }
 0x414   : > { %2246 = vrot.lane.b32.xlu2 %v4825_v15, %s3815_s9 }
 0x415   : > { %v1921_v34 = vpop.permute.xlu1 %1920  ;;  %v1911_v35 = vpop.permute.xlu0 %1910 }
 0x416   : > { %1926 = vst.msk [vmem:[#allocation2 + $0x90] sm:$0xf] %vm556_vm7, %v1921_v34  ;;  %v1971_v36 = vpop.permute.xlu2 %1970 }
 0x417   : > { %1915 = vst.msk [vmem:[#allocation2 + $0xa4] sm:$0xf] %vm523_vm6, %v1911_v35 }
 0x418   : > { %1976 = vst.msk [vmem:[#allocation2 + $0xa8] sm:$0xf] %vm358_vm1, %v1971_v36 }
 0x41b   : > { %2374 = vrot.lane.b32.xlu1 %v4890_v37, %s5330_s26  ;;  %2372 = vrot.lane.b32.xlu0 %v4893_v38, %s5330_s26 }
 0x41c   : > { %2272 = vrot.lane.b32.xlu2 %v4839_v20, %s3817_s30 }
 0x41d   : > { %v1931_v39 = vpop.permute.xlu1 %1930  ;;  %v1929_v40 = vpop.permute.xlu0 %1928 }
 0x41e   : > { %1935 = vst.msk [vmem:[#allocation2 + $0x9c] sm:$0xf] %vm556_vm7, %v1931_v39  ;;  %v1981_v41 = vpop.permute.xlu2 %1980 }
 0x41f   : > { %1934 = vst.msk [vmem:[#allocation2 + $0x98] sm:$0xf] %vm556_vm7, %v1929_v40 }
 0x420   : > { %1985 = vst.msk [vmem:[#allocation2 + $0xb4] sm:$0xf] %vm358_vm1, %v1981_v41 }
 0x423   : > { %2300 = vrot.lane.b32.xlu1 %v4851_v24, %s3819_s17  ;;  %2274 = vrot.lane.b32.xlu0 %v4836_v19, %s3817_s30 }
 0x424   : > { %2302 = vrot.lane.b32.xlu2 %v4855_v25, %s3819_s17 }
 0x425   : > { %v1951_v42 = vpop.permute.xlu1 %1950  ;;  %v1939_v43 = vpop.permute.xlu0 %1938 }
 0x426   : > { %1956 = vst.msk [vmem:[#allocation2 + $0xb0] sm:$0xf] %vm325_vm0, %v1951_v42  ;;  %v1999_v44 = vpop.permute.xlu2 %1998 }
 0x427   : > { %1943 = vst.msk [vmem:[#allocation2 + $0xa4] sm:$0xf] %vm556_vm7, %v1939_v43 }
 0x428   : > { %2004 = vst.msk [vmem:[#allocation2 + $0xa8] sm:$0xf] %vm391_vm2, %v1999_v44 }
 0x42b   : > { %2334 = vrot.lane.b32.xlu1 %v4878_v33, %s3821_s12  ;;  %2332 = vrot.lane.b32.xlu0 %v4867_v29, %s3821_s12 }
 0x42c   : > { %2042 = vrot.lane.b32.xlu2 %v4774_v62, %s3816_s11 }
 0x42d   : > { %v1961_v45 = vpop.permute.xlu1 %1960  ;;  %v1959_v46 = vpop.permute.xlu0 %1958 }
 0x42e   : > { %1965 = vst.msk [vmem:[#allocation2 + $0xbc] sm:$0xf] %vm325_vm0, %v1961_v45  ;;  %v2009_v48 = vpop.permute.xlu2 %2008 }
 0x42f   : > { %1964 = vst.msk [vmem:[#allocation2 + $0xb8] sm:$0xf] %vm325_vm0, %v1959_v46 }
 0x430   : > { %2013 = vst.msk [vmem:[#allocation2 + $0xb4] sm:$0xf] %vm391_vm2, %v2009_v48 }
 0x433   : > { %2364 = vrot.lane.b32.xlu1 %v4893_v38, %s3823_s4  ;;  %2044 = vrot.lane.b32.xlu0 %v4788_v3, %s3816_s11 }
 0x434   : > { %2366 = vrot.lane.b32.xlu2 %v4890_v37, %s3823_s4 }
 0x435   : > { %v1979_v49 = vpop.permute.xlu1 %1978  ;;  %v1973_v50 = vpop.permute.xlu0 %1972 }
 0x436   : > { %1984 = vst.msk [vmem:[#allocation2 + $0xb0] sm:$0xf] %vm358_vm1, %v1979_v49  ;;  %v2027_v51 = vpop.permute.xlu2 %2026 }
 0x437   : > { %1977 = vst.msk [vmem:[#allocation2 + $0xac] sm:$0xf] %vm358_vm1, %v1973_v50 }
 0x438   : > { %2032 = vst.msk [vmem:[#allocation2 + $0xa8] sm:$0xf] %vm424_vm3, %v2027_v51 }
 0x43b   : > { %2072 = vrot.lane.b32.xlu1 %v3206_v52, %s3818_s24  ;;  %2070 = vrot.lane.b32.xlu0 %v3205_v53, %s3818_s24 }
 0x43c   : > { %2098 = vrot.lane.b32.xlu2 %v3207_v54, %s5351_s23 }
 0x43d   : > { %v1989_v55 = vpop.permute.xlu1 %1988  ;;  %v1987_v56 = vpop.permute.xlu0 %1986 }
 0x43e   : > { %1993 = vst.msk [vmem:[#allocation2 + $0xbc] sm:$0xf] %vm358_vm1, %v1989_v55  ;;  %v2171_v57 = vpop.permute.xlu2 %2170 }
 0x43f   : > { %1992 = vst.msk [vmem:[#allocation2 + $0xb8] sm:$0xf] %vm358_vm1, %v1987_v56 }
 0x440   : > { %2175 = vst.msk [vmem:[#allocation2 + $0xcc] sm:$0xf] %vm325_vm0, %v2171_v57 }
 0x443   : > { %2126 = vrot.lane.b32.xlu1 %v3209_v58, %s3822_s5  ;;  %2100 = vrot.lane.b32.xlu0 %v3208_v59, %s5351_s23 }
 0x444   : > { %2128 = vrot.lane.b32.xlu2 %v3210_v60, %s3822_s5 }
 0x445   : > { %v2007_v61 = vpop.permute.xlu1 %2006  ;;  %v2001_v0 = vpop.permute.xlu0 %2000 }
 0x446   : > { %2012 = vst.msk [vmem:[#allocation2 + $0xb0] sm:$0xf] %vm391_vm2, %v2007_v61  ;;  %v2225_v1 = vpop.permute.xlu2 %2224 }
 0x447   : > { %2005 = vst.msk [vmem:[#allocation2 + $0xac] sm:$0xf] %vm391_vm2, %v2001_v0 }
 0x44b   : > { %2036 = vrot.lane.b32.xlu1 %v4788_v3, %s5312_s14  ;;  %2034 = vrot.lane.b32.xlu0 %v4774_v62, %s5312_s14 }
 0x44c   : > { %2154 = vrot.lane.b32.xlu2 %v3211_v2, %s3824_s18 }
 0x44d   : > { %v2017_v4 = vpop.permute.xlu1 %2016  ;;  %v2015_v5 = vpop.permute.xlu0 %2014 }
 0x44e   : > { %2021 = vst.msk [vmem:[#allocation2 + $0xbc] sm:$0xf] %vm391_vm2, %v2017_v4  ;;  %v2255_v6 = vpop.permute.xlu2 %2254  ;;  %v3270_v4 = vld [vmem:[%s5194_s1 + $0x4] sm:$0xf] }
 0x44f   : > { %2020 = vst.msk [vmem:[#allocation2 + $0xb8] sm:$0xf] %vm391_vm2, %v2015_v5 }
 0x453   : > { %2062 = vrot.lane.b32.xlu1 %v3205_v53, %s5329_s15  ;;  %2156 = vrot.lane.b32.xlu0 %v3212_v10, %s3824_s18 }
 0x454   : > { %2064 = vrot.lane.b32.xlu2 %v3206_v52, %s5329_s15 }
 0x455   : > { %v2169_v3 = vpop.permute.xlu1 %2168  ;;  %v2029_v11 = vpop.permute.xlu0 %2028 }
 0x456   : > { %2174 = vst.msk [vmem:[#allocation2 + $0xc8] sm:$0xf] %vm325_vm0, %v2169_v3  ;;  %v2189_v62 = vpop.permute.xlu2 %2188 }
 0x457   : > { %2033 = vst.msk [vmem:[#allocation2 + $0xac] sm:$0xf] %vm424_vm3, %v2029_v11 }
 0x458   : > { %2194 = vst.msk [vmem:[#allocation2 + $0xc0] sm:$0xf] %vm358_vm1, %v2189_v62 }
 0x45b   : > { %2092 = vrot.lane.b32.xlu1 %v3208_v59, %s5317_s16  ;;  %2090 = vrot.lane.b32.xlu0 %v3207_v54, %s5317_s16 }
 0x45c   : > { %2118 = vrot.lane.b32.xlu2 %v3209_v58, %s5343_s25 }
 0x45d   : > { %v2199_v12 = vpop.permute.xlu1 %2198  ;;  %v2197_v16 = vpop.permute.xlu0 %2196 }
 0x45e   : > { %2203 = vst.msk [vmem:[#allocation2 + $0xcc] sm:$0xf] %vm358_vm1, %v2199_v12  ;;  %v2311_v17 = vpop.permute.xlu2 %2310 }
 0x45f   : > { %2202 = vst.msk [vmem:[#allocation2 + $0xc8] sm:$0xf] %vm358_vm1, %v2197_v16 }
 0x460   : > { %2230 = vst.msk [vmem:[#allocation2 + $0xc8] sm:$0xf] %vm391_vm2, %v2225_v1 }
 0x463   : > { %2146 = vrot.lane.b32.xlu1 %v3211_v2, %s5330_s26  ;;  %2120 = vrot.lane.b32.xlu0 %v3210_v60, %s5343_s25 }
 0x464   : > { %2148 = vrot.lane.b32.xlu2 %v3212_v10, %s5330_s26 }
 0x465   : > { %v2253_v18 = vpop.permute.xlu1 %2252  ;;  %v2227_v21 = vpop.permute.xlu0 %2226 }
 0x466   : > { %2258 = vst.msk [vmem:[#allocation2 + $0xc8] sm:$0xf] %vm424_vm3, %v2253_v18  ;;  %v2341_v22 = vpop.permute.xlu2 %2340 }
 0x467   : > { %2231 = vst.msk [vmem:[#allocation2 + $0xcc] sm:$0xf] %vm391_vm2, %v2227_v21 }
 0x468   : > { %2259 = vst.msk [vmem:[#allocation2 + $0xcc] sm:$0xf] %vm424_vm3, %v2255_v6 }
 0x46b   : > { %2056 = vrot.lane.b32.xlu1 %v3206_v52, %s3817_s30  ;;  %2054 = vrot.lane.b32.xlu0 %v3205_v53, %s3817_s30 }
 0x46c   : > { %2082 = vrot.lane.b32.xlu2 %v3207_v54, %s3819_s17 }
 0x46d   : > { %v2283_v23 = vpop.permute.xlu1 %2282  ;;  %v2281_v26 = vpop.permute.xlu0 %2280 }
 0x46e   : > { %2287 = vst.msk [vmem:[#allocation2 + $0xcc] sm:$0xf] %vm457_vm4, %v2283_v23  ;;  %v2247_v27 = vpop.permute.xlu2 %2246  ;;  %v3403_v23 = vld [vmem:[#allocation2 + $0xa0] sm:$0xff] }
 0x46f   : > { %2286 = vst.msk [vmem:[#allocation2 + $0xc8] sm:$0xf] %vm457_vm4, %v2281_v26 }
 0x470   : > { %2315 = vst.msk [vmem:[#allocation2 + $0xcc] sm:$0xf] %vm490_vm5, %v2311_v17 }
 0x473   : > { %2110 = vrot.lane.b32.xlu1 %v3209_v58, %s3821_s12  ;;  %2084 = vrot.lane.b32.xlu0 %v3208_v59, %s3819_s17  ;;  %v2388_v59 = vld [vmem:[%s5194_s1] sm:$0xf] }
 0x474   : > { %2112 = vrot.lane.b32.xlu2 %v3210_v60, %s3821_s12  ;;  %2414 = vst [vmem:[#allocation1] ss:$4 sm:$0xff] %v2388_v59 }
 0x475   : > { %v2309_v28 = vpop.permute.xlu1 %2308  ;;  %v2191_v30 = vpop.permute.xlu0 %2190 }
 0x476   : > { %2314 = vst.msk [vmem:[#allocation2 + $0xc8] sm:$0xf] %vm490_vm5, %v2309_v28  ;;  %v2273_v31 = vpop.permute.xlu2 %2272  ;;  %v3402_v28 = vld [vmem:[#allocation2 + $0x98] sm:$0xff] }
 0x477   : > { %2195 = vst.msk [vmem:[#allocation2 + $0xc4] sm:$0xf] %vm358_vm1, %v2191_v30 }
 0x478   : > { %2346 = vst.msk [vmem:[#allocation2 + $0xc8] sm:$0xf] %vm523_vm6, %v2341_v22  ;;  %v3309_v22 = vld [vmem:[%s5194_s1 + $0x8] sm:$0xf] }
 0x47b   : > { %2140 = vrot.lane.b32.xlu1 %v3212_v10, %s3823_s4  ;;  %2138 = vrot.lane.b32.xlu0 %v3211_v2, %s3823_s4  ;;  %v2415_v1 = vld.sshfl [vmem:[#allocation1] sm:$0xff pattern:$0x73625140]  ;;  %v2416_v2 = vld.sshfl [vmem:[#allocation1 + $0x8] sm:$0xff pattern:$0x73625140] }
 0x47c   : > { %2176 = vrot.lane.b32.xlu2 %v4749_v47, %s3810_s0  ;;  %2483 = vmatmul.bf16.vlgmr.msra.gmra.mxu0 %v2415_v1  ;;  %2530 = vst [vmem:[#allocation1] ss:$4 sm:$0xff] %v3270_v4 }
 0x47d   : > { %v2219_v32 = vpop.permute.xlu1 %2218  ;;  %v2217_v34 = vpop.permute.xlu0 %2216  ;;  %3269 = vmatmul.msk.bf16.vlgmr.msra.gmra.mxu1 %vm2472_vm8, %v2416_v2 }
 0x47e   : > { %2223 = vst.msk [vmem:[#allocation2 + $0xc4] sm:$0xf] %vm391_vm2, %v2219_v32  ;;  %v2303_v35 = vpop.permute.xlu2 %2302  ;;  %v3271_v32 = vld [vmem:[%s5196_s3 + $0x4] sm:$0xf] }
 0x47f   : > { %2222 = vst.msk [vmem:[#allocation2 + $0xc0] sm:$0xf] %vm391_vm2, %v2217_v34  ;;  %v2407_v34 = vld [vmem:[%s5196_s3] sm:$0xf] }
 0x480   : > { %2251 = vst.msk [vmem:[#allocation2 + $0xc4] sm:$0xf] %vm424_vm3, %v2247_v27 }
 0x483   : > { %2178 = vrot.lane.b32.xlu0 %v4779_v63, %s3810_s0  ;;  %2204 = vrot.lane.b32.xlu1 %v4803_v8, %s3812_s21  ;;  %v2532_v3 = vld.sshfl [vmem:[#allocation1 + $0x8] sm:$0xff pattern:$0x73625140]  ;;  %v2531_v12 = vld.sshfl [vmem:[#allocation1] sm:$0xff pattern:$0x73625140] }
 0x484   : > { %2206 = vrot.lane.b32.xlu2 %v4800_v7, %s3812_s21  ;;  %3308 = vmatmul.msk.bf16.vlgmr.msra.gmra.mxu3 %vm2472_vm8, %v2532_v3  ;;  %2645 = vst [vmem:[#allocation1] ss:$4 sm:$0xff] %v3309_v22 }
 0x485   : > { %v2245_v36 = vpop.permute.xlu1 %2244  ;;  %v2343_v47 = vpop.permute.xlu0 %2342  ;;  %2598 = vmatmul.bf16.vlgmr.msra.gmra.mxu2 %v2531_v12 }
 0x486   : > { %2250 = vst.msk [vmem:[#allocation2 + $0xc0] sm:$0xf] %vm424_vm3, %v2245_v36  ;;  %v2043_v39 = vpop.permute.xlu2 %2042 }
 0x487   : > { %2347 = vst.msk [vmem:[#allocation2 + $0xcc] sm:$0xf] %vm523_vm6, %v2343_v47 }
 0x488   : > { %2278 = vst.msk [vmem:[#allocation2 + $0xc0] sm:$0xf] %vm457_vm4, %v2273_v31  ;;  %v3825_v31 = vmov 0  }
 0x489   : > { %2048 = vst.msk [vmem:[#allocation2 + $0xb8] sm:$0xf] %vm424_vm3, %v2043_v39  ;;  %3580 = vset.pattern.permute.xlu1 %v3825_v31  ;;  %3579 = vset.pattern.permute.xlu0 %v3825_v31 }
 0x48a   : > { %3581 = vset.pattern.permute.xlu2 %v3825_v31 }
 0x48b   : > { %2232 = vrot.lane.b32.xlu0 %v4807_v9, %s3814_s10  ;;  %2234 = vrot.lane.b32.xlu1 %v4821_v14, %s3814_s10  ;;  %v2646_v36 = vld.sshfl [vmem:[#allocation1] sm:$0xff pattern:$0x73625140] }
 0x48c   : > { %2260 = vrot.lane.b32.xlu2 %v4818_v13, %s3816_s11 }
 0x48d   : > { %v2375_v63 = vpop.permute.xlu1 %2374  ;;  %v2373_v7 = vpop.permute.xlu0 %2372 }
 0x48e   : > { %2379 = vst.msk [vmem:[#allocation2 + $0xcc] sm:$0xf] %vm556_vm7, %v2375_v63  ;;  %v2367_v8 = vpop.permute.xlu2 %2366 }
 0x48f   : > { %2378 = vst.msk [vmem:[#allocation2 + $0xc8] sm:$0xf] %vm556_vm7, %v2373_v7 }
 0x493   : > { %2262 = vrot.lane.b32.xlu0 %v4825_v15, %s3816_s11  ;;  %2288 = vrot.lane.b32.xlu1 %v4839_v20, %s3818_s24 }
 0x494   : > { %2290 = vrot.lane.b32.xlu2 %v4836_v19, %s3818_s24  ;;  %s5110_s24 = sand.u32 1, %s3730_s22  }
 0x495   : > { %v2301_v9 = vpop.permute.xlu1 %2300  ;;  %v2275_v14 = vpop.permute.xlu0 %2274  ;;  %s3051_s17 = sshll.u32 %s5110_s24, 2 }
 0x496   : > { %2306 = vst.msk [vmem:[#allocation2 + $0xc0] sm:$0xf] %vm490_vm5, %v2301_v9  ;;  %v3408_v13 = vld [vmem:[#allocation2 + $0xc8] sm:$0xff]  ;;  %v2099_v40 = vpop.permute.xlu2 %2098  ;;  %v3348_v9 = vld [vmem:[%s5196_s3 + $0xc] sm:$0xf]  ;;  %s5116_s12 = scalar_lea.vmem [#allocation7], %s3051_s17 }
 0x497   : > { %2279 = vst.msk [vmem:[#allocation2 + $0xc4] sm:$0xf] %vm457_vm4, %v2275_v14  ;;  %2705 = vmatpush.bf16.msrb.mxu1 %v3408_v13  ;;  %v3310_v13 = vld [vmem:[%s5196_s3 + $0x8] sm:$0xf] }
 0x498   : > { %2307 = vst.msk [vmem:[#allocation2 + $0xc4] sm:$0xf] %vm490_vm5, %v2303_v35  ;;  %v3401_v35 = vld [vmem:[#allocation2 + $0x90] sm:$0xff] }
 0x49b   : > { %2316 = vrot.lane.b32.xlu0 %v4851_v24, %s5351_s23  ;;  %2318 = vrot.lane.b32.xlu1 %v4855_v25, %s5351_s23 }
 0x49c   : > { %2348 = vrot.lane.b32.xlu2 %v4867_v29, %s3822_s5 }
 0x49d   : > { %v2335_v15 = vpop.permute.xlu1 %2334  ;;  %v2333_v19 = vpop.permute.xlu0 %2332 }
 0x49e   : > { %2339 = vst.msk [vmem:[#allocation2 + $0xc4] sm:$0xf] %vm523_vm6, %v2335_v15  ;;  %v2129_v20 = vpop.permute.xlu2 %2128 }
 0x49f   : > { %2338 = vst.msk [vmem:[#allocation2 + $0xc0] sm:$0xf] %vm523_vm6, %v2333_v19 }
 0x4a0   : > { %2371 = vst.msk [vmem:[#allocation2 + $0xc4] sm:$0xf] %vm556_vm7, %v2367_v8 }
 0x4a3   : > { %2350 = vrot.lane.b32.xlu0 %v4878_v33, %s3822_s5  ;;  %2380 = vrot.lane.b32.xlu1 %v4893_v38, %s3824_s18 }
 0x4a4   : > { %2382 = vrot.lane.b32.xlu2 %v4890_v37, %s3824_s18  ;;  %s5113_s18 = scalar_lea.vmem [#allocation6], %s3051_s17 }
 0x4a5   : > { %v2365_v24 = vpop.permute.xlu1 %2364  ;;  %v2045_v25 = vpop.permute.xlu0 %2044 }
 0x4a6   : > { %2370 = vst.msk [vmem:[#allocation2 + $0xc0] sm:$0xf] %vm556_vm7, %v2365_v24  ;;  %v2155_v29 = vpop.permute.xlu2 %2154  ;;  %v2647_v24 = vld.sshfl [vmem:[#allocation1 + $0x8] sm:$0xff pattern:$0x73625140] }
 0x4a7   : > { %2049 = vst.msk [vmem:[#allocation2 + $0xbc] sm:$0xf] %vm424_vm3, %v2045_v25  ;;  %v2732_v25 = vld [vmem:[%s5195_s2] sm:$0x3] }
 0x4ab   : > { %2526 = vperm.xlu1 %3580, %v3271_v32   ;;  %2410 = vperm.xlu0 %3579, %v2407_v34  }
 0x4ac   : > { %2641 = vperm.xlu2 %3581, %v3310_v13  }
 0x4ad   : > { %v2073_v41 = vpop.permute.xlu1 %2072  ;;  %v2071_v42 = vpop.permute.xlu0 %2070  ;;  %v3407_v43 = vld [vmem:[#allocation2 + $0xc0] sm:$0xff] }
 0x4ae   : > { %2077 = vst.msk [vmem:[#allocation2 + $0xbc] sm:$0xf] %vm457_vm4, %v2073_v41  ;;  %v2065_v44 = vpop.permute.xlu2 %2064  ;;  %2706 = vmatpush.bf16.msrb.mxu1 %v3407_v43 }
 0x4af   : > { %2076 = vst.msk [vmem:[#allocation2 + $0xb8] sm:$0xf] %vm457_vm4, %v2071_v42 }
 0x4b0   : > { %2104 = vst.msk [vmem:[#allocation2 + $0xb8] sm:$0xf] %vm490_vm5, %v2099_v40 }
 0x4b3   : > { %2739 = vperm.xlu1 %3580, %v3348_v9  }
 0x4b5   : > { %v2127_v33 = vpop.permute.xlu1 %2126  ;;  %v2101_v37 = vpop.permute.xlu0 %2100 }
 0x4b6   : > { %2132 = vst.msk [vmem:[#allocation2 + $0xb8] sm:$0xf] %vm523_vm6, %v2127_v33  ;;  %v2119_v38 = vpop.permute.xlu2 %2118 }
 0x4b7   : > { %2105 = vst.msk [vmem:[#allocation2 + $0xbc] sm:$0xf] %vm490_vm5, %v2101_v37 }
 0x4b8   : > { %2133 = vst.msk [vmem:[#allocation2 + $0xbc] sm:$0xf] %vm523_vm6, %v2129_v20  ;;  %v3410_v20 = vld [vmem:[#allocation2 + $0x20] sm:$0xff] }
 0x4b9   : > { %2160 = vst.msk [vmem:[#allocation2 + $0xb8] sm:$0xf] %vm556_vm7, %v2155_v29 }
 0x4bd   : > { %v2037_v45 = vpop.permute.xlu1 %2036  ;;  %v2035_v46 = vpop.permute.xlu0 %2034 }
 0x4be   : > { %2041 = vst.msk [vmem:[#allocation2 + $0xb4] sm:$0xf] %vm424_vm3, %v2037_v45  ;;  %v2149_v48 = vpop.permute.xlu2 %2148 }
 0x4bf   : > { %2040 = vst.msk [vmem:[#allocation2 + $0xb0] sm:$0xf] %vm424_vm3, %v2035_v46 }
 0x4c0   : > { %2069 = vst.msk [vmem:[#allocation2 + $0xb4] sm:$0xf] %vm457_vm4, %v2065_v44 }
 0x4c5   : > { %v2063_v49 = vpop.permute.xlu1 %2062  ;;  %v2157_v50 = vpop.permute.xlu0 %2156 }
 0x4c6   : > { %2068 = vst.msk [vmem:[#allocation2 + $0xb0] sm:$0xf] %vm457_vm4, %v2063_v49  ;;  %v2083_v51 = vpop.permute.xlu2 %2082 }
 0x4c7   : > { %2161 = vst.msk [vmem:[#allocation2 + $0xbc] sm:$0xf] %vm556_vm7, %v2157_v50 }
 0x4cd   : > { %v2093_v52 = vpop.permute.xlu1 %2092  ;;  %v2091_v53 = vpop.permute.xlu0 %2090 }
 0x4ce   : > { %2097 = vst.msk [vmem:[#allocation2 + $0xb4] sm:$0xf] %vm490_vm5, %v2093_v52  ;;  %v3406_v54 = vld [vmem:[#allocation2 + $0xb8] sm:$0xff]  ;;  %v2113_v55 = vpop.permute.xlu2 %2112 }
 0x4cf   : > { %2096 = vst.msk [vmem:[#allocation2 + $0xb0] sm:$0xf] %vm490_vm5, %v2091_v53  ;;  %2707 = vmatpush.bf16.msrb.mxu1 %v3406_v54 }
 0x4d0   : > { %2124 = vst.msk [vmem:[#allocation2 + $0xb0] sm:$0xf] %vm523_vm6, %v2119_v38 }
 0x4d5   : > { %v2147_v56 = vpop.permute.xlu1 %2146  ;;  %v2121_v57 = vpop.permute.xlu0 %2120 }
 0x4d6   : > { %2152 = vst.msk [vmem:[#allocation2 + $0xb0] sm:$0xf] %vm556_vm7, %v2147_v56  ;;  %v2177_v58 = vpop.permute.xlu2 %2176 }
 0x4d7   : > { %2125 = vst.msk [vmem:[#allocation2 + $0xb4] sm:$0xf] %vm523_vm6, %v2121_v57 }
 0x4d8   : > { %2153 = vst.msk [vmem:[#allocation2 + $0xb4] sm:$0xf] %vm556_vm7, %v2149_v48 }
 0x4d9   : > { %2182 = vst.msk [vmem:[#allocation2 + $0xd0] sm:$0xf] %vm325_vm0, %v2177_v58 }
 0x4dd   : > { %v2057_v60 = vpop.permute.xlu1 %2056  ;;  %v2055_v61 = vpop.permute.xlu0 %2054 }
 0x4de   : > { %2061 = vst.msk [vmem:[#allocation2 + $0xac] sm:$0xf] %vm457_vm4, %v2057_v60  ;;  %v2207_v10 = vpop.permute.xlu2 %2206 }
 0x4df   : > { %2060 = vst.msk [vmem:[#allocation2 + $0xa8] sm:$0xf] %vm457_vm4, %v2055_v61  ;;  %v3405_v0 = vld [vmem:[#allocation2 + $0xb0] sm:$0xff] }
 0x4e0   : > { %2088 = vst.msk [vmem:[#allocation2 + $0xa8] sm:$0xf] %vm490_vm5, %v2083_v51  ;;  %2708 = vmatpush.bf16.msrb.mxu1 %v3405_v0 }
 0x4e5   : > { %v2111_v5 = vpop.permute.xlu1 %2110  ;;  %v2085_v6 = vpop.permute.xlu0 %2084 }
 0x4e6   : > { %2116 = vst.msk [vmem:[#allocation2 + $0xa8] sm:$0xf] %vm523_vm6, %v2111_v5  ;;  %v2261_v21 = vpop.permute.xlu2 %2260 }
 0x4e7   : > { %2089 = vst.msk [vmem:[#allocation2 + $0xac] sm:$0xf] %vm490_vm5, %v2085_v6 }
 0x4e8   : > { %2117 = vst.msk [vmem:[#allocation2 + $0xac] sm:$0xf] %vm523_vm6, %v2113_v55 }
 0x4ed   : > { %v2141_v11 = vpop.permute.xlu1 %2140  ;;  %v2139_v62 = vpop.permute.xlu0 %2138 }
 0x4ee   : > { %2145 = vst.msk [vmem:[#allocation2 + $0xac] sm:$0xf] %vm556_vm7, %v2141_v11  ;;  %v2291_v30 = vpop.permute.xlu2 %2290 }
 0x4ef   : > { %2144 = vst.msk [vmem:[#allocation2 + $0xa8] sm:$0xf] %vm556_vm7, %v2139_v62 }
 0x4f5   : > { %v2179_v16 = vpop.permute.xlu0 %2178  ;;  %v2205_v17 = vpop.permute.xlu1 %2204 }
 0x4f6   : > { %2183 = vst.msk [vmem:[#allocation2 + $0xd4] sm:$0xf] %vm325_vm0, %v2179_v16  ;;  %v3404_v18 = vld [vmem:[#allocation2 + $0xa8] sm:$0xff]  ;;  %v2349_v63 = vpop.permute.xlu2 %2348 }
 0x4f7   : > { %2211 = vst.msk [vmem:[#allocation2 + $0xd4] sm:$0xf] %vm358_vm1, %v2207_v10  ;;  %2709 = vmatpush.bf16.msrb.mxu1 %v3404_v18 }
 0x4f8   : > { %2210 = vst.msk [vmem:[#allocation2 + $0xd0] sm:$0xf] %vm358_vm1, %v2205_v17 }
 0x4f9   : > { %v2484_v29 = vpop.f32.mrf.mxu0 }
 0x4fa   : > { %v2497_v41 = vpop.f32.mrf.mxu1 }
 0x4fb   : > { %2710 = vmatpush.bf16.msrb.mxu1 %v3403_v23 }
 0x4fd   : > { %v2233_v26 = vpop.permute.xlu0 %2232  ;;  %v2235_v27 = vpop.permute.xlu1 %2234 }
 0x4fe   : > { %2238 = vst.msk [vmem:[#allocation2 + $0xd0] sm:$0xf] %vm391_vm2, %v2233_v26  ;;  %v2383_v14 = vpop.permute.xlu2 %2382 }
 0x4ff   : > { %2266 = vst.msk [vmem:[#allocation2 + $0xd0] sm:$0xf] %vm424_vm3, %v2261_v21  ;;  %2711 = vmatpush.bf16.msrb.mxu1 %v3402_v28 }
 0x500   : > { %2239 = vst.msk [vmem:[#allocation2 + $0xd4] sm:$0xf] %vm391_vm2, %v2235_v27 }
 0x501   : > { %v2486_v42 = vpop.f32.mrf.mxu0 }
 0x502   : > { %v2499_v44 = vpop.f32.mrf.mxu1 }
 0x503   : > { %2712 = vmatpush.bf16.msrb.mxu1 %v3401_v35 }
 0x505   : > { %v2263_v47 = vpop.permute.xlu0 %2262  ;;  %v2289_v39 = vpop.permute.xlu1 %2288 }
 0x506   : > { %2267 = vst.msk [vmem:[#allocation2 + $0xd4] sm:$0xf] %vm424_vm3, %v2263_v47  ;;  %2713 = vmatmul.bf16.vlgmr.msrb.gmra.mxu1 %v2646_v36  ;;  %v2642_v52 = vpop.permute.xlu2 %2641 }
 0x507   : > { %2295 = vst.msk [vmem:[#allocation2 + $0xd4] sm:$0xf] %vm457_vm4, %v2291_v30  ;;  %v2612_v43 = vpop.f32.mrf.mxu3 }
 0x508   : > { %2294 = vst.msk [vmem:[#allocation2 + $0xd0] sm:$0xf] %vm457_vm4, %v2289_v39  ;;  %v2599_v33 = vpop.f32.mrf.mxu2 }
 0x50d   : > { %v2317_v7 = vpop.permute.xlu0 %2316  ;;  %v2319_v8 = vpop.permute.xlu1 %2318 }
 0x50e   : > { %2322 = vst.msk [vmem:[#allocation2 + $0xd0] sm:$0xf] %vm490_vm5, %v2317_v7 }
 0x50f   : > { %2354 = vst.msk [vmem:[#allocation2 + $0xd0] sm:$0xf] %vm523_vm6, %v2349_v63  ;;  %v2614_v37 = vpop.f32.mrf.mxu3 }
 0x510   : > { %2323 = vst.msk [vmem:[#allocation2 + $0xd4] sm:$0xf] %vm490_vm5, %v2319_v8  ;;  %v2601_v38 = vpop.f32.mrf.mxu2 }
 0x515   : > { %v2351_v40 = vpop.permute.xlu0 %2350  ;;  %v2381_v15 = vpop.permute.xlu1 %2380 }
 0x516   : > { %2355 = vst.msk [vmem:[#allocation2 + $0xd4] sm:$0xf] %vm523_vm6, %v2351_v40 }
 0x517   : > { %2387 = vst.msk [vmem:[#allocation2 + $0xd4] sm:$0xf] %vm556_vm7, %v2383_v14 }
 0x518   : > { %2386 = vst.msk [vmem:[#allocation2 + $0xd0] sm:$0xf] %vm556_vm7, %v2381_v15 }
 0x51d   : > { %v2527_v48 = vpop.permute.xlu1 %2526  ;;  %v2411_v49 = vpop.permute.xlu0 %2410 }
 0x51e   : > { %v2600_v50 = vadd.f32 %v2599_v33, %v2527_v48  ;;  %v2485_v51 = vadd.f32 %v2484_v29, %v2411_v49 }
 0x51f   : > { %v3409_v19 = vld [vmem:[#allocation2 + $0xd0] sm:$0xff] }
 0x520   : > { %2725 = vmatpush.bf16.msrb.mxu3 %v3409_v19  ;;  %v2613_v53 = vadd.f32 %v2612_v43, %v2600_v50  ;;  %v2498_v54 = vadd.f32 %v2497_v41, %v2485_v51 }
 0x522   : > { %v2616_v56 = vmax.f32 %v2613_v53, 0.0  ;;  %v2501_v57 = vmax.f32 %v2498_v54, 0.0 }
 0x523   : > { %3347 = vmatmul.msk.bf16.vlgmr.msrb.gmra.mxu3 %vm2472_vm8, %v2647_v24 }
 0x524   : > { %2758 = vmatpush.bf16.msra.mxu3 %v3410_v20  ;;  %v2765_v61 = vadd.f32 %v2616_v56, %v2501_v57 }
 0x525   : > { %v2740_v4 = vpop.permute.xlu1 %2739 }
 0x533   : > { %3353 = vmatmul.msk.bf16.vlgmr.msra.gmra.mxu3 %vm2472_vm8, %v2732_v25 }
 0x583   : > { %v2714_v45 = vpop.f32.mrf.mxu1 }
 0x584   : > { %v2715_v55 = vadd.f32 %v2714_v45, %v2642_v52 }
 0x58b   : > { %v2716_v46 = vpop.f32.mrf.mxu1 }
 0x5a6   : > { %v2727_v58 = vpop.f32.mrf.mxu3 }
 0x5a7   : > { %v2728_v59 = vadd.f32 %v2727_v58, %v2715_v55 }
 0x5a9   : > { %v2731_v60 = vmax.f32 %v2728_v59, 0.0 }
 0x5ab   : > { %v2766_v0 = vadd.f32 %v2765_v61, %v2731_v60 }
 0x5ad   : > { %2767 = vst [vmem:[%s5113_s18] sm:$0xf] %v2766_v0  ;;  %v2770_v1 = vsel %vm2769_vm9, %v2766_v0, 0.0 }
 0x5ae   : > { %v2729_v2 = vpop.f32.mrf.mxu3  ;;  %2771 = vadd.xlane.f32.xlu2 %v2770_v1 }
 0x5b6   : > { %v2760_v5 = vpop.f32.mrf.mxu3 }
 0x5b7   : > { %v2761_v6 = vadd.f32 %v2760_v5, %v2740_v4 }
 0x5b9   : > { %v2764_v10 = vmax.f32 %v2761_v6, 0.0 }
 0x5bb   : > { %2768 = vst [vmem:[%s5116_s12] sm:$0xf] %v2764_v10 }
 0x5be   : > { %v2762_v3 = vpop.f32.mrf.mxu3 }
 0x61d   : > { %2776 = sbr.rel (%p3354_p7) target bundleno = 1572 (0x624), region = 44 }
 0x621   : > { %v2772_v11 = vpop.xlane.xlu2 %2771 }
 0x622   : > { %vm2777_vm10 = vcmask 3072  }
 0x623   : > { %2778 = vst.msk [vmem:[%s4276_s13] sm:$0xf] %vm2777_vm10, %v2772_v11 }
 0x624 PF: > { %p3355_p9 = scmp.le.s32.totalorder %s3750_s27, 0 }
 0x626   : > { %2782 = sbr.rel (%p3355_p9) target bundleno = 1583 (0x62f), region = 48 }
 0x62b   : > { %v2783_v62 = vld [vmem:[%s4276_s13] sm:$0xf]  ;;  %vm2785_vm11 = vcmask 3072  }
 0x62c   : > { %v2784_v12 = vadd.f32 %v2783_v62, %v2772_v11 }
 0x62e   : > { %2786 = vst.msk [vmem:[%s4276_s13] sm:$0xf] %vm2785_vm11, %v2784_v12 }
 0x62f PF: > { %s3358_s5 = sshll.u32 %s3754_s28, 1  ;;  %s2811_s23 = sshll.u32 %s5113_s18, 4  ;;  %s2812_s23 = int_to_ptr.vmem [resolvable:$true] %s2811_s23 }
 0x630   : > { %s2807_s4 = sadd.s32 %s3750_s27, %s3358_s5  ;;  %s5352_s14 = sld [smem:[#allocation25_spill]] }
 0x631   : > { %s3359_s25 = sshll.u32 %s2807_s4, 2  ;;  %s5353_s13 = sld [smem:[#allocation26_spill]] }
 0x632   : > { %s2827_s6 = sshll.u32 %s5116_s12, 4  ;;  %s2788_s21 = scalar_lea.sflag [#allocation5], %s5110_s24  ;;  %s2828_s6 = int_to_ptr.vmem [resolvable:$true] %s2827_s6 }
 0x636   : > { %s2809_s29 = scalar_lea.hbm %s5352_s14, %s3359_s25  ;;  %s3632_s9 = scalar_lea.hbm %s5352_s14, 16 }
 0x637   : > { %s2813_s15 = sshll.u32 %s2809_s29, 4  ;;  %s2825_s0 = scalar_lea.hbm %s5353_s13, %s3359_s25  ;;  %s2814_s15 = int_to_ptr.hbm [resolvable:$true] %s2813_s15 }
 0x638   : > { %s3626_s7 = sshra.s32 %s2814_s15, 4  ;;  %s3627_s7 = int_to_ptr.hbm [resolvable:$true] %s3626_s7 }
 0x639   : > { %s3628_s10 = scalar_lea.hbm %s3627_s7, 4  ;;  %p3633_p0 = scmp.lt.s32.totalorder %s3627_s7, %s5352_s14 }
 0x63a   : > { %p3629_p10 = scmp.ne.s32.totalorder %s3627_s7, %s3628_s10  ;;  %p3634_p1 = scmp.lt.s32.totalorder %s3632_s9, %s3628_s10 }
 0x63c   : > { %p3630_p11 = pnand %p3629_p10, %p3943_p12  ;;  %p3635_p4 = por %p3634_p1, %p3633_p0 }
 0x63e   : > { %p3631_p13 = pneg %p3630_p11 }
 0x640   : > { %p3636_p5 = pnand %p3635_p4, %p3631_p13 }
 0x642   : > { %3639 = shalt.err (!%p3636_p5)
}
 0x643   : > { %3416 = dma.vmem_to_hbm [thread:$0]  (%p3943_p12), %s2812_s23, 64, %s2814_s15, %s2788_s21  }
 0x644   : > { %s2829_s17 = sshll.u32 %s2825_s0, 4  ;;  %s2793_s18 = scalar_lea.sflag [#allocation8], %s5110_s24  ;;  %s2830_s17 = int_to_ptr.hbm [resolvable:$true] %s2829_s17 }
 0x645   : > { %s3654_s12 = sshra.s32 %s2830_s17, 4  ;;  %s3660_s8 = scalar_lea.hbm %s5353_s13, 16  ;;  %s3655_s12 = int_to_ptr.hbm [resolvable:$true] %s3654_s12 }
 0x646   : > { %s3656_s5 = scalar_lea.hbm %s3655_s12, 4  ;;  %p3661_p7 = scmp.lt.s32.totalorder %s3655_s12, %s5353_s13 }
 0x647   : > { %p3657_p6 = scmp.ne.s32.totalorder %s3655_s12, %s3656_s5  ;;  %p3662_p9 = scmp.lt.s32.totalorder %s3660_s8, %s3656_s5 }
 0x649   : > { %p3658_p8 = pnand %p3657_p6, %p3943_p12  ;;  %p3663_p10 = por %p3662_p9, %p3661_p7 }
 0x64b   : > { %p3659_p3 = pneg %p3658_p8 }
 0x64d   : > { %p3664_p11 = pnand %p3663_p10, %p3659_p3 }
 0x64f   : > { %3667 = shalt.err (!%p3664_p11)
}
 0x650   : > { %3417 = dma.vmem_to_hbm [thread:$0]  (%p3943_p12), %s2828_s6, 64, %s2830_s17, %s2793_s18  }
 0x651 PF: > { %s5354_s24 = sld [smem:[#allocation18_spill]] }
 0x652   : > { %s5355_s23 = sld [smem:[#allocation12_spill]] }
 0x657   : > { %p3432_p13 = scmp.ge.s32.totalorder %s5354_s24, 2 }
 0x658   : > { %s2844_s26 = sand.u32 1, %s5355_s23  }
 0x659   : > { %p3425_p0 = pnand %p3432_p13, %p3956_p2  ;;  %s2845_s20 = scalar_lea.sflag [#allocation5], %s2844_s26 }
 0x65b   : > { %p3426_p1 = pneg %p3425_p0 }
 0x65d   : > { %3717 = dma.done.wait (%p3426_p1), %s2845_s20, 64  }
 0x65e   : > { %3719 = vsyncadd (%p3426_p1), %s2845_s20, 4294967232  ;;  %s2855_s0 = scalar_lea.sflag [#allocation8], %s2844_s26 }
 0x65f   : > { %3721 = dma.done.wait (%p3426_p1), %s2855_s0, 64  }
 0x660   : > { %3723 = vsyncadd (%p3426_p1), %s2855_s0, 4294967232  ;;  %s26_s7 = sadd.s32 1, %s5354_s24   ;;  %s5357_s19 = sld [smem:[#allocation13_spill]] }
 0x661   : > { %p23_p4 = scmp.ge.s32.totalorder %s26_s7, 6   ;;  %s5358_s23 = sld [smem:[#allocation22_spill]] }
 0x662   : > { %s5359_s24 = sld [smem:[#allocation14_spill]]  ;;  %s5366_s21 = smov %s3730_s22 }
 0x663   : > { %s5360_s25 = sld [smem:[#allocation15_spill]] }
 0x664   : > { %s5361_s26 = sld [smem:[#allocation21_spill]]  ;;  %25 = sbr.rel (!%p23_p4) target bundleno = 16 (0x10), region = 141 }
 0x665   : > { %s5362_s27 = sld [smem:[#allocation16_spill]] }
 0x666   : > { %s5363_s28 = sld [smem:[#allocation17_spill]]  ;;  %s5367_s22 = smov %s5357_s19 }
 0x667   : > { %s5364_s29 = sld [smem:[#allocation19_spill]] }
 0x668   : > { %s5365_s30 = sld [smem:[#allocation20_spill]] }
 0x669   :  { %2868 = vsyncpa [#allocation4], 1 }
 0x66a   :  { %2870 = vsyncpa [#allocation4 + $0x1], 1 }
 0x66b   :  { %2871 = vsyncpa [#allocation5], 1 }
 0x66c   :  { %2873 = vsyncpa [#allocation5 + $0x1], 1 }
 0x66d   :  { %2874 = vsyncpa [#allocation8], 1 }
 0x66e   :  { %2876 = vsyncpa [#allocation8 + $0x1], 1 }

</bundles_post_ra>
